<compile_context>
chip_gen: v7x
topology: tpu7x:2x2x1
jax: 0.10.0
libtpu: 0.0.40
codegen_flags: <defaults>
</compile_context>

<pallas_src>
import functools

import jax
import jax.numpy as jnp
from jax.experimental import pallas as pl
from jax.experimental.pallas import tpu as pltpu

HIDDEN_IN = 88     # nn.LSTM input feature size ("hidden_size" in the module)
RNN_HIDDEN = 128   # LSTM hidden size
NUM_LAYERS = 2
NUM_CLASSES = 4    # small example value for num_classes


# ----------------------------------------------------------------------------
# Fused forward kernel: 2-layer bidirectional LSTM + last-timestep Linear.
# Everything (weights, activations, recurrence state) stays in VMEM.
# ----------------------------------------------------------------------------
def _dqn_kernel(
    x_ref,                                   # (T*B, I)   time-major rows t*B+b
    w0f_ih_ref, w0f_hh_ref, b0f_ref,         # (I,4H), (H,4H), (1,4H)
    w0b_ih_ref, w0b_hh_ref, b0b_ref,         # (I,4H), (H,4H), (1,4H)
    w1f_ih_ref, w1f_hh_ref, b1f_ref,         # (2H,4H), (H,4H), (1,4H)
    w1b_ih_ref, b1b_ref,                     # (2H,4H), (1,4H)   (bwd w_hh unused: zero state)
    fc_wf_ref, fc_wb_ref, fc_b_ref,          # (H,C), (H,C), (1,C)
    out_ref,                                 # (B, C)
    h01_ref,                                 # scratch: (T*B, 2H) layer-0 output
    *, T, B, H):
    f32 = jnp.float32

    def cell(gates, c_prev):
        # PyTorch gate order: i, f, g, o
        i_g = jax.nn.sigmoid(gates[:, 0 * H:1 * H])
        f_g = jax.nn.sigmoid(gates[:, 1 * H:2 * H])
        g_g = jnp.tanh(gates[:, 2 * H:3 * H])
        o_g = jax.nn.sigmoid(gates[:, 3 * H:4 * H])
        c_new = f_g * c_prev + i_g * g_g
        h_new = o_g * jnp.tanh(c_new)
        return h_new, c_new

    x = x_ref[...]                                                  # (T*B, I)
    zeros = jnp.zeros((B, H), f32)

    # ---------------- layer 0 ----------------
    # Hoisted input projections (one big M = T*B matmul per direction),
    # bias folded in once.
    xp0f = jnp.dot(x, w0f_ih_ref[...], preferred_element_type=f32) + b0f_ref[...]
    xp0b = jnp.dot(x, w0b_ih_ref[...], preferred_element_type=f32) + b0b_ref[...]

    w0f_hh = w0f_hh_ref[...]
    w0b_hh = w0b_hh_ref[...]

    hf, cf = zeros, zeros
    hb, cb = zeros, zeros
    for s in range(T):                       # static unroll, T is small
        r = T - 1 - s                        # backward direction time index
        # forward direction, time s
        gf = xp0f[s * B:(s + 1) * B, :] + jnp.dot(
            hf, w0f_hh, preferred_element_type=f32)
        hf, cf = cell(gf, cf)
        h01_ref[s * B:(s + 1) * B, 0:H] = hf
        # backward direction, time r (reversal via row index, no data reversal)
        gb = xp0b[r * B:(r + 1) * B, :] + jnp.dot(
            hb, w0b_hh, preferred_element_type=f32)
        hb, cb = cell(gb, cb)
        h01_ref[r * B:(r + 1) * B, H:2 * H] = hb

    # ---------------- layer 1 ----------------
    h01 = h01_ref[...]                                              # (T*B, 2H)
    xp1f = jnp.dot(h01, w1f_ih_ref[...], preferred_element_type=f32) + b1f_ref[...]

    w1f_hh = w1f_hh_ref[...]
    h1f, c1f = zeros, zeros
    for s in range(T):
        g1 = xp1f[s * B:(s + 1) * B, :] + jnp.dot(
            h1f, w1f_hh, preferred_element_type=f32)
        h1f, c1f = cell(g1, c1f)

    # Layer-1 backward: only its step at time T-1 reaches out[:, -1, :].
    # Its previous (h, c) are zeros, so the recurrent matmul term vanishes.
    g1b = jnp.dot(h01[(T - 1) * B:T * B, :], w1b_ih_ref[...],
                  preferred_element_type=f32) + b1b_ref[...]
    h1b, _ = cell(g1b, zeros)

    # ---------------- fused Linear(2H -> C) ----------------
    out_ref[...] = (
        jnp.dot(h1f, fc_wf_ref[...], preferred_element_type=f32)
        + jnp.dot(h1b, fc_wb_ref[...], preferred_element_type=f32)
        + fc_b_ref[...]
    )


# ----------------------------------------------------------------------------
# Parameter init (deterministic, PyTorch-style U(-1/sqrt(H), 1/sqrt(H))).
# ----------------------------------------------------------------------------
def init_params(key, num_classes=NUM_CLASSES):
    H = RNN_HIDDEN
    k = 1.0 / jnp.sqrt(jnp.float32(H))

    def uni(key, shape, bound):
        return jax.random.uniform(key, shape, jnp.float32, -bound, bound)

    params = {}
    layer_inputs = [HIDDEN_IN, 2 * H]       # layer 1 consumes bidirectional concat
    for layer in range(NUM_LAYERS):
        I = layer_inputs[layer]
        for direction in ("fwd", "bwd"):
            key, k1, k2, k3, k4 = jax.random.split(key, 5)
            w_ih = uni(k1, (4 * H, I), k)
            w_hh = uni(k2, (4 * H, H), k)
            b_ih = uni(k3, (4 * H,), k)
            b_hh = uni(k4, (4 * H,), k)
            params[f"l{layer}_{direction}"] = dict(
                wihT=jnp.transpose(w_ih),                 # (I, 4H)
                whhT=jnp.transpose(w_hh),                 # (H, 4H)
                b=(b_ih + b_hh).reshape(1, 4 * H),        # (1, 4H)
            )

    key, k1, k2 = jax.random.split(key, 3)
    kc = 1.0 / jnp.sqrt(jnp.float32(2 * H))
    fc_w = uni(k1, (num_classes, 2 * H), kc)              # PyTorch (C, 2H)
    fc_b = uni(k2, (num_classes,), kc)
    fc_wT = jnp.transpose(fc_w)                           # (2H, C)
    params["fc_wT_f"] = fc_wT[:H]                         # (H, C) fwd half
    params["fc_wT_b"] = fc_wT[H:]                         # (H, C) bwd half
    params["fc_b"] = fc_b.reshape(1, num_classes)
    return params


# ----------------------------------------------------------------------------
# Public forward: accepts batch_first (B, T, 88) like the PyTorch module.
# ----------------------------------------------------------------------------
@jax.jit
def dqn_forward(x_bti, params):
    B, T, I = x_bti.shape
    H = RNN_HIDDEN
    C = params["fc_b"].shape[-1]

    # time-major, flattened to (T*B, I): row t*B + b  (cheap, tiny array)
    x_tm = jnp.transpose(x_bti, (1, 0, 2)).astype(jnp.float32).reshape(T * B, I)

    kernel = functools.partial(_dqn_kernel, T=T, B=B, H=H)
    return pl.pallas_call(
        kernel,
        out_shape=jax.ShapeDtypeStruct((B, C), jnp.float32),
        scratch_shapes=[pltpu.VMEM((T * B, 2 * H), jnp.float32)],
    )(
        x_tm,
        params["l0_fwd"]["wihT"], params["l0_fwd"]["whhT"], params["l0_fwd"]["b"],
        params["l0_bwd"]["wihT"], params["l0_bwd"]["whhT"], params["l0_bwd"]["b"],
        params["l1_fwd"]["wihT"], params["l1_fwd"]["whhT"], params["l1_fwd"]["b"],
        params["l1_bwd"]["wihT"], params["l1_bwd"]["b"],
        params["fc_wT_f"], params["fc_wT_b"], params["fc_b"],
    )


if __name__ == "__main__":
    key = jax.random.PRNGKey(0)
    k_params, k_x = jax.random.split(key)

    B, T = 2, 8
    params = init_params(k_params, NUM_CLASSES)
    x = jax.random.normal(k_x, (B, T, HIDDEN_IN), jnp.float32)

    out = dqn_forward(x, params)
    jax.block_until_ready(out)
    assert out.shape == (B, NUM_CLASSES), out.shape
    assert bool(jnp.all(jnp.isfinite(out))), "non-finite output"
    print("KERNEL_OK")
</pallas_src>

<mosaic_0001>
module attributes {stable_mosaic.version = 11 : i64} {
  func.func @_dqn_kernel(%arg0: memref<16x88xf32, #tpu.memory_space<vmem>>, %arg1: memref<88x512xf32, #tpu.memory_space<vmem>>, %arg2: memref<128x512xf32, #tpu.memory_space<vmem>>, %arg3: memref<1x512xf32, #tpu.memory_space<vmem>>, %arg4: memref<88x512xf32, #tpu.memory_space<vmem>>, %arg5: memref<128x512xf32, #tpu.memory_space<vmem>>, %arg6: memref<1x512xf32, #tpu.memory_space<vmem>>, %arg7: memref<256x512xf32, #tpu.memory_space<vmem>>, %arg8: memref<128x512xf32, #tpu.memory_space<vmem>>, %arg9: memref<1x512xf32, #tpu.memory_space<vmem>>, %arg10: memref<256x512xf32, #tpu.memory_space<vmem>>, %arg11: memref<1x512xf32, #tpu.memory_space<vmem>>, %arg12: memref<128x4xf32, #tpu.memory_space<vmem>>, %arg13: memref<128x4xf32, #tpu.memory_space<vmem>>, %arg14: memref<1x4xf32, #tpu.memory_space<vmem>>, %arg15: memref<2x4xf32, #tpu.memory_space<vmem>>, %arg16: memref<16x256xf32, #tpu.memory_space<vmem>>) attributes {dimension_semantics = [], scalar_prefetch = 0 : i64, scratch_operands = 1 : i64, tpu.core_type = #tpu.core_type<tc>} {
    %c0 = arith.constant 0 : index
    %c0_0 = arith.constant 0 : index
    %0 = vector.load %arg0[%c0, %c0_0] : memref<16x88xf32, #tpu.memory_space<vmem>>, vector<16x88xf32>
    %cst = arith.constant 0.000000e+00 : f32
    %1 = vector.broadcast %cst : f32 to vector<2x128xf32>
    %c0_1 = arith.constant 0 : index
    %c0_2 = arith.constant 0 : index
    %2 = vector.load %arg1[%c0_1, %c0_2] : memref<88x512xf32, #tpu.memory_space<vmem>>, vector<88x512xf32>
    %cst_3 = arith.constant dense<0.000000e+00> : vector<16x512xf32>
    %3 = tpu.matmul %0, %2, %cst_3 {dimension_numbers = #tpu.dot_dimension_numbers<[1], [0], [0], [1], [0, 0, 1, 1], [], []>} : vector<16x88xf32>, vector<88x512xf32>, vector<16x512xf32> -> vector<16x512xf32>
    %c0_4 = arith.constant 0 : index
    %c0_5 = arith.constant 0 : index
    %4 = vector.load %arg3[%c0_4, %c0_5] : memref<1x512xf32, #tpu.memory_space<vmem>>, vector<1x512xf32>
    %5 = vector.broadcast %4 : vector<1x512xf32> to vector<16x512xf32>
    %6 = arith.addf %3, %5 : vector<16x512xf32>
    %c0_6 = arith.constant 0 : index
    %c0_7 = arith.constant 0 : index
    %7 = vector.load %arg4[%c0_6, %c0_7] : memref<88x512xf32, #tpu.memory_space<vmem>>, vector<88x512xf32>
    %cst_8 = arith.constant dense<0.000000e+00> : vector<16x512xf32>
    %8 = tpu.matmul %0, %7, %cst_8 {dimension_numbers = #tpu.dot_dimension_numbers<[1], [0], [0], [1], [0, 0, 1, 1], [], []>} : vector<16x88xf32>, vector<88x512xf32>, vector<16x512xf32> -> vector<16x512xf32>
    %c0_9 = arith.constant 0 : index
    %c0_10 = arith.constant 0 : index
    %9 = vector.load %arg6[%c0_9, %c0_10] : memref<1x512xf32, #tpu.memory_space<vmem>>, vector<1x512xf32>
    %10 = vector.broadcast %9 : vector<1x512xf32> to vector<16x512xf32>
    %11 = arith.addf %8, %10 : vector<16x512xf32>
    %c0_11 = arith.constant 0 : index
    %c0_12 = arith.constant 0 : index
    %12 = vector.load %arg2[%c0_11, %c0_12] : memref<128x512xf32, #tpu.memory_space<vmem>>, vector<128x512xf32>
    %c0_13 = arith.constant 0 : index
    %c0_14 = arith.constant 0 : index
    %13 = vector.load %arg5[%c0_13, %c0_14] : memref<128x512xf32, #tpu.memory_space<vmem>>, vector<128x512xf32>
    %14 = vector.extract_strided_slice %6 {offsets = [0, 0], sizes = [2, 512], strides = [1, 1]} : vector<16x512xf32> to vector<2x512xf32>
    %cst_15 = arith.constant dense<0.000000e+00> : vector<2x512xf32>
    %15 = tpu.matmul %1, %12, %cst_15 {dimension_numbers = #tpu.dot_dimension_numbers<[1], [0], [0], [1], [0, 0, 1, 1], [], []>} : vector<2x128xf32>, vector<128x512xf32>, vector<2x512xf32> -> vector<2x512xf32>
    %16 = arith.addf %14, %15 : vector<2x512xf32>
    %17 = vector.extract_strided_slice %16 {offsets = [0, 0], sizes = [2, 128], strides = [1, 1]} : vector<2x512xf32> to vector<2x128xf32>
    %18 = arith.negf %17 : vector<2x128xf32>
    %19 = math.exp %18 : vector<2x128xf32>
    %cst_16 = arith.constant 1.000000e+00 : f32
    %20 = vector.broadcast %cst_16 : f32 to vector<2x128xf32>
    %21 = arith.addf %20, %19 : vector<2x128xf32>
    %22 = arith.divf %20, %21 : vector<2x128xf32>
    %23 = vector.extract_strided_slice %16 {offsets = [0, 128], sizes = [2, 128], strides = [1, 1]} : vector<2x512xf32> to vector<2x128xf32>
    %24 = arith.negf %23 : vector<2x128xf32>
    %25 = math.exp %24 : vector<2x128xf32>
    %cst_17 = arith.constant 1.000000e+00 : f32
    %26 = vector.broadcast %cst_17 : f32 to vector<2x128xf32>
    %27 = arith.addf %26, %25 : vector<2x128xf32>
    %28 = arith.divf %26, %27 : vector<2x128xf32>
    %29 = vector.extract_strided_slice %16 {offsets = [0, 256], sizes = [2, 128], strides = [1, 1]} : vector<2x512xf32> to vector<2x128xf32>
    %30 = math.tanh %29 : vector<2x128xf32>
    %31 = vector.extract_strided_slice %16 {offsets = [0, 384], sizes = [2, 128], strides = [1, 1]} : vector<2x512xf32> to vector<2x128xf32>
    %32 = arith.negf %31 : vector<2x128xf32>
    %33 = math.exp %32 : vector<2x128xf32>
    %cst_18 = arith.constant 1.000000e+00 : f32
    %34 = vector.broadcast %cst_18 : f32 to vector<2x128xf32>
    %35 = arith.addf %34, %33 : vector<2x128xf32>
    %36 = arith.divf %34, %35 : vector<2x128xf32>
    %37 = arith.mulf %28, %1 : vector<2x128xf32>
    %38 = arith.mulf %22, %30 : vector<2x128xf32>
    %39 = arith.addf %37, %38 : vector<2x128xf32>
    %40 = math.tanh %39 : vector<2x128xf32>
    %41 = arith.mulf %36, %40 : vector<2x128xf32>
    %c0_19 = arith.constant 0 : index
    %c0_20 = arith.constant 0 : index
    %42 = vector.load %arg16[%c0_19, %c0_20] : memref<16x256xf32, #tpu.memory_space<vmem>>, vector<2x128xf32>
    tpu.vector_store %arg16[%c0_19, %c0_20], %41 {strides = array<i32>} : memref<16x256xf32, #tpu.memory_space<vmem>>, vector<2x128xf32>,
    %43 = vector.extract_strided_slice %11 {offsets = [14, 0], sizes = [2, 512], strides = [1, 1]} : vector<16x512xf32> to vector<2x512xf32>
    %cst_21 = arith.constant dense<0.000000e+00> : vector<2x512xf32>
    %44 = tpu.matmul %1, %13, %cst_21 {dimension_numbers = #tpu.dot_dimension_numbers<[1], [0], [0], [1], [0, 0, 1, 1], [], []>} : vector<2x128xf32>, vector<128x512xf32>, vector<2x512xf32> -> vector<2x512xf32>
    %45 = arith.addf %43, %44 : vector<2x512xf32>
    %46 = vector.extract_strided_slice %45 {offsets = [0, 0], sizes = [2, 128], strides = [1, 1]} : vector<2x512xf32> to vector<2x128xf32>
    %47 = arith.negf %46 : vector<2x128xf32>
    %48 = math.exp %47 : vector<2x128xf32>
    %cst_22 = arith.constant 1.000000e+00 : f32
    %49 = vector.broadcast %cst_22 : f32 to vector<2x128xf32>
    %50 = arith.addf %49, %48 : vector<2x128xf32>
    %51 = arith.divf %49, %50 : vector<2x128xf32>
    %52 = vector.extract_strided_slice %45 {offsets = [0, 128], sizes = [2, 128], strides = [1, 1]} : vector<2x512xf32> to vector<2x128xf32>
    %53 = arith.negf %52 : vector<2x128xf32>
    %54 = math.exp %53 : vector<2x128xf32>
    %cst_23 = arith.constant 1.000000e+00 : f32
    %55 = vector.broadcast %cst_23 : f32 to vector<2x128xf32>
    %56 = arith.addf %55, %54 : vector<2x128xf32>
    %57 = arith.divf %55, %56 : vector<2x128xf32>
    %58 = vector.extract_strided_slice %45 {offsets = [0, 256], sizes = [2, 128], strides = [1, 1]} : vector<2x512xf32> to vector<2x128xf32>
    %59 = math.tanh %58 : vector<2x128xf32>
    %60 = vector.extract_strided_slice %45 {offsets = [0, 384], sizes = [2, 128], strides = [1, 1]} : vector<2x512xf32> to vector<2x128xf32>
    %61 = arith.negf %60 : vector<2x128xf32>
    %62 = math.exp %61 : vector<2x128xf32>
    %cst_24 = arith.constant 1.000000e+00 : f32
    %63 = vector.broadcast %cst_24 : f32 to vector<2x128xf32>
    %64 = arith.addf %63, %62 : vector<2x128xf32>
    %65 = arith.divf %63, %64 : vector<2x128xf32>
    %66 = arith.mulf %57, %1 : vector<2x128xf32>
    %67 = arith.mulf %51, %59 : vector<2x128xf32>
    %68 = arith.addf %66, %67 : vector<2x128xf32>
    %69 = math.tanh %68 : vector<2x128xf32>
    %70 = arith.mulf %65, %69 : vector<2x128xf32>
    %c14 = arith.constant 14 : index
    %c128 = arith.constant 128 : index
    %71 = vector.load %arg16[%c14, %c128] : memref<16x256xf32, #tpu.memory_space<vmem>>, vector<2x128xf32>
    tpu.vector_store %arg16[%c14, %c128], %70 {strides = array<i32>} : memref<16x256xf32, #tpu.memory_space<vmem>>, vector<2x128xf32>,
    %72 = vector.extract_strided_slice %6 {offsets = [2, 0], sizes = [2, 512], strides = [1, 1]} : vector<16x512xf32> to vector<2x512xf32>
    %cst_25 = arith.constant dense<0.000000e+00> : vector<2x512xf32>
    %73 = tpu.matmul %41, %12, %cst_25 {dimension_numbers = #tpu.dot_dimension_numbers<[1], [0], [0], [1], [0, 0, 1, 1], [], []>} : vector<2x128xf32>, vector<128x512xf32>, vector<2x512xf32> -> vector<2x512xf32>
    %74 = arith.addf %72, %73 : vector<2x512xf32>
    %75 = vector.extract_strided_slice %74 {offsets = [0, 0], sizes = [2, 128], strides = [1, 1]} : vector<2x512xf32> to vector<2x128xf32>
    %76 = arith.negf %75 : vector<2x128xf32>
    %77 = math.exp %76 : vector<2x128xf32>
    %cst_26 = arith.constant 1.000000e+00 : f32
    %78 = vector.broadcast %cst_26 : f32 to vector<2x128xf32>
    %79 = arith.addf %78, %77 : vector<2x128xf32>
    %80 = arith.divf %78, %79 : vector<2x128xf32>
    %81 = vector.extract_strided_slice %74 {offsets = [0, 128], sizes = [2, 128], strides = [1, 1]} : vector<2x512xf32> to vector<2x128xf32>
    %82 = arith.negf %81 : vector<2x128xf32>
    %83 = math.exp %82 : vector<2x128xf32>
    %cst_27 = arith.constant 1.000000e+00 : f32
    %84 = vector.broadcast %cst_27 : f32 to vector<2x128xf32>
    %85 = arith.addf %84, %83 : vector<2x128xf32>
    %86 = arith.divf %84, %85 : vector<2x128xf32>
    %87 = vector.extract_strided_slice %74 {offsets = [0, 256], sizes = [2, 128], strides = [1, 1]} : vector<2x512xf32> to vector<2x128xf32>
    %88 = math.tanh %87 : vector<2x128xf32>
    %89 = vector.extract_strided_slice %74 {offsets = [0, 384], sizes = [2, 128], strides = [1, 1]} : vector<2x512xf32> to vector<2x128xf32>
    %90 = arith.negf %89 : vector<2x128xf32>
    %91 = math.exp %90 : vector<2x128xf32>
    %cst_28 = arith.constant 1.000000e+00 : f32
    %92 = vector.broadcast %cst_28 : f32 to vector<2x128xf32>
    %93 = arith.addf %92, %91 : vector<2x128xf32>
    %94 = arith.divf %92, %93 : vector<2x128xf32>
    %95 = arith.mulf %86, %39 : vector<2x128xf32>
    %96 = arith.mulf %80, %88 : vector<2x128xf32>
    %97 = arith.addf %95, %96 : vector<2x128xf32>
    %98 = math.tanh %97 : vector<2x128xf32>
    %99 = arith.mulf %94, %98 : vector<2x128xf32>
    %c2 = arith.constant 2 : index
    %c0_29 = arith.constant 0 : index
    %100 = vector.load %arg16[%c2, %c0_29] : memref<16x256xf32, #tpu.memory_space<vmem>>, vector<2x128xf32>
    tpu.vector_store %arg16[%c2, %c0_29], %99 {strides = array<i32>} : memref<16x256xf32, #tpu.memory_space<vmem>>, vector<2x128xf32>,
    %101 = vector.extract_strided_slice %11 {offsets = [12, 0], sizes = [2, 512], strides = [1, 1]} : vector<16x512xf32> to vector<2x512xf32>
    %cst_30 = arith.constant dense<0.000000e+00> : vector<2x512xf32>
    %102 = tpu.matmul %70, %13, %cst_30 {dimension_numbers = #tpu.dot_dimension_numbers<[1], [0], [0], [1], [0, 0, 1, 1], [], []>} : vector<2x128xf32>, vector<128x512xf32>, vector<2x512xf32> -> vector<2x512xf32>
    %103 = arith.addf %101, %102 : vector<2x512xf32>
    %104 = vector.extract_strided_slice %103 {offsets = [0, 0], sizes = [2, 128], strides = [1, 1]} : vector<2x512xf32> to vector<2x128xf32>
    %105 = arith.negf %104 : vector<2x128xf32>
    %106 = math.exp %105 : vector<2x128xf32>
    %cst_31 = arith.constant 1.000000e+00 : f32
    %107 = vector.broadcast %cst_31 : f32 to vector<2x128xf32>
    %108 = arith.addf %107, %106 : vector<2x128xf32>
    %109 = arith.divf %107, %108 : vector<2x128xf32>
    %110 = vector.extract_strided_slice %103 {offsets = [0, 128], sizes = [2, 128], strides = [1, 1]} : vector<2x512xf32> to vector<2x128xf32>
    %111 = arith.negf %110 : vector<2x128xf32>
    %112 = math.exp %111 : vector<2x128xf32>
    %cst_32 = arith.constant 1.000000e+00 : f32
    %113 = vector.broadcast %cst_32 : f32 to vector<2x128xf32>
    %114 = arith.addf %113, %112 : vector<2x128xf32>
    %115 = arith.divf %113, %114 : vector<2x128xf32>
    %116 = vector.extract_strided_slice %103 {offsets = [0, 256], sizes = [2, 128], strides = [1, 1]} : vector<2x512xf32> to vector<2x128xf32>
    %117 = math.tanh %116 : vector<2x128xf32>
    %118 = vector.extract_strided_slice %103 {offsets = [0, 384], sizes = [2, 128], strides = [1, 1]} : vector<2x512xf32> to vector<2x128xf32>
    %119 = arith.negf %118 : vector<2x128xf32>
    %120 = math.exp %119 : vector<2x128xf32>
    %cst_33 = arith.constant 1.000000e+00 : f32
    %121 = vector.broadcast %cst_33 : f32 to vector<2x128xf32>
    %122 = arith.addf %121, %120 : vector<2x128xf32>
    %123 = arith.divf %121, %122 : vector<2x128xf32>
    %124 = arith.mulf %115, %68 : vector<2x128xf32>
    %125 = arith.mulf %109, %117 : vector<2x128xf32>
    %126 = arith.addf %124, %125 : vector<2x128xf32>
    %127 = math.tanh %126 : vector<2x128xf32>
    %128 = arith.mulf %123, %127 : vector<2x128xf32>
    %c12 = arith.constant 12 : index
    %c128_34 = arith.constant 128 : index
    %129 = vector.load %arg16[%c12, %c128_34] : memref<16x256xf32, #tpu.memory_space<vmem>>, vector<2x128xf32>
    tpu.vector_store %arg16[%c12, %c128_34], %128 {strides = array<i32>} : memref<16x256xf32, #tpu.memory_space<vmem>>, vector<2x128xf32>,
    %130 = vector.extract_strided_slice %6 {offsets = [4, 0], sizes = [2, 512], strides = [1, 1]} : vector<16x512xf32> to vector<2x512xf32>
    %cst_35 = arith.constant dense<0.000000e+00> : vector<2x512xf32>
    %131 = tpu.matmul %99, %12, %cst_35 {dimension_numbers = #tpu.dot_dimension_numbers<[1], [0], [0], [1], [0, 0, 1, 1], [], []>} : vector<2x128xf32>, vector<128x512xf32>, vector<2x512xf32> -> vector<2x512xf32>
    %132 = arith.addf %130, %131 : vector<2x512xf32>
    %133 = vector.extract_strided_slice %132 {offsets = [0, 0], sizes = [2, 128], strides = [1, 1]} : vector<2x512xf32> to vector<2x128xf32>
    %134 = arith.negf %133 : vector<2x128xf32>
    %135 = math.exp %134 : vector<2x128xf32>
    %cst_36 = arith.constant 1.000000e+00 : f32
    %136 = vector.broadcast %cst_36 : f32 to vector<2x128xf32>
    %137 = arith.addf %136, %135 : vector<2x128xf32>
    %138 = arith.divf %136, %137 : vector<2x128xf32>
    %139 = vector.extract_strided_slice %132 {offsets = [0, 128], sizes = [2, 128], strides = [1, 1]} : vector<2x512xf32> to vector<2x128xf32>
    %140 = arith.negf %139 : vector<2x128xf32>
    %141 = math.exp %140 : vector<2x128xf32>
    %cst_37 = arith.constant 1.000000e+00 : f32
    %142 = vector.broadcast %cst_37 : f32 to vector<2x128xf32>
    %143 = arith.addf %142, %141 : vector<2x128xf32>
    %144 = arith.divf %142, %143 : vector<2x128xf32>
    %145 = vector.extract_strided_slice %132 {offsets = [0, 256], sizes = [2, 128], strides = [1, 1]} : vector<2x512xf32> to vector<2x128xf32>
    %146 = math.tanh %145 : vector<2x128xf32>
    %147 = vector.extract_strided_slice %132 {offsets = [0, 384], sizes = [2, 128], strides = [1, 1]} : vector<2x512xf32> to vector<2x128xf32>
    %148 = arith.negf %147 : vector<2x128xf32>
    %149 = math.exp %148 : vector<2x128xf32>
    %cst_38 = arith.constant 1.000000e+00 : f32
    %150 = vector.broadcast %cst_38 : f32 to vector<2x128xf32>
    %151 = arith.addf %150, %149 : vector<2x128xf32>
    %152 = arith.divf %150, %151 : vector<2x128xf32>
    %153 = arith.mulf %144, %97 : vector<2x128xf32>
    %154 = arith.mulf %138, %146 : vector<2x128xf32>
    %155 = arith.addf %153, %154 : vector<2x128xf32>
    %156 = math.tanh %155 : vector<2x128xf32>
    %157 = arith.mulf %152, %156 : vector<2x128xf32>
    %c4 = arith.constant 4 : index
    %c0_39 = arith.constant 0 : index
    %158 = vector.load %arg16[%c4, %c0_39] : memref<16x256xf32, #tpu.memory_space<vmem>>, vector<2x128xf32>
    tpu.vector_store %arg16[%c4, %c0_39], %157 {strides = array<i32>} : memref<16x256xf32, #tpu.memory_space<vmem>>, vector<2x128xf32>,
    %159 = vector.extract_strided_slice %11 {offsets = [10, 0], sizes = [2, 512], strides = [1, 1]} : vector<16x512xf32> to vector<2x512xf32>
    %cst_40 = arith.constant dense<0.000000e+00> : vector<2x512xf32>
    %160 = tpu.matmul %128, %13, %cst_40 {dimension_numbers = #tpu.dot_dimension_numbers<[1], [0], [0], [1], [0, 0, 1, 1], [], []>} : vector<2x128xf32>, vector<128x512xf32>, vector<2x512xf32> -> vector<2x512xf32>
    %161 = arith.addf %159, %160 : vector<2x512xf32>
    %162 = vector.extract_strided_slice %161 {offsets = [0, 0], sizes = [2, 128], strides = [1, 1]} : vector<2x512xf32> to vector<2x128xf32>
    %163 = arith.negf %162 : vector<2x128xf32>
    %164 = math.exp %163 : vector<2x128xf32>
    %cst_41 = arith.constant 1.000000e+00 : f32
    %165 = vector.broadcast %cst_41 : f32 to vector<2x128xf32>
    %166 = arith.addf %165, %164 : vector<2x128xf32>
    %167 = arith.divf %165, %166 : vector<2x128xf32>
    %168 = vector.extract_strided_slice %161 {offsets = [0, 128], sizes = [2, 128], strides = [1, 1]} : vector<2x512xf32> to vector<2x128xf32>
    %169 = arith.negf %168 : vector<2x128xf32>
    %170 = math.exp %169 : vector<2x128xf32>
    %cst_42 = arith.constant 1.000000e+00 : f32
    %171 = vector.broadcast %cst_42 : f32 to vector<2x128xf32>
    %172 = arith.addf %171, %170 : vector<2x128xf32>
    %173 = arith.divf %171, %172 : vector<2x128xf32>
    %174 = vector.extract_strided_slice %161 {offsets = [0, 256], sizes = [2, 128], strides = [1, 1]} : vector<2x512xf32> to vector<2x128xf32>
    %175 = math.tanh %174 : vector<2x128xf32>
    %176 = vector.extract_strided_slice %161 {offsets = [0, 384], sizes = [2, 128], strides = [1, 1]} : vector<2x512xf32> to vector<2x128xf32>
    %177 = arith.negf %176 : vector<2x128xf32>
    %178 = math.exp %177 : vector<2x128xf32>
    %cst_43 = arith.constant 1.000000e+00 : f32
    %179 = vector.broadcast %cst_43 : f32 to vector<2x128xf32>
    %180 = arith.addf %179, %178 : vector<2x128xf32>
    %181 = arith.divf %179, %180 : vector<2x128xf32>
    %182 = arith.mulf %173, %126 : vector<2x128xf32>
    %183 = arith.mulf %167, %175 : vector<2x128xf32>
    %184 = arith.addf %182, %183 : vector<2x128xf32>
    %185 = math.tanh %184 : vector<2x128xf32>
    %186 = arith.mulf %181, %185 : vector<2x128xf32>
    %c10 = arith.constant 10 : index
    %c128_44 = arith.constant 128 : index
    %187 = vector.load %arg16[%c10, %c128_44] : memref<16x256xf32, #tpu.memory_space<vmem>>, vector<2x128xf32>
    tpu.vector_store %arg16[%c10, %c128_44], %186 {strides = array<i32>} : memref<16x256xf32, #tpu.memory_space<vmem>>, vector<2x128xf32>,
    %188 = vector.extract_strided_slice %6 {offsets = [6, 0], sizes = [2, 512], strides = [1, 1]} : vector<16x512xf32> to vector<2x512xf32>
    %cst_45 = arith.constant dense<0.000000e+00> : vector<2x512xf32>
    %189 = tpu.matmul %157, %12, %cst_45 {dimension_numbers = #tpu.dot_dimension_numbers<[1], [0], [0], [1], [0, 0, 1, 1], [], []>} : vector<2x128xf32>, vector<128x512xf32>, vector<2x512xf32> -> vector<2x512xf32>
    %190 = arith.addf %188, %189 : vector<2x512xf32>
    %191 = vector.extract_strided_slice %190 {offsets = [0, 0], sizes = [2, 128], strides = [1, 1]} : vector<2x512xf32> to vector<2x128xf32>
    %192 = arith.negf %191 : vector<2x128xf32>
    %193 = math.exp %192 : vector<2x128xf32>
    %cst_46 = arith.constant 1.000000e+00 : f32
    %194 = vector.broadcast %cst_46 : f32 to vector<2x128xf32>
    %195 = arith.addf %194, %193 : vector<2x128xf32>
    %196 = arith.divf %194, %195 : vector<2x128xf32>
    %197 = vector.extract_strided_slice %190 {offsets = [0, 128], sizes = [2, 128], strides = [1, 1]} : vector<2x512xf32> to vector<2x128xf32>
    %198 = arith.negf %197 : vector<2x128xf32>
    %199 = math.exp %198 : vector<2x128xf32>
    %cst_47 = arith.constant 1.000000e+00 : f32
    %200 = vector.broadcast %cst_47 : f32 to vector<2x128xf32>
    %201 = arith.addf %200, %199 : vector<2x128xf32>
    %202 = arith.divf %200, %201 : vector<2x128xf32>
    %203 = vector.extract_strided_slice %190 {offsets = [0, 256], sizes = [2, 128], strides = [1, 1]} : vector<2x512xf32> to vector<2x128xf32>
    %204 = math.tanh %203 : vector<2x128xf32>
    %205 = vector.extract_strided_slice %190 {offsets = [0, 384], sizes = [2, 128], strides = [1, 1]} : vector<2x512xf32> to vector<2x128xf32>
    %206 = arith.negf %205 : vector<2x128xf32>
    %207 = math.exp %206 : vector<2x128xf32>
    %cst_48 = arith.constant 1.000000e+00 : f32
    %208 = vector.broadcast %cst_48 : f32 to vector<2x128xf32>
    %209 = arith.addf %208, %207 : vector<2x128xf32>
    %210 = arith.divf %208, %209 : vector<2x128xf32>
    %211 = arith.mulf %202, %155 : vector<2x128xf32>
    %212 = arith.mulf %196, %204 : vector<2x128xf32>
    %213 = arith.addf %211, %212 : vector<2x128xf32>
    %214 = math.tanh %213 : vector<2x128xf32>
    %215 = arith.mulf %210, %214 : vector<2x128xf32>
    %c6 = arith.constant 6 : index
    %c0_49 = arith.constant 0 : index
    %216 = vector.load %arg16[%c6, %c0_49] : memref<16x256xf32, #tpu.memory_space<vmem>>, vector<2x128xf32>
    tpu.vector_store %arg16[%c6, %c0_49], %215 {strides = array<i32>} : memref<16x256xf32, #tpu.memory_space<vmem>>, vector<2x128xf32>,
    %217 = vector.extract_strided_slice %11 {offsets = [8, 0], sizes = [2, 512], strides = [1, 1]} : vector<16x512xf32> to vector<2x512xf32>
    %cst_50 = arith.constant dense<0.000000e+00> : vector<2x512xf32>
    %218 = tpu.matmul %186, %13, %cst_50 {dimension_numbers = #tpu.dot_dimension_numbers<[1], [0], [0], [1], [0, 0, 1, 1], [], []>} : vector<2x128xf32>, vector<128x512xf32>, vector<2x512xf32> -> vector<2x512xf32>
    %219 = arith.addf %217, %218 : vector<2x512xf32>
    %220 = vector.extract_strided_slice %219 {offsets = [0, 0], sizes = [2, 128], strides = [1, 1]} : vector<2x512xf32> to vector<2x128xf32>
    %221 = arith.negf %220 : vector<2x128xf32>
    %222 = math.exp %221 : vector<2x128xf32>
    %cst_51 = arith.constant 1.000000e+00 : f32
    %223 = vector.broadcast %cst_51 : f32 to vector<2x128xf32>
    %224 = arith.addf %223, %222 : vector<2x128xf32>
    %225 = arith.divf %223, %224 : vector<2x128xf32>
    %226 = vector.extract_strided_slice %219 {offsets = [0, 128], sizes = [2, 128], strides = [1, 1]} : vector<2x512xf32> to vector<2x128xf32>
    %227 = arith.negf %226 : vector<2x128xf32>
    %228 = math.exp %227 : vector<2x128xf32>
    %cst_52 = arith.constant 1.000000e+00 : f32
    %229 = vector.broadcast %cst_52 : f32 to vector<2x128xf32>
    %230 = arith.addf %229, %228 : vector<2x128xf32>
    %231 = arith.divf %229, %230 : vector<2x128xf32>
    %232 = vector.extract_strided_slice %219 {offsets = [0, 256], sizes = [2, 128], strides = [1, 1]} : vector<2x512xf32> to vector<2x128xf32>
    %233 = math.tanh %232 : vector<2x128xf32>
    %234 = vector.extract_strided_slice %219 {offsets = [0, 384], sizes = [2, 128], strides = [1, 1]} : vector<2x512xf32> to vector<2x128xf32>
    %235 = arith.negf %234 : vector<2x128xf32>
    %236 = math.exp %235 : vector<2x128xf32>
    %cst_53 = arith.constant 1.000000e+00 : f32
    %237 = vector.broadcast %cst_53 : f32 to vector<2x128xf32>
    %238 = arith.addf %237, %236 : vector<2x128xf32>
    %239 = arith.divf %237, %238 : vector<2x128xf32>
    %240 = arith.mulf %231, %184 : vector<2x128xf32>
    %241 = arith.mulf %225, %233 : vector<2x128xf32>
    %242 = arith.addf %240, %241 : vector<2x128xf32>
    %243 = math.tanh %242 : vector<2x128xf32>
    %244 = arith.mulf %239, %243 : vector<2x128xf32>
    %c8 = arith.constant 8 : index
    %c128_54 = arith.constant 128 : index
    %245 = vector.load %arg16[%c8, %c128_54] : memref<16x256xf32, #tpu.memory_space<vmem>>, vector<2x128xf32>
    tpu.vector_store %arg16[%c8, %c128_54], %244 {strides = array<i32>} : memref<16x256xf32, #tpu.memory_space<vmem>>, vector<2x128xf32>,
    %246 = vector.extract_strided_slice %6 {offsets = [8, 0], sizes = [2, 512], strides = [1, 1]} : vector<16x512xf32> to vector<2x512xf32>
    %cst_55 = arith.constant dense<0.000000e+00> : vector<2x512xf32>
    %247 = tpu.matmul %215, %12, %cst_55 {dimension_numbers = #tpu.dot_dimension_numbers<[1], [0], [0], [1], [0, 0, 1, 1], [], []>} : vector<2x128xf32>, vector<128x512xf32>, vector<2x512xf32> -> vector<2x512xf32>
    %248 = arith.addf %246, %247 : vector<2x512xf32>
    %249 = vector.extract_strided_slice %248 {offsets = [0, 0], sizes = [2, 128], strides = [1, 1]} : vector<2x512xf32> to vector<2x128xf32>
    %250 = arith.negf %249 : vector<2x128xf32>
    %251 = math.exp %250 : vector<2x128xf32>
    %cst_56 = arith.constant 1.000000e+00 : f32
    %252 = vector.broadcast %cst_56 : f32 to vector<2x128xf32>
    %253 = arith.addf %252, %251 : vector<2x128xf32>
    %254 = arith.divf %252, %253 : vector<2x128xf32>
    %255 = vector.extract_strided_slice %248 {offsets = [0, 128], sizes = [2, 128], strides = [1, 1]} : vector<2x512xf32> to vector<2x128xf32>
    %256 = arith.negf %255 : vector<2x128xf32>
    %257 = math.exp %256 : vector<2x128xf32>
    %cst_57 = arith.constant 1.000000e+00 : f32
    %258 = vector.broadcast %cst_57 : f32 to vector<2x128xf32>
    %259 = arith.addf %258, %257 : vector<2x128xf32>
    %260 = arith.divf %258, %259 : vector<2x128xf32>
    %261 = vector.extract_strided_slice %248 {offsets = [0, 256], sizes = [2, 128], strides = [1, 1]} : vector<2x512xf32> to vector<2x128xf32>
    %262 = math.tanh %261 : vector<2x128xf32>
    %263 = vector.extract_strided_slice %248 {offsets = [0, 384], sizes = [2, 128], strides = [1, 1]} : vector<2x512xf32> to vector<2x128xf32>
    %264 = arith.negf %263 : vector<2x128xf32>
    %265 = math.exp %264 : vector<2x128xf32>
    %cst_58 = arith.constant 1.000000e+00 : f32
    %266 = vector.broadcast %cst_58 : f32 to vector<2x128xf32>
    %267 = arith.addf %266, %265 : vector<2x128xf32>
    %268 = arith.divf %266, %267 : vector<2x128xf32>
    %269 = arith.mulf %260, %213 : vector<2x128xf32>
    %270 = arith.mulf %254, %262 : vector<2x128xf32>
    %271 = arith.addf %269, %270 : vector<2x128xf32>
    %272 = math.tanh %271 : vector<2x128xf32>
    %273 = arith.mulf %268, %272 : vector<2x128xf32>
    %c8_59 = arith.constant 8 : index
    %c0_60 = arith.constant 0 : index
    %274 = vector.load %arg16[%c8_59, %c0_60] : memref<16x256xf32, #tpu.memory_space<vmem>>, vector<2x128xf32>
    tpu.vector_store %arg16[%c8_59, %c0_60], %273 {strides = array<i32>} : memref<16x256xf32, #tpu.memory_space<vmem>>, vector<2x128xf32>,
    %275 = vector.extract_strided_slice %11 {offsets = [6, 0], sizes = [2, 512], strides = [1, 1]} : vector<16x512xf32> to vector<2x512xf32>
    %cst_61 = arith.constant dense<0.000000e+00> : vector<2x512xf32>
    %276 = tpu.matmul %244, %13, %cst_61 {dimension_numbers = #tpu.dot_dimension_numbers<[1], [0], [0], [1], [0, 0, 1, 1], [], []>} : vector<2x128xf32>, vector<128x512xf32>, vector<2x512xf32> -> vector<2x512xf32>
    %277 = arith.addf %275, %276 : vector<2x512xf32>
    %278 = vector.extract_strided_slice %277 {offsets = [0, 0], sizes = [2, 128], strides = [1, 1]} : vector<2x512xf32> to vector<2x128xf32>
    %279 = arith.negf %278 : vector<2x128xf32>
    %280 = math.exp %279 : vector<2x128xf32>
    %cst_62 = arith.constant 1.000000e+00 : f32
    %281 = vector.broadcast %cst_62 : f32 to vector<2x128xf32>
    %282 = arith.addf %281, %280 : vector<2x128xf32>
    %283 = arith.divf %281, %282 : vector<2x128xf32>
    %284 = vector.extract_strided_slice %277 {offsets = [0, 128], sizes = [2, 128], strides = [1, 1]} : vector<2x512xf32> to vector<2x128xf32>
    %285 = arith.negf %284 : vector<2x128xf32>
    %286 = math.exp %285 : vector<2x128xf32>
    %cst_63 = arith.constant 1.000000e+00 : f32
    %287 = vector.broadcast %cst_63 : f32 to vector<2x128xf32>
    %288 = arith.addf %287, %286 : vector<2x128xf32>
    %289 = arith.divf %287, %288 : vector<2x128xf32>
    %290 = vector.extract_strided_slice %277 {offsets = [0, 256], sizes = [2, 128], strides = [1, 1]} : vector<2x512xf32> to vector<2x128xf32>
    %291 = math.tanh %290 : vector<2x128xf32>
    %292 = vector.extract_strided_slice %277 {offsets = [0, 384], sizes = [2, 128], strides = [1, 1]} : vector<2x512xf32> to vector<2x128xf32>
    %293 = arith.negf %292 : vector<2x128xf32>
    %294 = math.exp %293 : vector<2x128xf32>
    %cst_64 = arith.constant 1.000000e+00 : f32
    %295 = vector.broadcast %cst_64 : f32 to vector<2x128xf32>
    %296 = arith.addf %295, %294 : vector<2x128xf32>
    %297 = arith.divf %295, %296 : vector<2x128xf32>
    %298 = arith.mulf %289, %242 : vector<2x128xf32>
    %299 = arith.mulf %283, %291 : vector<2x128xf32>
    %300 = arith.addf %298, %299 : vector<2x128xf32>
    %301 = math.tanh %300 : vector<2x128xf32>
    %302 = arith.mulf %297, %301 : vector<2x128xf32>
    %c6_65 = arith.constant 6 : index
    %c128_66 = arith.constant 128 : index
    %303 = vector.load %arg16[%c6_65, %c128_66] : memref<16x256xf32, #tpu.memory_space<vmem>>, vector<2x128xf32>
    tpu.vector_store %arg16[%c6_65, %c128_66], %302 {strides = array<i32>} : memref<16x256xf32, #tpu.memory_space<vmem>>, vector<2x128xf32>,
    %304 = vector.extract_strided_slice %6 {offsets = [10, 0], sizes = [2, 512], strides = [1, 1]} : vector<16x512xf32> to vector<2x512xf32>
    %cst_67 = arith.constant dense<0.000000e+00> : vector<2x512xf32>
    %305 = tpu.matmul %273, %12, %cst_67 {dimension_numbers = #tpu.dot_dimension_numbers<[1], [0], [0], [1], [0, 0, 1, 1], [], []>} : vector<2x128xf32>, vector<128x512xf32>, vector<2x512xf32> -> vector<2x512xf32>
    %306 = arith.addf %304, %305 : vector<2x512xf32>
    %307 = vector.extract_strided_slice %306 {offsets = [0, 0], sizes = [2, 128], strides = [1, 1]} : vector<2x512xf32> to vector<2x128xf32>
    %308 = arith.negf %307 : vector<2x128xf32>
    %309 = math.exp %308 : vector<2x128xf32>
    %cst_68 = arith.constant 1.000000e+00 : f32
    %310 = vector.broadcast %cst_68 : f32 to vector<2x128xf32>
    %311 = arith.addf %310, %309 : vector<2x128xf32>
    %312 = arith.divf %310, %311 : vector<2x128xf32>
    %313 = vector.extract_strided_slice %306 {offsets = [0, 128], sizes = [2, 128], strides = [1, 1]} : vector<2x512xf32> to vector<2x128xf32>
    %314 = arith.negf %313 : vector<2x128xf32>
    %315 = math.exp %314 : vector<2x128xf32>
    %cst_69 = arith.constant 1.000000e+00 : f32
    %316 = vector.broadcast %cst_69 : f32 to vector<2x128xf32>
    %317 = arith.addf %316, %315 : vector<2x128xf32>
    %318 = arith.divf %316, %317 : vector<2x128xf32>
    %319 = vector.extract_strided_slice %306 {offsets = [0, 256], sizes = [2, 128], strides = [1, 1]} : vector<2x512xf32> to vector<2x128xf32>
    %320 = math.tanh %319 : vector<2x128xf32>
    %321 = vector.extract_strided_slice %306 {offsets = [0, 384], sizes = [2, 128], strides = [1, 1]} : vector<2x512xf32> to vector<2x128xf32>
    %322 = arith.negf %321 : vector<2x128xf32>
    %323 = math.exp %322 : vector<2x128xf32>
    %cst_70 = arith.constant 1.000000e+00 : f32
    %324 = vector.broadcast %cst_70 : f32 to vector<2x128xf32>
    %325 = arith.addf %324, %323 : vector<2x128xf32>
    %326 = arith.divf %324, %325 : vector<2x128xf32>
    %327 = arith.mulf %318, %271 : vector<2x128xf32>
    %328 = arith.mulf %312, %320 : vector<2x128xf32>
    %329 = arith.addf %327, %328 : vector<2x128xf32>
    %330 = math.tanh %329 : vector<2x128xf32>
    %331 = arith.mulf %326, %330 : vector<2x128xf32>
    %c10_71 = arith.constant 10 : index
    %c0_72 = arith.constant 0 : index
    %332 = vector.load %arg16[%c10_71, %c0_72] : memref<16x256xf32, #tpu.memory_space<vmem>>, vector<2x128xf32>
    tpu.vector_store %arg16[%c10_71, %c0_72], %331 {strides = array<i32>} : memref<16x256xf32, #tpu.memory_space<vmem>>, vector<2x128xf32>,
    %333 = vector.extract_strided_slice %11 {offsets = [4, 0], sizes = [2, 512], strides = [1, 1]} : vector<16x512xf32> to vector<2x512xf32>
    %cst_73 = arith.constant dense<0.000000e+00> : vector<2x512xf32>
    %334 = tpu.matmul %302, %13, %cst_73 {dimension_numbers = #tpu.dot_dimension_numbers<[1], [0], [0], [1], [0, 0, 1, 1], [], []>} : vector<2x128xf32>, vector<128x512xf32>, vector<2x512xf32> -> vector<2x512xf32>
    %335 = arith.addf %333, %334 : vector<2x512xf32>
    %336 = vector.extract_strided_slice %335 {offsets = [0, 0], sizes = [2, 128], strides = [1, 1]} : vector<2x512xf32> to vector<2x128xf32>
    %337 = arith.negf %336 : vector<2x128xf32>
    %338 = math.exp %337 : vector<2x128xf32>
    %cst_74 = arith.constant 1.000000e+00 : f32
    %339 = vector.broadcast %cst_74 : f32 to vector<2x128xf32>
    %340 = arith.addf %339, %338 : vector<2x128xf32>
    %341 = arith.divf %339, %340 : vector<2x128xf32>
    %342 = vector.extract_strided_slice %335 {offsets = [0, 128], sizes = [2, 128], strides = [1, 1]} : vector<2x512xf32> to vector<2x128xf32>
    %343 = arith.negf %342 : vector<2x128xf32>
    %344 = math.exp %343 : vector<2x128xf32>
    %cst_75 = arith.constant 1.000000e+00 : f32
    %345 = vector.broadcast %cst_75 : f32 to vector<2x128xf32>
    %346 = arith.addf %345, %344 : vector<2x128xf32>
    %347 = arith.divf %345, %346 : vector<2x128xf32>
    %348 = vector.extract_strided_slice %335 {offsets = [0, 256], sizes = [2, 128], strides = [1, 1]} : vector<2x512xf32> to vector<2x128xf32>
    %349 = math.tanh %348 : vector<2x128xf32>
    %350 = vector.extract_strided_slice %335 {offsets = [0, 384], sizes = [2, 128], strides = [1, 1]} : vector<2x512xf32> to vector<2x128xf32>
    %351 = arith.negf %350 : vector<2x128xf32>
    %352 = math.exp %351 : vector<2x128xf32>
    %cst_76 = arith.constant 1.000000e+00 : f32
    %353 = vector.broadcast %cst_76 : f32 to vector<2x128xf32>
    %354 = arith.addf %353, %352 : vector<2x128xf32>
    %355 = arith.divf %353, %354 : vector<2x128xf32>
    %356 = arith.mulf %347, %300 : vector<2x128xf32>
    %357 = arith.mulf %341, %349 : vector<2x128xf32>
    %358 = arith.addf %356, %357 : vector<2x128xf32>
    %359 = math.tanh %358 : vector<2x128xf32>
    %360 = arith.mulf %355, %359 : vector<2x128xf32>
    %c4_77 = arith.constant 4 : index
    %c128_78 = arith.constant 128 : index
    %361 = vector.load %arg16[%c4_77, %c128_78] : memref<16x256xf32, #tpu.memory_space<vmem>>, vector<2x128xf32>
    tpu.vector_store %arg16[%c4_77, %c128_78], %360 {strides = array<i32>} : memref<16x256xf32, #tpu.memory_space<vmem>>, vector<2x128xf32>,
    %362 = vector.extract_strided_slice %6 {offsets = [12, 0], sizes = [2, 512], strides = [1, 1]} : vector<16x512xf32> to vector<2x512xf32>
    %cst_79 = arith.constant dense<0.000000e+00> : vector<2x512xf32>
    %363 = tpu.matmul %331, %12, %cst_79 {dimension_numbers = #tpu.dot_dimension_numbers<[1], [0], [0], [1], [0, 0, 1, 1], [], []>} : vector<2x128xf32>, vector<128x512xf32>, vector<2x512xf32> -> vector<2x512xf32>
    %364 = arith.addf %362, %363 : vector<2x512xf32>
    %365 = vector.extract_strided_slice %364 {offsets = [0, 0], sizes = [2, 128], strides = [1, 1]} : vector<2x512xf32> to vector<2x128xf32>
    %366 = arith.negf %365 : vector<2x128xf32>
    %367 = math.exp %366 : vector<2x128xf32>
    %cst_80 = arith.constant 1.000000e+00 : f32
    %368 = vector.broadcast %cst_80 : f32 to vector<2x128xf32>
    %369 = arith.addf %368, %367 : vector<2x128xf32>
    %370 = arith.divf %368, %369 : vector<2x128xf32>
    %371 = vector.extract_strided_slice %364 {offsets = [0, 128], sizes = [2, 128], strides = [1, 1]} : vector<2x512xf32> to vector<2x128xf32>
    %372 = arith.negf %371 : vector<2x128xf32>
    %373 = math.exp %372 : vector<2x128xf32>
    %cst_81 = arith.constant 1.000000e+00 : f32
    %374 = vector.broadcast %cst_81 : f32 to vector<2x128xf32>
    %375 = arith.addf %374, %373 : vector<2x128xf32>
    %376 = arith.divf %374, %375 : vector<2x128xf32>
    %377 = vector.extract_strided_slice %364 {offsets = [0, 256], sizes = [2, 128], strides = [1, 1]} : vector<2x512xf32> to vector<2x128xf32>
    %378 = math.tanh %377 : vector<2x128xf32>
    %379 = vector.extract_strided_slice %364 {offsets = [0, 384], sizes = [2, 128], strides = [1, 1]} : vector<2x512xf32> to vector<2x128xf32>
    %380 = arith.negf %379 : vector<2x128xf32>
    %381 = math.exp %380 : vector<2x128xf32>
    %cst_82 = arith.constant 1.000000e+00 : f32
    %382 = vector.broadcast %cst_82 : f32 to vector<2x128xf32>
    %383 = arith.addf %382, %381 : vector<2x128xf32>
    %384 = arith.divf %382, %383 : vector<2x128xf32>
    %385 = arith.mulf %376, %329 : vector<2x128xf32>
    %386 = arith.mulf %370, %378 : vector<2x128xf32>
    %387 = arith.addf %385, %386 : vector<2x128xf32>
    %388 = math.tanh %387 : vector<2x128xf32>
    %389 = arith.mulf %384, %388 : vector<2x128xf32>
    %c12_83 = arith.constant 12 : index
    %c0_84 = arith.constant 0 : index
    %390 = vector.load %arg16[%c12_83, %c0_84] : memref<16x256xf32, #tpu.memory_space<vmem>>, vector<2x128xf32>
    tpu.vector_store %arg16[%c12_83, %c0_84], %389 {strides = array<i32>} : memref<16x256xf32, #tpu.memory_space<vmem>>, vector<2x128xf32>,
    %391 = vector.extract_strided_slice %11 {offsets = [2, 0], sizes = [2, 512], strides = [1, 1]} : vector<16x512xf32> to vector<2x512xf32>
    %cst_85 = arith.constant dense<0.000000e+00> : vector<2x512xf32>
    %392 = tpu.matmul %360, %13, %cst_85 {dimension_numbers = #tpu.dot_dimension_numbers<[1], [0], [0], [1], [0, 0, 1, 1], [], []>} : vector<2x128xf32>, vector<128x512xf32>, vector<2x512xf32> -> vector<2x512xf32>
    %393 = arith.addf %391, %392 : vector<2x512xf32>
    %394 = vector.extract_strided_slice %393 {offsets = [0, 0], sizes = [2, 128], strides = [1, 1]} : vector<2x512xf32> to vector<2x128xf32>
    %395 = arith.negf %394 : vector<2x128xf32>
    %396 = math.exp %395 : vector<2x128xf32>
    %cst_86 = arith.constant 1.000000e+00 : f32
    %397 = vector.broadcast %cst_86 : f32 to vector<2x128xf32>
    %398 = arith.addf %397, %396 : vector<2x128xf32>
    %399 = arith.divf %397, %398 : vector<2x128xf32>
    %400 = vector.extract_strided_slice %393 {offsets = [0, 128], sizes = [2, 128], strides = [1, 1]} : vector<2x512xf32> to vector<2x128xf32>
    %401 = arith.negf %400 : vector<2x128xf32>
    %402 = math.exp %401 : vector<2x128xf32>
    %cst_87 = arith.constant 1.000000e+00 : f32
    %403 = vector.broadcast %cst_87 : f32 to vector<2x128xf32>
    %404 = arith.addf %403, %402 : vector<2x128xf32>
    %405 = arith.divf %403, %404 : vector<2x128xf32>
    %406 = vector.extract_strided_slice %393 {offsets = [0, 256], sizes = [2, 128], strides = [1, 1]} : vector<2x512xf32> to vector<2x128xf32>
    %407 = math.tanh %406 : vector<2x128xf32>
    %408 = vector.extract_strided_slice %393 {offsets = [0, 384], sizes = [2, 128], strides = [1, 1]} : vector<2x512xf32> to vector<2x128xf32>
    %409 = arith.negf %408 : vector<2x128xf32>
    %410 = math.exp %409 : vector<2x128xf32>
    %cst_88 = arith.constant 1.000000e+00 : f32
    %411 = vector.broadcast %cst_88 : f32 to vector<2x128xf32>
    %412 = arith.addf %411, %410 : vector<2x128xf32>
    %413 = arith.divf %411, %412 : vector<2x128xf32>
    %414 = arith.mulf %405, %358 : vector<2x128xf32>
    %415 = arith.mulf %399, %407 : vector<2x128xf32>
    %416 = arith.addf %414, %415 : vector<2x128xf32>
    %417 = math.tanh %416 : vector<2x128xf32>
    %418 = arith.mulf %413, %417 : vector<2x128xf32>
    %c2_89 = arith.constant 2 : index
    %c128_90 = arith.constant 128 : index
    %419 = vector.load %arg16[%c2_89, %c128_90] : memref<16x256xf32, #tpu.memory_space<vmem>>, vector<2x128xf32>
    tpu.vector_store %arg16[%c2_89, %c128_90], %418 {strides = array<i32>} : memref<16x256xf32, #tpu.memory_space<vmem>>, vector<2x128xf32>,
    %420 = vector.extract_strided_slice %6 {offsets = [14, 0], sizes = [2, 512], strides = [1, 1]} : vector<16x512xf32> to vector<2x512xf32>
    %cst_91 = arith.constant dense<0.000000e+00> : vector<2x512xf32>
    %421 = tpu.matmul %389, %12, %cst_91 {dimension_numbers = #tpu.dot_dimension_numbers<[1], [0], [0], [1], [0, 0, 1, 1], [], []>} : vector<2x128xf32>, vector<128x512xf32>, vector<2x512xf32> -> vector<2x512xf32>
    %422 = arith.addf %420, %421 : vector<2x512xf32>
    %423 = vector.extract_strided_slice %422 {offsets = [0, 0], sizes = [2, 128], strides = [1, 1]} : vector<2x512xf32> to vector<2x128xf32>
    %424 = arith.negf %423 : vector<2x128xf32>
    %425 = math.exp %424 : vector<2x128xf32>
    %cst_92 = arith.constant 1.000000e+00 : f32
    %426 = vector.broadcast %cst_92 : f32 to vector<2x128xf32>
    %427 = arith.addf %426, %425 : vector<2x128xf32>
    %428 = arith.divf %426, %427 : vector<2x128xf32>
    %429 = vector.extract_strided_slice %422 {offsets = [0, 128], sizes = [2, 128], strides = [1, 1]} : vector<2x512xf32> to vector<2x128xf32>
    %430 = arith.negf %429 : vector<2x128xf32>
    %431 = math.exp %430 : vector<2x128xf32>
    %cst_93 = arith.constant 1.000000e+00 : f32
    %432 = vector.broadcast %cst_93 : f32 to vector<2x128xf32>
    %433 = arith.addf %432, %431 : vector<2x128xf32>
    %434 = arith.divf %432, %433 : vector<2x128xf32>
    %435 = vector.extract_strided_slice %422 {offsets = [0, 256], sizes = [2, 128], strides = [1, 1]} : vector<2x512xf32> to vector<2x128xf32>
    %436 = math.tanh %435 : vector<2x128xf32>
    %437 = vector.extract_strided_slice %422 {offsets = [0, 384], sizes = [2, 128], strides = [1, 1]} : vector<2x512xf32> to vector<2x128xf32>
    %438 = arith.negf %437 : vector<2x128xf32>
    %439 = math.exp %438 : vector<2x128xf32>
    %cst_94 = arith.constant 1.000000e+00 : f32
    %440 = vector.broadcast %cst_94 : f32 to vector<2x128xf32>
    %441 = arith.addf %440, %439 : vector<2x128xf32>
    %442 = arith.divf %440, %441 : vector<2x128xf32>
    %443 = arith.mulf %434, %387 : vector<2x128xf32>
    %444 = arith.mulf %428, %436 : vector<2x128xf32>
    %445 = arith.addf %443, %444 : vector<2x128xf32>
    %446 = math.tanh %445 : vector<2x128xf32>
    %447 = arith.mulf %442, %446 : vector<2x128xf32>
    %c14_95 = arith.constant 14 : index
    %c0_96 = arith.constant 0 : index
    %448 = vector.load %arg16[%c14_95, %c0_96] : memref<16x256xf32, #tpu.memory_space<vmem>>, vector<2x128xf32>
    tpu.vector_store %arg16[%c14_95, %c0_96], %447 {strides = array<i32>} : memref<16x256xf32, #tpu.memory_space<vmem>>, vector<2x128xf32>,
    %449 = vector.extract_strided_slice %11 {offsets = [0, 0], sizes = [2, 512], strides = [1, 1]} : vector<16x512xf32> to vector<2x512xf32>
    %cst_97 = arith.constant dense<0.000000e+00> : vector<2x512xf32>
    %450 = tpu.matmul %418, %13, %cst_97 {dimension_numbers = #tpu.dot_dimension_numbers<[1], [0], [0], [1], [0, 0, 1, 1], [], []>} : vector<2x128xf32>, vector<128x512xf32>, vector<2x512xf32> -> vector<2x512xf32>
    %451 = arith.addf %449, %450 : vector<2x512xf32>
    %452 = vector.extract_strided_slice %451 {offsets = [0, 0], sizes = [2, 128], strides = [1, 1]} : vector<2x512xf32> to vector<2x128xf32>
    %453 = arith.negf %452 : vector<2x128xf32>
    %454 = math.exp %453 : vector<2x128xf32>
    %cst_98 = arith.constant 1.000000e+00 : f32
    %455 = vector.broadcast %cst_98 : f32 to vector<2x128xf32>
    %456 = arith.addf %455, %454 : vector<2x128xf32>
    %457 = arith.divf %455, %456 : vector<2x128xf32>
    %458 = vector.extract_strided_slice %451 {offsets = [0, 128], sizes = [2, 128], strides = [1, 1]} : vector<2x512xf32> to vector<2x128xf32>
    %459 = arith.negf %458 : vector<2x128xf32>
    %460 = math.exp %459 : vector<2x128xf32>
    %cst_99 = arith.constant 1.000000e+00 : f32
    %461 = vector.broadcast %cst_99 : f32 to vector<2x128xf32>
    %462 = arith.addf %461, %460 : vector<2x128xf32>
    %463 = arith.divf %461, %462 : vector<2x128xf32>
    %464 = vector.extract_strided_slice %451 {offsets = [0, 256], sizes = [2, 128], strides = [1, 1]} : vector<2x512xf32> to vector<2x128xf32>
    %465 = math.tanh %464 : vector<2x128xf32>
    %466 = vector.extract_strided_slice %451 {offsets = [0, 384], sizes = [2, 128], strides = [1, 1]} : vector<2x512xf32> to vector<2x128xf32>
    %467 = arith.negf %466 : vector<2x128xf32>
    %468 = math.exp %467 : vector<2x128xf32>
    %cst_100 = arith.constant 1.000000e+00 : f32
    %469 = vector.broadcast %cst_100 : f32 to vector<2x128xf32>
    %470 = arith.addf %469, %468 : vector<2x128xf32>
    %471 = arith.divf %469, %470 : vector<2x128xf32>
    %472 = arith.mulf %463, %416 : vector<2x128xf32>
    %473 = arith.mulf %457, %465 : vector<2x128xf32>
    %474 = arith.addf %472, %473 : vector<2x128xf32>
    %475 = math.tanh %474 : vector<2x128xf32>
    %476 = arith.mulf %471, %475 : vector<2x128xf32>
    %c0_101 = arith.constant 0 : index
    %c128_102 = arith.constant 128 : index
    %477 = vector.load %arg16[%c0_101, %c128_102] : memref<16x256xf32, #tpu.memory_space<vmem>>, vector<2x128xf32>
    tpu.vector_store %arg16[%c0_101, %c128_102], %476 {strides = array<i32>} : memref<16x256xf32, #tpu.memory_space<vmem>>, vector<2x128xf32>,
    %c0_103 = arith.constant 0 : index
    %c0_104 = arith.constant 0 : index
    %478 = vector.load %arg16[%c0_103, %c0_104] : memref<16x256xf32, #tpu.memory_space<vmem>>, vector<16x256xf32>
    %c0_105 = arith.constant 0 : index
    %c0_106 = arith.constant 0 : index
    %479 = vector.load %arg7[%c0_105, %c0_106] : memref<256x512xf32, #tpu.memory_space<vmem>>, vector<256x512xf32>
    %cst_107 = arith.constant dense<0.000000e+00> : vector<16x512xf32>
    %480 = tpu.matmul %478, %479, %cst_107 {dimension_numbers = #tpu.dot_dimension_numbers<[1], [0], [0], [1], [0, 0, 1, 1], [], []>} : vector<16x256xf32>, vector<256x512xf32>, vector<16x512xf32> -> vector<16x512xf32>
    %c0_108 = arith.constant 0 : index
    %c0_109 = arith.constant 0 : index
    %481 = vector.load %arg9[%c0_108, %c0_109] : memref<1x512xf32, #tpu.memory_space<vmem>>, vector<1x512xf32>
    %482 = vector.broadcast %481 : vector<1x512xf32> to vector<16x512xf32>
    %483 = arith.addf %480, %482 : vector<16x512xf32>
    %c0_110 = arith.constant 0 : index
    %c0_111 = arith.constant 0 : index
    %484 = vector.load %arg8[%c0_110, %c0_111] : memref<128x512xf32, #tpu.memory_space<vmem>>, vector<128x512xf32>
    %485 = vector.extract_strided_slice %483 {offsets = [0, 0], sizes = [2, 512], strides = [1, 1]} : vector<16x512xf32> to vector<2x512xf32>
    %cst_112 = arith.constant dense<0.000000e+00> : vector<2x512xf32>
    %486 = tpu.matmul %1, %484, %cst_112 {dimension_numbers = #tpu.dot_dimension_numbers<[1], [0], [0], [1], [0, 0, 1, 1], [], []>} : vector<2x128xf32>, vector<128x512xf32>, vector<2x512xf32> -> vector<2x512xf32>
    %487 = arith.addf %485, %486 : vector<2x512xf32>
    %488 = vector.extract_strided_slice %487 {offsets = [0, 0], sizes = [2, 128], strides = [1, 1]} : vector<2x512xf32> to vector<2x128xf32>
    %489 = arith.negf %488 : vector<2x128xf32>
    %490 = math.exp %489 : vector<2x128xf32>
    %cst_113 = arith.constant 1.000000e+00 : f32
    %491 = vector.broadcast %cst_113 : f32 to vector<2x128xf32>
    %492 = arith.addf %491, %490 : vector<2x128xf32>
    %493 = arith.divf %491, %492 : vector<2x128xf32>
    %494 = vector.extract_strided_slice %487 {offsets = [0, 128], sizes = [2, 128], strides = [1, 1]} : vector<2x512xf32> to vector<2x128xf32>
    %495 = arith.negf %494 : vector<2x128xf32>
    %496 = math.exp %495 : vector<2x128xf32>
    %cst_114 = arith.constant 1.000000e+00 : f32
    %497 = vector.broadcast %cst_114 : f32 to vector<2x128xf32>
    %498 = arith.addf %497, %496 : vector<2x128xf32>
    %499 = arith.divf %497, %498 : vector<2x128xf32>
    %500 = vector.extract_strided_slice %487 {offsets = [0, 256], sizes = [2, 128], strides = [1, 1]} : vector<2x512xf32> to vector<2x128xf32>
    %501 = math.tanh %500 : vector<2x128xf32>
    %502 = vector.extract_strided_slice %487 {offsets = [0, 384], sizes = [2, 128], strides = [1, 1]} : vector<2x512xf32> to vector<2x128xf32>
    %503 = arith.negf %502 : vector<2x128xf32>
    %504 = math.exp %503 : vector<2x128xf32>
    %cst_115 = arith.constant 1.000000e+00 : f32
    %505 = vector.broadcast %cst_115 : f32 to vector<2x128xf32>
    %506 = arith.addf %505, %504 : vector<2x128xf32>
    %507 = arith.divf %505, %506 : vector<2x128xf32>
    %508 = arith.mulf %499, %1 : vector<2x128xf32>
    %509 = arith.mulf %493, %501 : vector<2x128xf32>
    %510 = arith.addf %508, %509 : vector<2x128xf32>
    %511 = math.tanh %510 : vector<2x128xf32>
    %512 = arith.mulf %507, %511 : vector<2x128xf32>
    %513 = vector.extract_strided_slice %483 {offsets = [2, 0], sizes = [2, 512], strides = [1, 1]} : vector<16x512xf32> to vector<2x512xf32>
    %cst_116 = arith.constant dense<0.000000e+00> : vector<2x512xf32>
    %514 = tpu.matmul %512, %484, %cst_116 {dimension_numbers = #tpu.dot_dimension_numbers<[1], [0], [0], [1], [0, 0, 1, 1], [], []>} : vector<2x128xf32>, vector<128x512xf32>, vector<2x512xf32> -> vector<2x512xf32>
    %515 = arith.addf %513, %514 : vector<2x512xf32>
    %516 = vector.extract_strided_slice %515 {offsets = [0, 0], sizes = [2, 128], strides = [1, 1]} : vector<2x512xf32> to vector<2x128xf32>
    %517 = arith.negf %516 : vector<2x128xf32>
    %518 = math.exp %517 : vector<2x128xf32>
    %cst_117 = arith.constant 1.000000e+00 : f32
    %519 = vector.broadcast %cst_117 : f32 to vector<2x128xf32>
    %520 = arith.addf %519, %518 : vector<2x128xf32>
    %521 = arith.divf %519, %520 : vector<2x128xf32>
    %522 = vector.extract_strided_slice %515 {offsets = [0, 128], sizes = [2, 128], strides = [1, 1]} : vector<2x512xf32> to vector<2x128xf32>
    %523 = arith.negf %522 : vector<2x128xf32>
    %524 = math.exp %523 : vector<2x128xf32>
    %cst_118 = arith.constant 1.000000e+00 : f32
    %525 = vector.broadcast %cst_118 : f32 to vector<2x128xf32>
    %526 = arith.addf %525, %524 : vector<2x128xf32>
    %527 = arith.divf %525, %526 : vector<2x128xf32>
    %528 = vector.extract_strided_slice %515 {offsets = [0, 256], sizes = [2, 128], strides = [1, 1]} : vector<2x512xf32> to vector<2x128xf32>
    %529 = math.tanh %528 : vector<2x128xf32>
    %530 = vector.extract_strided_slice %515 {offsets = [0, 384], sizes = [2, 128], strides = [1, 1]} : vector<2x512xf32> to vector<2x128xf32>
    %531 = arith.negf %530 : vector<2x128xf32>
    %532 = math.exp %531 : vector<2x128xf32>
    %cst_119 = arith.constant 1.000000e+00 : f32
    %533 = vector.broadcast %cst_119 : f32 to vector<2x128xf32>
    %534 = arith.addf %533, %532 : vector<2x128xf32>
    %535 = arith.divf %533, %534 : vector<2x128xf32>
    %536 = arith.mulf %527, %510 : vector<2x128xf32>
    %537 = arith.mulf %521, %529 : vector<2x128xf32>
    %538 = arith.addf %536, %537 : vector<2x128xf32>
    %539 = math.tanh %538 : vector<2x128xf32>
    %540 = arith.mulf %535, %539 : vector<2x128xf32>
    %541 = vector.extract_strided_slice %483 {offsets = [4, 0], sizes = [2, 512], strides = [1, 1]} : vector<16x512xf32> to vector<2x512xf32>
    %cst_120 = arith.constant dense<0.000000e+00> : vector<2x512xf32>
    %542 = tpu.matmul %540, %484, %cst_120 {dimension_numbers = #tpu.dot_dimension_numbers<[1], [0], [0], [1], [0, 0, 1, 1], [], []>} : vector<2x128xf32>, vector<128x512xf32>, vector<2x512xf32> -> vector<2x512xf32>
    %543 = arith.addf %541, %542 : vector<2x512xf32>
    %544 = vector.extract_strided_slice %543 {offsets = [0, 0], sizes = [2, 128], strides = [1, 1]} : vector<2x512xf32> to vector<2x128xf32>
    %545 = arith.negf %544 : vector<2x128xf32>
    %546 = math.exp %545 : vector<2x128xf32>
    %cst_121 = arith.constant 1.000000e+00 : f32
    %547 = vector.broadcast %cst_121 : f32 to vector<2x128xf32>
    %548 = arith.addf %547, %546 : vector<2x128xf32>
    %549 = arith.divf %547, %548 : vector<2x128xf32>
    %550 = vector.extract_strided_slice %543 {offsets = [0, 128], sizes = [2, 128], strides = [1, 1]} : vector<2x512xf32> to vector<2x128xf32>
    %551 = arith.negf %550 : vector<2x128xf32>
    %552 = math.exp %551 : vector<2x128xf32>
    %cst_122 = arith.constant 1.000000e+00 : f32
    %553 = vector.broadcast %cst_122 : f32 to vector<2x128xf32>
    %554 = arith.addf %553, %552 : vector<2x128xf32>
    %555 = arith.divf %553, %554 : vector<2x128xf32>
    %556 = vector.extract_strided_slice %543 {offsets = [0, 256], sizes = [2, 128], strides = [1, 1]} : vector<2x512xf32> to vector<2x128xf32>
    %557 = math.tanh %556 : vector<2x128xf32>
    %558 = vector.extract_strided_slice %543 {offsets = [0, 384], sizes = [2, 128], strides = [1, 1]} : vector<2x512xf32> to vector<2x128xf32>
    %559 = arith.negf %558 : vector<2x128xf32>
    %560 = math.exp %559 : vector<2x128xf32>
    %cst_123 = arith.constant 1.000000e+00 : f32
    %561 = vector.broadcast %cst_123 : f32 to vector<2x128xf32>
    %562 = arith.addf %561, %560 : vector<2x128xf32>
    %563 = arith.divf %561, %562 : vector<2x128xf32>
    %564 = arith.mulf %555, %538 : vector<2x128xf32>
    %565 = arith.mulf %549, %557 : vector<2x128xf32>
    %566 = arith.addf %564, %565 : vector<2x128xf32>
    %567 = math.tanh %566 : vector<2x128xf32>
    %568 = arith.mulf %563, %567 : vector<2x128xf32>
    %569 = vector.extract_strided_slice %483 {offsets = [6, 0], sizes = [2, 512], strides = [1, 1]} : vector<16x512xf32> to vector<2x512xf32>
    %cst_124 = arith.constant dense<0.000000e+00> : vector<2x512xf32>
    %570 = tpu.matmul %568, %484, %cst_124 {dimension_numbers = #tpu.dot_dimension_numbers<[1], [0], [0], [1], [0, 0, 1, 1], [], []>} : vector<2x128xf32>, vector<128x512xf32>, vector<2x512xf32> -> vector<2x512xf32>
    %571 = arith.addf %569, %570 : vector<2x512xf32>
    %572 = vector.extract_strided_slice %571 {offsets = [0, 0], sizes = [2, 128], strides = [1, 1]} : vector<2x512xf32> to vector<2x128xf32>
    %573 = arith.negf %572 : vector<2x128xf32>
    %574 = math.exp %573 : vector<2x128xf32>
    %cst_125 = arith.constant 1.000000e+00 : f32
    %575 = vector.broadcast %cst_125 : f32 to vector<2x128xf32>
    %576 = arith.addf %575, %574 : vector<2x128xf32>
    %577 = arith.divf %575, %576 : vector<2x128xf32>
    %578 = vector.extract_strided_slice %571 {offsets = [0, 128], sizes = [2, 128], strides = [1, 1]} : vector<2x512xf32> to vector<2x128xf32>
    %579 = arith.negf %578 : vector<2x128xf32>
    %580 = math.exp %579 : vector<2x128xf32>
    %cst_126 = arith.constant 1.000000e+00 : f32
    %581 = vector.broadcast %cst_126 : f32 to vector<2x128xf32>
    %582 = arith.addf %581, %580 : vector<2x128xf32>
    %583 = arith.divf %581, %582 : vector<2x128xf32>
    %584 = vector.extract_strided_slice %571 {offsets = [0, 256], sizes = [2, 128], strides = [1, 1]} : vector<2x512xf32> to vector<2x128xf32>
    %585 = math.tanh %584 : vector<2x128xf32>
    %586 = vector.extract_strided_slice %571 {offsets = [0, 384], sizes = [2, 128], strides = [1, 1]} : vector<2x512xf32> to vector<2x128xf32>
    %587 = arith.negf %586 : vector<2x128xf32>
    %588 = math.exp %587 : vector<2x128xf32>
    %cst_127 = arith.constant 1.000000e+00 : f32
    %589 = vector.broadcast %cst_127 : f32 to vector<2x128xf32>
    %590 = arith.addf %589, %588 : vector<2x128xf32>
    %591 = arith.divf %589, %590 : vector<2x128xf32>
    %592 = arith.mulf %583, %566 : vector<2x128xf32>
    %593 = arith.mulf %577, %585 : vector<2x128xf32>
    %594 = arith.addf %592, %593 : vector<2x128xf32>
    %595 = math.tanh %594 : vector<2x128xf32>
    %596 = arith.mulf %591, %595 : vector<2x128xf32>
    %597 = vector.extract_strided_slice %483 {offsets = [8, 0], sizes = [2, 512], strides = [1, 1]} : vector<16x512xf32> to vector<2x512xf32>
    %cst_128 = arith.constant dense<0.000000e+00> : vector<2x512xf32>
    %598 = tpu.matmul %596, %484, %cst_128 {dimension_numbers = #tpu.dot_dimension_numbers<[1], [0], [0], [1], [0, 0, 1, 1], [], []>} : vector<2x128xf32>, vector<128x512xf32>, vector<2x512xf32> -> vector<2x512xf32>
    %599 = arith.addf %597, %598 : vector<2x512xf32>
    %600 = vector.extract_strided_slice %599 {offsets = [0, 0], sizes = [2, 128], strides = [1, 1]} : vector<2x512xf32> to vector<2x128xf32>
    %601 = arith.negf %600 : vector<2x128xf32>
    %602 = math.exp %601 : vector<2x128xf32>
    %cst_129 = arith.constant 1.000000e+00 : f32
    %603 = vector.broadcast %cst_129 : f32 to vector<2x128xf32>
    %604 = arith.addf %603, %602 : vector<2x128xf32>
    %605 = arith.divf %603, %604 : vector<2x128xf32>
    %606 = vector.extract_strided_slice %599 {offsets = [0, 128], sizes = [2, 128], strides = [1, 1]} : vector<2x512xf32> to vector<2x128xf32>
    %607 = arith.negf %606 : vector<2x128xf32>
    %608 = math.exp %607 : vector<2x128xf32>
    %cst_130 = arith.constant 1.000000e+00 : f32
    %609 = vector.broadcast %cst_130 : f32 to vector<2x128xf32>
    %610 = arith.addf %609, %608 : vector<2x128xf32>
    %611 = arith.divf %609, %610 : vector<2x128xf32>
    %612 = vector.extract_strided_slice %599 {offsets = [0, 256], sizes = [2, 128], strides = [1, 1]} : vector<2x512xf32> to vector<2x128xf32>
    %613 = math.tanh %612 : vector<2x128xf32>
    %614 = vector.extract_strided_slice %599 {offsets = [0, 384], sizes = [2, 128], strides = [1, 1]} : vector<2x512xf32> to vector<2x128xf32>
    %615 = arith.negf %614 : vector<2x128xf32>
    %616 = math.exp %615 : vector<2x128xf32>
    %cst_131 = arith.constant 1.000000e+00 : f32
    %617 = vector.broadcast %cst_131 : f32 to vector<2x128xf32>
    %618 = arith.addf %617, %616 : vector<2x128xf32>
    %619 = arith.divf %617, %618 : vector<2x128xf32>
    %620 = arith.mulf %611, %594 : vector<2x128xf32>
    %621 = arith.mulf %605, %613 : vector<2x128xf32>
    %622 = arith.addf %620, %621 : vector<2x128xf32>
    %623 = math.tanh %622 : vector<2x128xf32>
    %624 = arith.mulf %619, %623 : vector<2x128xf32>
    %625 = vector.extract_strided_slice %483 {offsets = [10, 0], sizes = [2, 512], strides = [1, 1]} : vector<16x512xf32> to vector<2x512xf32>
    %cst_132 = arith.constant dense<0.000000e+00> : vector<2x512xf32>
    %626 = tpu.matmul %624, %484, %cst_132 {dimension_numbers = #tpu.dot_dimension_numbers<[1], [0], [0], [1], [0, 0, 1, 1], [], []>} : vector<2x128xf32>, vector<128x512xf32>, vector<2x512xf32> -> vector<2x512xf32>
    %627 = arith.addf %625, %626 : vector<2x512xf32>
    %628 = vector.extract_strided_slice %627 {offsets = [0, 0], sizes = [2, 128], strides = [1, 1]} : vector<2x512xf32> to vector<2x128xf32>
    %629 = arith.negf %628 : vector<2x128xf32>
    %630 = math.exp %629 : vector<2x128xf32>
    %cst_133 = arith.constant 1.000000e+00 : f32
    %631 = vector.broadcast %cst_133 : f32 to vector<2x128xf32>
    %632 = arith.addf %631, %630 : vector<2x128xf32>
    %633 = arith.divf %631, %632 : vector<2x128xf32>
    %634 = vector.extract_strided_slice %627 {offsets = [0, 128], sizes = [2, 128], strides = [1, 1]} : vector<2x512xf32> to vector<2x128xf32>
    %635 = arith.negf %634 : vector<2x128xf32>
    %636 = math.exp %635 : vector<2x128xf32>
    %cst_134 = arith.constant 1.000000e+00 : f32
    %637 = vector.broadcast %cst_134 : f32 to vector<2x128xf32>
    %638 = arith.addf %637, %636 : vector<2x128xf32>
    %639 = arith.divf %637, %638 : vector<2x128xf32>
    %640 = vector.extract_strided_slice %627 {offsets = [0, 256], sizes = [2, 128], strides = [1, 1]} : vector<2x512xf32> to vector<2x128xf32>
    %641 = math.tanh %640 : vector<2x128xf32>
    %642 = vector.extract_strided_slice %627 {offsets = [0, 384], sizes = [2, 128], strides = [1, 1]} : vector<2x512xf32> to vector<2x128xf32>
    %643 = arith.negf %642 : vector<2x128xf32>
    %644 = math.exp %643 : vector<2x128xf32>
    %cst_135 = arith.constant 1.000000e+00 : f32
    %645 = vector.broadcast %cst_135 : f32 to vector<2x128xf32>
    %646 = arith.addf %645, %644 : vector<2x128xf32>
    %647 = arith.divf %645, %646 : vector<2x128xf32>
    %648 = arith.mulf %639, %622 : vector<2x128xf32>
    %649 = arith.mulf %633, %641 : vector<2x128xf32>
    %650 = arith.addf %648, %649 : vector<2x128xf32>
    %651 = math.tanh %650 : vector<2x128xf32>
    %652 = arith.mulf %647, %651 : vector<2x128xf32>
    %653 = vector.extract_strided_slice %483 {offsets = [12, 0], sizes = [2, 512], strides = [1, 1]} : vector<16x512xf32> to vector<2x512xf32>
    %cst_136 = arith.constant dense<0.000000e+00> : vector<2x512xf32>
    %654 = tpu.matmul %652, %484, %cst_136 {dimension_numbers = #tpu.dot_dimension_numbers<[1], [0], [0], [1], [0, 0, 1, 1], [], []>} : vector<2x128xf32>, vector<128x512xf32>, vector<2x512xf32> -> vector<2x512xf32>
    %655 = arith.addf %653, %654 : vector<2x512xf32>
    %656 = vector.extract_strided_slice %655 {offsets = [0, 0], sizes = [2, 128], strides = [1, 1]} : vector<2x512xf32> to vector<2x128xf32>
    %657 = arith.negf %656 : vector<2x128xf32>
    %658 = math.exp %657 : vector<2x128xf32>
    %cst_137 = arith.constant 1.000000e+00 : f32
    %659 = vector.broadcast %cst_137 : f32 to vector<2x128xf32>
    %660 = arith.addf %659, %658 : vector<2x128xf32>
    %661 = arith.divf %659, %660 : vector<2x128xf32>
    %662 = vector.extract_strided_slice %655 {offsets = [0, 128], sizes = [2, 128], strides = [1, 1]} : vector<2x512xf32> to vector<2x128xf32>
    %663 = arith.negf %662 : vector<2x128xf32>
    %664 = math.exp %663 : vector<2x128xf32>
    %cst_138 = arith.constant 1.000000e+00 : f32
    %665 = vector.broadcast %cst_138 : f32 to vector<2x128xf32>
    %666 = arith.addf %665, %664 : vector<2x128xf32>
    %667 = arith.divf %665, %666 : vector<2x128xf32>
    %668 = vector.extract_strided_slice %655 {offsets = [0, 256], sizes = [2, 128], strides = [1, 1]} : vector<2x512xf32> to vector<2x128xf32>
    %669 = math.tanh %668 : vector<2x128xf32>
    %670 = vector.extract_strided_slice %655 {offsets = [0, 384], sizes = [2, 128], strides = [1, 1]} : vector<2x512xf32> to vector<2x128xf32>
    %671 = arith.negf %670 : vector<2x128xf32>
    %672 = math.exp %671 : vector<2x128xf32>
    %cst_139 = arith.constant 1.000000e+00 : f32
    %673 = vector.broadcast %cst_139 : f32 to vector<2x128xf32>
    %674 = arith.addf %673, %672 : vector<2x128xf32>
    %675 = arith.divf %673, %674 : vector<2x128xf32>
    %676 = arith.mulf %667, %650 : vector<2x128xf32>
    %677 = arith.mulf %661, %669 : vector<2x128xf32>
    %678 = arith.addf %676, %677 : vector<2x128xf32>
    %679 = math.tanh %678 : vector<2x128xf32>
    %680 = arith.mulf %675, %679 : vector<2x128xf32>
    %681 = vector.extract_strided_slice %483 {offsets = [14, 0], sizes = [2, 512], strides = [1, 1]} : vector<16x512xf32> to vector<2x512xf32>
    %cst_140 = arith.constant dense<0.000000e+00> : vector<2x512xf32>
    %682 = tpu.matmul %680, %484, %cst_140 {dimension_numbers = #tpu.dot_dimension_numbers<[1], [0], [0], [1], [0, 0, 1, 1], [], []>} : vector<2x128xf32>, vector<128x512xf32>, vector<2x512xf32> -> vector<2x512xf32>
    %683 = arith.addf %681, %682 : vector<2x512xf32>
    %684 = vector.extract_strided_slice %683 {offsets = [0, 0], sizes = [2, 128], strides = [1, 1]} : vector<2x512xf32> to vector<2x128xf32>
    %685 = arith.negf %684 : vector<2x128xf32>
    %686 = math.exp %685 : vector<2x128xf32>
    %cst_141 = arith.constant 1.000000e+00 : f32
    %687 = vector.broadcast %cst_141 : f32 to vector<2x128xf32>
    %688 = arith.addf %687, %686 : vector<2x128xf32>
    %689 = arith.divf %687, %688 : vector<2x128xf32>
    %690 = vector.extract_strided_slice %683 {offsets = [0, 128], sizes = [2, 128], strides = [1, 1]} : vector<2x512xf32> to vector<2x128xf32>
    %691 = arith.negf %690 : vector<2x128xf32>
    %692 = math.exp %691 : vector<2x128xf32>
    %cst_142 = arith.constant 1.000000e+00 : f32
    %693 = vector.broadcast %cst_142 : f32 to vector<2x128xf32>
    %694 = arith.addf %693, %692 : vector<2x128xf32>
    %695 = arith.divf %693, %694 : vector<2x128xf32>
    %696 = vector.extract_strided_slice %683 {offsets = [0, 256], sizes = [2, 128], strides = [1, 1]} : vector<2x512xf32> to vector<2x128xf32>
    %697 = math.tanh %696 : vector<2x128xf32>
    %698 = vector.extract_strided_slice %683 {offsets = [0, 384], sizes = [2, 128], strides = [1, 1]} : vector<2x512xf32> to vector<2x128xf32>
    %699 = arith.negf %698 : vector<2x128xf32>
    %700 = math.exp %699 : vector<2x128xf32>
    %cst_143 = arith.constant 1.000000e+00 : f32
    %701 = vector.broadcast %cst_143 : f32 to vector<2x128xf32>
    %702 = arith.addf %701, %700 : vector<2x128xf32>
    %703 = arith.divf %701, %702 : vector<2x128xf32>
    %704 = arith.mulf %695, %678 : vector<2x128xf32>
    %705 = arith.mulf %689, %697 : vector<2x128xf32>
    %706 = arith.addf %704, %705 : vector<2x128xf32>
    %707 = math.tanh %706 : vector<2x128xf32>
    %708 = arith.mulf %703, %707 : vector<2x128xf32>
    %709 = vector.extract_strided_slice %478 {offsets = [14, 0], sizes = [2, 256], strides = [1, 1]} : vector<16x256xf32> to vector<2x256xf32>
    %c0_144 = arith.constant 0 : index
    %c0_145 = arith.constant 0 : index
    %710 = vector.load %arg10[%c0_144, %c0_145] : memref<256x512xf32, #tpu.memory_space<vmem>>, vector<256x512xf32>
    %cst_146 = arith.constant dense<0.000000e+00> : vector<2x512xf32>
    %711 = tpu.matmul %709, %710, %cst_146 {dimension_numbers = #tpu.dot_dimension_numbers<[1], [0], [0], [1], [0, 0, 1, 1], [], []>} : vector<2x256xf32>, vector<256x512xf32>, vector<2x512xf32> -> vector<2x512xf32>
    %c0_147 = arith.constant 0 : index
    %c0_148 = arith.constant 0 : index
    %712 = vector.load %arg11[%c0_147, %c0_148] : memref<1x512xf32, #tpu.memory_space<vmem>>, vector<1x512xf32>
    %713 = vector.broadcast %712 : vector<1x512xf32> to vector<2x512xf32>
    %714 = arith.addf %711, %713 : vector<2x512xf32>
    %715 = vector.extract_strided_slice %714 {offsets = [0, 0], sizes = [2, 128], strides = [1, 1]} : vector<2x512xf32> to vector<2x128xf32>
    %716 = arith.negf %715 : vector<2x128xf32>
    %717 = math.exp %716 : vector<2x128xf32>
    %cst_149 = arith.constant 1.000000e+00 : f32
    %718 = vector.broadcast %cst_149 : f32 to vector<2x128xf32>
    %719 = arith.addf %718, %717 : vector<2x128xf32>
    %720 = arith.divf %718, %719 : vector<2x128xf32>
    %721 = vector.extract_strided_slice %714 {offsets = [0, 128], sizes = [2, 128], strides = [1, 1]} : vector<2x512xf32> to vector<2x128xf32>
    %722 = arith.negf %721 : vector<2x128xf32>
    %723 = math.exp %722 : vector<2x128xf32>
    %cst_150 = arith.constant 1.000000e+00 : f32
    %724 = vector.broadcast %cst_150 : f32 to vector<2x128xf32>
    %725 = arith.addf %724, %723 : vector<2x128xf32>
    %726 = arith.divf %724, %725 : vector<2x128xf32>
    %727 = vector.extract_strided_slice %714 {offsets = [0, 256], sizes = [2, 128], strides = [1, 1]} : vector<2x512xf32> to vector<2x128xf32>
    %728 = math.tanh %727 : vector<2x128xf32>
    %729 = vector.extract_strided_slice %714 {offsets = [0, 384], sizes = [2, 128], strides = [1, 1]} : vector<2x512xf32> to vector<2x128xf32>
    %730 = arith.negf %729 : vector<2x128xf32>
    %731 = math.exp %730 : vector<2x128xf32>
    %cst_151 = arith.constant 1.000000e+00 : f32
    %732 = vector.broadcast %cst_151 : f32 to vector<2x128xf32>
    %733 = arith.addf %732, %731 : vector<2x128xf32>
    %734 = arith.divf %732, %733 : vector<2x128xf32>
    %735 = arith.mulf %726, %1 : vector<2x128xf32>
    %736 = arith.mulf %720, %728 : vector<2x128xf32>
    %737 = arith.addf %735, %736 : vector<2x128xf32>
    %738 = math.tanh %737 : vector<2x128xf32>
    %739 = arith.mulf %734, %738 : vector<2x128xf32>
    %c0_152 = arith.constant 0 : index
    %c0_153 = arith.constant 0 : index
    %740 = vector.load %arg12[%c0_152, %c0_153] : memref<128x4xf32, #tpu.memory_space<vmem>>, vector<128x4xf32>
    %cst_154 = arith.constant dense<0.000000e+00> : vector<2x4xf32>
    %741 = tpu.matmul %708, %740, %cst_154 {dimension_numbers = #tpu.dot_dimension_numbers<[1], [0], [0], [1], [0, 0, 1, 1], [], []>} : vector<2x128xf32>, vector<128x4xf32>, vector<2x4xf32> -> vector<2x4xf32>
    %c0_155 = arith.constant 0 : index
    %c0_156 = arith.constant 0 : index
    %742 = vector.load %arg13[%c0_155, %c0_156] : memref<128x4xf32, #tpu.memory_space<vmem>>, vector<128x4xf32>
    %cst_157 = arith.constant dense<0.000000e+00> : vector<2x4xf32>
    %743 = tpu.matmul %739, %742, %cst_157 {dimension_numbers = #tpu.dot_dimension_numbers<[1], [0], [0], [1], [0, 0, 1, 1], [], []>} : vector<2x128xf32>, vector<128x4xf32>, vector<2x4xf32> -> vector<2x4xf32>
    %744 = arith.addf %741, %743 : vector<2x4xf32>
    %c0_158 = arith.constant 0 : index
    %c0_159 = arith.constant 0 : index
    %745 = vector.load %arg14[%c0_158, %c0_159] : memref<1x4xf32, #tpu.memory_space<vmem>>, vector<1x4xf32>
    %746 = vector.broadcast %745 : vector<1x4xf32> to vector<2x4xf32>
    %747 = arith.addf %744, %746 : vector<2x4xf32>
    %c0_160 = arith.constant 0 : index
    %c0_161 = arith.constant 0 : index
    %748 = vector.load %arg15[%c0_160, %c0_161] : memref<2x4xf32, #tpu.memory_space<vmem>>, vector<2x4xf32>
    tpu.vector_store %arg15[%c0_160, %c0_161], %747 {strides = array<i32>} : memref<2x4xf32, #tpu.memory_space<vmem>>, vector<2x4xf32>,
    return
  }
}

</mosaic_0001>

<bundles_post_ra>
// kernel: dqn_forward.1
= control target key start
LH: loop header
LB: loop body
LE: loop exit
PB: predicated region body
PF: predicated region fallthrough
CT: control target
= control target key end

     0   :  { %20 = vsyncpa [#allocation4], 0  ;;  %s10416_s0 = inlined_call_operand.vmem [shape: f32[16,88], index: 0, kind: input, shape index: {}]   ;;  %s10417_s1 = inlined_call_operand.hbm [shape: f32[88,512], index: 1, kind: input, shape index: {}]   ;;  %s10418_s2 = inlined_call_operand.hbm [shape: f32[128,512], index: 2, kind: input, shape index: {}]   ;;  %s10419_s3 = inlined_call_operand.vmem [shape: f32[1,512], index: 3, kind: input, shape index: {}]   ;;  %s10420_s4 = inlined_call_operand.hbm [shape: f32[88,512], index: 4, kind: input, shape index: {}]   ;;  %s10421_s5 = inlined_call_operand.hbm [shape: f32[128,512], index: 5, kind: input, shape index: {}]   ;;  %s10422_s6 = inlined_call_operand.vmem [shape: f32[1,512], index: 6, kind: input, shape index: {}]   ;;  %s10423_s7 = inlined_call_operand.hbm [shape: f32[256,512], index: 7, kind: input, shape index: {}]   ;;  %s10424_s8 = inlined_call_operand.hbm [shape: f32[128,512], index: 8, kind: input, shape index: {}]   ;;  %s10425_s9 = inlined_call_operand.vmem [shape: f32[1,512], index: 9, kind: input, shape index: {}]   ;;  %s10426_s10 = inlined_call_operand.hbm [shape: f32[256,512], index: 10, kind: input, shape index: {}]   ;;  %s10427_s11 = inlined_call_operand.vmem [shape: f32[1,512], index: 11, kind: input, shape index: {}]   ;;  %s10428_s12 = inlined_call_operand.vmem [shape: f32[128,4], index: 12, kind: input, shape index: {}]   ;;  %s10429_s13 = inlined_call_operand.vmem [shape: f32[128,4], index: 13, kind: input, shape index: {}]   ;;  %s10430_s14 = inlined_call_operand.vmem [shape: f32[1,4], index: 14, kind: input, shape index: {}]   ;;  %s10431_s15 = inlined_call_operand.hbm [shape: f32[2,4], index: 15, kind: output, shape index: {}]  }
   0x1   :  { %21 = vsyncpa [#allocation7], 0 }
   0x2   :  { %22 = vsyncpa [#allocation10], 0 }
   0x3   :  { %23 = vsyncpa [#allocation13], 0 }
   0x4   :  { %24 = vsyncpa [#allocation5], 0  ;;  %s8752_s18 = smov [#allocation6]   ;;  %s8753_s20 = smov [#allocation9]  }
   0x5   :  { %s44_s19 = sshll.u32 %s8752_s18, 4  ;;  %s70_s21 = sshll.u32 %s8753_s20, 4  ;;  %s45_s19 = int_to_ptr.vmem [resolvable:$true] %s44_s19  ;;  %s8845_s21 = int_to_ptr.vmem [resolvable:$true] %s70_s21 }
   0x6   :  { %s8566_s24 = scalar_lea.hbm %s10418_s2, 8192 }
   0x7   :  { %p8567_p0 = scmp.ne.s32.totalorder %s10418_s2, %s8566_s24  ;;  %p8570_p1 = scmp.lt.u32.totalorder %s8566_s24, %s10418_s2 }
   0x9   :  { %p8572_p2 = pnand %p8570_p1, %p8567_p0 }
   0xb   :  { %8575 = shalt.err (!%p8572_p2)
}
   0xc   :  { %s8576_s29 = scalar_lea.vmem %s45_s19, 8192  ;;  %p8581_p4 = scmp.lt.s32.totalorder %s45_s19, %s45_s19 }
   0xd   :  { %p8577_p3 = scmp.ne.s32.totalorder %s45_s19, %s8576_s29  ;;  %p8582_p5 = scmp.lt.s32.totalorder %s8576_s29, %s8576_s29 }
   0xf   :  { %p8583_p6 = por %p8582_p5, %p8581_p4 }
  0x11   :  { %p8584_p7 = pnand %p8583_p6, %p8577_p3 }
  0x13   :  { %8587 = shalt.err (!%p8584_p7)
}
  0x14   :  { %s8754_s30 = smov 512   ;;  %s8755_s16 = smov 32  }
  0x15   :  { %50 = dma.hbm_to_vmem [thread:$0]  %s10418_s2, 8192, %s45_s19, [#allocation7], %s8754_s30, %s8754_s30, %s8755_s16  }
  0x16   :  { %s8588_s23 = scalar_lea.hbm %s10421_s5, 8192 }
  0x17   :  { %p8589_p8 = scmp.ne.s32.totalorder %s10421_s5, %s8588_s23  ;;  %p8592_p9 = scmp.lt.u32.totalorder %s8588_s23, %s10421_s5 }
  0x19   :  { %p8594_p10 = pnand %p8592_p9, %p8589_p8 }
  0x1b   :  { %8597 = shalt.err (!%p8594_p10)
}
  0x1c   :  { %s8598_s28 = scalar_lea.vmem %s8845_s21, 8192  ;;  %p8603_p12 = scmp.lt.s32.totalorder %s8845_s21, %s8845_s21 }
  0x1d   :  { %p8599_p11 = scmp.ne.s32.totalorder %s8845_s21, %s8598_s28  ;;  %p8604_p13 = scmp.lt.s32.totalorder %s8598_s28, %s8598_s28 }
  0x1f   :  { %p8605_p0 = por %p8604_p13, %p8603_p12 }
  0x21   :  { %p8606_p1 = pnand %p8605_p0, %p8599_p11 }
  0x23   :  { %8609 = shalt.err (!%p8606_p1)
}
  0x24   :  { %76 = dma.hbm_to_vmem [thread:$0]  %s10421_s5, 8192, %s8845_s21, [#allocation10], %s8754_s30, %s8754_s30, %s8755_s16  }
  0x25   :  { %s8756_s29 = smov [#allocation12]   ;;  %s8757_s18 = smov [#allocation3]  }
  0x26   :  { %s96_s17 = sshll.u32 %s8756_s29, 4  ;;  %s32_s20 = sshll.u32 %s8757_s18, 4  ;;  %s97_s17 = int_to_ptr.vmem [resolvable:$true] %s96_s17  ;;  %s8882_s20 = int_to_ptr.vmem [resolvable:$true] %s32_s20 }
  0x27   :  { %s8610_s24 = scalar_lea.hbm %s10424_s8, 8192 }
  0x28   :  { %p8611_p2 = scmp.ne.s32.totalorder %s10424_s8, %s8610_s24  ;;  %p8614_p3 = scmp.lt.u32.totalorder %s8610_s24, %s10424_s8 }
  0x2a   :  { %p8616_p4 = pnand %p8614_p3, %p8611_p2 }
  0x2c   :  { %8619 = shalt.err (!%p8616_p4)
}
  0x2d   :  { %s8620_s5 = scalar_lea.vmem %s97_s17, 8192  ;;  %p8625_p6 = scmp.lt.s32.totalorder %s97_s17, %s97_s17 }
  0x2e   :  { %p8621_p5 = scmp.ne.s32.totalorder %s97_s17, %s8620_s5  ;;  %p8626_p7 = scmp.lt.s32.totalorder %s8620_s5, %s8620_s5 }
  0x30   :  { %p8627_p8 = por %p8626_p7, %p8625_p6 }
  0x32   :  { %p8628_p9 = pnand %p8627_p8, %p8621_p5 }
  0x34   :  { %8631 = shalt.err (!%p8628_p9)
}
  0x35   :  { %102 = dma.hbm_to_vmem [thread:$0]  %s10424_s8, 8192, %s97_s17, [#allocation13], %s8754_s30, %s8754_s30, %s8755_s16  }
  0x36   :  { %s8632_s18 = scalar_lea.hbm %s10417_s1, 5632 }
  0x37   :  { %p8633_p10 = scmp.ne.s32.totalorder %s10417_s1, %s8632_s18  ;;  %p8636_p11 = scmp.lt.u32.totalorder %s8632_s18, %s10417_s1 }
  0x39   :  { %p8638_p12 = pnand %p8636_p11, %p8633_p10 }
  0x3b   :  { %8641 = shalt.err (!%p8638_p12)
}
  0x3c   :  { %s8642_s26 = scalar_lea.vmem %s8882_s20, 5632  ;;  %p8647_p0 = scmp.lt.s32.totalorder %s8882_s20, %s8882_s20 }
  0x3d   :  { %p8643_p13 = scmp.ne.s32.totalorder %s8882_s20, %s8642_s26  ;;  %p8648_p1 = scmp.lt.s32.totalorder %s8642_s26, %s8642_s26 }
  0x3f   :  { %p8649_p2 = por %p8648_p1, %p8647_p0 }
  0x41   :  { %p8650_p3 = pnand %p8649_p2, %p8643_p13 }
  0x43   :  { %8653 = shalt.err (!%p8650_p3)
}
  0x44   :  { %38 = dma.hbm_to_vmem [thread:$0]  %s10417_s1, 5632, %s8882_s20, [#allocation4], %s8754_s30, %s8754_s30, %s8755_s16  }
  0x45   :  { %s8758_s27 = smov [#allocation8]   ;;  %s8759_s5 = smov [#allocation11]  }
  0x46   :  { %s58_s28 = sshll.u32 %s8758_s27, 4  ;;  %s84_s21 = sshll.u32 %s8759_s5, 4  ;;  %s59_s28 = int_to_ptr.vmem [resolvable:$true] %s58_s28  ;;  %s8919_s21 = int_to_ptr.vmem [resolvable:$true] %s84_s21 }
  0x47   :  { %s8654_s29 = scalar_lea.hbm %s10420_s4, 5632 }
  0x48   :  { %p8655_p4 = scmp.ne.s32.totalorder %s10420_s4, %s8654_s29  ;;  %p8658_p5 = scmp.lt.u32.totalorder %s8654_s29, %s10420_s4 }
  0x4a   :  { %p8660_p6 = pnand %p8658_p5, %p8655_p4 }
  0x4c   :  { %8663 = shalt.err (!%p8660_p6)
}
  0x4d   :  { %s8664_s1 = scalar_lea.vmem %s59_s28, 5632  ;;  %p8669_p8 = scmp.lt.s32.totalorder %s59_s28, %s59_s28 }
  0x4e   :  { %p8665_p7 = scmp.ne.s32.totalorder %s59_s28, %s8664_s1  ;;  %p8670_p9 = scmp.lt.s32.totalorder %s8664_s1, %s8664_s1 }
  0x50   :  { %p8671_p10 = por %p8670_p9, %p8669_p8 }
  0x52   :  { %p8672_p11 = pnand %p8671_p10, %p8665_p7 }
  0x54   :  { %8675 = shalt.err (!%p8672_p11)
}
  0x55   :  { %64 = dma.hbm_to_vmem [thread:$0]  %s10420_s4, 5632, %s59_s28, [#allocation7], %s8754_s30, %s8754_s30, %s8755_s16  }
  0x56   :  { %s8676_s17 = scalar_lea.hbm %s10423_s7, 16384 }
  0x57   :  { %p8677_p12 = scmp.ne.s32.totalorder %s10423_s7, %s8676_s17  ;;  %p8680_p13 = scmp.lt.u32.totalorder %s8676_s17, %s10423_s7 }
  0x59   :  { %p8682_p0 = pnand %p8680_p13, %p8677_p12 }
  0x5b   :  { %8685 = shalt.err (!%p8682_p0)
}
  0x5c   :  { %s8686_s29 = scalar_lea.vmem %s8919_s21, 16384  ;;  %p8691_p2 = scmp.lt.s32.totalorder %s8919_s21, %s8919_s21 }
  0x5d   :  { %p8687_p1 = scmp.ne.s32.totalorder %s8919_s21, %s8686_s29  ;;  %p8692_p3 = scmp.lt.s32.totalorder %s8686_s29, %s8686_s29 }
  0x5f   :  { %p8693_p4 = por %p8692_p3, %p8691_p2 }
  0x61   :  { %p8694_p5 = pnand %p8693_p4, %p8687_p1 }
  0x63   :  { %8697 = shalt.err (!%p8694_p5)
}
  0x64   :  { %90 = dma.hbm_to_vmem [thread:$0]  %s10423_s7, 16384, %s8919_s21, [#allocation10], %s8754_s30, %s8754_s30, %s8755_s16  }
  0x65   :  { %s8760_s18 = smov [#allocation14]   ;;  %s8698_s1 = scalar_lea.hbm %s10426_s10, 16384 }
  0x66   :  { %s110_s22 = sshll.u32 %s8760_s18, 4  ;;  %p8699_p6 = scmp.ne.s32.totalorder %s10426_s10, %s8698_s1  ;;  %s111_s22 = int_to_ptr.vmem [resolvable:$true] %s110_s22 }
  0x67   :  { %p8702_p7 = scmp.lt.u32.totalorder %s8698_s1, %s10426_s10 }
  0x69   :  { %p8704_p8 = pnand %p8702_p7, %p8699_p6 }
  0x6b   :  { %8707 = shalt.err (!%p8704_p8)
}
  0x6c   :  { %s8708_s17 = scalar_lea.vmem %s111_s22, 16384  ;;  %p8713_p10 = scmp.lt.s32.totalorder %s111_s22, %s111_s22 }
  0x6d   :  { %p8709_p9 = scmp.ne.s32.totalorder %s111_s22, %s8708_s17  ;;  %p8714_p11 = scmp.lt.s32.totalorder %s8708_s17, %s8708_s17 }
  0x6f   :  { %p8715_p12 = por %p8714_p11, %p8713_p10 }
  0x71   :  { %p8716_p13 = pnand %p8715_p12, %p8709_p9 }
  0x73   :  { %8719 = shalt.err (!%p8716_p13)
}
  0x74   :  { %116 = dma.hbm_to_vmem [thread:$0]  %s10426_s10, 16384, %s111_s22, [#allocation13], %s8754_s30, %s8754_s30, %s8755_s16  }
  0x75   :  { %8742 = dma.done.wait [#allocation4], 5632  }
  0x76   :  { %8743 = vsyncadd [#allocation4], 4294961664 }
  0x77   :  { %8744 = dma.done.wait [#allocation7], 13824  }
  0x78   :  { %8745 = vsyncadd [#allocation7], 4294953472 }
  0x79   :  { %8746 = dma.done.wait [#allocation10], 24576  }
  0x7a   :  { %8747 = vsyncadd [#allocation10], 4294942720 }
  0x7b   :  { %8748 = dma.done.wait [#allocation13], 24576  }
  0x7c   :  { %8749 = vsyncadd [#allocation13], 4294942720  ;;  %v10432_v0 = vmov 0.0   ;;  %v149_v1 = vld [vmem:[#allocation3 + $0x8] sm:$0xff]  ;;  %v151_v3 = vld [vmem:[#allocation3 + $0x18] sm:$0xff]  ;;  %vm214_vm0 = vcmask 719872  }
  0x7d   :  { %285 = vmatprep.mubr.f32.mxu0 %v10432_v0  ;;  %362 = vmatprep.mubr.f32.mxu1 %v10432_v0  ;;  %v153_v2 = vld [vmem:[#allocation3 + $0x28] sm:$0xff]  ;;  %v155_v5 = vld [vmem:[#allocation3 + $0x38] sm:$0xff]  ;;  %v148_v6 = vld [vmem:[#allocation3] sm:$0xff]  ;;  %vm8763_vm1 = vmmov 0   ;;  %s8764_s8 = smov [#allocation15]   ;;  %vm6023_vm2 = vcmask 25600  }
  0x7e   :  { %v6231_v4 = vpack.c.bf16 %v153_v2, %v149_v1  ;;  %v152_v7 = vld [vmem:[#allocation3 + $0x20] sm:$0xff]  ;;  %v6251_v8 = vpack.c.bf16 %v155_v5, %v151_v3  ;;  %v150_v10 = vld [vmem:[#allocation3 + $0x10] sm:$0xff]  ;;  %v157_v12 = vld [vmem:[#allocation3 + $0x48] sm:$0xff]  ;;  %s6031_s17 = sshll.u32 %s8764_s8, 4  ;;  %s6032_s17 = int_to_ptr.vmem [resolvable:$true] %s6031_s17 }
  0x7f   :  { %v6233_v9 = vpack.c.bf16 %v152_v7, %v148_v6  ;;  %v154_v11 = vld [vmem:[#allocation3 + $0x30] sm:$0xff]  ;;  %v161_v14 = vld [vmem:[#allocation3 + $0x68] sm:$0xff]  ;;  %v159_v15 = vld [vmem:[#allocation3 + $0x58] sm:$0xff]  ;;  %s8720_s7 = scalar_lea.vmem %s6032_s17, 32  ;;  %p8725_p1 = scmp.lt.s32.totalorder %s6032_s17, %s6032_s17 }
  0x80   :  { %6232 = vmatprep.subr.bf16.mxu0 %v6231_v4  ;;  %v6253_v13 = vpack.c.bf16 %v154_v11, %v150_v10  ;;  %v163_v16 = vld [vmem:[#allocation3 + $0x78] sm:$0xff]  ;;  %6252 = vmatprep.subr.bf16.mxu1 %v6251_v8  ;;  %v6235_v17 = vpack.c.bf16 %v161_v14, %v157_v12  ;;  %v156_v19 = vld [vmem:[#allocation3 + $0x40] sm:$0xff]  ;;  %v158_v21 = vld [vmem:[#allocation3 + $0x50] sm:$0xff]  ;;  %p8721_p0 = scmp.ne.s32.totalorder %s6032_s17, %s8720_s7  ;;  %p8726_p2 = scmp.lt.s32.totalorder %s8720_s7, %s8720_s7 }
  0x81   :  { %6234 = vmatpush1.bf16.msra.mxu0 %v6233_v9  ;;  %v6255_v18 = vpack.c.bf16 %v163_v16, %v159_v15  ;;  %v160_v20 = vld [vmem:[#allocation3 + $0x60] sm:$0xff]  ;;  %v162_v23 = vld [vmem:[#allocation3 + $0x70] sm:$0xff]  ;;  %v165_v24 = vld [vmem:[#allocation3 + $0x88] sm:$0xff] }
  0x82   :  { %6254 = vmatpush1.bf16.msra.mxu1 %v6253_v13  ;;  %v6237_v22 = vpack.c.bf16 %v160_v20, %v156_v19  ;;  %v169_v25 = vld [vmem:[#allocation3 + $0xa8] sm:$0xff]  ;;  %6236 = vmatprep.subr.bf16.mxu0 %v6235_v17  ;;  %v6257_v26 = vpack.c.bf16 %v162_v23, %v158_v21  ;;  %v167_v28 = vld [vmem:[#allocation3 + $0x98] sm:$0xff]  ;;  %v164_v30 = vld [vmem:[#allocation3 + $0x80] sm:$0xff]  ;;  %p8727_p3 = por %p8726_p2, %p8725_p1 }
  0x83   :  { %6256 = vmatprep.subr.bf16.mxu1 %v6255_v18  ;;  %v6239_v27 = vpack.c.bf16 %v169_v25, %v165_v24  ;;  %v171_v29 = vld [vmem:[#allocation3 + $0xb8] sm:$0xff]  ;;  %v168_v32 = vld [vmem:[#allocation3 + $0xa0] sm:$0xff]  ;;  %v166_v33 = vld [vmem:[#allocation3 + $0x90] sm:$0xff] }
  0x84   :  { %v6259_v31 = vpack.c.bf16 %v171_v29, %v167_v28  ;;  %v170_v34 = vld [vmem:[#allocation3 + $0xb0] sm:$0xff]  ;;  %v6241_v35 = vpack.c.bf16 %v168_v32, %v164_v30  ;;  %v173_v36 = vld [vmem:[#allocation3 + $0xc8] sm:$0xff]  ;;  %v175_v38 = vld [vmem:[#allocation3 + $0xd8] sm:$0xff]  ;;  %p8728_p4 = pnand %p8727_p3, %p8721_p0 }
  0x85   :  { %6238 = vmatpush1.bf16.msra.mxu0 %v6237_v22  ;;  %v177_v37 = vld [vmem:[#allocation3 + $0xe8] sm:$0xff]  ;;  %v6261_v39 = vpack.c.bf16 %v170_v34, %v166_v33  ;;  %v179_v41 = vld [vmem:[#allocation3 + $0xf8] sm:$0xff]  ;;  %v172_v42 = vld [vmem:[#allocation3 + $0xc0] sm:$0xff] }
  0x86   :  { %6258 = vmatpush1.bf16.msra.mxu1 %v6257_v26  ;;  %6240 = vmatprep.subr.bf16.mxu0 %v6239_v27  ;;  %v6243_v40 = vpack.c.bf16 %v177_v37, %v173_v36  ;;  %v176_v43 = vld [vmem:[#allocation3 + $0xe0] sm:$0xff]  ;;  %v6263_v44 = vpack.c.bf16 %v179_v41, %v175_v38  ;;  %v174_v45 = vld [vmem:[#allocation3 + $0xd0] sm:$0xff]  ;;  %v181_v47 = vld [vmem:[#allocation3 + $0x108] sm:$0xff] }
  0x87   :  { %6260 = vmatprep.subr.bf16.mxu1 %v6259_v31  ;;  %v178_v46 = vld [vmem:[#allocation3 + $0xf0] sm:$0xff]  ;;  %v185_v48 = vld [vmem:[#allocation3 + $0x128] sm:$0xff]  ;;  %v183_v49 = vld [vmem:[#allocation3 + $0x118] sm:$0xff]  ;;  %v6245_v51 = vpack.c.bf16 %v176_v43, %v172_v42 }
  0x88   :  { %v187_v50 = vld [vmem:[#allocation3 + $0x138] sm:$0xff]  ;;  %v6265_v52 = vpack.c.bf16 %v178_v46, %v174_v45  ;;  %v6247_v53 = vpack.c.bf16 %v185_v48, %v181_v47  ;;  %v180_v54 = vld [vmem:[#allocation3 + $0x100] sm:$0xff]  ;;  %v182_v57 = vld [vmem:[#allocation3 + $0x110] sm:$0xff] }
  0x89   :  { %6242 = vmatpush1.bf16.msra.mxu0 %v6241_v35  ;;  %v184_v55 = vld [vmem:[#allocation3 + $0x120] sm:$0xff]  ;;  %v6267_v56 = vpack.c.bf16 %v187_v50, %v183_v49  ;;  %v186_v58 = vld [vmem:[#allocation3 + $0x130] sm:$0xff]  ;;  %v189_v61 = vld [vmem:[#allocation3 + $0x148] sm:$0xff] }
  0x8a   :  { %6262 = vmatpush1.bf16.msra.mxu1 %v6261_v39  ;;  %6244 = vmatprep.subr.bf16.mxu0 %v6243_v40  ;;  %v6249_v59 = vpack.c.bf16 %v184_v55, %v180_v54  ;;  %v6269_v60 = vpack.c.bf16 %v186_v58, %v182_v57  ;;  %v191_v62 = vld [vmem:[#allocation3 + $0x158] sm:$0xff]  ;;  %v376_v63 = vld [vmem:[#allocation8 + $0x8] sm:$0xff]  ;;  %v188_v1 = vld [vmem:[#allocation3 + $0x140] sm:$0xff] }
  0x8b   :  { %6264 = vmatprep.subr.bf16.mxu1 %v6263_v44  ;;  %v380_v2 = vld [vmem:[#allocation8 + $0x28] sm:$0xff]  ;;  %v378_v3 = vld [vmem:[#allocation8 + $0x18] sm:$0xff]  ;;  %v190_v5 = vld [vmem:[#allocation3 + $0x150] sm:$0xff] }
  0x8c   :  { %v382_v4 = vld [vmem:[#allocation8 + $0x38] sm:$0xff]  ;;  %v375_v6 = vld [vmem:[#allocation8] sm:$0xff]  ;;  %v377_v8 = vld [vmem:[#allocation8 + $0x10] sm:$0xff]  ;;  %v6271_v13 = vpack.c.bf16 %v380_v2, %v376_v63 }
  0x8d   :  { %6246 = vmatpush1.bf16.msra.mxu0 %v6245_v51  ;;  %v379_v7 = vld [vmem:[#allocation8 + $0x20] sm:$0xff]  ;;  %v381_v9 = vld [vmem:[#allocation8 + $0x30] sm:$0xff]  ;;  %v384_v10 = vld [vmem:[#allocation8 + $0x48] sm:$0xff]  ;;  %v6291_v14 = vpack.c.bf16 %v382_v4, %v378_v3 }
  0x8e   :  { %6266 = vmatpush1.bf16.msra.mxu1 %v6265_v52  ;;  %6248 = vmatprep.subr.bf16.mxu0 %v6247_v53  ;;  %v388_v11 = vld [vmem:[#allocation8 + $0x68] sm:$0xff]  ;;  %v8976_v12 = vld [vmem:[%s10416_s0] sm:$0xff]  ;;  %v386_v15 = vld [vmem:[#allocation8 + $0x58] sm:$0xff]  ;;  %v6273_v17 = vpack.c.bf16 %v379_v7, %v375_v6  ;;  %v6293_v18 = vpack.c.bf16 %v381_v9, %v377_v8 }
  0x8f   :  { %6268 = vmatprep.subr.bf16.mxu1 %v6267_v56  ;;  %v390_v16 = vld [vmem:[#allocation8 + $0x78] sm:$0xff]  ;;  %v6275_v19 = vpack.c.bf16 %v388_v11, %v384_v10  ;;  %v383_v20 = vld [vmem:[#allocation8 + $0x40] sm:$0xff]  ;;  %v385_v22 = vld [vmem:[#allocation8 + $0x50] sm:$0xff] }
  0x90   :  { %v387_v21 = vld [vmem:[#allocation8 + $0x60] sm:$0xff]  ;;  %v6295_v23 = vpack.c.bf16 %v390_v16, %v386_v15  ;;  %v389_v24 = vld [vmem:[#allocation8 + $0x70] sm:$0xff]  ;;  %v392_v25 = vld [vmem:[#allocation8 + $0x88] sm:$0xff] }
  0x91   :  { %6250 = vmatpush1.bf16.msra.mxu0 %v6249_v59  ;;  %v396_v26 = vld [vmem:[#allocation8 + $0xa8] sm:$0xff]  ;;  %v394_v27 = vld [vmem:[#allocation8 + $0x98] sm:$0xff]  ;;  %v6277_v29 = vpack.c.bf16 %v387_v21, %v383_v20  ;;  %v391_v30 = vld [vmem:[#allocation8 + $0x80] sm:$0xff]  ;;  %v6297_v31 = vpack.c.bf16 %v389_v24, %v385_v22 }
  0x92   :  { %6270 = vmatpush1.bf16.msra.mxu1 %v6269_v60  ;;  %241 = vmatprep.subr.mxu0 %v189_v61  ;;  %v398_v28 = vld [vmem:[#allocation8 + $0xb8] sm:$0xff]  ;;  %v6279_v32 = vpack.c.bf16 %v396_v26, %v392_v25  ;;  %v395_v33 = vld [vmem:[#allocation8 + $0xa0] sm:$0xff]  ;;  %v393_v34 = vld [vmem:[#allocation8 + $0x90] sm:$0xff] }
  0x93   :  { %318 = vmatprep.subr.mxu1 %v191_v62  ;;  %v8985_v35 = vld [vmem:[%s10416_s0 + $0x8] sm:$0xff]  ;;  %v6299_v36 = vpack.c.bf16 %v398_v28, %v394_v27  ;;  %v397_v37 = vld [vmem:[#allocation8 + $0xb0] sm:$0xff]  ;;  %v402_v40 = vld [vmem:[#allocation8 + $0xd8] sm:$0xff]  ;;  %v6281_v42 = vpack.c.bf16 %v395_v33, %v391_v30 }
  0x94   :  { %v400_v38 = vld [vmem:[#allocation8 + $0xc8] sm:$0xff]  ;;  %v406_v41 = vld [vmem:[#allocation8 + $0xf8] sm:$0xff]  ;;  %v6301_v43 = vpack.c.bf16 %v397_v37, %v393_v34  ;;  %v399_v45 = vld [vmem:[#allocation8 + $0xc0] sm:$0xff] }
  0x95   :  { %242 = vmatpush1.msra.mxu0 %v188_v1  ;;  %v404_v39 = vld [vmem:[#allocation8 + $0xe8] sm:$0xff]  ;;  %v403_v46 = vld [vmem:[#allocation8 + $0xe0] sm:$0xff]  ;;  %v401_v47 = vld [vmem:[#allocation8 + $0xd0] sm:$0xff]  ;;  %v6303_v48 = vpack.c.bf16 %v406_v41, %v402_v40 }
  0x96   :  { %319 = vmatpush1.msra.mxu1 %v190_v5  ;;  %6043 = vmatmul.mubr.msk.f32.vlgmr.msra.gmra.mrb[0].mxu0 %vm214_vm0, %v8976_v12  ;;  %v6283_v44 = vpack.c.bf16 %v404_v39, %v400_v38  ;;  %v405_v49 = vld [vmem:[#allocation8 + $0xf0] sm:$0xff]  ;;  %v408_v50 = vld [vmem:[#allocation8 + $0x108] sm:$0xff]  ;;  %v410_v52 = vld [vmem:[#allocation8 + $0x118] sm:$0xff]  ;;  %v6285_v54 = vpack.c.bf16 %v403_v46, %v399_v45 }
  0x97   :  { %6272 = vmatprep.subr.bf16.mxu0 %v6271_v13  ;;  %6292 = vmatprep.subr.bf16.mxu1 %v6291_v14  ;;  %v412_v51 = vld [vmem:[#allocation8 + $0x128] sm:$0xff]  ;;  %v414_v53 = vld [vmem:[#allocation8 + $0x138] sm:$0xff]  ;;  %v6305_v55 = vpack.c.bf16 %v405_v49, %v401_v47  ;;  %v407_v57 = vld [vmem:[#allocation8 + $0x100] sm:$0xff] }
  0x98   :  { %6045 = vmatmul.mubr.msk.f32.vlgmr.msra.gmra.mrb[0].mxu1 %vm214_vm0, %v8976_v12  ;;  %6274 = vmatpush1.bf16.msra.mxu0 %v6273_v17  ;;  %v6287_v56 = vpack.c.bf16 %v412_v51, %v408_v50  ;;  %v411_v58 = vld [vmem:[#allocation8 + $0x120] sm:$0xff]  ;;  %v6307_v59 = vpack.c.bf16 %v414_v53, %v410_v52  ;;  %v409_v60 = vld [vmem:[#allocation8 + $0x110] sm:$0xff]  ;;  %v416_v1 = vld [vmem:[#allocation8 + $0x148] sm:$0xff] }
  0x99   :  { %6294 = vmatpush1.bf16.msra.mxu1 %v6293_v18  ;;  %6276 = vmatprep.subr.bf16.mxu0 %v6275_v19  ;;  %v413_v61 = vld [vmem:[#allocation8 + $0x130] sm:$0xff]  ;;  %v6289_v62 = vpack.c.bf16 %v411_v58, %v407_v57  ;;  %v418_v2 = vld [vmem:[#allocation8 + $0x158] sm:$0xff]  ;;  %v596_v3 = vld [vmem:[#allocation6 + $0x8] sm:$0xff] }
  0x9a   :  { %6296 = vmatprep.subr.bf16.mxu1 %v6295_v23  ;;  %291 = vmatprep.mubr.f32.mxu0 %v10432_v0  ;;  %v6309_v63 = vpack.c.bf16 %v413_v61, %v409_v60  ;;  %v415_v4 = vld [vmem:[#allocation8 + $0x140] sm:$0xff]  ;;  %v600_v5 = vld [vmem:[#allocation6 + $0x28] sm:$0xff]  ;;  %v598_v6 = vld [vmem:[#allocation6 + $0x18] sm:$0xff] }
  0x9b   :  { %6044 = vmatmul.mubr.msk.f32.gmra.mrb[2].mxu0 %vm214_vm0, %v8985_v35  ;;  %368 = vmatprep.mubr.f32.mxu1 %v10432_v0  ;;  %v602_v7 = vld [vmem:[#allocation6 + $0x38] sm:$0xff]  ;;  %v595_v8 = vld [vmem:[#allocation6] sm:$0xff]  ;;  %v597_v10 = vld [vmem:[#allocation6 + $0x10] sm:$0xff]  ;;  %v8995_v16 = vpack.c.bf16 %v600_v5, %v596_v3 }
  0x9c   :  { %6278 = vmatpush1.bf16.msra.mxu0 %v6277_v29  ;;  %6046 = vmatmul.mubr.msk.f32.gmra.mrb[2].mxu1 %vm214_vm0, %v8985_v35  ;;  %v599_v9 = vld [vmem:[#allocation6 + $0x20] sm:$0xff]  ;;  %v601_v11 = vld [vmem:[#allocation6 + $0x30] sm:$0xff]  ;;  %v604_v13 = vld [vmem:[#allocation6 + $0x48] sm:$0xff]  ;;  %v8997_v17 = vpack.c.bf16 %v602_v7, %v598_v6 }
  0x9d   :  { %6298 = vmatpush1.bf16.msra.mxu1 %v6297_v31  ;;  %6280 = vmatprep.subr.bf16.mxu0 %v6279_v32  ;;  %v608_v14 = vld [vmem:[#allocation6 + $0x68] sm:$0xff]  ;;  %v417_v15 = vld [vmem:[#allocation8 + $0x150] sm:$0xff]  ;;  %v606_v18 = vld [vmem:[#allocation6 + $0x58] sm:$0xff]  ;;  %v8999_v20 = vpack.c.bf16 %v599_v9, %v595_v8  ;;  %v9001_v21 = vpack.c.bf16 %v601_v11, %v597_v10 }
  0x9e   :  { %6300 = vmatprep.subr.bf16.mxu1 %v6299_v36  ;;  %505 = vmatprep.mubr.f32.mxu0 %v10432_v0  ;;  %v610_v19 = vld [vmem:[#allocation6 + $0x78] sm:$0xff]  ;;  %v9003_v22 = vpack.c.bf16 %v608_v14, %v604_v13  ;;  %v603_v23 = vld [vmem:[#allocation6 + $0x40] sm:$0xff]  ;;  %v605_v25 = vld [vmem:[#allocation6 + $0x50] sm:$0xff] }
  0x9f   :  { %582 = vmatprep.mubr.f32.mxu1 %v10432_v0  ;;  %v607_v24 = vld [vmem:[#allocation6 + $0x60] sm:$0xff]  ;;  %v9007_v26 = vpack.c.bf16 %v610_v19, %v606_v18  ;;  %v609_v27 = vld [vmem:[#allocation6 + $0x70] sm:$0xff]  ;;  %v612_v28 = vld [vmem:[#allocation6 + $0x88] sm:$0xff] }
  0xa0   :  { %6282 = vmatpush1.bf16.msra.mxu0 %v6281_v42  ;;  %v616_v29 = vld [vmem:[#allocation6 + $0xa8] sm:$0xff]  ;;  %v614_v30 = vld [vmem:[#allocation6 + $0x98] sm:$0xff]  ;;  %v9014_v32 = vpack.c.bf16 %v607_v24, %v603_v23  ;;  %v9018_v33 = vpack.c.bf16 %v609_v27, %v605_v25  ;;  %v611_v36 = vld [vmem:[#allocation6 + $0x80] sm:$0xff] }
  0xa1   :  { %6302 = vmatpush1.bf16.msra.mxu1 %v6301_v43  ;;  %6284 = vmatprep.subr.bf16.mxu0 %v6283_v44  ;;  %v618_v31 = vld [vmem:[#allocation6 + $0xb8] sm:$0xff]  ;;  %v9020_v34 = vpack.c.bf16 %v616_v29, %v612_v28  ;;  %v615_v37 = vld [vmem:[#allocation6 + $0xa0] sm:$0xff]  ;;  %v613_v38 = vld [vmem:[#allocation6 + $0x90] sm:$0xff] }
  0xa2   :  { %6304 = vmatprep.subr.bf16.mxu1 %v6303_v48  ;;  %10535 = vst [vmem:[#allocation21_spill] sm:$0xff] %v9014_v32  ;;  %10536 = vst [vmem:[#allocation22_spill] sm:$0xff] %v9018_v33  ;;  %v9023_v39 = vpack.c.bf16 %v618_v31, %v614_v30  ;;  %v620_v40 = vld [vmem:[#allocation6 + $0xc8] sm:$0xff]  ;;  %v622_v42 = vld [vmem:[#allocation6 + $0xd8] sm:$0xff]  ;;  %v9030_v44 = vpack.c.bf16 %v615_v37, %v611_v36 }
  0xa3   :  { %10537 = vst [vmem:[#allocation23_spill] sm:$0xff] %v9020_v34  ;;  %v624_v41 = vld [vmem:[#allocation6 + $0xe8] sm:$0xff]  ;;  %v626_v43 = vld [vmem:[#allocation6 + $0xf8] sm:$0xff]  ;;  %v619_v47 = vld [vmem:[#allocation6 + $0xc0] sm:$0xff] }
  0xa4   :  { %6286 = vmatpush1.bf16.msra.mxu0 %v6285_v54  ;;  %10538 = vst [vmem:[#allocation24_spill] sm:$0xff] %v9023_v39  ;;  %10539 = vst [vmem:[#allocation25_spill] sm:$0xff] %v9030_v44  ;;  %v9038_v46 = vpack.c.bf16 %v624_v41, %v620_v40  ;;  %v623_v48 = vld [vmem:[#allocation6 + $0xe0] sm:$0xff]  ;;  %v621_v49 = vld [vmem:[#allocation6 + $0xd0] sm:$0xff]  ;;  %v9041_v50 = vpack.c.bf16 %v626_v43, %v622_v42 }
  0xa5   :  { %6306 = vmatpush1.bf16.msra.mxu1 %v6305_v55  ;;  %6288 = vmatprep.subr.bf16.mxu0 %v6287_v56  ;;  %v625_v51 = vld [vmem:[#allocation6 + $0xf0] sm:$0xff]  ;;  %v628_v52 = vld [vmem:[#allocation6 + $0x108] sm:$0xff]  ;;  %v634_v54 = vld [vmem:[#allocation6 + $0x138] sm:$0xff]  ;;  %v9046_v55 = vpack.c.bf16 %v623_v48, %v619_v47 }
  0xa6   :  { %6308 = vmatprep.subr.bf16.mxu1 %v6307_v59  ;;  %10541 = vst [vmem:[#allocation27_spill] sm:$0xff] %v9038_v46  ;;  %10542 = vst [vmem:[#allocation28_spill] sm:$0xff] %v9041_v50  ;;  %v632_v53 = vld [vmem:[#allocation6 + $0x128] sm:$0xff]  ;;  %v9050_v56 = vpack.c.bf16 %v625_v51, %v621_v49  ;;  %v627_v58 = vld [vmem:[#allocation6 + $0x100] sm:$0xff] }
  0xa7   :  { %10543 = vst [vmem:[#allocation29_spill] sm:$0xff] %v9046_v55  ;;  %v9052_v57 = vpack.c.bf16 %v632_v53, %v628_v52  ;;  %v631_v59 = vld [vmem:[#allocation6 + $0x120] sm:$0xff]  ;;  %v629_v60 = vld [vmem:[#allocation6 + $0x110] sm:$0xff]  ;;  %v642_v3 = vld [vmem:[#allocation6 + $0x178] sm:$0xff] }
  0xa8   :  { %6290 = vmatpush1.bf16.msra.mxu0 %v6289_v62  ;;  %10544 = vst [vmem:[#allocation30_spill] sm:$0xff] %v9050_v56  ;;  %v633_v62 = vld [vmem:[#allocation6 + $0x130] sm:$0xff]  ;;  %v635_v7 = vld [vmem:[#allocation6 + $0x140] sm:$0xff]  ;;  %v644_v13 = vld [vmem:[#allocation6 + $0x188] sm:$0xff] }
  0xa9   :  { %6310 = vmatpush1.bf16.msra.mxu1 %v6309_v63  ;;  %461 = vmatprep.subr.mxu0 %v416_v1  ;;  %10545 = vst [vmem:[#allocation31_spill] sm:$0xff] %v9052_v57  ;;  %v636_v63 = vld [vmem:[#allocation6 + $0x148] sm:$0xff]  ;;  %v9062_v5 = vpack.c.bf16 %v633_v62, %v629_v60  ;;  %v639_v8 = vld [vmem:[#allocation6 + $0x160] sm:$0xff]  ;;  %v637_v9 = vld [vmem:[#allocation6 + $0x150] sm:$0xff] }
  0xaa   :  { %538 = vmatprep.subr.mxu1 %v418_v2  ;;  %v640_v1 = vld [vmem:[#allocation6 + $0x168] sm:$0xff]  ;;  %v638_v2 = vld [vmem:[#allocation6 + $0x158] sm:$0xff]  ;;  %v641_v11 = vld [vmem:[#allocation6 + $0x170] sm:$0xff]  ;;  %v9070_v19 = vpack.c.bf16 %v639_v8, %v635_v7 }
  0xab   :  { %10548 = vst [vmem:[#allocation34_spill] sm:$0xff] %v9062_v5  ;;  %v9064_v6 = vpack.c.bf16 %v640_v1, %v636_v63  ;;  %v9067_v10 = vpack.c.bf16 %v642_v3, %v638_v2  ;;  %v648_v14 = vld [vmem:[#allocation6 + $0x1a8] sm:$0xff]  ;;  %v650_v18 = vld [vmem:[#allocation6 + $0x1b8] sm:$0xff]  ;;  %v9074_v23 = vpack.c.bf16 %v641_v11, %v637_v9  ;;  %v643_v25 = vld [vmem:[#allocation6 + $0x180] sm:$0xff] }
  0xac   :  { %462 = vmatpush1.msra.mxu0 %v415_v4  ;;  %v9058_v4 = vpack.c.bf16 %v631_v59, %v627_v58  ;;  %10551 = vst [vmem:[#allocation37_spill] sm:$0xff] %v9070_v19  ;;  %v9076_v24 = vpack.c.bf16 %v648_v14, %v644_v13  ;;  %v647_v27 = vld [vmem:[#allocation6 + $0x1a0] sm:$0xff]  ;;  %v645_v28 = vld [vmem:[#allocation6 + $0x190] sm:$0xff]  ;;  %v652_v31 = vld [vmem:[#allocation6 + $0x1c8] sm:$0xff] }
  0xad   :  { %539 = vmatpush1.msra.mxu1 %v417_v15  ;;  %6047 = vmatmul.mubr.msk.f32.vlgmr.msra.gmra.mrb[4].mxu0 %vm214_vm0, %v8976_v12  ;;  %10549 = vst [vmem:[#allocation35_spill] sm:$0xff] %v9064_v6  ;;  %10550 = vst [vmem:[#allocation36_spill] sm:$0xff] %v9067_v10  ;;  %v646_v15 = vld [vmem:[#allocation6 + $0x198] sm:$0xff]  ;;  %v649_v30 = vld [vmem:[#allocation6 + $0x1b0] sm:$0xff] }
  0xae   :  { %6312 = vmatprep.subr.bf16.mxu0 %v8995_v16  ;;  %6344 = vmatprep.subr.bf16.mxu1 %v8997_v17  ;;  %10547 = vst [vmem:[#allocation33_spill] sm:$0xff] %v9058_v4  ;;  %10552 = vst [vmem:[#allocation38_spill] sm:$0xff] %v9074_v23  ;;  %v9079_v29 = vpack.c.bf16 %v650_v18, %v646_v15  ;;  %v656_v36 = vld [vmem:[#allocation6 + $0x1e8] sm:$0xff]  ;;  %v654_v37 = vld [vmem:[#allocation6 + $0x1d8] sm:$0xff]  ;;  %v9086_v40 = vpack.c.bf16 %v649_v30, %v645_v28 }
  0xaf   :  { %6049 = vmatmul.mubr.msk.f32.vlgmr.msra.gmra.mrb[4].mxu1 %vm214_vm0, %v8976_v12  ;;  %6314 = vmatpush1.bf16.msra.mxu0 %v8999_v20  ;;  %v617_v12 = vld [vmem:[#allocation6 + $0xb0] sm:$0xff]  ;;  %10553 = vst [vmem:[#allocation39_spill] sm:$0xff] %v9076_v24  ;;  %v9088_v41 = vpack.c.bf16 %v656_v36, %v652_v31  ;;  %v651_v42 = vld [vmem:[#allocation6 + $0x1c0] sm:$0xff]  ;;  %v660_v51 = vld [vmem:[#allocation9 + $0x8] sm:$0xff] }
  0xb0   :  { %6346 = vmatpush1.bf16.msra.mxu1 %v9001_v21  ;;  %6316 = vmatprep.subr.bf16.mxu0 %v9003_v22  ;;  %v9036_v45 = vpack.c.bf16 %v617_v12, %v613_v38  ;;  %10554 = vst [vmem:[#allocation40_spill] sm:$0xff] %v9079_v29  ;;  %v658_v38 = vld [vmem:[#allocation6 + $0x1f8] sm:$0xff]  ;;  %v9082_v12 = vpack.c.bf16 %v647_v27, %v643_v25  ;;  %10556 = vst [vmem:[#allocation42_spill] sm:$0xff] %v9086_v40  ;;  %v655_v43 = vld [vmem:[#allocation6 + $0x1e0] sm:$0xff] }
  0xb1   :  { %6348 = vmatprep.subr.bf16.mxu1 %v9007_v26  ;;  %511 = vmatprep.mubr.f32.mxu0 %v10432_v0  ;;  %10557 = vst [vmem:[#allocation43_spill] sm:$0xff] %v9088_v41  ;;  %v653_v47 = vld [vmem:[#allocation6 + $0x1d0] sm:$0xff]  ;;  %v9091_v48 = vpack.c.bf16 %v658_v38, %v654_v37  ;;  %v664_v52 = vld [vmem:[#allocation9 + $0x28] sm:$0xff]  ;;  %v662_v53 = vld [vmem:[#allocation9 + $0x18] sm:$0xff] }
  0xb2   :  { %588 = vmatprep.mubr.f32.mxu1 %v10432_v0  ;;  %6048 = vmatmul.mubr.msk.f32.gmra.mrb[6].mxu0 %vm214_vm0, %v8985_v35  ;;  %10540 = vst [vmem:[#allocation26_spill] sm:$0xff] %v9036_v45  ;;  %10555 = vst [vmem:[#allocation41_spill] sm:$0xff] %v9082_v12  ;;  %v657_v49 = vld [vmem:[#allocation6 + $0x1f0] sm:$0xff]  ;;  %v9100_v59 = vpack.c.bf16 %v664_v52, %v660_v51  ;;  %v659_v60 = vld [vmem:[#allocation9] sm:$0xff] }
  0xb3   :  { %6318 = vmatpush1.bf16.msra.mxu0 %v9014_v32  ;;  %6050 = vmatmul.mubr.msk.f32.gmra.mrb[6].mxu1 %vm214_vm0, %v8985_v35  ;;  %v630_v35 = vld [vmem:[#allocation6 + $0x118] sm:$0xff]  ;;  %10558 = vst [vmem:[#allocation44_spill] sm:$0xff] %v9091_v48  ;;  %v9098_v58 = vpack.c.bf16 %v657_v49, %v653_v47  ;;  %v663_v62 = vld [vmem:[#allocation9 + $0x20] sm:$0xff]  ;;  %v661_v63 = vld [vmem:[#allocation9 + $0x10] sm:$0xff] }
  0xb4   :  { %6350 = vmatpush1.bf16.msra.mxu1 %v9018_v33  ;;  %6320 = vmatprep.subr.bf16.mxu0 %v9020_v34  ;;  %v9055_v61 = vpack.c.bf16 %v634_v54, %v630_v35  ;;  %v666_v35 = vld [vmem:[#allocation9 + $0x38] sm:$0xff]  ;;  %v9094_v54 = vpack.c.bf16 %v655_v43, %v651_v42  ;;  %10561 = vst [vmem:[#allocation47_spill] sm:$0xff] %v9100_v59  ;;  %v665_v2 = vld [vmem:[#allocation9 + $0x30] sm:$0xff]  ;;  %v668_v3 = vld [vmem:[#allocation9 + $0x48] sm:$0xff] }
  0xb5   :  { %6352 = vmatprep.subr.bf16.mxu1 %v9023_v39  ;;  %787 = vmatprep.mubr.f32.mxu0 %v10432_v0  ;;  %10560 = vst [vmem:[#allocation46_spill] sm:$0xff] %v9098_v58  ;;  %v9103_v1 = vpack.c.bf16 %v666_v35, %v662_v53  ;;  %v672_v7 = vld [vmem:[#allocation9 + $0x68] sm:$0xff]  ;;  %v670_v8 = vld [vmem:[#allocation9 + $0x58] sm:$0xff]  ;;  %v9106_v11 = vpack.c.bf16 %v663_v62, %v659_v60  ;;  %v667_v15 = vld [vmem:[#allocation9 + $0x40] sm:$0xff] }
  0xb6   :  { %858 = vmatprep.mubr.f32.mxu1 %v10432_v0  ;;  %10546 = vst [vmem:[#allocation32_spill] sm:$0xff] %v9055_v61  ;;  %10559 = vst [vmem:[#allocation45_spill] sm:$0xff] %v9094_v54  ;;  %v674_v9 = vld [vmem:[#allocation9 + $0x78] sm:$0xff]  ;;  %v9110_v13 = vpack.c.bf16 %v665_v2, %v661_v63  ;;  %v9112_v14 = vpack.c.bf16 %v672_v7, %v668_v3  ;;  %v671_v18 = vld [vmem:[#allocation9 + $0x60] sm:$0xff] }
  0xb7   :  { %6322 = vmatpush1.bf16.msra.mxu0 %v9030_v44  ;;  %10562 = vst [vmem:[#allocation48_spill] sm:$0xff] %v9103_v1  ;;  %v669_v25 = vld [vmem:[#allocation9 + $0x50] sm:$0xff]  ;;  %v9115_v27 = vpack.c.bf16 %v674_v9, %v670_v8  ;;  %v676_v30 = vld [vmem:[#allocation9 + $0x88] sm:$0xff]  ;;  %v678_v36 = vld [vmem:[#allocation9 + $0x98] sm:$0xff]  ;;  %v9120_v38 = vpack.c.bf16 %v671_v18, %v667_v15 }
  0xb8   :  { %6354 = vmatpush1.bf16.msra.mxu1 %v9036_v45  ;;  %6324 = vmatprep.subr.bf16.mxu0 %v9038_v46  ;;  %v673_v28 = vld [vmem:[#allocation9 + $0x70] sm:$0xff]  ;;  %v680_v31 = vld [vmem:[#allocation9 + $0xa8] sm:$0xff]  ;;  %v682_v37 = vld [vmem:[#allocation9 + $0xb8] sm:$0xff] }
  0xb9   :  { %6356 = vmatprep.subr.bf16.mxu1 %v9041_v50  ;;  %v9124_v42 = vpack.c.bf16 %v673_v28, %v669_v25  ;;  %v9126_v43 = vpack.c.bf16 %v680_v31, %v676_v30  ;;  %v675_v47 = vld [vmem:[#allocation9 + $0x80] sm:$0xff]  ;;  %v677_v51 = vld [vmem:[#allocation9 + $0x90] sm:$0xff]  ;;  %v9129_v52 = vpack.c.bf16 %v682_v37, %v678_v36  ;;  %v684_v35 = vld [vmem:[#allocation9 + $0xc8] sm:$0xff] }
  0xba   :  { %v679_v49 = vld [vmem:[#allocation9 + $0xa0] sm:$0xff]  ;;  %v681_v53 = vld [vmem:[#allocation9 + $0xb0] sm:$0xff]  ;;  %v688_v60 = vld [vmem:[#allocation9 + $0xe8] sm:$0xff] }
  0xbb   :  { %6326 = vmatpush1.bf16.msra.mxu0 %v9046_v55  ;;  %v686_v62 = vld [vmem:[#allocation9 + $0xd8] sm:$0xff]  ;;  %v9134_v2 = vpack.c.bf16 %v679_v49, %v675_v47  ;;  %v9138_v3 = vpack.c.bf16 %v681_v53, %v677_v51  ;;  %v9140_v7 = vpack.c.bf16 %v688_v60, %v684_v35  ;;  %v683_v8 = vld [vmem:[#allocation9 + $0xc0] sm:$0xff]  ;;  %v685_v15 = vld [vmem:[#allocation9 + $0xd0] sm:$0xff] }
  0xbc   :  { %6358 = vmatpush1.bf16.msra.mxu1 %v9050_v56  ;;  %6328 = vmatprep.subr.bf16.mxu0 %v9052_v57  ;;  %v690_v63 = vld [vmem:[#allocation9 + $0xf8] sm:$0xff]  ;;  %v687_v9 = vld [vmem:[#allocation9 + $0xe0] sm:$0xff]  ;;  %v689_v25 = vld [vmem:[#allocation9 + $0xf0] sm:$0xff] }
  0xbd   :  { %6360 = vmatprep.subr.bf16.mxu1 %v9055_v61  ;;  %10563 = vst [vmem:[#allocation49_spill] sm:$0xff] %v9138_v3  ;;  %10564 = vst [vmem:[#allocation50_spill] sm:$0xff] %v9140_v7  ;;  %v9143_v18 = vpack.c.bf16 %v690_v63, %v686_v62  ;;  %v692_v28 = vld [vmem:[#allocation9 + $0x108] sm:$0xff]  ;;  %v694_v31 = vld [vmem:[#allocation9 + $0x118] sm:$0xff]  ;;  %v9146_v37 = vpack.c.bf16 %v687_v9, %v683_v8  ;;  %v9150_v47 = vpack.c.bf16 %v689_v25, %v685_v15 }
  0xbe   :  { %v696_v30 = vld [vmem:[#allocation9 + $0x128] sm:$0xff]  ;;  %v698_v36 = vld [vmem:[#allocation9 + $0x138] sm:$0xff]  ;;  %v691_v51 = vld [vmem:[#allocation9 + $0x100] sm:$0xff] }
  0xbf   :  { %6330 = vmatpush1.bf16.msra.mxu0 %v9058_v4  ;;  %10565 = vst [vmem:[#allocation51_spill] sm:$0xff] %v9143_v18  ;;  %10566 = vst [vmem:[#allocation52_spill] sm:$0xff] %v9146_v37  ;;  %v9152_v49 = vpack.c.bf16 %v696_v30, %v692_v28  ;;  %v695_v53 = vld [vmem:[#allocation9 + $0x120] sm:$0xff]  ;;  %v693_v35 = vld [vmem:[#allocation9 + $0x110] sm:$0xff]  ;;  %v9155_v60 = vpack.c.bf16 %v698_v36, %v694_v31 }
  0xc0   :  { %6362 = vmatpush1.bf16.msra.mxu1 %v9062_v5  ;;  %6332 = vmatprep.subr.bf16.mxu0 %v9064_v6  ;;  %10567 = vst [vmem:[#allocation53_spill] sm:$0xff] %v9150_v47  ;;  %v697_v62 = vld [vmem:[#allocation9 + $0x130] sm:$0xff]  ;;  %v700_v63 = vld [vmem:[#allocation9 + $0x148] sm:$0xff]  ;;  %v702_v8 = vld [vmem:[#allocation9 + $0x158] sm:$0xff] }
  0xc1   :  { %6364 = vmatprep.subr.bf16.mxu1 %v9067_v10  ;;  %10568 = vst [vmem:[#allocation54_spill] sm:$0xff] %v9152_v49  ;;  %10569 = vst [vmem:[#allocation55_spill] sm:$0xff] %v9155_v60  ;;  %v706_v9 = vld [vmem:[#allocation9 + $0x178] sm:$0xff]  ;;  %v9162_v15 = vpack.c.bf16 %v697_v62, %v693_v35  ;;  %v699_v28 = vld [vmem:[#allocation9 + $0x140] sm:$0xff] }
  0xc2   :  { %v703_v30 = vld [vmem:[#allocation9 + $0x160] sm:$0xff]  ;;  %v701_v31 = vld [vmem:[#allocation9 + $0x150] sm:$0xff]  ;;  %v9167_v36 = vpack.c.bf16 %v706_v9, %v702_v8 }
  0xc3   :  { %6334 = vmatpush1.bf16.msra.mxu0 %v9070_v19  ;;  %10571 = vst [vmem:[#allocation57_spill] sm:$0xff] %v9162_v15  ;;  %v707_v62 = vld [vmem:[#allocation9 + $0x180] sm:$0xff]  ;;  %v709_v8 = vld [vmem:[#allocation9 + $0x190] sm:$0xff] }
  0xc4   :  { %6366 = vmatpush1.bf16.msra.mxu1 %v9074_v23  ;;  %6336 = vmatprep.subr.bf16.mxu0 %v9076_v24  ;;  %10572 = vst [vmem:[#allocation58_spill] sm:$0xff] %v9167_v36 }
  0xc5   :  { %6368 = vmatprep.subr.bf16.mxu1 %v9079_v29 }
  0xc7   :  { %6338 = vmatpush1.bf16.msra.mxu0 %v9082_v12 }
  0xc8   :  { %6370 = vmatpush1.bf16.msra.mxu1 %v9086_v40  ;;  %6340 = vmatprep.subr.bf16.mxu0 %v9088_v41 }
  0xc9   :  { %6372 = vmatprep.subr.bf16.mxu1 %v9091_v48 }
  0xcb   :  { %6342 = vmatpush1.bf16.msra.mxu0 %v9094_v54 }
  0xcc   :  { %6374 = vmatpush1.bf16.msra.mxu1 %v9098_v58  ;;  %6376 = vmatprep.subr.bf16.mxu0 %v9100_v59 }
  0xcd   :  { %6408 = vmatprep.subr.bf16.mxu1 %v9103_v1 }
  0xce   :  { %788 = vmatmul.mubr.f32.vlgmr.msra.gmra.mrb[8].mxu0 %v10432_v0 }
  0xcf   :  { %859 = vmatmul.mubr.f32.vlgmr.msra.gmra.mrb[8].mxu1 %v10432_v0  ;;  %6378 = vmatpush1.bf16.msra.mxu0 %v9106_v11 }
  0xd0   :  { %6410 = vmatpush1.bf16.msra.mxu1 %v9110_v13  ;;  %6380 = vmatprep.subr.bf16.mxu0 %v9112_v14 }
  0xd1   :  { %6412 = vmatprep.subr.bf16.mxu1 %v9115_v27  ;;  %958 = vmatprep.mubr.f32.mxu0 %v10432_v0 }
  0xd2   :  { %1029 = vmatprep.mubr.f32.mxu1 %v10432_v0  ;;  %v704_v0 = vld [vmem:[#allocation9 + $0x168] sm:$0xff] }
  0xd3   :  { %6382 = vmatpush1.bf16.msra.mxu0 %v9120_v38  ;;  %v9164_v25 = vpack.c.bf16 %v704_v0, %v700_v63  ;;  %v711_v63 = vld [vmem:[#allocation9 + $0x1a0] sm:$0xff] }
  0xd4   :  { %6414 = vmatpush1.bf16.msra.mxu1 %v9124_v42  ;;  %6384 = vmatprep.subr.bf16.mxu0 %v9126_v43 }
  0xd5   :  { %6416 = vmatprep.subr.bf16.mxu1 %v9129_v52 }
  0xd7   :  { %6386 = vmatpush1.bf16.msra.mxu0 %v9134_v2 }
  0xd8   :  { %6418 = vmatpush1.bf16.msra.mxu1 %v9138_v3  ;;  %6388 = vmatprep.subr.bf16.mxu0 %v9140_v7  ;;  %v9158_v3 = vpack.c.bf16 %v695_v53, %v691_v51  ;;  %v708_v7 = vld [vmem:[#allocation9 + $0x188] sm:$0xff]  ;;  %v710_v51 = vld [vmem:[#allocation9 + $0x198] sm:$0xff] }
  0xd9   :  { %6420 = vmatprep.subr.bf16.mxu1 %v9143_v18  ;;  %v705_v18 = vld [vmem:[#allocation9 + $0x170] sm:$0xff]  ;;  %v714_v53 = vld [vmem:[#allocation9 + $0x1b8] sm:$0xff] }
  0xda   :  { %10570 = vst [vmem:[#allocation56_spill] sm:$0xff] %v9158_v3  ;;  %v9174_v0 = vpack.c.bf16 %v705_v18, %v701_v31  ;;  %v9179_v9 = vpack.c.bf16 %v714_v53, %v710_v51  ;;  %v719_v31 = vld [vmem:[#allocation9 + $0x1e0] sm:$0xff]  ;;  %v717_v53 = vld [vmem:[#allocation9 + $0x1d0] sm:$0xff] }
  0xdb   :  { %6390 = vmatpush1.bf16.msra.mxu0 %v9146_v37  ;;  %v712_v37 = vld [vmem:[#allocation9 + $0x1a8] sm:$0xff] }
  0xdc   :  { %6422 = vmatpush1.bf16.msra.mxu1 %v9150_v47  ;;  %6392 = vmatprep.subr.bf16.mxu0 %v9152_v49  ;;  %v9170_v47 = vpack.c.bf16 %v703_v30, %v699_v28  ;;  %v9176_v35 = vpack.c.bf16 %v712_v37, %v708_v7  ;;  %v716_v49 = vld [vmem:[#allocation9 + $0x1c8] sm:$0xff]  ;;  %v718_v28 = vld [vmem:[#allocation9 + $0x1d8] sm:$0xff]  ;;  %v715_v37 = vld [vmem:[#allocation9 + $0x1c0] sm:$0xff] }
  0xdd   :  { %6424 = vmatprep.subr.bf16.mxu1 %v9155_v60  ;;  %v713_v60 = vld [vmem:[#allocation9 + $0x1b0] sm:$0xff]  ;;  %v722_v30 = vld [vmem:[#allocation9 + $0x1f8] sm:$0xff] }
  0xde   :  { %v9186_v7 = vpack.c.bf16 %v713_v60, %v709_v8  ;;  %v9191_v51 = vpack.c.bf16 %v722_v30, %v718_v28  ;;  %v192_v28 = vld [vmem:[%s10419_s3] sm:$0xf] }
  0xdf   :  { %6394 = vmatpush1.bf16.msra.mxu0 %v9158_v3  ;;  %v720_v3 = vld [vmem:[#allocation9 + $0x1e8] sm:$0xff] }
  0xe0   :  { %6426 = vmatpush1.bf16.msra.mxu1 %v9162_v15  ;;  %6396 = vmatprep.subr.bf16.mxu0 %v9164_v25  ;;  %v9182_v15 = vpack.c.bf16 %v711_v63, %v707_v62  ;;  %v9188_v18 = vpack.c.bf16 %v720_v3, %v716_v49  ;;  %v9194_v62 = vpack.c.bf16 %v719_v31, %v715_v37  ;;  %v10573_v3 = vmov 0.0  }
  0xe1   :  { %6428 = vmatprep.subr.bf16.mxu1 %v9167_v36  ;;  %v721_v36 = vld [vmem:[#allocation9 + $0x1f0] sm:$0xff]  ;;  %v194_v49 = vlaneseq }
  0xe2   :  { %v9198_v60 = vpack.c.bf16 %v721_v36, %v717_v53 }
  0xe3   :  { %6398 = vmatpush1.bf16.msra.mxu0 %v9170_v47  ;;  %v195_v36 = vshrl.u32 %v194_v49, 7 }
  0xe4   :  { %6430 = vmatpush1.bf16.msra.mxu1 %v9174_v0  ;;  %6400 = vmatprep.subr.bf16.mxu0 %v9176_v35 }
  0xe5   :  { %6432 = vmatprep.subr.bf16.mxu1 %v9179_v9  ;;  %v9241_v63 = vsub.s32 0, %v195_v36  ;;  %v9246_v30 = vsub.s32 1, %v195_v36  ;;  %v9248_v31 = vsub.s32 2, %v195_v36 }
  0xe7   :  { %6402 = vmatpush1.bf16.msra.mxu0 %v9182_v15  ;;  %10574 = vst [vmem:[#allocation59_spill] sm:$0xff] %v9241_v63  ;;  %10575 = vst [vmem:[#allocation60_spill] sm:$0xff] %v9246_v30  ;;  %v201_v49 = vrot.slane %v192_v28, %v9246_v30 }
  0xe8   :  { %6434 = vmatpush1.bf16.msra.mxu1 %v9186_v7  ;;  %6404 = vmatprep.subr.bf16.mxu0 %v9188_v18  ;;  %10576 = vst [vmem:[#allocation61_spill] sm:$0xff] %v9248_v31 }
  0xe9   :  { %6436 = vmatprep.subr.bf16.mxu1 %v9191_v51 }
  0xeb   :  { %6406 = vmatpush1.bf16.msra.mxu0 %v9194_v62 }
  0xec   :  { %6438 = vmatpush1.bf16.msra.mxu1 %v9198_v60  ;;  %6440 = vmatprep.subr.bf16.mxu0 %v8995_v16 }
  0xed   :  { %6472 = vmatprep.subr.bf16.mxu1 %v8997_v17 }
  0xee   :  { %959 = vmatmul.mubr.f32.vlgmr.msra.gmra.mrb[10].mxu0 %v10573_v3 }
  0xef   :  { %1030 = vmatmul.mubr.f32.vlgmr.msra.gmra.mrb[10].mxu1 %v10573_v3  ;;  %6442 = vmatpush1.bf16.msra.mxu0 %v8999_v20 }
  0xf0   :  { %6474 = vmatpush1.bf16.msra.mxu1 %v9001_v21  ;;  %6444 = vmatprep.subr.bf16.mxu0 %v9003_v22 }
  0xf1   :  { %6476 = vmatprep.subr.bf16.mxu1 %v9007_v26  ;;  %1141 = vmatprep.mubr.f32.mxu0 %v10573_v3 }
  0xf2   :  { %1212 = vmatprep.mubr.f32.mxu1 %v10573_v3 }
  0xf3   :  { %6446 = vmatpush1.bf16.msra.mxu0 %v9014_v32 }
  0xf4   :  { %6478 = vmatpush1.bf16.msra.mxu1 %v9018_v33  ;;  %6448 = vmatprep.subr.bf16.mxu0 %v9020_v34 }
  0xf5   :  { %6480 = vmatprep.subr.bf16.mxu1 %v9023_v39 }
  0xf7   :  { %6450 = vmatpush1.bf16.msra.mxu0 %v9030_v44 }
  0xf8   :  { %6482 = vmatpush1.bf16.msra.mxu1 %v9036_v45  ;;  %6452 = vmatprep.subr.bf16.mxu0 %v9038_v46 }
  0xf9   :  { %6484 = vmatprep.subr.bf16.mxu1 %v9041_v50 }
  0xfb   :  { %6454 = vmatpush1.bf16.msra.mxu0 %v9046_v55 }
  0xfc   :  { %6486 = vmatpush1.bf16.msra.mxu1 %v9050_v56  ;;  %6456 = vmatprep.subr.bf16.mxu0 %v9052_v57 }
  0xfd   :  { %6488 = vmatprep.subr.bf16.mxu1 %v9055_v61 }
  0xff   :  { %6458 = vmatpush1.bf16.msra.mxu0 %v9058_v4 }
 0x100   :  { %6490 = vmatpush1.bf16.msra.mxu1 %v9062_v5  ;;  %6460 = vmatprep.subr.bf16.mxu0 %v9064_v6 }
 0x101   :  { %6492 = vmatprep.subr.bf16.mxu1 %v9067_v10  ;;  %v419_v10 = vld [vmem:[%s10422_s6] sm:$0xf] }
 0x102   :  { %v424_v6 = vrot.slane %v419_v10, %v9241_v63  ;;  %v428_v5 = vrot.slane %v419_v10, %v9246_v30 }
 0x103   :  { %6462 = vmatpush1.bf16.msra.mxu0 %v9070_v19 }
 0x104   :  { %6494 = vmatpush1.bf16.msra.mxu1 %v9074_v23  ;;  %6464 = vmatprep.subr.bf16.mxu0 %v9076_v24 }
 0x105   :  { %6496 = vmatprep.subr.bf16.mxu1 %v9079_v29 }
 0x107   :  { %6466 = vmatpush1.bf16.msra.mxu0 %v9082_v12 }
 0x108   :  { %6498 = vmatpush1.bf16.msra.mxu1 %v9086_v40  ;;  %6468 = vmatprep.subr.bf16.mxu0 %v9088_v41 }
 0x109   :  { %6500 = vmatprep.subr.bf16.mxu1 %v9091_v48 }
 0x10b   :  { %6470 = vmatpush1.bf16.msra.mxu0 %v9094_v54  ;;  %v205_v54 = vrot.slane %v192_v28, %v9248_v31 }
 0x10c   :  { %6502 = vmatpush1.bf16.msra.mxu1 %v9098_v58  ;;  %6504 = vmatprep.subr.bf16.mxu0 %v9100_v59  ;;  %v9250_v58 = vsub.s32 3, %v195_v36 }
 0x10d   :  { %6536 = vmatprep.subr.bf16.mxu1 %v9103_v1  ;;  %v197_v1 = vrot.slane %v192_v28, %v9241_v63 }
 0x10e   :  { %10577 = vst [vmem:[#allocation62_spill] sm:$0xff] %v9250_v58  ;;  %v209_v41 = vrot.slane %v192_v28, %v9250_v58 }
 0x169   :  { %v287_v8 = vpop.f32.mrb[0].mxu0 }
 0x16a   :  { %v289_v37 = vpop.f32.mrb[1].mxu0  ;;  %v9282_v57 = vadd.f32 %v287_v8, %v197_v1 }
 0x16b   :  { %v364_v53 = vpop.f32.mrb[0].mxu1  ;;  %v9284_v56 = vadd.f32 %v289_v37, %v201_v49 }
 0x16c   :  { %v366_v59 = vpop.f32.mrb[1].mxu1  ;;  %10586 = vst [vmem:[#allocation71_spill] sm:$0xff] %v9282_v57 }
 0x16e   :  { %v293_v48 = vpop.f32.mrb[2].mxu0 }
 0x16f   :  { %v9256_v40 = vadd.f32 %v293_v48, %v197_v1  ;;  %v295_v12 = vpop.f32.mrb[3].mxu0  ;;  %v370_v29 = vpop.f32.mrb[2].mxu1  ;;  %v9270_v48 = vrot.slane %v419_v10, %v9248_v31  ;;  %v9291_v1 = vadd.f32 %v364_v53, %v205_v54 }
 0x170   :  { %v9258_v24 = vadd.f32 %v295_v12, %v201_v49  ;;  %v9260_v23 = vadd.f32 %v370_v29, %v205_v54  ;;  %v372_v36 = vpop.f32.mrb[3].mxu1  ;;  %v436_v12 = vrot.slane %v419_v10, %v9250_v58 }
 0x171   :  { %10578 = vst [vmem:[#allocation63_spill] sm:$0xff] %v9256_v40  ;;  %v9262_v19 = vadd.f32 %v372_v36, %v209_v41  ;;  %10587 = vst [vmem:[#allocation72_spill] sm:$0xff] %v9291_v1 }
 0x172   :  { %10579 = vst [vmem:[#allocation64_spill] sm:$0xff] %v9258_v24  ;;  %10580 = vst [vmem:[#allocation65_spill] sm:$0xff] %v9260_v23 }
 0x173   :  { %10581 = vst [vmem:[#allocation66_spill] sm:$0xff] %v9262_v19 }
 0x180   :  { %v507_v28 = vpop.f32.mrb[4].mxu0 }
 0x181   :  { %v9273_v24 = vadd.f32 %v507_v28, %v424_v6  ;;  %v509_v29 = vpop.f32.mrb[5].mxu0 }
 0x182   :  { %v9275_v23 = vadd.f32 %v509_v29, %v428_v5  ;;  %v584_v36 = vpop.f32.mrb[4].mxu1 }
 0x183   :  { %10582 = vst [vmem:[#allocation67_spill] sm:$0xff] %v9273_v24  ;;  %v9278_v19 = vadd.f32 %v584_v36, %v9270_v48  ;;  %v586_v40 = vpop.f32.mrb[5].mxu1 }
 0x184   :  { %10583 = vst [vmem:[#allocation68_spill] sm:$0xff] %v9275_v23  ;;  %v9280_v4 = vadd.f32 %v586_v40, %v436_v12  ;;  %v9288_v40 = vadd.f32 %v366_v59, %v209_v41 }
 0x185   :  { %10584 = vst [vmem:[#allocation69_spill] sm:$0xff] %v9278_v19  ;;  %v513_v63 = vpop.f32.mrb[6].mxu0 }
 0x186   :  { %10585 = vst [vmem:[#allocation70_spill] sm:$0xff] %v9280_v4  ;;  %v515_v30 = vpop.f32.mrb[7].mxu0  ;;  %v590_v61 = vpop.f32.mrb[6].mxu1  ;;  %v9296_v53 = vadd.f32 %v513_v63, %v424_v6 }
 0x187   :  { %v592_v31 = vpop.f32.mrb[7].mxu1 }
 0x188   :  { %v9303_v6 = vadd.f32 %v592_v31, %v436_v12 }
 0x1a1   :  { %v789_v10 = vpop.f32.mrb[8].mxu0 }
 0x1a2   :  { %v865_v28 = vadd.f32 %v789_v10, %v9282_v57  ;;  %v860_v29 = vpop.f32.mrb[8].mxu1  ;;  %v791_v58 = vpop.f32.mrb[9].mxu0 }
 0x1a3   :  { %v866_v23 = vadd.f32 %v791_v58, %v9284_v56  ;;  %v862_v36 = vpop.f32.mrb[9].mxu1  ;;  %v867_v37 = vadd.f32 %v860_v29, %v9291_v1 }
 0x1a4   :  { %v6051_v19 = vmul.f32 -1.442695, %v865_v28  ;;  %v868_v4 = vadd.f32 %v862_v36, %v9288_v40 }
 0x1a5   :  { %v6052_v24 = vmul.f32 -1.442695, %v866_v23 }
 0x1a6   :  { %8164 = vpow2.f32 %v6051_v19  ;;  %v6053_v8 = vmul.f32 -1.442695, %v868_v4 }
 0x1a7   :  { %8166 = vpow2.f32 %v6052_v24 }
 0x1a8   :  { %8168 = vpow2.f32 %v6053_v8 }
 0x1a9   :  { %8170 = vtanh.f32 %v867_v37  ;;  %v9298_v37 = vadd.f32 %v515_v30, %v428_v5 }
 0x1b0   :  { %v8165_v49 = vpop.eup %8164 }
 0x1b1   :  { %v8167_v10 = vpop.eup %8166  ;;  %v872_v57 = vadd.f32 1.0, %v8165_v49 }
 0x1b2   :  { %v878_v58 = vadd.f32 1.0, %v8167_v10  ;;  %v8169_v23 = vpop.eup %8168 }
 0x1b3   :  { %8172 = vrcp.f32 %v872_v57  ;;  %v8171_v19 = vpop.eup %8170  ;;  %v885_v28 = vadd.f32 1.0, %v8169_v23 }
 0x1b4   :  { %8174 = vrcp.f32 %v878_v58 }
 0x1b5   :  { %8176 = vrcp.f32 %v885_v28  ;;  %v9307_v28 = vadd.f32 %v590_v61, %v9270_v48  ;;  %v10588_v48 = vld [vmem:[#allocation49_spill] sm:$0xff] }
 0x1bd   :  { %v8173_v41 = vpop.eup %8172 }
 0x1be   :  { %v8175_v59 = vpop.eup %8174  ;;  %v889_v24 = vmul.f32 %v8173_v41, %v8171_v19 }
 0x1bf   :  { %v888_v36 = vmul.f32 0.0, %v8175_v59 }
 0x1c1   :  { %v9294_v54 = vadd.f32 %v889_v24, %v888_v36  ;;  %v960_v4 = vpop.f32.mrb[10].mxu0  ;;  %v8177_v24 = vpop.eup %8176 }
 0x1c2   :  { %v1040_v29 = vrot.slane %v960_v4, 2  ;;  %v1031_v49 = vpop.f32.mrb[10].mxu1  ;;  %v962_v8 = vpop.f32.mrb[11].mxu0 }
 0x1c3   :  { %8178 = vtanh.f32 %v9294_v54  ;;  %v1041_v57 = vrot.slane %v962_v8, 2  ;;  %v1033_v10 = vpop.f32.mrb[11].mxu1  ;;  %v1042_v5 = vrot.slane %v1031_v49, 2  ;;  %v10589_v8 = vld [vmem:[#allocation50_spill] sm:$0xff] }
 0x1c4   :  { %v1048_v58 = vadd.f32 %v1040_v29, %v9296_v53  ;;  %v1043_v59 = vrot.slane %v1033_v10, 2 }
 0x1c5   :  { %v1049_v23 = vadd.f32 %v1041_v57, %v9298_v37  ;;  %v1050_v29 = vadd.f32 %v1042_v5, %v9307_v28  ;;  %v10590_v57 = vld [vmem:[#allocation51_spill] sm:$0xff] }
 0x1c6   :  { %v6054_v19 = vmul.f32 -1.442695, %v1048_v58  ;;  %v1051_v63 = vadd.f32 %v1043_v59, %v9303_v6  ;;  %v10591_v58 = vld [vmem:[#allocation52_spill] sm:$0xff]  ;;  %v10594_v59 = vld [vmem:[#allocation55_spill] sm:$0xff] }
 0x1c7   :  { %v6055_v41 = vmul.f32 -1.442695, %v1049_v23  ;;  %v10592_v23 = vld [vmem:[#allocation53_spill] sm:$0xff] }
 0x1c8   :  { %8180 = vpow2.f32 %v6054_v19  ;;  %v6056_v4 = vmul.f32 -1.442695, %v1051_v63 }
 0x1c9   :  { %8182 = vpow2.f32 %v6055_v41  ;;  %v10593_v41 = vld [vmem:[#allocation54_spill] sm:$0xff] }
 0x1ca   :  { %8184 = vpow2.f32 %v6056_v4  ;;  %v10595_v4 = vld [vmem:[#allocation56_spill] sm:$0xff] }
 0x1cb   :  { %8186 = vtanh.f32 %v1050_v29  ;;  %v10596_v29 = vld [vmem:[#allocation57_spill] sm:$0xff] }
 0x1cd   :  { %v8179_v30 = vpop.eup %8178 }
 0x1ce   :  { %v892_v36 = vmul.f32 %v8179_v30, %v8177_v24 }
 0x1d0   :  { %893 = vst [vmem:[#allocation2] sm:$0x3] %v892_v36  ;;  %1142 = vmatmul.mubr.f32.vlgmr.msra.gmra.mrb[12].mxu0 %v892_v36  ;;  %1213 = vmatmul.mubr.f32.vlgmr.msra.gmra.mrb[12].mxu1 %v892_v36 }
 0x1d1   :  { %6506 = vmatpush1.bf16.msra.mxu0 %v9106_v11  ;;  %6538 = vmatpush1.bf16.msra.mxu1 %v9110_v13 }
 0x1d2   :  { %v8181_v31 = vpop.eup %8180  ;;  %6508 = vmatprep.subr.bf16.mxu0 %v9112_v14  ;;  %6540 = vmatprep.subr.bf16.mxu1 %v9115_v27 }
 0x1d3   :  { %v8183_v12 = vpop.eup %8182  ;;  %v1055_v49 = vadd.f32 1.0, %v8181_v31  ;;  %1330 = vmatprep.mubr.f32.mxu0 %v10573_v3  ;;  %1401 = vmatprep.mubr.f32.mxu1 %v10573_v3  ;;  %v10597_v31 = vld [vmem:[#allocation58_spill] sm:$0xff] }
 0x1d4   :  { %v1061_v61 = vadd.f32 1.0, %v8183_v12  ;;  %v8185_v10 = vpop.eup %8184 }
 0x1d5   :  { %8188 = vrcp.f32 %v1055_v49  ;;  %6510 = vmatpush1.bf16.msra.mxu0 %v9120_v38  ;;  %6542 = vmatpush1.bf16.msra.mxu1 %v9124_v42  ;;  %v8187_v19 = vpop.eup %8186  ;;  %v1068_v30 = vadd.f32 1.0, %v8185_v10 }
 0x1d6   :  { %8190 = vrcp.f32 %v1061_v61  ;;  %6512 = vmatprep.subr.bf16.mxu0 %v9126_v43  ;;  %6544 = vmatprep.subr.bf16.mxu1 %v9129_v52 }
 0x1d7   :  { %8192 = vrcp.f32 %v1068_v30  ;;  %v10601_v30 = vld [vmem:[#allocation33_spill] sm:$0xff] }
 0x1d9   :  { %6514 = vmatpush1.bf16.msra.mxu0 %v9134_v2  ;;  %6546 = vmatpush1.bf16.msra.mxu1 %v10588_v48 }
 0x1da   :  { %6516 = vmatprep.subr.bf16.mxu0 %v10589_v8  ;;  %6548 = vmatprep.subr.bf16.mxu1 %v10590_v57 }
 0x1dd   :  { %6518 = vmatpush1.bf16.msra.mxu0 %v10591_v58  ;;  %6550 = vmatpush1.bf16.msra.mxu1 %v10592_v23 }
 0x1de   :  { %6520 = vmatprep.subr.bf16.mxu0 %v10593_v41  ;;  %6552 = vmatprep.subr.bf16.mxu1 %v10594_v59 }
 0x1df   :  { %v8189_v63 = vpop.eup %8188 }
 0x1e0   :  { %v8191_v24 = vpop.eup %8190  ;;  %v1072_v5 = vmul.f32 %v8189_v63, %v8187_v19  ;;  %v10598_v63 = vld [vmem:[#allocation30_spill] sm:$0xff] }
 0x1e1   :  { %v1071_v36 = vmul.f32 0.0, %v8191_v24  ;;  %6522 = vmatpush1.bf16.msra.mxu0 %v10595_v4  ;;  %6554 = vmatpush1.bf16.msra.mxu1 %v10596_v29  ;;  %v8193_v49 = vpop.eup %8192  ;;  %v10599_v24 = vld [vmem:[#allocation31_spill] sm:$0xff] }
 0x1e2   :  { %6524 = vmatprep.subr.bf16.mxu0 %v9164_v25  ;;  %6556 = vmatprep.subr.bf16.mxu1 %v10597_v31 }
 0x1e3   :  { %v9332_v12 = vadd.f32 %v1072_v5, %v1071_v36  ;;  %v10600_v5 = vld [vmem:[#allocation32_spill] sm:$0xff]  ;;  %v10602_v36 = vld [vmem:[#allocation34_spill] sm:$0xff] }
 0x1e5   :  { %8194 = vtanh.f32 %v9332_v12  ;;  %6526 = vmatpush1.bf16.msra.mxu0 %v9170_v47  ;;  %6558 = vmatpush1.bf16.msra.mxu1 %v9174_v0 }
 0x1e6   :  { %6528 = vmatprep.subr.bf16.mxu0 %v9176_v35  ;;  %6560 = vmatprep.subr.bf16.mxu1 %v9179_v9 }
 0x1e9   :  { %6530 = vmatpush1.bf16.msra.mxu0 %v9182_v15  ;;  %6562 = vmatpush1.bf16.msra.mxu1 %v9186_v7 }
 0x1ea   :  { %6532 = vmatprep.subr.bf16.mxu0 %v9188_v18  ;;  %6564 = vmatprep.subr.bf16.mxu1 %v9191_v51 }
 0x1ed   :  { %6534 = vmatpush1.bf16.msra.mxu0 %v9194_v62  ;;  %6566 = vmatpush1.bf16.msra.mxu1 %v9198_v60 }
 0x1ee   :  { %6568 = vmatprep.subr.bf16.mxu0 %v8995_v16  ;;  %6600 = vmatprep.subr.bf16.mxu1 %v8997_v17 }
 0x1ef   :  { %v8195_v61 = vpop.eup %8194 }
 0x1f0   :  { %v1075_v10 = vmul.f32 %v8195_v61, %v8193_v49  ;;  %v10603_v49 = vld [vmem:[#allocation35_spill] sm:$0xff]  ;;  %v10604_v61 = vld [vmem:[#allocation36_spill] sm:$0xff] }
 0x1f2   :  { %1076 = vst [vmem:[#allocation2 + $0x18] sm:$0xc0] %v1075_v10  ;;  %v1264_v19 = vrot.slane %v1075_v10, 6  ;;  %v10605_v10 = vld [vmem:[#allocation37_spill] sm:$0xff] }
 0x1f4   :  { %1331 = vmatmul.mubr.f32.vlgmr.msra.gmra.mrb[14].mxu0 %v1264_v19  ;;  %1402 = vmatmul.mubr.f32.vlgmr.msra.gmra.mrb[14].mxu1 %v1264_v19  ;;  %v10606_v19 = vld [vmem:[#allocation38_spill] sm:$0xff] }
 0x1f5   :  { %6570 = vmatpush1.bf16.msra.mxu0 %v8999_v20  ;;  %6602 = vmatpush1.bf16.msra.mxu1 %v9001_v21 }
 0x1f6   :  { %6572 = vmatprep.subr.bf16.mxu0 %v9003_v22  ;;  %6604 = vmatprep.subr.bf16.mxu1 %v9007_v26 }
 0x1f7   :  { %1519 = vmatprep.mubr.f32.mxu0 %v10573_v3  ;;  %1590 = vmatprep.mubr.f32.mxu1 %v10573_v3 }
 0x1f9   :  { %6574 = vmatpush1.bf16.msra.mxu0 %v9014_v32  ;;  %6606 = vmatpush1.bf16.msra.mxu1 %v9018_v33 }
 0x1fa   :  { %6576 = vmatprep.subr.bf16.mxu0 %v9020_v34  ;;  %6608 = vmatprep.subr.bf16.mxu1 %v9023_v39 }
 0x1fd   :  { %6578 = vmatpush1.bf16.msra.mxu0 %v9030_v44  ;;  %6610 = vmatpush1.bf16.msra.mxu1 %v9036_v45  ;;  %v10617_v44 = vld [vmem:[#allocation71_spill] sm:$0xff] }
 0x1fe   :  { %6580 = vmatprep.subr.bf16.mxu0 %v9038_v46  ;;  %6612 = vmatprep.subr.bf16.mxu1 %v9041_v50  ;;  %v10607_v50 = vld [vmem:[#allocation39_spill] sm:$0xff] }
 0x201   :  { %6582 = vmatpush1.bf16.msra.mxu0 %v9046_v55  ;;  %6614 = vmatpush1.bf16.msra.mxu1 %v10598_v63  ;;  %v10608_v55 = vld [vmem:[#allocation40_spill] sm:$0xff]  ;;  %v10609_v63 = vld [vmem:[#allocation41_spill] sm:$0xff] }
 0x202   :  { %6584 = vmatprep.subr.bf16.mxu0 %v10599_v24  ;;  %6616 = vmatprep.subr.bf16.mxu1 %v10600_v5  ;;  %v10610_v24 = vld [vmem:[#allocation42_spill] sm:$0xff]  ;;  %v10611_v5 = vld [vmem:[#allocation43_spill] sm:$0xff] }
 0x205   :  { %6586 = vmatpush1.bf16.msra.mxu0 %v10601_v30  ;;  %6618 = vmatpush1.bf16.msra.mxu1 %v10602_v36  ;;  %v10612_v30 = vld [vmem:[#allocation44_spill] sm:$0xff]  ;;  %v10613_v36 = vld [vmem:[#allocation45_spill] sm:$0xff] }
 0x206   :  { %6588 = vmatprep.subr.bf16.mxu0 %v10603_v49  ;;  %6620 = vmatprep.subr.bf16.mxu1 %v10604_v61  ;;  %v10614_v49 = vld [vmem:[#allocation46_spill] sm:$0xff]  ;;  %v10615_v61 = vld [vmem:[#allocation47_spill] sm:$0xff] }
 0x209   :  { %6590 = vmatpush1.bf16.msra.mxu0 %v10605_v10  ;;  %6622 = vmatpush1.bf16.msra.mxu1 %v10606_v19  ;;  %v10616_v10 = vld [vmem:[#allocation48_spill] sm:$0xff] }
 0x20a   :  { %6592 = vmatprep.subr.bf16.mxu0 %v10607_v50  ;;  %6624 = vmatprep.subr.bf16.mxu1 %v10608_v55 }
 0x20d   :  { %6594 = vmatpush1.bf16.msra.mxu0 %v10609_v63  ;;  %6626 = vmatpush1.bf16.msra.mxu1 %v10610_v24 }
 0x20e   :  { %6596 = vmatprep.subr.bf16.mxu0 %v10611_v5  ;;  %6628 = vmatprep.subr.bf16.mxu1 %v10612_v30 }
 0x211   :  { %6598 = vmatpush1.bf16.msra.mxu0 %v10613_v36  ;;  %6630 = vmatpush1.bf16.msra.mxu1 %v10614_v49 }
 0x212   :  { %6632 = vmatprep.subr.bf16.mxu0 %v10615_v61  ;;  %6664 = vmatprep.subr.bf16.mxu1 %v10616_v10 }
 0x2a3   :  { %v1143_v19 = vpop.f32.mrb[12].mxu0  ;;  %v1214_v50 = vpop.f32.mrb[12].mxu1 }
 0x2a4   :  { %v1223_v46 = vrot.slane %v1143_v19, 6  ;;  %v1145_v55 = vpop.f32.mrb[13].mxu0  ;;  %v1216_v45 = vpop.f32.mrb[13].mxu1  ;;  %v1225_v61 = vrot.slane %v1214_v50, 6 }
 0x2a5   :  { %v1224_v63 = vrot.slane %v1145_v55, 6  ;;  %v1226_v34 = vrot.slane %v1216_v45, 6 }
 0x2a6   :  { %v1231_v24 = vadd.f32 %v1223_v46, %v10617_v44  ;;  %v1233_v10 = vadd.f32 %v1225_v61, %v9291_v1 }
 0x2a7   :  { %v1232_v5 = vadd.f32 %v1224_v63, %v9284_v56  ;;  %v1234_v49 = vadd.f32 %v1226_v34, %v9288_v40 }
 0x2a8   :  { %v6057_v39 = vmul.f32 -1.442695, %v1231_v24 }
 0x2a9   :  { %v6058_v30 = vmul.f32 -1.442695, %v1232_v5  ;;  %v6059_v36 = vmul.f32 -1.442695, %v1234_v49 }
 0x2aa   :  { %8196 = vpow2.f32 %v6057_v39  ;;  %v1255_v39 = vrot.slane %v9294_v54, 6 }
 0x2ab   :  { %8198 = vpow2.f32 %v6058_v30 }
 0x2ac   :  { %8200 = vpow2.f32 %v6059_v36 }
 0x2ad   :  { %8202 = vtanh.f32 %v1233_v10 }
 0x2b4   :  { %v8197_v33 = vpop.eup %8196 }
 0x2b5   :  { %v8199_v19 = vpop.eup %8198  ;;  %v1238_v32 = vadd.f32 1.0, %v8197_v33 }
 0x2b6   :  { %v1244_v55 = vadd.f32 1.0, %v8199_v19  ;;  %v8201_v46 = vpop.eup %8200 }
 0x2b7   :  { %8204 = vrcp.f32 %v1238_v32  ;;  %v8203_v63 = vpop.eup %8202  ;;  %v1251_v34 = vadd.f32 1.0, %v8201_v46 }
 0x2b8   :  { %8206 = vrcp.f32 %v1244_v55 }
 0x2b9   :  { %8208 = vrcp.f32 %v1251_v34 }
 0x2c1   :  { %v8205_v24 = vpop.eup %8204 }
 0x2c2   :  { %v8207_v45 = vpop.eup %8206  ;;  %v1258_v5 = vmul.f32 %v8205_v24, %v8203_v63 }
 0x2c3   :  { %v1257_v50 = vmul.f32 %v8207_v45, %v1255_v39  ;;  %v8209_v46 = vpop.eup %8208 }
 0x2c5   :  { %v9386_v30 = vadd.f32 %v1258_v5, %v1257_v50 }
 0x2c7   :  { %v1332_v49 = vpop.f32.mrb[14].mxu0  ;;  %v1403_v61 = vpop.f32.mrb[14].mxu1  ;;  %8210 = vtanh.f32 %v9386_v30 }
 0x2c8   :  { %v1412_v33 = vrot.slane %v1332_v49, 4  ;;  %v1334_v36 = vpop.f32.mrb[15].mxu0  ;;  %v1405_v32 = vpop.f32.mrb[15].mxu1  ;;  %v1414_v45 = vrot.slane %v1403_v61, 4 }
 0x2c9   :  { %v1413_v10 = vrot.slane %v1334_v36, 4  ;;  %v1415_v63 = vrot.slane %v1405_v32, 4 }
 0x2ca   :  { %v1420_v19 = vadd.f32 %v1412_v33, %v9296_v53  ;;  %v1422_v49 = vadd.f32 %v1414_v45, %v9307_v28 }
 0x2cb   :  { %v1421_v55 = vadd.f32 %v1413_v10, %v9298_v37  ;;  %v1423_v39 = vadd.f32 %v1415_v63, %v9303_v6 }
 0x2cc   :  { %v6060_v54 = vmul.f32 -1.442695, %v1420_v19 }
 0x2cd   :  { %v6061_v1 = vmul.f32 -1.442695, %v1421_v55  ;;  %v6062_v50 = vmul.f32 -1.442695, %v1423_v39  ;;  %v1444_v55 = vrot.slane %v9332_v12, 2 }
 0x2ce   :  { %8212 = vpow2.f32 %v6060_v54 }
 0x2cf   :  { %8214 = vpow2.f32 %v6061_v1 }
 0x2d0   :  { %8216 = vpow2.f32 %v6062_v50  ;;  %v10618_v50 = vld [vmem:[#allocation21_spill] sm:$0xff] }
 0x2d1   :  { %v8211_v24 = vpop.eup %8210  ;;  %8218 = vtanh.f32 %v1422_v49  ;;  %v10619_v49 = vld [vmem:[#allocation22_spill] sm:$0xff] }
 0x2d2   :  { %v1261_v5 = vmul.f32 %v8211_v24, %v8209_v46 }
 0x2d4   :  { %1262 = vst [vmem:[#allocation2] sm:$0xc] %v1261_v5  ;;  %v1453_v34 = vrot.slane %v1261_v5, 2 }
 0x2d6   :  { %1520 = vmatmul.mubr.f32.vlgmr.msra.gmra.mrb[16].mxu0 %v1453_v34  ;;  %1591 = vmatmul.mubr.f32.vlgmr.msra.gmra.mrb[16].mxu1 %v1453_v34 }
 0x2d7   :  { %6634 = vmatpush1.bf16.msra.mxu0 %v9106_v11  ;;  %6666 = vmatpush1.bf16.msra.mxu1 %v9110_v13 }
 0x2d8   :  { %v8213_v33 = vpop.eup %8212  ;;  %6636 = vmatprep.subr.bf16.mxu0 %v9112_v14  ;;  %6668 = vmatprep.subr.bf16.mxu1 %v9115_v27 }
 0x2d9   :  { %v8215_v1 = vpop.eup %8214  ;;  %v1427_v36 = vadd.f32 1.0, %v8213_v33  ;;  %1708 = vmatprep.mubr.f32.mxu0 %v10573_v3  ;;  %1779 = vmatprep.mubr.f32.mxu1 %v10573_v3  ;;  %v10620_v33 = vld [vmem:[#allocation23_spill] sm:$0xff] }
 0x2da   :  { %v1433_v61 = vadd.f32 1.0, %v8215_v1  ;;  %v8217_v32 = vpop.eup %8216  ;;  %v10621_v1 = vld [vmem:[#allocation24_spill] sm:$0xff] }
 0x2db   :  { %8220 = vrcp.f32 %v1427_v36  ;;  %6638 = vmatpush1.bf16.msra.mxu0 %v9120_v38  ;;  %6670 = vmatpush1.bf16.msra.mxu1 %v9124_v42  ;;  %v8219_v10 = vpop.eup %8218  ;;  %v1440_v46 = vadd.f32 1.0, %v8217_v32  ;;  %v10622_v36 = vld [vmem:[#allocation25_spill] sm:$0xff]  ;;  %v10624_v32 = vld [vmem:[#allocation27_spill] sm:$0xff] }
 0x2dc   :  { %8222 = vrcp.f32 %v1433_v61  ;;  %6640 = vmatprep.subr.bf16.mxu0 %v9126_v43  ;;  %6672 = vmatprep.subr.bf16.mxu1 %v9129_v52  ;;  %v10623_v61 = vld [vmem:[#allocation26_spill] sm:$0xff] }
 0x2dd   :  { %8224 = vrcp.f32 %v1440_v46  ;;  %v10630_v46 = vld [vmem:[#allocation33_spill] sm:$0xff] }
 0x2df   :  { %6642 = vmatpush1.bf16.msra.mxu0 %v9134_v2  ;;  %6674 = vmatpush1.bf16.msra.mxu1 %v10588_v48 }
 0x2e0   :  { %6644 = vmatprep.subr.bf16.mxu0 %v10589_v8  ;;  %6676 = vmatprep.subr.bf16.mxu1 %v10590_v57 }
 0x2e3   :  { %6646 = vmatpush1.bf16.msra.mxu0 %v10591_v58  ;;  %6678 = vmatpush1.bf16.msra.mxu1 %v10592_v23 }
 0x2e4   :  { %6648 = vmatprep.subr.bf16.mxu0 %v10593_v41  ;;  %6680 = vmatprep.subr.bf16.mxu1 %v10594_v59 }
 0x2e5   :  { %v8221_v19 = vpop.eup %8220 }
 0x2e6   :  { %v8223_v54 = vpop.eup %8222  ;;  %v1447_v63 = vmul.f32 %v8221_v19, %v8219_v10  ;;  %v10625_v10 = vld [vmem:[#allocation28_spill] sm:$0xff]  ;;  %v10626_v19 = vld [vmem:[#allocation29_spill] sm:$0xff] }
 0x2e7   :  { %v1446_v24 = vmul.f32 %v8223_v54, %v1444_v55  ;;  %6650 = vmatpush1.bf16.msra.mxu0 %v10595_v4  ;;  %6682 = vmatpush1.bf16.msra.mxu1 %v10596_v29  ;;  %v8225_v12 = vpop.eup %8224  ;;  %v10627_v55 = vld [vmem:[#allocation30_spill] sm:$0xff]  ;;  %v10628_v54 = vld [vmem:[#allocation31_spill] sm:$0xff] }
 0x2e8   :  { %6652 = vmatprep.subr.bf16.mxu0 %v9164_v25  ;;  %6684 = vmatprep.subr.bf16.mxu1 %v10597_v31 }
 0x2e9   :  { %v9416_v39 = vadd.f32 %v1447_v63, %v1446_v24  ;;  %v10629_v63 = vld [vmem:[#allocation32_spill] sm:$0xff]  ;;  %v10631_v24 = vld [vmem:[#allocation34_spill] sm:$0xff] }
 0x2eb   :  { %6654 = vmatpush1.bf16.msra.mxu0 %v9170_v47  ;;  %6686 = vmatpush1.bf16.msra.mxu1 %v9174_v0  ;;  %8226 = vtanh.f32 %v9416_v39 }
 0x2ec   :  { %6656 = vmatprep.subr.bf16.mxu0 %v9176_v35  ;;  %6688 = vmatprep.subr.bf16.mxu1 %v9179_v9 }
 0x2ef   :  { %6658 = vmatpush1.bf16.msra.mxu0 %v9182_v15  ;;  %6690 = vmatpush1.bf16.msra.mxu1 %v9186_v7 }
 0x2f0   :  { %6660 = vmatprep.subr.bf16.mxu0 %v9188_v18  ;;  %6692 = vmatprep.subr.bf16.mxu1 %v9191_v51 }
 0x2f3   :  { %6662 = vmatpush1.bf16.msra.mxu0 %v9194_v62  ;;  %6694 = vmatpush1.bf16.msra.mxu1 %v9198_v60 }
 0x2f4   :  { %6696 = vmatprep.subr.bf16.mxu0 %v8995_v16  ;;  %6728 = vmatprep.subr.bf16.mxu1 %v8997_v17 }
 0x2f5   :  { %v8227_v45 = vpop.eup %8226 }
 0x2f6   :  { %v1450_v5 = vmul.f32 %v8227_v45, %v8225_v12  ;;  %v10632_v12 = vld [vmem:[#allocation35_spill] sm:$0xff]  ;;  %v10633_v45 = vld [vmem:[#allocation36_spill] sm:$0xff] }
 0x2f8   :  { %1451 = vst [vmem:[#allocation2 + $0x18] sm:$0x30] %v1450_v5  ;;  %v1642_v34 = vrot.slane %v1450_v5, 4  ;;  %v10634_v5 = vld [vmem:[#allocation37_spill] sm:$0xff] }
 0x2fa   :  { %1709 = vmatmul.mubr.f32.vlgmr.msra.gmra.mrb[18].mxu0 %v1642_v34  ;;  %1780 = vmatmul.mubr.f32.vlgmr.msra.gmra.mrb[18].mxu1 %v1642_v34  ;;  %v10635_v34 = vld [vmem:[#allocation38_spill] sm:$0xff] }
 0x2fb   :  { %6698 = vmatpush1.bf16.msra.mxu0 %v8999_v20  ;;  %6730 = vmatpush1.bf16.msra.mxu1 %v9001_v21 }
 0x2fc   :  { %6700 = vmatprep.subr.bf16.mxu0 %v9003_v22  ;;  %6732 = vmatprep.subr.bf16.mxu1 %v9007_v26 }
 0x2fd   :  { %1897 = vmatprep.mubr.f32.mxu0 %v10573_v3  ;;  %1968 = vmatprep.mubr.f32.mxu1 %v10573_v3 }
 0x2ff   :  { %6702 = vmatpush1.bf16.msra.mxu0 %v10618_v50  ;;  %6734 = vmatpush1.bf16.msra.mxu1 %v10619_v49 }
 0x300   :  { %6704 = vmatprep.subr.bf16.mxu0 %v10620_v33  ;;  %6736 = vmatprep.subr.bf16.mxu1 %v10621_v1 }
 0x303   :  { %6706 = vmatpush1.bf16.msra.mxu0 %v10622_v36  ;;  %6738 = vmatpush1.bf16.msra.mxu1 %v10623_v61 }
 0x304   :  { %6708 = vmatprep.subr.bf16.mxu0 %v10624_v32  ;;  %6740 = vmatprep.subr.bf16.mxu1 %v10625_v10  ;;  %v10636_v10 = vld [vmem:[#allocation39_spill] sm:$0xff] }
 0x307   :  { %6710 = vmatpush1.bf16.msra.mxu0 %v10626_v19  ;;  %6742 = vmatpush1.bf16.msra.mxu1 %v10627_v55  ;;  %v10637_v19 = vld [vmem:[#allocation40_spill] sm:$0xff]  ;;  %v10638_v55 = vld [vmem:[#allocation41_spill] sm:$0xff] }
 0x308   :  { %6712 = vmatprep.subr.bf16.mxu0 %v10628_v54  ;;  %6744 = vmatprep.subr.bf16.mxu1 %v10629_v63  ;;  %v10639_v54 = vld [vmem:[#allocation42_spill] sm:$0xff]  ;;  %v10640_v63 = vld [vmem:[#allocation43_spill] sm:$0xff] }
 0x30b   :  { %6714 = vmatpush1.bf16.msra.mxu0 %v10630_v46  ;;  %6746 = vmatpush1.bf16.msra.mxu1 %v10631_v24  ;;  %v10641_v46 = vld [vmem:[#allocation44_spill] sm:$0xff]  ;;  %v10642_v24 = vld [vmem:[#allocation45_spill] sm:$0xff] }
 0x30c   :  { %6716 = vmatprep.subr.bf16.mxu0 %v10632_v12  ;;  %6748 = vmatprep.subr.bf16.mxu1 %v10633_v45  ;;  %v10643_v12 = vld [vmem:[#allocation46_spill] sm:$0xff]  ;;  %v10644_v45 = vld [vmem:[#allocation47_spill] sm:$0xff] }
 0x30f   :  { %6718 = vmatpush1.bf16.msra.mxu0 %v10634_v5  ;;  %6750 = vmatpush1.bf16.msra.mxu1 %v10635_v34  ;;  %v10645_v5 = vld [vmem:[#allocation48_spill] sm:$0xff] }
 0x310   :  { %6720 = vmatprep.subr.bf16.mxu0 %v10636_v10  ;;  %6752 = vmatprep.subr.bf16.mxu1 %v10637_v19 }
 0x313   :  { %6722 = vmatpush1.bf16.msra.mxu0 %v10638_v55  ;;  %6754 = vmatpush1.bf16.msra.mxu1 %v10639_v54 }
 0x314   :  { %6724 = vmatprep.subr.bf16.mxu0 %v10640_v63  ;;  %6756 = vmatprep.subr.bf16.mxu1 %v10641_v46 }
 0x317   :  { %6726 = vmatpush1.bf16.msra.mxu0 %v10642_v24  ;;  %6758 = vmatpush1.bf16.msra.mxu1 %v10643_v12 }
 0x318   :  { %6760 = vmatprep.subr.bf16.mxu0 %v10644_v45  ;;  %6792 = vmatprep.subr.bf16.mxu1 %v10645_v5  ;;  %v10646_v5 = vld [vmem:[#allocation72_spill] sm:$0xff] }
 0x3a9   :  { %v1521_v34 = vpop.f32.mrb[16].mxu0  ;;  %v1592_v10 = vpop.f32.mrb[16].mxu1 }
 0x3aa   :  { %v1601_v32 = vrot.slane %v1521_v34, 4  ;;  %v1523_v19 = vpop.f32.mrb[17].mxu0  ;;  %v1594_v61 = vpop.f32.mrb[17].mxu1  ;;  %v1603_v45 = vrot.slane %v1592_v10, 4 }
 0x3ab   :  { %v1602_v55 = vrot.slane %v1523_v19, 4  ;;  %v1604_v1 = vrot.slane %v1594_v61, 4 }
 0x3ac   :  { %v1609_v54 = vadd.f32 %v1601_v32, %v10617_v44  ;;  %v1611_v33 = vadd.f32 %v1603_v45, %v10646_v5 }
 0x3ad   :  { %v1610_v63 = vadd.f32 %v1602_v55, %v9284_v56  ;;  %v1612_v12 = vadd.f32 %v1604_v1, %v9288_v40 }
 0x3ae   :  { %v6063_v36 = vmul.f32 -1.442695, %v1609_v54 }
 0x3af   :  { %v6064_v46 = vmul.f32 -1.442695, %v1610_v63  ;;  %v6065_v24 = vmul.f32 -1.442695, %v1612_v12 }
 0x3b0   :  { %8228 = vpow2.f32 %v6063_v36  ;;  %v1633_v36 = vrot.slane %v9386_v30, 6 }
 0x3b1   :  { %8230 = vpow2.f32 %v6064_v46 }
 0x3b2   :  { %8232 = vpow2.f32 %v6065_v24 }
 0x3b3   :  { %8234 = vtanh.f32 %v1611_v33 }
 0x3ba   :  { %v8229_v49 = vpop.eup %8228 }
 0x3bb   :  { %v8231_v34 = vpop.eup %8230  ;;  %v1616_v50 = vadd.f32 1.0, %v8229_v49 }
 0x3bc   :  { %v1622_v19 = vadd.f32 1.0, %v8231_v34  ;;  %v8233_v32 = vpop.eup %8232 }
 0x3bd   :  { %8236 = vrcp.f32 %v1616_v50  ;;  %v8235_v55 = vpop.eup %8234  ;;  %v1629_v1 = vadd.f32 1.0, %v8233_v32 }
 0x3be   :  { %8238 = vrcp.f32 %v1622_v19 }
 0x3bf   :  { %8240 = vrcp.f32 %v1629_v1 }
 0x3c7   :  { %v8237_v54 = vpop.eup %8236 }
 0x3c8   :  { %v8239_v61 = vpop.eup %8238  ;;  %v1636_v63 = vmul.f32 %v8237_v54, %v8235_v55 }
 0x3c9   :  { %v1635_v10 = vmul.f32 %v8239_v61, %v1633_v36  ;;  %v8241_v32 = vpop.eup %8240 }
 0x3cb   :  { %v9470_v46 = vadd.f32 %v1636_v63, %v1635_v10 }
 0x3cd   :  { %v1710_v12 = vpop.f32.mrb[18].mxu0  ;;  %v1781_v45 = vpop.f32.mrb[18].mxu1  ;;  %8242 = vtanh.f32 %v9470_v46 }
 0x3ce   :  { %v1790_v49 = vrot.slane %v1710_v12, 6  ;;  %v1712_v33 = vpop.f32.mrb[19].mxu0  ;;  %v1783_v50 = vpop.f32.mrb[19].mxu1  ;;  %v1792_v61 = vrot.slane %v1781_v45, 6 }
 0x3cf   :  { %v1791_v24 = vrot.slane %v1712_v33, 6  ;;  %v1793_v55 = vrot.slane %v1783_v50, 6 }
 0x3d0   :  { %v1798_v34 = vadd.f32 %v1790_v49, %v9296_v53  ;;  %v1800_v12 = vadd.f32 %v1792_v61, %v9307_v28 }
 0x3d1   :  { %v1799_v19 = vadd.f32 %v1791_v24, %v9298_v37  ;;  %v1801_v36 = vadd.f32 %v1793_v55, %v9303_v6 }
 0x3d2   :  { %v6066_v30 = vmul.f32 -1.442695, %v1798_v34 }
 0x3d3   :  { %v6067_v5 = vmul.f32 -1.442695, %v1799_v19  ;;  %v6068_v10 = vmul.f32 -1.442695, %v1801_v36  ;;  %v1822_v19 = vrot.slane %v9416_v39, 2 }
 0x3d4   :  { %8244 = vpow2.f32 %v6066_v30 }
 0x3d5   :  { %8246 = vpow2.f32 %v6067_v5 }
 0x3d6   :  { %8248 = vpow2.f32 %v6068_v10  ;;  %v10647_v10 = vld [vmem:[#allocation21_spill] sm:$0xff] }
 0x3d7   :  { %v8243_v54 = vpop.eup %8242  ;;  %8250 = vtanh.f32 %v1800_v12  ;;  %v10648_v12 = vld [vmem:[#allocation22_spill] sm:$0xff] }
 0x3d8   :  { %v1639_v63 = vmul.f32 %v8243_v54, %v8241_v32 }
 0x3da   :  { %1640 = vst [vmem:[#allocation2] sm:$0x30] %v1639_v63  ;;  %v1831_v1 = vrot.slane %v1639_v63, 4 }
 0x3dc   :  { %1898 = vmatmul.mubr.f32.vlgmr.msra.gmra.mrb[20].mxu0 %v1831_v1  ;;  %1969 = vmatmul.mubr.f32.vlgmr.msra.gmra.mrb[20].mxu1 %v1831_v1 }
 0x3dd   :  { %6762 = vmatpush1.bf16.msra.mxu0 %v9106_v11  ;;  %6794 = vmatpush1.bf16.msra.mxu1 %v9110_v13 }
 0x3de   :  { %v8245_v49 = vpop.eup %8244  ;;  %6764 = vmatprep.subr.bf16.mxu0 %v9112_v14  ;;  %6796 = vmatprep.subr.bf16.mxu1 %v9115_v27 }
 0x3df   :  { %v8247_v5 = vpop.eup %8246  ;;  %v1805_v33 = vadd.f32 1.0, %v8245_v49  ;;  %2086 = vmatprep.mubr.f32.mxu0 %v10573_v3  ;;  %2157 = vmatprep.mubr.f32.mxu1 %v10573_v3  ;;  %v10649_v49 = vld [vmem:[#allocation23_spill] sm:$0xff] }
 0x3e0   :  { %v1811_v45 = vadd.f32 1.0, %v8247_v5  ;;  %v8249_v50 = vpop.eup %8248  ;;  %v10650_v5 = vld [vmem:[#allocation24_spill] sm:$0xff] }
 0x3e1   :  { %8252 = vrcp.f32 %v1805_v33  ;;  %6766 = vmatpush1.bf16.msra.mxu0 %v9120_v38  ;;  %6798 = vmatpush1.bf16.msra.mxu1 %v9124_v42  ;;  %v8251_v24 = vpop.eup %8250  ;;  %v1818_v32 = vadd.f32 1.0, %v8249_v50  ;;  %v10651_v33 = vld [vmem:[#allocation25_spill] sm:$0xff]  ;;  %v10653_v50 = vld [vmem:[#allocation27_spill] sm:$0xff] }
 0x3e2   :  { %8254 = vrcp.f32 %v1811_v45  ;;  %6768 = vmatprep.subr.bf16.mxu0 %v9126_v43  ;;  %6800 = vmatprep.subr.bf16.mxu1 %v9129_v52  ;;  %v10652_v45 = vld [vmem:[#allocation26_spill] sm:$0xff] }
 0x3e3   :  { %8256 = vrcp.f32 %v1818_v32  ;;  %v10659_v32 = vld [vmem:[#allocation33_spill] sm:$0xff] }
 0x3e5   :  { %6770 = vmatpush1.bf16.msra.mxu0 %v9134_v2  ;;  %6802 = vmatpush1.bf16.msra.mxu1 %v10588_v48 }
 0x3e6   :  { %6772 = vmatprep.subr.bf16.mxu0 %v10589_v8  ;;  %6804 = vmatprep.subr.bf16.mxu1 %v10590_v57 }
 0x3e9   :  { %6774 = vmatpush1.bf16.msra.mxu0 %v10591_v58  ;;  %6806 = vmatpush1.bf16.msra.mxu1 %v10592_v23 }
 0x3ea   :  { %6776 = vmatprep.subr.bf16.mxu0 %v10593_v41  ;;  %6808 = vmatprep.subr.bf16.mxu1 %v10594_v59 }
 0x3eb   :  { %v8253_v34 = vpop.eup %8252 }
 0x3ec   :  { %v8255_v30 = vpop.eup %8254  ;;  %v1825_v55 = vmul.f32 %v8253_v34, %v8251_v24  ;;  %v10654_v24 = vld [vmem:[#allocation28_spill] sm:$0xff]  ;;  %v10655_v34 = vld [vmem:[#allocation29_spill] sm:$0xff] }
 0x3ed   :  { %v1824_v54 = vmul.f32 %v8255_v30, %v1822_v19  ;;  %6778 = vmatpush1.bf16.msra.mxu0 %v10595_v4  ;;  %6810 = vmatpush1.bf16.msra.mxu1 %v10596_v29  ;;  %v8257_v39 = vpop.eup %8256  ;;  %v10656_v19 = vld [vmem:[#allocation30_spill] sm:$0xff]  ;;  %v10657_v30 = vld [vmem:[#allocation31_spill] sm:$0xff] }
 0x3ee   :  { %6780 = vmatprep.subr.bf16.mxu0 %v9164_v25  ;;  %6812 = vmatprep.subr.bf16.mxu1 %v10597_v31 }
 0x3ef   :  { %v9500_v36 = vadd.f32 %v1825_v55, %v1824_v54  ;;  %v10658_v55 = vld [vmem:[#allocation32_spill] sm:$0xff]  ;;  %v10660_v54 = vld [vmem:[#allocation34_spill] sm:$0xff] }
 0x3f1   :  { %6782 = vmatpush1.bf16.msra.mxu0 %v9170_v47  ;;  %6814 = vmatpush1.bf16.msra.mxu1 %v9174_v0  ;;  %8258 = vtanh.f32 %v9500_v36 }
 0x3f2   :  { %6784 = vmatprep.subr.bf16.mxu0 %v9176_v35  ;;  %6816 = vmatprep.subr.bf16.mxu1 %v9179_v9 }
 0x3f5   :  { %6786 = vmatpush1.bf16.msra.mxu0 %v9182_v15  ;;  %6818 = vmatpush1.bf16.msra.mxu1 %v9186_v7 }
 0x3f6   :  { %6788 = vmatprep.subr.bf16.mxu0 %v9188_v18  ;;  %6820 = vmatprep.subr.bf16.mxu1 %v9191_v51 }
 0x3f9   :  { %6790 = vmatpush1.bf16.msra.mxu0 %v9194_v62  ;;  %6822 = vmatpush1.bf16.msra.mxu1 %v9198_v60 }
 0x3fa   :  { %6824 = vmatprep.subr.bf16.mxu0 %v8995_v16  ;;  %6856 = vmatprep.subr.bf16.mxu1 %v8997_v17 }
 0x3fb   :  { %v8259_v61 = vpop.eup %8258 }
 0x3fc   :  { %v1828_v63 = vmul.f32 %v8259_v61, %v8257_v39  ;;  %v10661_v39 = vld [vmem:[#allocation35_spill] sm:$0xff]  ;;  %v10662_v61 = vld [vmem:[#allocation36_spill] sm:$0xff] }
 0x3fe   :  { %1829 = vst [vmem:[#allocation2 + $0x18] sm:$0xc] %v1828_v63  ;;  %v2020_v1 = vrot.slane %v1828_v63, 2  ;;  %v10663_v63 = vld [vmem:[#allocation37_spill] sm:$0xff] }
 0x400   :  { %2087 = vmatmul.mubr.f32.vlgmr.msra.gmra.mrb[22].mxu0 %v2020_v1  ;;  %2158 = vmatmul.mubr.f32.vlgmr.msra.gmra.mrb[22].mxu1 %v2020_v1  ;;  %v10664_v1 = vld [vmem:[#allocation38_spill] sm:$0xff] }
 0x401   :  { %6826 = vmatpush1.bf16.msra.mxu0 %v8999_v20  ;;  %6858 = vmatpush1.bf16.msra.mxu1 %v9001_v21 }
 0x402   :  { %6828 = vmatprep.subr.bf16.mxu0 %v9003_v22  ;;  %6860 = vmatprep.subr.bf16.mxu1 %v9007_v26 }
 0x403   :  { %2263 = vmatprep.mubr.f32.mxu0 %v10573_v3  ;;  %2334 = vmatprep.mubr.f32.mxu1 %v10573_v3 }
 0x405   :  { %6830 = vmatpush1.bf16.msra.mxu0 %v10647_v10  ;;  %6862 = vmatpush1.bf16.msra.mxu1 %v10648_v12 }
 0x406   :  { %6832 = vmatprep.subr.bf16.mxu0 %v10649_v49  ;;  %6864 = vmatprep.subr.bf16.mxu1 %v10650_v5 }
 0x409   :  { %6834 = vmatpush1.bf16.msra.mxu0 %v10651_v33  ;;  %6866 = vmatpush1.bf16.msra.mxu1 %v10652_v45 }
 0x40a   :  { %6836 = vmatprep.subr.bf16.mxu0 %v10653_v50  ;;  %6868 = vmatprep.subr.bf16.mxu1 %v10654_v24  ;;  %v10665_v24 = vld [vmem:[#allocation39_spill] sm:$0xff] }
 0x40d   :  { %6838 = vmatpush1.bf16.msra.mxu0 %v10655_v34  ;;  %6870 = vmatpush1.bf16.msra.mxu1 %v10656_v19  ;;  %v10666_v34 = vld [vmem:[#allocation40_spill] sm:$0xff]  ;;  %v10667_v19 = vld [vmem:[#allocation41_spill] sm:$0xff] }
 0x40e   :  { %6840 = vmatprep.subr.bf16.mxu0 %v10657_v30  ;;  %6872 = vmatprep.subr.bf16.mxu1 %v10658_v55  ;;  %v10668_v30 = vld [vmem:[#allocation42_spill] sm:$0xff]  ;;  %v10669_v55 = vld [vmem:[#allocation43_spill] sm:$0xff] }
 0x411   :  { %6842 = vmatpush1.bf16.msra.mxu0 %v10659_v32  ;;  %6874 = vmatpush1.bf16.msra.mxu1 %v10660_v54  ;;  %v10670_v32 = vld [vmem:[#allocation44_spill] sm:$0xff]  ;;  %v10671_v54 = vld [vmem:[#allocation45_spill] sm:$0xff] }
 0x412   :  { %6844 = vmatprep.subr.bf16.mxu0 %v10661_v39  ;;  %6876 = vmatprep.subr.bf16.mxu1 %v10662_v61  ;;  %v10672_v39 = vld [vmem:[#allocation46_spill] sm:$0xff]  ;;  %v10673_v61 = vld [vmem:[#allocation47_spill] sm:$0xff] }
 0x415   :  { %6846 = vmatpush1.bf16.msra.mxu0 %v10663_v63  ;;  %6878 = vmatpush1.bf16.msra.mxu1 %v10664_v1  ;;  %v10674_v63 = vld [vmem:[#allocation48_spill] sm:$0xff] }
 0x416   :  { %6848 = vmatprep.subr.bf16.mxu0 %v10665_v24  ;;  %6880 = vmatprep.subr.bf16.mxu1 %v10666_v34 }
 0x419   :  { %6850 = vmatpush1.bf16.msra.mxu0 %v10667_v19  ;;  %6882 = vmatpush1.bf16.msra.mxu1 %v10668_v30 }
 0x41a   :  { %6852 = vmatprep.subr.bf16.mxu0 %v10669_v55  ;;  %6884 = vmatprep.subr.bf16.mxu1 %v10670_v32 }
 0x41d   :  { %6854 = vmatpush1.bf16.msra.mxu0 %v10671_v54  ;;  %6886 = vmatpush1.bf16.msra.mxu1 %v10672_v39 }
 0x41e   :  { %6888 = vmatprep.subr.bf16.mxu0 %v10673_v61  ;;  %6920 = vmatprep.subr.bf16.mxu1 %v10674_v63  ;;  %v10675_v63 = vld [vmem:[#allocation72_spill] sm:$0xff] }
 0x4af   :  { %v1899_v1 = vpop.f32.mrb[20].mxu0  ;;  %v1970_v24 = vpop.f32.mrb[20].mxu1 }
 0x4b0   :  { %v1979_v50 = vrot.slane %v1899_v1, 2  ;;  %v1901_v34 = vpop.f32.mrb[21].mxu0  ;;  %v1972_v45 = vpop.f32.mrb[21].mxu1  ;;  %v1981_v61 = vrot.slane %v1970_v24, 2 }
 0x4b1   :  { %v1980_v19 = vrot.slane %v1901_v34, 2  ;;  %v1982_v5 = vrot.slane %v1972_v45, 2 }
 0x4b2   :  { %v1987_v30 = vadd.f32 %v1979_v50, %v10617_v44  ;;  %v1989_v49 = vadd.f32 %v1981_v61, %v10675_v63 }
 0x4b3   :  { %v1988_v55 = vadd.f32 %v1980_v19, %v9284_v56  ;;  %v1990_v39 = vadd.f32 %v1982_v5, %v9288_v40 }
 0x4b4   :  { %v6069_v33 = vmul.f32 -1.442695, %v1987_v30 }
 0x4b5   :  { %v6070_v32 = vmul.f32 -1.442695, %v1988_v55  ;;  %v6071_v54 = vmul.f32 -1.442695, %v1990_v39 }
 0x4b6   :  { %8260 = vpow2.f32 %v6069_v33  ;;  %v2011_v33 = vrot.slane %v9470_v46, 6 }
 0x4b7   :  { %8262 = vpow2.f32 %v6070_v32 }
 0x4b8   :  { %8264 = vpow2.f32 %v6071_v54 }
 0x4b9   :  { %8266 = vtanh.f32 %v1989_v49 }
 0x4c0   :  { %v8261_v12 = vpop.eup %8260 }
 0x4c1   :  { %v8263_v1 = vpop.eup %8262  ;;  %v1994_v10 = vadd.f32 1.0, %v8261_v12 }
 0x4c2   :  { %v2000_v34 = vadd.f32 1.0, %v8263_v1  ;;  %v8265_v44 = vpop.eup %8264 }
 0x4c3   :  { %8268 = vrcp.f32 %v1994_v10  ;;  %v8267_v56 = vpop.eup %8266  ;;  %v2007_v40 = vadd.f32 1.0, %v8265_v44 }
 0x4c4   :  { %8270 = vrcp.f32 %v2000_v34 }
 0x4c5   :  { %8272 = vrcp.f32 %v2007_v40 }
 0x4cd   :  { %v8269_v50 = vpop.eup %8268 }
 0x4ce   :  { %v8271_v45 = vpop.eup %8270  ;;  %v2014_v19 = vmul.f32 %v8269_v50, %v8267_v56 }
 0x4cf   :  { %v2013_v5 = vmul.f32 %v8271_v45, %v2011_v33  ;;  %v8273_v61 = vpop.eup %8272 }
 0x4d1   :  { %v9554_v24 = vadd.f32 %v2014_v19, %v2013_v5  ;;  %v2188_v19 = vrot.slane %v9500_v36, 2 }
 0x4d3   :  { %v2088_v30 = vpop.f32.mrb[22].mxu0  ;;  %v2159_v55 = vpop.f32.mrb[22].mxu1  ;;  %8274 = vtanh.f32 %v9554_v24 }
 0x4d4   :  { %v2164_v12 = vadd.f32 %v2088_v30, %v9296_v53  ;;  %v2090_v10 = vpop.f32.mrb[23].mxu0  ;;  %v2161_v49 = vpop.f32.mrb[23].mxu1  ;;  %v2166_v44 = vadd.f32 %v2159_v55, %v9307_v28 }
 0x4d5   :  { %v2165_v32 = vadd.f32 %v2090_v10, %v9298_v37  ;;  %v2167_v46 = vadd.f32 %v2161_v49, %v9303_v6 }
 0x4d6   :  { %v6072_v54 = vmul.f32 -1.442695, %v2164_v12 }
 0x4d7   :  { %v6073_v39 = vmul.f32 -1.442695, %v2165_v32  ;;  %v6074_v34 = vmul.f32 -1.442695, %v2167_v46  ;;  %v10676_v32 = vld [vmem:[#allocation21_spill] sm:$0xff]  ;;  %v10679_v46 = vld [vmem:[#allocation24_spill] sm:$0xff] }
 0x4d8   :  { %8276 = vpow2.f32 %v6072_v54  ;;  %v10677_v54 = vld [vmem:[#allocation22_spill] sm:$0xff] }
 0x4d9   :  { %8278 = vpow2.f32 %v6073_v39  ;;  %v10678_v39 = vld [vmem:[#allocation23_spill] sm:$0xff] }
 0x4da   :  { %8280 = vpow2.f32 %v6074_v34  ;;  %v10683_v34 = vld [vmem:[#allocation28_spill] sm:$0xff] }
 0x4db   :  { %8282 = vtanh.f32 %v2166_v44  ;;  %v10684_v44 = vld [vmem:[#allocation29_spill] sm:$0xff] }
 0x4dd   :  { %v8275_v63 = vpop.eup %8274 }
 0x4de   :  { %v2017_v1 = vmul.f32 %v8275_v63, %v8273_v61  ;;  %v10680_v61 = vld [vmem:[#allocation25_spill] sm:$0xff]  ;;  %v10681_v63 = vld [vmem:[#allocation26_spill] sm:$0xff] }
 0x4e0   :  { %2018 = vst [vmem:[#allocation2] sm:$0xc0] %v2017_v1  ;;  %v2197_v56 = vrot.slane %v2017_v1, 6  ;;  %v10682_v1 = vld [vmem:[#allocation27_spill] sm:$0xff] }
 0x4e2   :  { %v8277_v50 = vpop.eup %8276  ;;  %2264 = vmatmul.mubr.f32.vlgmr.msra.gmra.mrb[24].mxu0 %v2197_v56  ;;  %2335 = vmatmul.mubr.f32.vlgmr.msra.gmra.mrb[24].mxu1 %v2197_v56  ;;  %v10685_v56 = vld [vmem:[#allocation30_spill] sm:$0xff] }
 0x4e3   :  { %v8279_v53 = vpop.eup %8278  ;;  %v2171_v33 = vadd.f32 1.0, %v8277_v50  ;;  %6890 = vmatpush1.bf16.msra.mxu0 %v9106_v11  ;;  %6922 = vmatpush1.bf16.msra.mxu1 %v9110_v13  ;;  %v10686_v50 = vld [vmem:[#allocation31_spill] sm:$0xff] }
 0x4e4   :  { %v2177_v37 = vadd.f32 1.0, %v8279_v53  ;;  %6892 = vmatprep.subr.bf16.mxu0 %v9112_v14  ;;  %6924 = vmatprep.subr.bf16.mxu1 %v9115_v27  ;;  %v8281_v6 = vpop.eup %8280  ;;  %v10687_v53 = vld [vmem:[#allocation32_spill] sm:$0xff] }
 0x4e5   :  { %8284 = vrcp.f32 %v2171_v33  ;;  %2437 = vmatprep.mubr.f32.mxu0 %v10573_v3  ;;  %2508 = vmatprep.mubr.f32.mxu1 %v10573_v3  ;;  %v8283_v28 = vpop.eup %8282  ;;  %v2184_v30 = vadd.f32 1.0, %v8281_v6  ;;  %v10688_v33 = vld [vmem:[#allocation33_spill] sm:$0xff]  ;;  %v10690_v6 = vld [vmem:[#allocation35_spill] sm:$0xff] }
 0x4e6   :  { %8286 = vrcp.f32 %v2177_v37  ;;  %v10689_v37 = vld [vmem:[#allocation34_spill] sm:$0xff] }
 0x4e7   :  { %6894 = vmatpush1.bf16.msra.mxu0 %v9120_v38  ;;  %6926 = vmatpush1.bf16.msra.mxu1 %v9124_v42  ;;  %8288 = vrcp.f32 %v2184_v30  ;;  %v10696_v30 = vld [vmem:[#allocation41_spill] sm:$0xff] }
 0x4e8   :  { %6896 = vmatprep.subr.bf16.mxu0 %v9126_v43  ;;  %6928 = vmatprep.subr.bf16.mxu1 %v9129_v52 }
 0x4eb   :  { %6898 = vmatpush1.bf16.msra.mxu0 %v9134_v2  ;;  %6930 = vmatpush1.bf16.msra.mxu1 %v10588_v48 }
 0x4ec   :  { %6900 = vmatprep.subr.bf16.mxu0 %v10589_v8  ;;  %6932 = vmatprep.subr.bf16.mxu1 %v10590_v57 }
 0x4ef   :  { %v8285_v45 = vpop.eup %8284  ;;  %6902 = vmatpush1.bf16.msra.mxu0 %v10591_v58  ;;  %6934 = vmatpush1.bf16.msra.mxu1 %v10592_v23 }
 0x4f0   :  { %v8287_v40 = vpop.eup %8286  ;;  %v2191_v5 = vmul.f32 %v8285_v45, %v8283_v28  ;;  %6904 = vmatprep.subr.bf16.mxu0 %v10593_v41  ;;  %6936 = vmatprep.subr.bf16.mxu1 %v10594_v59  ;;  %v10691_v28 = vld [vmem:[#allocation36_spill] sm:$0xff]  ;;  %v10692_v45 = vld [vmem:[#allocation37_spill] sm:$0xff] }
 0x4f1   :  { %v2190_v55 = vmul.f32 %v8287_v40, %v2188_v19  ;;  %v8289_v36 = vpop.eup %8288  ;;  %v10693_v19 = vld [vmem:[#allocation38_spill] sm:$0xff]  ;;  %v10694_v40 = vld [vmem:[#allocation39_spill] sm:$0xff] }
 0x4f3   :  { %v9580_v12 = vadd.f32 %v2191_v5, %v2190_v55  ;;  %6906 = vmatpush1.bf16.msra.mxu0 %v10595_v4  ;;  %6938 = vmatpush1.bf16.msra.mxu1 %v10596_v29  ;;  %v10695_v5 = vld [vmem:[#allocation40_spill] sm:$0xff]  ;;  %v10697_v55 = vld [vmem:[#allocation42_spill] sm:$0xff] }
 0x4f4   :  { %6908 = vmatprep.subr.bf16.mxu0 %v9164_v25  ;;  %6940 = vmatprep.subr.bf16.mxu1 %v10597_v31 }
 0x4f5   :  { %8290 = vtanh.f32 %v9580_v12 }
 0x4f7   :  { %6910 = vmatpush1.bf16.msra.mxu0 %v9170_v47  ;;  %6942 = vmatpush1.bf16.msra.mxu1 %v9174_v0 }
 0x4f8   :  { %6912 = vmatprep.subr.bf16.mxu0 %v9176_v35  ;;  %6944 = vmatprep.subr.bf16.mxu1 %v9179_v9 }
 0x4fb   :  { %6914 = vmatpush1.bf16.msra.mxu0 %v9182_v15  ;;  %6946 = vmatpush1.bf16.msra.mxu1 %v9186_v7 }
 0x4fc   :  { %6916 = vmatprep.subr.bf16.mxu0 %v9188_v18  ;;  %6948 = vmatprep.subr.bf16.mxu1 %v9191_v51 }
 0x4ff   :  { %v8291_v10 = vpop.eup %8290  ;;  %6918 = vmatpush1.bf16.msra.mxu0 %v9194_v62  ;;  %6950 = vmatpush1.bf16.msra.mxu1 %v9198_v60 }
 0x500   :  { %v2194_v49 = vmul.f32 %v8291_v10, %v8289_v36  ;;  %6952 = vmatprep.subr.bf16.mxu0 %v8995_v16  ;;  %6984 = vmatprep.subr.bf16.mxu1 %v8997_v17  ;;  %v10698_v36 = vld [vmem:[#allocation43_spill] sm:$0xff]  ;;  %v10699_v10 = vld [vmem:[#allocation44_spill] sm:$0xff] }
 0x502   :  { %2195 = vst [vmem:[#allocation2 + $0x18] sm:$0x3] %v2194_v49  ;;  %2438 = vmatmul.mubr.f32.vlgmr.msra.gmra.mrb[26].mxu0 %v2194_v49  ;;  %2509 = vmatmul.mubr.f32.vlgmr.msra.gmra.mrb[26].mxu1 %v2194_v49  ;;  %v10700_v49 = vld [vmem:[#allocation45_spill] sm:$0xff] }
 0x503   :  { %6954 = vmatpush1.bf16.msra.mxu0 %v8999_v20  ;;  %6986 = vmatpush1.bf16.msra.mxu1 %v9001_v21 }
 0x504   :  { %6956 = vmatprep.subr.bf16.mxu0 %v9003_v22  ;;  %6988 = vmatprep.subr.bf16.mxu1 %v9007_v26 }
 0x505   :  { %2623 = vmatprep.mubr.f32.mxu0 %v10573_v3  ;;  %2694 = vmatprep.mubr.f32.mxu1 %v10573_v3 }
 0x507   :  { %6958 = vmatpush1.bf16.msra.mxu0 %v10676_v32  ;;  %6990 = vmatpush1.bf16.msra.mxu1 %v10677_v54 }
 0x508   :  { %6960 = vmatprep.subr.bf16.mxu0 %v10678_v39  ;;  %6992 = vmatprep.subr.bf16.mxu1 %v10679_v46 }
 0x50b   :  { %6962 = vmatpush1.bf16.msra.mxu0 %v10680_v61  ;;  %6994 = vmatpush1.bf16.msra.mxu1 %v10681_v63 }
 0x50c   :  { %6964 = vmatprep.subr.bf16.mxu0 %v10682_v1  ;;  %6996 = vmatprep.subr.bf16.mxu1 %v10683_v34 }
 0x50f   :  { %6966 = vmatpush1.bf16.msra.mxu0 %v10684_v44  ;;  %6998 = vmatpush1.bf16.msra.mxu1 %v10685_v56 }
 0x510   :  { %6968 = vmatprep.subr.bf16.mxu0 %v10686_v50  ;;  %7000 = vmatprep.subr.bf16.mxu1 %v10687_v53  ;;  %v10705_v53 = vld [vmem:[#allocation64_spill] sm:$0xff] }
 0x513   :  { %6970 = vmatpush1.bf16.msra.mxu0 %v10688_v33  ;;  %7002 = vmatpush1.bf16.msra.mxu1 %v10689_v37  ;;  %v10704_v37 = vld [vmem:[#allocation63_spill] sm:$0xff] }
 0x514   :  { %6972 = vmatprep.subr.bf16.mxu0 %v10690_v6  ;;  %7004 = vmatprep.subr.bf16.mxu1 %v10691_v28  ;;  %v10701_v6 = vld [vmem:[#allocation46_spill] sm:$0xff]  ;;  %v10702_v28 = vld [vmem:[#allocation47_spill] sm:$0xff] }
 0x517   :  { %6974 = vmatpush1.bf16.msra.mxu0 %v10692_v45  ;;  %7006 = vmatpush1.bf16.msra.mxu1 %v10693_v19  ;;  %v10703_v45 = vld [vmem:[#allocation48_spill] sm:$0xff] }
 0x518   :  { %6976 = vmatprep.subr.bf16.mxu0 %v10694_v40  ;;  %7008 = vmatprep.subr.bf16.mxu1 %v10695_v5 }
 0x51b   :  { %6978 = vmatpush1.bf16.msra.mxu0 %v10696_v30  ;;  %7010 = vmatpush1.bf16.msra.mxu1 %v10697_v55 }
 0x51c   :  { %6980 = vmatprep.subr.bf16.mxu0 %v10698_v36  ;;  %7012 = vmatprep.subr.bf16.mxu1 %v10699_v10  ;;  %v10706_v10 = vld [vmem:[#allocation66_spill] sm:$0xff] }
 0x51f   :  { %6982 = vmatpush1.bf16.msra.mxu0 %v10700_v49  ;;  %7014 = vmatpush1.bf16.msra.mxu1 %v10701_v6  ;;  %v10707_v6 = vld [vmem:[#allocation65_spill] sm:$0xff] }
 0x520   :  { %7016 = vmatprep.subr.bf16.mxu0 %v10702_v28  ;;  %7048 = vmatprep.subr.bf16.mxu1 %v10703_v45 }
 0x5b5   :  { %v2265_v19 = vpop.f32.mrb[24].mxu0  ;;  %v2336_v40 = vpop.f32.mrb[24].mxu1 }
 0x5b6   :  { %v2341_v5 = vadd.f32 %v2265_v19, %v10704_v37  ;;  %v2267_v33 = vpop.f32.mrb[25].mxu0  ;;  %v2338_v30 = vpop.f32.mrb[25].mxu1  ;;  %v2343_v44 = vadd.f32 %v2336_v40, %v10707_v6 }
 0x5b7   :  { %v2342_v55 = vadd.f32 %v2267_v33, %v10705_v53  ;;  %v2344_v49 = vadd.f32 %v2338_v30, %v10706_v10  ;;  %v10709_v10 = vld [vmem:[#allocation68_spill] sm:$0xff] }
 0x5b8   :  { %v6075_v50 = vmul.f32 -1.442695, %v2341_v5  ;;  %v2365_v5 = vrot.slane %v9554_v24, 6 }
 0x5b9   :  { %v6076_v36 = vmul.f32 -1.442695, %v2342_v55  ;;  %v6077_v56 = vmul.f32 -1.442695, %v2344_v49 }
 0x5ba   :  { %8292 = vpow2.f32 %v6075_v50 }
 0x5bb   :  { %8294 = vpow2.f32 %v6076_v36 }
 0x5bc   :  { %8296 = vpow2.f32 %v6077_v56 }
 0x5bd   :  { %8298 = vtanh.f32 %v2343_v44 }
 0x5c4   :  { %v8293_v28 = vpop.eup %8292 }
 0x5c5   :  { %v8295_v34 = vpop.eup %8294  ;;  %v2348_v45 = vadd.f32 1.0, %v8293_v28 }
 0x5c6   :  { %v2354_v1 = vadd.f32 1.0, %v8295_v34  ;;  %v8297_v19 = vpop.eup %8296 }
 0x5c7   :  { %8300 = vrcp.f32 %v2348_v45  ;;  %v8299_v37 = vpop.eup %8298  ;;  %v2361_v36 = vadd.f32 1.0, %v8297_v19  ;;  %v10710_v19 = vld [vmem:[#allocation70_spill] sm:$0xff] }
 0x5c8   :  { %8302 = vrcp.f32 %v2354_v1  ;;  %v10708_v1 = vld [vmem:[#allocation67_spill] sm:$0xff] }
 0x5c9   :  { %8304 = vrcp.f32 %v2361_v36 }
 0x5d1   :  { %v8301_v33 = vpop.eup %8300 }
 0x5d2   :  { %v8303_v50 = vpop.eup %8302  ;;  %v2368_v55 = vmul.f32 %v8301_v33, %v8299_v37 }
 0x5d3   :  { %v2367_v30 = vmul.f32 %v8303_v50, %v2365_v5  ;;  %v8305_v5 = vpop.eup %8304 }
 0x5d5   :  { %v9638_v49 = vadd.f32 %v2368_v55, %v2367_v30  ;;  %v2439_v40 = vpop.f32.mrb[26].mxu0  ;;  %v2510_v6 = vpop.f32.mrb[26].mxu1 }
 0x5d6   :  { %v2519_v28 = vrot.slane %v2439_v40, 2  ;;  %v2441_v56 = vpop.f32.mrb[27].mxu0  ;;  %v2512_v44 = vpop.f32.mrb[27].mxu1  ;;  %v2521_v50 = vrot.slane %v2510_v6, 2  ;;  %v10711_v40 = vld [vmem:[#allocation69_spill] sm:$0xff] }
 0x5d7   :  { %v2520_v34 = vrot.slane %v2441_v56, 2  ;;  %8306 = vtanh.f32 %v9638_v49  ;;  %v2522_v37 = vrot.slane %v2512_v44, 2 }
 0x5d8   :  { %v2527_v45 = vadd.f32 %v2519_v28, %v10708_v1  ;;  %v2529_v56 = vadd.f32 %v2521_v50, %v10711_v40 }
 0x5d9   :  { %v2528_v53 = vadd.f32 %v2520_v34, %v10709_v10  ;;  %v2530_v33 = vadd.f32 %v2522_v37, %v10710_v19 }
 0x5da   :  { %v6078_v24 = vmul.f32 -1.442695, %v2527_v45 }
 0x5db   :  { %v6079_v63 = vmul.f32 -1.442695, %v2528_v53  ;;  %v6080_v30 = vmul.f32 -1.442695, %v2530_v33 }
 0x5dc   :  { %8308 = vpow2.f32 %v6078_v24  ;;  %v2551_v24 = vrot.slane %v9580_v12, 2 }
 0x5dd   :  { %8310 = vpow2.f32 %v6079_v63 }
 0x5de   :  { %8312 = vpow2.f32 %v6080_v30 }
 0x5df   :  { %8314 = vtanh.f32 %v2529_v56 }
 0x5e1   :  { %v8307_v55 = vpop.eup %8306 }
 0x5e2   :  { %v2371_v36 = vmul.f32 %v8307_v55, %v8305_v5 }
 0x5e4   :  { %2372 = vst [vmem:[#allocation2 + $0x10] sm:$0x3] %v2371_v36  ;;  %2624 = vmatmul.mubr.f32.vlgmr.msra.gmra.mrb[28].mxu0 %v2371_v36  ;;  %2695 = vmatmul.mubr.f32.vlgmr.msra.gmra.mrb[28].mxu1 %v2371_v36 }
 0x5e5   :  { %7018 = vmatpush1.bf16.msra.mxu0 %v9106_v11  ;;  %7050 = vmatpush1.bf16.msra.mxu1 %v9110_v13 }
 0x5e6   :  { %v8309_v53 = vpop.eup %8308  ;;  %7020 = vmatprep.subr.bf16.mxu0 %v9112_v14  ;;  %7052 = vmatprep.subr.bf16.mxu1 %v9115_v27 }
 0x5e7   :  { %v8311_v63 = vpop.eup %8310  ;;  %v2534_v28 = vadd.f32 1.0, %v8309_v53  ;;  %2812 = vmatprep.mubr.f32.mxu0 %v10573_v3  ;;  %2883 = vmatprep.mubr.f32.mxu1 %v10573_v3  ;;  %v10712_v53 = vld [vmem:[#allocation26_spill] sm:$0xff] }
 0x5e8   :  { %v2540_v6 = vadd.f32 1.0, %v8311_v63  ;;  %v8313_v44 = vpop.eup %8312  ;;  %v10713_v63 = vld [vmem:[#allocation27_spill] sm:$0xff] }
 0x5e9   :  { %8316 = vrcp.f32 %v2534_v28  ;;  %7022 = vmatpush1.bf16.msra.mxu0 %v9120_v38  ;;  %7054 = vmatpush1.bf16.msra.mxu1 %v9124_v42  ;;  %v8315_v34 = vpop.eup %8314  ;;  %v2547_v5 = vadd.f32 1.0, %v8313_v44  ;;  %v10714_v28 = vld [vmem:[#allocation28_spill] sm:$0xff]  ;;  %v10716_v44 = vld [vmem:[#allocation30_spill] sm:$0xff] }
 0x5ea   :  { %8318 = vrcp.f32 %v2540_v6  ;;  %7024 = vmatprep.subr.bf16.mxu0 %v9126_v43  ;;  %7056 = vmatprep.subr.bf16.mxu1 %v9129_v52  ;;  %v10715_v6 = vld [vmem:[#allocation29_spill] sm:$0xff] }
 0x5eb   :  { %8320 = vrcp.f32 %v2547_v5  ;;  %v10722_v5 = vld [vmem:[#allocation36_spill] sm:$0xff] }
 0x5ed   :  { %7026 = vmatpush1.bf16.msra.mxu0 %v9134_v2  ;;  %7058 = vmatpush1.bf16.msra.mxu1 %v10588_v48 }
 0x5ee   :  { %7028 = vmatprep.subr.bf16.mxu0 %v10589_v8  ;;  %7060 = vmatprep.subr.bf16.mxu1 %v10590_v57 }
 0x5f1   :  { %7030 = vmatpush1.bf16.msra.mxu0 %v10591_v58  ;;  %7062 = vmatpush1.bf16.msra.mxu1 %v10592_v23 }
 0x5f2   :  { %7032 = vmatprep.subr.bf16.mxu0 %v10593_v41  ;;  %7064 = vmatprep.subr.bf16.mxu1 %v10594_v59 }
 0x5f3   :  { %v8317_v45 = vpop.eup %8316 }
 0x5f4   :  { %v8319_v37 = vpop.eup %8318  ;;  %v2554_v33 = vmul.f32 %v8317_v45, %v8315_v34  ;;  %v10717_v34 = vld [vmem:[#allocation31_spill] sm:$0xff]  ;;  %v10718_v45 = vld [vmem:[#allocation32_spill] sm:$0xff] }
 0x5f5   :  { %v2553_v50 = vmul.f32 %v8319_v37, %v2551_v24  ;;  %7034 = vmatpush1.bf16.msra.mxu0 %v10595_v4  ;;  %7066 = vmatpush1.bf16.msra.mxu1 %v10596_v29  ;;  %v8321_v12 = vpop.eup %8320  ;;  %v10719_v24 = vld [vmem:[#allocation33_spill] sm:$0xff]  ;;  %v10720_v37 = vld [vmem:[#allocation34_spill] sm:$0xff] }
 0x5f6   :  { %7036 = vmatprep.subr.bf16.mxu0 %v9164_v25  ;;  %7068 = vmatprep.subr.bf16.mxu1 %v10597_v31 }
 0x5f7   :  { %v9668_v55 = vadd.f32 %v2554_v33, %v2553_v50  ;;  %v10721_v33 = vld [vmem:[#allocation35_spill] sm:$0xff]  ;;  %v10723_v50 = vld [vmem:[#allocation37_spill] sm:$0xff] }
 0x5f9   :  { %7038 = vmatpush1.bf16.msra.mxu0 %v9170_v47  ;;  %7070 = vmatpush1.bf16.msra.mxu1 %v9174_v0  ;;  %8322 = vtanh.f32 %v9668_v55 }
 0x5fa   :  { %7040 = vmatprep.subr.bf16.mxu0 %v9176_v35  ;;  %7072 = vmatprep.subr.bf16.mxu1 %v9179_v9 }
 0x5fd   :  { %7042 = vmatpush1.bf16.msra.mxu0 %v9182_v15  ;;  %7074 = vmatpush1.bf16.msra.mxu1 %v9186_v7 }
 0x5fe   :  { %7044 = vmatprep.subr.bf16.mxu0 %v9188_v18  ;;  %7076 = vmatprep.subr.bf16.mxu1 %v9191_v51 }
 0x601   :  { %7046 = vmatpush1.bf16.msra.mxu0 %v9194_v62  ;;  %7078 = vmatpush1.bf16.msra.mxu1 %v9198_v60 }
 0x602   :  { %7080 = vmatprep.subr.bf16.mxu0 %v8995_v16  ;;  %7112 = vmatprep.subr.bf16.mxu1 %v8997_v17 }
 0x603   :  { %v8323_v36 = vpop.eup %8322 }
 0x604   :  { %v2557_v30 = vmul.f32 %v8323_v36, %v8321_v12  ;;  %v10724_v12 = vld [vmem:[#allocation38_spill] sm:$0xff]  ;;  %v10725_v36 = vld [vmem:[#allocation39_spill] sm:$0xff] }
 0x606   :  { %2558 = vst [vmem:[#allocation2 + $0x8] sm:$0xc0] %v2557_v30  ;;  %v2746_v56 = vrot.slane %v2557_v30, 6  ;;  %v10726_v30 = vld [vmem:[#allocation40_spill] sm:$0xff] }
 0x608   :  { %2813 = vmatmul.mubr.f32.vlgmr.msra.gmra.mrb[30].mxu0 %v2746_v56  ;;  %2884 = vmatmul.mubr.f32.vlgmr.msra.gmra.mrb[30].mxu1 %v2746_v56  ;;  %v10727_v56 = vld [vmem:[#allocation41_spill] sm:$0xff] }
 0x609   :  { %7082 = vmatpush1.bf16.msra.mxu0 %v8999_v20  ;;  %7114 = vmatpush1.bf16.msra.mxu1 %v9001_v21 }
 0x60a   :  { %7084 = vmatprep.subr.bf16.mxu0 %v9003_v22  ;;  %7116 = vmatprep.subr.bf16.mxu1 %v9007_v26 }
 0x60b   :  { %3001 = vmatprep.mubr.f32.mxu0 %v10573_v3  ;;  %3072 = vmatprep.mubr.f32.mxu1 %v10573_v3 }
 0x60d   :  { %7086 = vmatpush1.bf16.msra.mxu0 %v10676_v32  ;;  %7118 = vmatpush1.bf16.msra.mxu1 %v10677_v54 }
 0x60e   :  { %7088 = vmatprep.subr.bf16.mxu0 %v10678_v39  ;;  %7120 = vmatprep.subr.bf16.mxu1 %v10679_v46 }
 0x611   :  { %7090 = vmatpush1.bf16.msra.mxu0 %v10680_v61  ;;  %7122 = vmatpush1.bf16.msra.mxu1 %v10712_v53 }
 0x612   :  { %7092 = vmatprep.subr.bf16.mxu0 %v10713_v63  ;;  %7124 = vmatprep.subr.bf16.mxu1 %v10714_v28  ;;  %v10735_v28 = vld [vmem:[#allocation63_spill] sm:$0xff]  ;;  %v10736_v63 = vld [vmem:[#allocation64_spill] sm:$0xff] }
 0x615   :  { %7094 = vmatpush1.bf16.msra.mxu0 %v10715_v6  ;;  %7126 = vmatpush1.bf16.msra.mxu1 %v10716_v44 }
 0x616   :  { %7096 = vmatprep.subr.bf16.mxu0 %v10717_v34  ;;  %7128 = vmatprep.subr.bf16.mxu1 %v10718_v45  ;;  %v10728_v34 = vld [vmem:[#allocation42_spill] sm:$0xff]  ;;  %v10729_v45 = vld [vmem:[#allocation43_spill] sm:$0xff] }
 0x619   :  { %7098 = vmatpush1.bf16.msra.mxu0 %v10719_v24  ;;  %7130 = vmatpush1.bf16.msra.mxu1 %v10720_v37  ;;  %v10730_v24 = vld [vmem:[#allocation44_spill] sm:$0xff]  ;;  %v10731_v37 = vld [vmem:[#allocation45_spill] sm:$0xff] }
 0x61a   :  { %7100 = vmatprep.subr.bf16.mxu0 %v10721_v33  ;;  %7132 = vmatprep.subr.bf16.mxu1 %v10722_v5  ;;  %v10732_v33 = vld [vmem:[#allocation46_spill] sm:$0xff]  ;;  %v10733_v5 = vld [vmem:[#allocation47_spill] sm:$0xff] }
 0x61d   :  { %7102 = vmatpush1.bf16.msra.mxu0 %v10723_v50  ;;  %7134 = vmatpush1.bf16.msra.mxu1 %v10724_v12  ;;  %v10734_v50 = vld [vmem:[#allocation48_spill] sm:$0xff] }
 0x61e   :  { %7104 = vmatprep.subr.bf16.mxu0 %v10725_v36  ;;  %7136 = vmatprep.subr.bf16.mxu1 %v10726_v30 }
 0x621   :  { %7106 = vmatpush1.bf16.msra.mxu0 %v10727_v56  ;;  %7138 = vmatpush1.bf16.msra.mxu1 %v10728_v34 }
 0x622   :  { %7108 = vmatprep.subr.bf16.mxu0 %v10729_v45  ;;  %7140 = vmatprep.subr.bf16.mxu1 %v10730_v24 }
 0x625   :  { %7110 = vmatpush1.bf16.msra.mxu0 %v10731_v37  ;;  %7142 = vmatpush1.bf16.msra.mxu1 %v10732_v33  ;;  %v10737_v33 = vld [vmem:[#allocation66_spill] sm:$0xff] }
 0x626   :  { %7144 = vmatprep.subr.bf16.mxu0 %v10733_v5  ;;  %7176 = vmatprep.subr.bf16.mxu1 %v10734_v50  ;;  %v10738_v50 = vld [vmem:[#allocation65_spill] sm:$0xff] }
 0x6b7   :  { %v2625_v12 = vpop.f32.mrb[28].mxu0  ;;  %v2696_v36 = vpop.f32.mrb[28].mxu1 }
 0x6b8   :  { %v2705_v44 = vrot.slane %v2625_v12, 6  ;;  %v2627_v30 = vpop.f32.mrb[29].mxu0  ;;  %v2698_v6 = vpop.f32.mrb[29].mxu1  ;;  %v2707_v5 = vrot.slane %v2696_v36, 6 }
 0x6b9   :  { %v2706_v56 = vrot.slane %v2627_v30, 6  ;;  %v2708_v61 = vrot.slane %v2698_v6, 6 }
 0x6ba   :  { %v2713_v34 = vadd.f32 %v2705_v44, %v10735_v28  ;;  %v2715_v39 = vadd.f32 %v2707_v5, %v10738_v50 }
 0x6bb   :  { %v2714_v45 = vadd.f32 %v2706_v56, %v10736_v63  ;;  %v2716_v37 = vadd.f32 %v2708_v61, %v10737_v33 }
 0x6bc   :  { %v6081_v53 = vmul.f32 -1.442695, %v2713_v34 }
 0x6bd   :  { %v6082_v24 = vmul.f32 -1.442695, %v2714_v45  ;;  %v6083_v46 = vmul.f32 -1.442695, %v2716_v37 }
 0x6be   :  { %8324 = vpow2.f32 %v6081_v53  ;;  %v2737_v53 = vrot.slane %v9638_v49, 6 }
 0x6bf   :  { %8326 = vpow2.f32 %v6082_v24 }
 0x6c0   :  { %8328 = vpow2.f32 %v6083_v46 }
 0x6c1   :  { %8330 = vtanh.f32 %v2715_v39 }
 0x6c8   :  { %v8325_v54 = vpop.eup %8324 }
 0x6c9   :  { %v8327_v12 = vpop.eup %8326  ;;  %v2720_v32 = vadd.f32 1.0, %v8325_v54 }
 0x6ca   :  { %v2726_v30 = vadd.f32 1.0, %v8327_v12  ;;  %v8329_v44 = vpop.eup %8328 }
 0x6cb   :  { %8332 = vrcp.f32 %v2720_v32  ;;  %v8331_v34 = vpop.eup %8330  ;;  %v2733_v61 = vadd.f32 1.0, %v8329_v44 }
 0x6cc   :  { %8334 = vrcp.f32 %v2726_v30 }
 0x6cd   :  { %8336 = vrcp.f32 %v2733_v61 }
 0x6d5   :  { %v8333_v45 = vpop.eup %8332 }
 0x6d6   :  { %v8335_v6 = vpop.eup %8334  ;;  %v2740_v24 = vmul.f32 %v8333_v45, %v8331_v34 }
 0x6d7   :  { %v2739_v36 = vmul.f32 %v8335_v6, %v2737_v53  ;;  %v8337_v44 = vpop.eup %8336 }
 0x6d9   :  { %v9722_v37 = vadd.f32 %v2740_v24, %v2739_v36 }
 0x6db   :  { %v2814_v5 = vpop.f32.mrb[30].mxu0  ;;  %v2885_v56 = vpop.f32.mrb[30].mxu1  ;;  %8338 = vtanh.f32 %v9722_v37 }
 0x6dc   :  { %v2894_v54 = vrot.slane %v2814_v5, 4  ;;  %v2816_v39 = vpop.f32.mrb[31].mxu0  ;;  %v2887_v32 = vpop.f32.mrb[31].mxu1  ;;  %v2896_v6 = vrot.slane %v2885_v56, 4 }
 0x6dd   :  { %v2895_v46 = vrot.slane %v2816_v39, 4  ;;  %v2897_v34 = vrot.slane %v2887_v32, 4 }
 0x6de   :  { %v2902_v12 = vadd.f32 %v2894_v54, %v10708_v1  ;;  %v2904_v5 = vadd.f32 %v2896_v6, %v10711_v40 }
 0x6df   :  { %v2903_v30 = vadd.f32 %v2895_v46, %v10709_v10  ;;  %v2905_v53 = vadd.f32 %v2897_v34, %v10710_v19 }
 0x6e0   :  { %v6084_v49 = vmul.f32 -1.442695, %v2902_v12 }
 0x6e1   :  { %v6085_v50 = vmul.f32 -1.442695, %v2903_v30  ;;  %v6086_v36 = vmul.f32 -1.442695, %v2905_v53  ;;  %v2926_v30 = vrot.slane %v9668_v55, 2 }
 0x6e2   :  { %8340 = vpow2.f32 %v6084_v49 }
 0x6e3   :  { %8342 = vpow2.f32 %v6085_v50 }
 0x6e4   :  { %8344 = vpow2.f32 %v6086_v36  ;;  %v10741_v36 = vld [vmem:[#allocation23_spill] sm:$0xff] }
 0x6e5   :  { %v8339_v45 = vpop.eup %8338  ;;  %8346 = vtanh.f32 %v2904_v5  ;;  %v10742_v5 = vld [vmem:[#allocation24_spill] sm:$0xff] }
 0x6e6   :  { %v2743_v24 = vmul.f32 %v8339_v45, %v8337_v44 }
 0x6e8   :  { %2744 = vst [vmem:[#allocation2 + $0x10] sm:$0xc] %v2743_v24  ;;  %v2935_v61 = vrot.slane %v2743_v24, 2 }
 0x6ea   :  { %3002 = vmatmul.mubr.f32.vlgmr.msra.gmra.mrb[32].mxu0 %v2935_v61  ;;  %3073 = vmatmul.mubr.f32.vlgmr.msra.gmra.mrb[32].mxu1 %v2935_v61 }
 0x6eb   :  { %7146 = vmatpush1.bf16.msra.mxu0 %v9106_v11  ;;  %7178 = vmatpush1.bf16.msra.mxu1 %v9110_v13 }
 0x6ec   :  { %v8341_v54 = vpop.eup %8340  ;;  %7148 = vmatprep.subr.bf16.mxu0 %v9112_v14  ;;  %7180 = vmatprep.subr.bf16.mxu1 %v9115_v27 }
 0x6ed   :  { %v8343_v50 = vpop.eup %8342  ;;  %v2909_v39 = vadd.f32 1.0, %v8341_v54  ;;  %3190 = vmatprep.mubr.f32.mxu0 %v10573_v3  ;;  %3261 = vmatprep.mubr.f32.mxu1 %v10573_v3  ;;  %v10743_v54 = vld [vmem:[#allocation25_spill] sm:$0xff] }
 0x6ee   :  { %v2915_v56 = vadd.f32 1.0, %v8343_v50  ;;  %v8345_v32 = vpop.eup %8344  ;;  %v10748_v50 = vld [vmem:[#allocation30_spill] sm:$0xff] }
 0x6ef   :  { %8348 = vrcp.f32 %v2909_v39  ;;  %7150 = vmatpush1.bf16.msra.mxu0 %v9120_v38  ;;  %7182 = vmatpush1.bf16.msra.mxu1 %v9124_v42  ;;  %v8347_v46 = vpop.eup %8346  ;;  %v2922_v44 = vadd.f32 1.0, %v8345_v32  ;;  %v10749_v39 = vld [vmem:[#allocation31_spill] sm:$0xff]  ;;  %v10751_v32 = vld [vmem:[#allocation33_spill] sm:$0xff] }
 0x6f0   :  { %8350 = vrcp.f32 %v2915_v56  ;;  %7152 = vmatprep.subr.bf16.mxu0 %v9126_v43  ;;  %7184 = vmatprep.subr.bf16.mxu1 %v9129_v52  ;;  %v10750_v56 = vld [vmem:[#allocation32_spill] sm:$0xff] }
 0x6f1   :  { %8352 = vrcp.f32 %v2922_v44  ;;  %v10757_v44 = vld [vmem:[#allocation39_spill] sm:$0xff] }
 0x6f3   :  { %7154 = vmatpush1.bf16.msra.mxu0 %v9134_v2  ;;  %7186 = vmatpush1.bf16.msra.mxu1 %v10588_v48 }
 0x6f4   :  { %7156 = vmatprep.subr.bf16.mxu0 %v10589_v8  ;;  %7188 = vmatprep.subr.bf16.mxu1 %v10590_v57 }
 0x6f7   :  { %7158 = vmatpush1.bf16.msra.mxu0 %v10591_v58  ;;  %7190 = vmatpush1.bf16.msra.mxu1 %v10592_v23 }
 0x6f8   :  { %7160 = vmatprep.subr.bf16.mxu0 %v10593_v41  ;;  %7192 = vmatprep.subr.bf16.mxu1 %v10594_v59 }
 0x6f9   :  { %v8349_v12 = vpop.eup %8348 }
 0x6fa   :  { %v8351_v49 = vpop.eup %8350  ;;  %v2929_v34 = vmul.f32 %v8349_v12, %v8347_v46  ;;  %v10752_v46 = vld [vmem:[#allocation34_spill] sm:$0xff]  ;;  %v10753_v12 = vld [vmem:[#allocation35_spill] sm:$0xff] }
 0x6fb   :  { %v2928_v45 = vmul.f32 %v8351_v49, %v2926_v30  ;;  %7162 = vmatpush1.bf16.msra.mxu0 %v10595_v4  ;;  %7194 = vmatpush1.bf16.msra.mxu1 %v10596_v29  ;;  %v8353_v55 = vpop.eup %8352  ;;  %v10754_v30 = vld [vmem:[#allocation36_spill] sm:$0xff]  ;;  %v10755_v49 = vld [vmem:[#allocation37_spill] sm:$0xff] }
 0x6fc   :  { %7164 = vmatprep.subr.bf16.mxu0 %v9164_v25  ;;  %7196 = vmatprep.subr.bf16.mxu1 %v10597_v31 }
 0x6fd   :  { %v9752_v53 = vadd.f32 %v2929_v34, %v2928_v45  ;;  %v10756_v34 = vld [vmem:[#allocation38_spill] sm:$0xff]  ;;  %v10758_v45 = vld [vmem:[#allocation40_spill] sm:$0xff] }
 0x6ff   :  { %7166 = vmatpush1.bf16.msra.mxu0 %v9170_v47  ;;  %7198 = vmatpush1.bf16.msra.mxu1 %v9174_v0  ;;  %8354 = vtanh.f32 %v9752_v53 }
 0x700   :  { %7168 = vmatprep.subr.bf16.mxu0 %v9176_v35  ;;  %7200 = vmatprep.subr.bf16.mxu1 %v9179_v9 }
 0x703   :  { %7170 = vmatpush1.bf16.msra.mxu0 %v9182_v15  ;;  %7202 = vmatpush1.bf16.msra.mxu1 %v9186_v7 }
 0x704   :  { %7172 = vmatprep.subr.bf16.mxu0 %v9188_v18  ;;  %7204 = vmatprep.subr.bf16.mxu1 %v9191_v51 }
 0x707   :  { %7174 = vmatpush1.bf16.msra.mxu0 %v9194_v62  ;;  %7206 = vmatpush1.bf16.msra.mxu1 %v9198_v60 }
 0x708   :  { %7208 = vmatprep.subr.bf16.mxu0 %v8995_v16  ;;  %7240 = vmatprep.subr.bf16.mxu1 %v8997_v17  ;;  %v10739_v16 = vld [vmem:[#allocation21_spill] sm:$0xff]  ;;  %v10740_v17 = vld [vmem:[#allocation22_spill] sm:$0xff] }
 0x709   :  { %v8355_v6 = vpop.eup %8354 }
 0x70a   :  { %v2932_v24 = vmul.f32 %v8355_v6, %v8353_v55  ;;  %v10759_v55 = vld [vmem:[#allocation41_spill] sm:$0xff]  ;;  %v10760_v6 = vld [vmem:[#allocation42_spill] sm:$0xff] }
 0x70c   :  { %2933 = vst [vmem:[#allocation2 + $0x8] sm:$0x30] %v2932_v24  ;;  %v3124_v61 = vrot.slane %v2932_v24, 4  ;;  %v10761_v24 = vld [vmem:[#allocation43_spill] sm:$0xff] }
 0x70e   :  { %3191 = vmatmul.mubr.f32.vlgmr.msra.gmra.mrb[34].mxu0 %v3124_v61  ;;  %3262 = vmatmul.mubr.f32.vlgmr.msra.gmra.mrb[34].mxu1 %v3124_v61  ;;  %v10762_v61 = vld [vmem:[#allocation44_spill] sm:$0xff] }
 0x70f   :  { %7210 = vmatpush1.bf16.msra.mxu0 %v8999_v20  ;;  %7242 = vmatpush1.bf16.msra.mxu1 %v9001_v21  ;;  %v10744_v20 = vld [vmem:[#allocation26_spill] sm:$0xff]  ;;  %v10745_v21 = vld [vmem:[#allocation27_spill] sm:$0xff] }
 0x710   :  { %7212 = vmatprep.subr.bf16.mxu0 %v9003_v22  ;;  %7244 = vmatprep.subr.bf16.mxu1 %v9007_v26  ;;  %v10746_v22 = vld [vmem:[#allocation28_spill] sm:$0xff]  ;;  %v10747_v26 = vld [vmem:[#allocation29_spill] sm:$0xff] }
 0x711   :  { %3379 = vmatprep.mubr.f32.mxu0 %v10573_v3  ;;  %3450 = vmatprep.mubr.f32.mxu1 %v10573_v3 }
 0x713   :  { %7214 = vmatpush1.bf16.msra.mxu0 %v10739_v16  ;;  %7246 = vmatpush1.bf16.msra.mxu1 %v10740_v17  ;;  %v10763_v16 = vld [vmem:[#allocation45_spill] sm:$0xff]  ;;  %v10764_v17 = vld [vmem:[#allocation46_spill] sm:$0xff] }
 0x714   :  { %7216 = vmatprep.subr.bf16.mxu0 %v10741_v36  ;;  %7248 = vmatprep.subr.bf16.mxu1 %v10742_v5  ;;  %v10765_v36 = vld [vmem:[#allocation47_spill] sm:$0xff]  ;;  %v10766_v5 = vld [vmem:[#allocation48_spill] sm:$0xff] }
 0x717   :  { %7218 = vmatpush1.bf16.msra.mxu0 %v10743_v54  ;;  %7250 = vmatpush1.bf16.msra.mxu1 %v10744_v20 }
 0x718   :  { %7220 = vmatprep.subr.bf16.mxu0 %v10745_v21  ;;  %7252 = vmatprep.subr.bf16.mxu1 %v10746_v22 }
 0x71b   :  { %7222 = vmatpush1.bf16.msra.mxu0 %v10747_v26  ;;  %7254 = vmatpush1.bf16.msra.mxu1 %v10748_v50 }
 0x71c   :  { %7224 = vmatprep.subr.bf16.mxu0 %v10749_v39  ;;  %7256 = vmatprep.subr.bf16.mxu1 %v10750_v56 }
 0x71f   :  { %7226 = vmatpush1.bf16.msra.mxu0 %v10751_v32  ;;  %7258 = vmatpush1.bf16.msra.mxu1 %v10752_v46 }
 0x720   :  { %7228 = vmatprep.subr.bf16.mxu0 %v10753_v12  ;;  %7260 = vmatprep.subr.bf16.mxu1 %v10754_v30 }
 0x723   :  { %7230 = vmatpush1.bf16.msra.mxu0 %v10755_v49  ;;  %7262 = vmatpush1.bf16.msra.mxu1 %v10756_v34 }
 0x724   :  { %7232 = vmatprep.subr.bf16.mxu0 %v10757_v44  ;;  %7264 = vmatprep.subr.bf16.mxu1 %v10758_v45  ;;  %v10767_v44 = vld [vmem:[#allocation65_spill] sm:$0xff] }
 0x727   :  { %7234 = vmatpush1.bf16.msra.mxu0 %v10759_v55  ;;  %7266 = vmatpush1.bf16.msra.mxu1 %v10760_v6 }
 0x728   :  { %7236 = vmatprep.subr.bf16.mxu0 %v10761_v24  ;;  %7268 = vmatprep.subr.bf16.mxu1 %v10762_v61 }
 0x72b   :  { %7238 = vmatpush1.bf16.msra.mxu0 %v10763_v16  ;;  %7270 = vmatpush1.bf16.msra.mxu1 %v10764_v17 }
 0x72c   :  { %7272 = vmatprep.subr.bf16.mxu0 %v10765_v36  ;;  %7304 = vmatprep.subr.bf16.mxu1 %v10766_v5  ;;  %v3115_v5 = vrot.slane %v9722_v37, 6 }
 0x7bd   :  { %v3003_v54 = vpop.f32.mrb[32].mxu0  ;;  %v3074_v20 = vpop.f32.mrb[32].mxu1 }
 0x7be   :  { %v3083_v21 = vrot.slane %v3003_v54, 4  ;;  %v3005_v22 = vpop.f32.mrb[33].mxu0  ;;  %v3076_v26 = vpop.f32.mrb[33].mxu1  ;;  %v3085_v49 = vrot.slane %v3074_v20, 4 }
 0x7bf   :  { %v3084_v50 = vrot.slane %v3005_v22, 4  ;;  %v3086_v12 = vrot.slane %v3076_v26, 4 }
 0x7c0   :  { %v3091_v39 = vadd.f32 %v3083_v21, %v10735_v28  ;;  %v3093_v45 = vadd.f32 %v3085_v49, %v10767_v44 }
 0x7c1   :  { %v3092_v56 = vadd.f32 %v3084_v50, %v10736_v63  ;;  %v3094_v30 = vadd.f32 %v3086_v12, %v10737_v33 }
 0x7c2   :  { %v6087_v32 = vmul.f32 -1.442695, %v3091_v39 }
 0x7c3   :  { %v6088_v46 = vmul.f32 -1.442695, %v3092_v56  ;;  %v6089_v34 = vmul.f32 -1.442695, %v3094_v30 }
 0x7c4   :  { %8356 = vpow2.f32 %v6087_v32 }
 0x7c5   :  { %8358 = vpow2.f32 %v6088_v46 }
 0x7c6   :  { %8360 = vpow2.f32 %v6089_v34 }
 0x7c7   :  { %8362 = vtanh.f32 %v3093_v45 }
 0x7ce   :  { %v8357_v55 = vpop.eup %8356 }
 0x7cf   :  { %v8359_v6 = vpop.eup %8358  ;;  %v3098_v24 = vadd.f32 1.0, %v8357_v55 }
 0x7d0   :  { %v3104_v61 = vadd.f32 1.0, %v8359_v6  ;;  %v8361_v16 = vpop.eup %8360 }
 0x7d1   :  { %8364 = vrcp.f32 %v3098_v24  ;;  %v8363_v17 = vpop.eup %8362  ;;  %v3111_v22 = vadd.f32 1.0, %v8361_v16 }
 0x7d2   :  { %8366 = vrcp.f32 %v3104_v61 }
 0x7d3   :  { %8368 = vrcp.f32 %v3111_v22 }
 0x7db   :  { %v8365_v36 = vpop.eup %8364 }
 0x7dc   :  { %v8367_v54 = vpop.eup %8366  ;;  %v3118_v21 = vmul.f32 %v8365_v36, %v8363_v17 }
 0x7dd   :  { %v3117_v20 = vmul.f32 %v8367_v54, %v3115_v5  ;;  %v8369_v55 = vpop.eup %8368 }
 0x7df   :  { %v9806_v26 = vadd.f32 %v3118_v21, %v3117_v20 }
 0x7e1   :  { %v3192_v50 = vpop.f32.mrb[34].mxu0  ;;  %v3263_v39 = vpop.f32.mrb[34].mxu1  ;;  %8370 = vtanh.f32 %v9806_v26 }
 0x7e2   :  { %v3272_v56 = vrot.slane %v3192_v50, 6  ;;  %v3194_v32 = vpop.f32.mrb[35].mxu0  ;;  %v3265_v46 = vpop.f32.mrb[35].mxu1  ;;  %v3274_v61 = vrot.slane %v3263_v39, 6  ;;  %v3694_v50 = vld [vmem:[#allocation11 + $0x60] sm:$0xff] }
 0x7e3   :  { %v3273_v12 = vrot.slane %v3194_v32, 6  ;;  %v3275_v45 = vrot.slane %v3265_v46, 6  ;;  %v3692_v32 = vld [vmem:[#allocation11 + $0x50] sm:$0xff] }
 0x7e4   :  { %v3280_v30 = vadd.f32 %v3272_v56, %v10708_v1  ;;  %v3282_v5 = vadd.f32 %v3274_v61, %v10711_v40  ;;  %v3696_v46 = vld [vmem:[#allocation11 + $0x70] sm:$0xff] }
 0x7e5   :  { %v3281_v49 = vadd.f32 %v3273_v12, %v10709_v10  ;;  %v3283_v24 = vadd.f32 %v3275_v45, %v10710_v19  ;;  %v7405_v12 = vpack.c.bf16 %v3696_v46, %v3692_v32  ;;  %v3705_v45 = vld [vmem:[#allocation11 + $0xb8] sm:$0xff] }
 0x7e6   :  { %v6090_v37 = vmul.f32 -1.442695, %v3280_v30  ;;  %v3699_v30 = vld [vmem:[#allocation11 + $0x88] sm:$0xff]  ;;  %v3733_v32 = vld [vmem:[#allocation11 + $0x198] sm:$0xff] }
 0x7e7   :  { %v6091_v34 = vmul.f32 -1.442695, %v3281_v49  ;;  %v6092_v36 = vmul.f32 -1.442695, %v3283_v24  ;;  %v3703_v49 = vld [vmem:[#allocation11 + $0xa8] sm:$0xff] }
 0x7e8   :  { %8372 = vpow2.f32 %v6090_v37  ;;  %v3701_v37 = vld [vmem:[#allocation11 + $0x98] sm:$0xff] }
 0x7e9   :  { %8374 = vpow2.f32 %v6091_v34  ;;  %v7343_v34 = vpack.c.bf16 %v3703_v49, %v3699_v30  ;;  %v7407_v24 = vpack.c.bf16 %v3705_v45, %v3701_v37  ;;  %v3730_v30 = vld [vmem:[#allocation11 + $0x180] sm:$0xff]  ;;  %v3732_v45 = vld [vmem:[#allocation11 + $0x190] sm:$0xff] }
 0x7ea   :  { %8376 = vpow2.f32 %v6092_v36  ;;  %v3734_v49 = vld [vmem:[#allocation11 + $0x1a0] sm:$0xff] }
 0x7eb   :  { %v8371_v6 = vpop.eup %8370  ;;  %8378 = vtanh.f32 %v3282_v5  ;;  %v3707_v5 = vld [vmem:[#allocation11 + $0xc8] sm:$0xff] }
 0x7ec   :  { %v3121_v16 = vmul.f32 %v8371_v6, %v8369_v55  ;;  %v3698_v55 = vld [vmem:[#allocation11 + $0x80] sm:$0xff] }
 0x7ed   :  { %v3702_v6 = vld [vmem:[#allocation11 + $0xa0] sm:$0xff] }
 0x7ee   :  { %3122 = vst [vmem:[#allocation2 + $0x10] sm:$0x30] %v3121_v16  ;;  %v3313_v17 = vrot.slane %v3121_v16, 4  ;;  %v7345_v61 = vpack.c.bf16 %v3702_v6, %v3698_v55  ;;  %v3700_v16 = vld [vmem:[#allocation11 + $0x90] sm:$0xff] }
 0x7ef   :  { %v3736_v55 = vld [vmem:[#allocation11 + $0x1b0] sm:$0xff] }
 0x7f0   :  { %3380 = vmatmul.mubr.f32.vlgmr.msra.gmra.mrb[36].mxu0 %v3313_v17  ;;  %3451 = vmatmul.mubr.f32.vlgmr.msra.gmra.mrb[36].mxu1 %v3313_v17  ;;  %v3704_v17 = vld [vmem:[#allocation11 + $0xb0] sm:$0xff]  ;;  %v7425_v6 = vpack.c.bf16 %v3736_v55, %v3732_v45  ;;  %v3773_v45 = vld [vmem:[#allocation11 + $0x2d8] sm:$0xff] }
 0x7f1   :  { %7274 = vmatpush1.bf16.msra.mxu0 %v9106_v11  ;;  %7306 = vmatpush1.bf16.msra.mxu1 %v9110_v13  ;;  %v7409_v36 = vpack.c.bf16 %v3704_v17, %v3700_v16  ;;  %v3741_v16 = vld [vmem:[#allocation11 + $0x1d8] sm:$0xff] }
 0x7f2   :  { %v8373_v54 = vpop.eup %8372  ;;  %7276 = vmatprep.subr.bf16.mxu0 %v9112_v14  ;;  %7308 = vmatprep.subr.bf16.mxu1 %v9115_v27  ;;  %v3304_v27 = vrot.slane %v9752_v53, 2  ;;  %v3690_v53 = vld [vmem:[#allocation11 + $0x40] sm:$0xff] }
 0x7f3   :  { %v8375_v21 = vpop.eup %8374  ;;  %v3287_v22 = vadd.f32 1.0, %v8373_v54  ;;  %3568 = vmatprep.mubr.f32.mxu0 %v10573_v3  ;;  %3639 = vmatprep.mubr.f32.mxu1 %v10573_v3  ;;  %v7341_v56 = vpack.c.bf16 %v3694_v50, %v3690_v53  ;;  %v3711_v54 = vld [vmem:[#allocation11 + $0xe8] sm:$0xff]  ;;  %v3728_v53 = vld [vmem:[#allocation11 + $0x170] sm:$0xff] }
 0x7f4   :  { %v3293_v20 = vadd.f32 1.0, %v8375_v21  ;;  %v8377_v11 = vpop.eup %8376  ;;  %v3709_v21 = vld [vmem:[#allocation11 + $0xd8] sm:$0xff] }
 0x7f5   :  { %8380 = vrcp.f32 %v3287_v22  ;;  %7278 = vmatpush1.bf16.msra.mxu0 %v9120_v38  ;;  %7310 = vmatpush1.bf16.msra.mxu1 %v9124_v42  ;;  %v8379_v13 = vpop.eup %8378  ;;  %v7347_v22 = vpack.c.bf16 %v3711_v54, %v3707_v5  ;;  %v3738_v5 = vld [vmem:[#allocation11 + $0x1c0] sm:$0xff] }
 0x7f6   :  { %8382 = vrcp.f32 %v3293_v20  ;;  %7280 = vmatprep.subr.bf16.mxu0 %v9126_v43  ;;  %7312 = vmatprep.subr.bf16.mxu1 %v9129_v52  ;;  %v3300_v43 = vadd.f32 1.0, %v8377_v11  ;;  %v3713_v20 = vld [vmem:[#allocation11 + $0xf8] sm:$0xff]  ;;  %v3706_v11 = vld [vmem:[#allocation11 + $0xc0] sm:$0xff] }
 0x7f7   :  { %v3742_v54 = vld [vmem:[#allocation11 + $0x1e0] sm:$0xff] }
 0x7f8   :  { %8384 = vrcp.f32 %v3300_v43 }
 0x7f9   :  { %7282 = vmatpush1.bf16.msra.mxu0 %v9134_v2  ;;  %7314 = vmatpush1.bf16.msra.mxu1 %v10588_v48 }
 0x7fa   :  { %7284 = vmatprep.subr.bf16.mxu0 %v10589_v8  ;;  %7316 = vmatprep.subr.bf16.mxu1 %v10590_v57  ;;  %v3682_v57 = vld [vmem:[#allocation11] sm:$0xff] }
 0x7fd   :  { %7286 = vmatpush1.bf16.msra.mxu0 %v10591_v58  ;;  %7318 = vmatpush1.bf16.msra.mxu1 %v10592_v23  ;;  %v3684_v23 = vld [vmem:[#allocation11 + $0x10] sm:$0xff] }
 0x7fe   :  { %7288 = vmatprep.subr.bf16.mxu0 %v10593_v41  ;;  %7320 = vmatprep.subr.bf16.mxu1 %v10594_v59  ;;  %v3691_v41 = vld [vmem:[#allocation11 + $0x48] sm:$0xff] }
 0x7ff   :  { %v8381_v14 = vpop.eup %8380  ;;  %v3695_v59 = vld [vmem:[#allocation11 + $0x68] sm:$0xff] }
 0x800   :  { %v8383_v38 = vpop.eup %8382  ;;  %v3307_v42 = vmul.f32 %v8381_v14, %v8379_v13  ;;  %v3710_v13 = vld [vmem:[#allocation11 + $0xe0] sm:$0xff]  ;;  %v7411_v14 = vpack.c.bf16 %v3713_v20, %v3709_v21  ;;  %v3740_v20 = vld [vmem:[#allocation11 + $0x1d0] sm:$0xff] }
 0x801   :  { %v3306_v52 = vmul.f32 %v8383_v38, %v3304_v27  ;;  %7290 = vmatpush1.bf16.msra.mxu0 %v10595_v4  ;;  %7322 = vmatpush1.bf16.msra.mxu1 %v10596_v29  ;;  %v3693_v4 = vld [vmem:[#allocation11 + $0x58] sm:$0xff]  ;;  %v7339_v29 = vpack.c.bf16 %v3695_v59, %v3691_v41  ;;  %v7349_v27 = vpack.c.bf16 %v3710_v13, %v3706_v11  ;;  %v3708_v38 = vld [vmem:[#allocation11 + $0xd0] sm:$0xff]  ;;  %v3722_v41 = vld [vmem:[#allocation11 + $0x140] sm:$0xff] }
 0x802   :  { %7292 = vmatprep.subr.bf16.mxu0 %v9164_v25  ;;  %7324 = vmatprep.subr.bf16.mxu1 %v10597_v31  ;;  %v3697_v31 = vld [vmem:[#allocation11 + $0x78] sm:$0xff]  ;;  %v3726_v59 = vld [vmem:[#allocation11 + $0x160] sm:$0xff]  ;;  %v3744_v11 = vld [vmem:[#allocation11 + $0x1f0] sm:$0xff] }
 0x803   :  { %v9836_v2 = vadd.f32 %v3307_v42, %v3306_v52  ;;  %v7403_v39 = vpack.c.bf16 %v3697_v31, %v3693_v4  ;;  %v3712_v42 = vld [vmem:[#allocation11 + $0xf0] sm:$0xff]  ;;  %v3715_v52 = vld [vmem:[#allocation11 + $0x108] sm:$0xff]  ;;  %v7429_v13 = vpack.c.bf16 %v3744_v11, %v3740_v20  ;;  %v3781_v20 = vld [vmem:[#allocation11 + $0x318] sm:$0xff] }
 0x804   :  { %v7413_v43 = vpack.c.bf16 %v3712_v42, %v3708_v38  ;;  %v3724_v31 = vld [vmem:[#allocation11 + $0x150] sm:$0xff]  ;;  %v3749_v38 = vld [vmem:[#allocation11 + $0x218] sm:$0xff] }
 0x805   :  { %7294 = vmatpush1.bf16.msra.mxu0 %v9170_v47  ;;  %7326 = vmatpush1.bf16.msra.mxu1 %v9174_v0  ;;  %8386 = vtanh.f32 %v9836_v2  ;;  %v8385_v47 = vpop.eup %8384  ;;  %v7421_v50 = vpack.c.bf16 %v3728_v53, %v3724_v31  ;;  %v3765_v31 = vld [vmem:[#allocation11 + $0x298] sm:$0xff] }
 0x806   :  { %7296 = vmatprep.subr.bf16.mxu0 %v9176_v35  ;;  %7328 = vmatprep.subr.bf16.mxu1 %v9179_v9  ;;  %v3683_v35 = vld [vmem:[#allocation11 + $0x8] sm:$0xff] }
 0x807   :  { %v3687_v9 = vld [vmem:[#allocation11 + $0x28] sm:$0xff] }
 0x808   :  { %v7335_v8 = vpack.c.bf16 %v3687_v9, %v3683_v35  ;;  %v3714_v35 = vld [vmem:[#allocation11 + $0x100] sm:$0xff] }
 0x809   :  { %7298 = vmatpush1.bf16.msra.mxu0 %v9182_v15  ;;  %7330 = vmatpush1.bf16.msra.mxu1 %v9186_v7  ;;  %v3685_v15 = vld [vmem:[#allocation11 + $0x18] sm:$0xff]  ;;  %v3718_v9 = vld [vmem:[#allocation11 + $0x120] sm:$0xff] }
 0x80a   :  { %7300 = vmatprep.subr.bf16.mxu0 %v9188_v18  ;;  %7332 = vmatprep.subr.bf16.mxu1 %v9191_v51  ;;  %v3689_v7 = vld [vmem:[#allocation11 + $0x38] sm:$0xff]  ;;  %v3686_v18 = vld [vmem:[#allocation11 + $0x20] sm:$0xff] }
 0x80b   :  { %v7399_v58 = vpack.c.bf16 %v3689_v7, %v3685_v15  ;;  %v7337_v51 = vpack.c.bf16 %v3686_v18, %v3682_v57  ;;  %v3716_v7 = vld [vmem:[#allocation11 + $0x110] sm:$0xff] }
 0x80c   :  { %v3720_v57 = vld [vmem:[#allocation11 + $0x130] sm:$0xff] }
 0x80d   :  { %7302 = vmatpush1.bf16.msra.mxu0 %v9194_v62  ;;  %7334 = vmatpush1.bf16.msra.mxu1 %v9198_v60  ;;  %v3688_v62 = vld [vmem:[#allocation11 + $0x30] sm:$0xff]  ;;  %v7417_v18 = vpack.c.bf16 %v3720_v57, %v3716_v7  ;;  %v3757_v7 = vld [vmem:[#allocation11 + $0x258] sm:$0xff] }
 0x80e   :  { %7336 = vmatprep.subr.bf16.mxu0 %v7335_v8  ;;  %v7401_v60 = vpack.c.bf16 %v3688_v62, %v3684_v23  ;;  %7400 = vmatprep.subr.bf16.mxu1 %v7399_v58  ;;  %v7353_v8 = vpack.c.bf16 %v3718_v9, %v3714_v35  ;;  %v3723_v58 = vld [vmem:[#allocation11 + $0x148] sm:$0xff]  ;;  %v3725_v23 = vld [vmem:[#allocation11 + $0x158] sm:$0xff]  ;;  %v3752_v35 = vld [vmem:[#allocation11 + $0x230] sm:$0xff] }
 0x80f   :  { %v8387_v25 = vpop.eup %8386 }
 0x810   :  { %v3310_v0 = vmul.f32 %v8387_v25, %v8385_v47  ;;  %v3719_v47 = vld [vmem:[#allocation11 + $0x128] sm:$0xff]  ;;  %v3717_v25 = vld [vmem:[#allocation11 + $0x118] sm:$0xff] }
 0x812   :  { %3311 = vst [vmem:[#allocation2 + $0x8] sm:$0xc] %v3310_v0  ;;  %v3502_v48 = vrot.slane %v3310_v0, 2  ;;  %v7351_v0 = vpack.c.bf16 %v3719_v47, %v3715_v52  ;;  %v3746_v52 = vld [vmem:[#allocation11 + $0x200] sm:$0xff] }
 0x813   :  { %v3750_v47 = vld [vmem:[#allocation11 + $0x220] sm:$0xff] }
 0x814   :  { %3569 = vmatmul.mubr.f32.vlgmr.msra.gmra.mrb[38].mxu0 %v3502_v48  ;;  %3640 = vmatmul.mubr.f32.vlgmr.msra.gmra.mrb[38].mxu1 %v3502_v48  ;;  %v3721_v48 = vld [vmem:[#allocation11 + $0x138] sm:$0xff] }
 0x815   :  { %7338 = vmatpush1.bf16.msra.mxu0 %v7337_v51  ;;  %7402 = vmatpush1.bf16.msra.mxu1 %v7401_v60  ;;  %v7415_v15 = vpack.c.bf16 %v3721_v48, %v3717_v25  ;;  %v3727_v51 = vld [vmem:[#allocation11 + $0x168] sm:$0xff]  ;;  %v3729_v60 = vld [vmem:[#allocation11 + $0x178] sm:$0xff]  ;;  %v3748_v48 = vld [vmem:[#allocation11 + $0x210] sm:$0xff] }
 0x816   :  { %7340 = vmatprep.subr.bf16.mxu0 %v7339_v29  ;;  %7404 = vmatprep.subr.bf16.mxu1 %v7403_v39  ;;  %v7355_v62 = vpack.c.bf16 %v3727_v51, %v3723_v58  ;;  %v7419_v4 = vpack.c.bf16 %v3729_v60, %v3725_v23  ;;  %v7357_v29 = vpack.c.bf16 %v3726_v59, %v3722_v41  ;;  %v3731_v39 = vld [vmem:[#allocation11 + $0x188] sm:$0xff]  ;;  %v3754_v58 = vld [vmem:[#allocation11 + $0x240] sm:$0xff]  ;;  %v3756_v60 = vld [vmem:[#allocation11 + $0x250] sm:$0xff] }
 0x817   :  { %v7433_v9 = vpack.c.bf16 %v3752_v35, %v3748_v48  ;;  %v3758_v51 = vld [vmem:[#allocation11 + $0x260] sm:$0xff]  ;;  %v3760_v41 = vld [vmem:[#allocation11 + $0x270] sm:$0xff]  ;;  %v3789_v48 = vld [vmem:[#allocation11 + $0x358] sm:$0xff] }
 0x818   :  { %v7437_v59 = vpack.c.bf16 %v3760_v41, %v3756_v60  ;;  %v3797_v60 = vld [vmem:[#allocation11 + $0x398] sm:$0xff] }
 0x819   :  { %7342 = vmatpush1.bf16.msra.mxu0 %v7341_v56  ;;  %7406 = vmatpush1.bf16.msra.mxu1 %v7405_v12  ;;  %v3735_v56 = vld [vmem:[#allocation11 + $0x1a8] sm:$0xff]  ;;  %v3737_v12 = vld [vmem:[#allocation11 + $0x1b8] sm:$0xff] }
 0x81a   :  { %7344 = vmatprep.subr.bf16.mxu0 %v7343_v34  ;;  %7408 = vmatprep.subr.bf16.mxu1 %v7407_v24  ;;  %v7359_v46 = vpack.c.bf16 %v3735_v56, %v3731_v39  ;;  %v7423_v37 = vpack.c.bf16 %v3737_v12, %v3733_v32  ;;  %v7361_v34 = vpack.c.bf16 %v3734_v49, %v3730_v30  ;;  %v3739_v24 = vld [vmem:[#allocation11 + $0x1c8] sm:$0xff]  ;;  %v3762_v39 = vld [vmem:[#allocation11 + $0x280] sm:$0xff]  ;;  %v3764_v12 = vld [vmem:[#allocation11 + $0x290] sm:$0xff] }
 0x81b   :  { %v3766_v56 = vld [vmem:[#allocation11 + $0x2a0] sm:$0xff]  ;;  %v3768_v30 = vld [vmem:[#allocation11 + $0x2b0] sm:$0xff] }
 0x81c   :  { %v7441_v49 = vpack.c.bf16 %v3768_v30, %v3764_v12  ;;  %v3805_v12 = vld [vmem:[#allocation11 + $0x3d8] sm:$0xff] }
 0x81d   :  { %7346 = vmatpush1.bf16.msra.mxu0 %v7345_v61  ;;  %7410 = vmatpush1.bf16.msra.mxu1 %v7409_v36  ;;  %v3743_v61 = vld [vmem:[#allocation11 + $0x1e8] sm:$0xff]  ;;  %v3745_v36 = vld [vmem:[#allocation11 + $0x1f8] sm:$0xff] }
 0x81e   :  { %7348 = vmatprep.subr.bf16.mxu0 %v7347_v22  ;;  %7412 = vmatprep.subr.bf16.mxu1 %v7411_v14  ;;  %v7363_v17 = vpack.c.bf16 %v3743_v61, %v3739_v24  ;;  %v7427_v21 = vpack.c.bf16 %v3745_v36, %v3741_v16  ;;  %v7365_v22 = vpack.c.bf16 %v3742_v54, %v3738_v5  ;;  %v3747_v14 = vld [vmem:[#allocation11 + $0x208] sm:$0xff]  ;;  %v3770_v24 = vld [vmem:[#allocation11 + $0x2c0] sm:$0xff]  ;;  %v3772_v36 = vld [vmem:[#allocation11 + $0x2d0] sm:$0xff] }
 0x81f   :  { %v3774_v61 = vld [vmem:[#allocation11 + $0x2e0] sm:$0xff]  ;;  %v3776_v5 = vld [vmem:[#allocation11 + $0x2f0] sm:$0xff]  ;;  %v3809_v30 = vld [vmem:[#allocation11 + $0x3f8] sm:$0xff] }
 0x820   :  { %v7445_v54 = vpack.c.bf16 %v3776_v5, %v3772_v36  ;;  %v3989_v36 = vld [vmem:[#allocation12 + $0x18] sm:$0xff] }
 0x821   :  { %7350 = vmatpush1.bf16.msra.mxu0 %v7349_v27  ;;  %7414 = vmatpush1.bf16.msra.mxu1 %v7413_v43  ;;  %v3751_v27 = vld [vmem:[#allocation11 + $0x228] sm:$0xff]  ;;  %v3753_v43 = vld [vmem:[#allocation11 + $0x238] sm:$0xff] }
 0x822   :  { %7352 = vmatprep.subr.bf16.mxu0 %v7351_v0  ;;  %7416 = vmatprep.subr.bf16.mxu1 %v7415_v15  ;;  %v7367_v42 = vpack.c.bf16 %v3751_v27, %v3747_v14  ;;  %v7431_v25 = vpack.c.bf16 %v3753_v43, %v3749_v38  ;;  %v7369_v0 = vpack.c.bf16 %v3750_v47, %v3746_v52  ;;  %v3755_v15 = vld [vmem:[#allocation11 + $0x248] sm:$0xff]  ;;  %v3778_v14 = vld [vmem:[#allocation11 + $0x300] sm:$0xff]  ;;  %v3780_v43 = vld [vmem:[#allocation11 + $0x310] sm:$0xff] }
 0x823   :  { %v3782_v27 = vld [vmem:[#allocation11 + $0x320] sm:$0xff]  ;;  %v3784_v52 = vld [vmem:[#allocation11 + $0x330] sm:$0xff] }
 0x824   :  { %v7449_v47 = vpack.c.bf16 %v3784_v52, %v3780_v43 }
 0x825   :  { %7354 = vmatpush1.bf16.msra.mxu0 %v7353_v8  ;;  %7418 = vmatpush1.bf16.msra.mxu1 %v7417_v18  ;;  %v3759_v8 = vld [vmem:[#allocation11 + $0x268] sm:$0xff]  ;;  %v3761_v18 = vld [vmem:[#allocation11 + $0x278] sm:$0xff] }
 0x826   :  { %7356 = vmatprep.subr.bf16.mxu0 %v7355_v62  ;;  %7420 = vmatprep.subr.bf16.mxu1 %v7419_v4  ;;  %v7371_v57 = vpack.c.bf16 %v3759_v8, %v3755_v15  ;;  %v7435_v23 = vpack.c.bf16 %v3761_v18, %v3757_v7  ;;  %v7373_v62 = vpack.c.bf16 %v3758_v51, %v3754_v58  ;;  %v3763_v4 = vld [vmem:[#allocation11 + $0x288] sm:$0xff]  ;;  %v3786_v15 = vld [vmem:[#allocation11 + $0x340] sm:$0xff]  ;;  %v3788_v18 = vld [vmem:[#allocation11 + $0x350] sm:$0xff] }
 0x827   :  { %v3790_v8 = vld [vmem:[#allocation11 + $0x360] sm:$0xff]  ;;  %v3792_v58 = vld [vmem:[#allocation11 + $0x370] sm:$0xff] }
 0x828   :  { %v7453_v51 = vpack.c.bf16 %v3792_v58, %v3788_v18  ;;  %v3493_v18 = vrot.slane %v9806_v26, 6 }
 0x829   :  { %7358 = vmatpush1.bf16.msra.mxu0 %v7357_v29  ;;  %7422 = vmatpush1.bf16.msra.mxu1 %v7421_v50  ;;  %v3767_v29 = vld [vmem:[#allocation11 + $0x2a8] sm:$0xff]  ;;  %v3769_v50 = vld [vmem:[#allocation11 + $0x2b8] sm:$0xff] }
 0x82a   :  { %7360 = vmatprep.subr.bf16.mxu0 %v7359_v46  ;;  %7424 = vmatprep.subr.bf16.mxu1 %v7423_v37  ;;  %v7375_v53 = vpack.c.bf16 %v3767_v29, %v3763_v4  ;;  %v7439_v32 = vpack.c.bf16 %v3769_v50, %v3765_v31  ;;  %v7377_v46 = vpack.c.bf16 %v3766_v56, %v3762_v39  ;;  %v3771_v37 = vld [vmem:[#allocation11 + $0x2c8] sm:$0xff]  ;;  %v3794_v4 = vld [vmem:[#allocation11 + $0x380] sm:$0xff]  ;;  %v3796_v50 = vld [vmem:[#allocation11 + $0x390] sm:$0xff] }
 0x82b   :  { %v3798_v29 = vld [vmem:[#allocation11 + $0x3a0] sm:$0xff]  ;;  %v3800_v39 = vld [vmem:[#allocation11 + $0x3b0] sm:$0xff]  ;;  %v3803_v56 = vld [vmem:[#allocation11 + $0x3c8] sm:$0xff] }
 0x82d   :  { %7362 = vmatpush1.bf16.msra.mxu0 %v7361_v34  ;;  %7426 = vmatpush1.bf16.msra.mxu1 %v7425_v6  ;;  %v3775_v34 = vld [vmem:[#allocation11 + $0x2e8] sm:$0xff]  ;;  %v3777_v6 = vld [vmem:[#allocation11 + $0x2f8] sm:$0xff] }
 0x82e   :  { %7364 = vmatprep.subr.bf16.mxu0 %v7363_v17  ;;  %7428 = vmatprep.subr.bf16.mxu1 %v7427_v21  ;;  %v7379_v55 = vpack.c.bf16 %v3775_v34, %v3771_v37  ;;  %v7443_v16 = vpack.c.bf16 %v3777_v6, %v3773_v45  ;;  %v7381_v17 = vpack.c.bf16 %v3774_v61, %v3770_v24  ;;  %v3779_v21 = vld [vmem:[#allocation11 + $0x308] sm:$0xff]  ;;  %v3802_v34 = vld [vmem:[#allocation11 + $0x3c0] sm:$0xff]  ;;  %v3808_v24 = vld [vmem:[#allocation11 + $0x3f0] sm:$0xff] }
 0x82f   :  { %v7459_v37 = vpack.c.bf16 %v3809_v30, %v3805_v12  ;;  %v3806_v45 = vld [vmem:[#allocation11 + $0x3e0] sm:$0xff] }
 0x830   :  { %v7397_v6 = vpack.c.bf16 %v3806_v45, %v3802_v34 }
 0x831   :  { %7366 = vmatpush1.bf16.msra.mxu0 %v7365_v22  ;;  %7430 = vmatpush1.bf16.msra.mxu1 %v7429_v13  ;;  %v3783_v22 = vld [vmem:[#allocation11 + $0x328] sm:$0xff]  ;;  %v3785_v13 = vld [vmem:[#allocation11 + $0x338] sm:$0xff] }
 0x832   :  { %7368 = vmatprep.subr.bf16.mxu0 %v7367_v42  ;;  %7432 = vmatprep.subr.bf16.mxu1 %v7431_v25  ;;  %v7383_v11 = vpack.c.bf16 %v3783_v22, %v3779_v21  ;;  %v7447_v38 = vpack.c.bf16 %v3785_v13, %v3781_v20  ;;  %v7385_v42 = vpack.c.bf16 %v3782_v27, %v3778_v14  ;;  %v3787_v25 = vld [vmem:[#allocation11 + $0x348] sm:$0xff] }
 0x835   :  { %7370 = vmatpush1.bf16.msra.mxu0 %v7369_v0  ;;  %7434 = vmatpush1.bf16.msra.mxu1 %v7433_v9  ;;  %v3791_v0 = vld [vmem:[#allocation11 + $0x368] sm:$0xff]  ;;  %v3793_v9 = vld [vmem:[#allocation11 + $0x378] sm:$0xff] }
 0x836   :  { %7372 = vmatprep.subr.bf16.mxu0 %v7371_v57  ;;  %7436 = vmatprep.subr.bf16.mxu1 %v7435_v23  ;;  %v7387_v35 = vpack.c.bf16 %v3791_v0, %v3787_v25  ;;  %v7451_v7 = vpack.c.bf16 %v3793_v9, %v3789_v48  ;;  %v7389_v57 = vpack.c.bf16 %v3790_v8, %v3786_v15  ;;  %v3795_v23 = vld [vmem:[#allocation11 + $0x388] sm:$0xff] }
 0x839   :  { %7374 = vmatpush1.bf16.msra.mxu0 %v7373_v62  ;;  %7438 = vmatpush1.bf16.msra.mxu1 %v7437_v59  ;;  %v3799_v62 = vld [vmem:[#allocation11 + $0x3a8] sm:$0xff]  ;;  %v3801_v59 = vld [vmem:[#allocation11 + $0x3b8] sm:$0xff] }
 0x83a   :  { %7376 = vmatprep.subr.bf16.mxu0 %v7375_v53  ;;  %7440 = vmatprep.subr.bf16.mxu1 %v7439_v32  ;;  %v7391_v41 = vpack.c.bf16 %v3799_v62, %v3795_v23  ;;  %v7455_v31 = vpack.c.bf16 %v3801_v59, %v3797_v60  ;;  %v7393_v53 = vpack.c.bf16 %v3798_v29, %v3794_v4 }
 0x83b   :  { %v7457_v32 = vpack.c.bf16 %v3800_v39, %v3796_v50 }
 0x83d   :  { %7378 = vmatpush1.bf16.msra.mxu0 %v7377_v46  ;;  %7442 = vmatpush1.bf16.msra.mxu1 %v7441_v49  ;;  %v3807_v46 = vld [vmem:[#allocation11 + $0x3e8] sm:$0xff] }
 0x83e   :  { %7380 = vmatprep.subr.bf16.mxu0 %v7379_v55  ;;  %7444 = vmatprep.subr.bf16.mxu1 %v7443_v16  ;;  %v7395_v49 = vpack.c.bf16 %v3807_v46, %v3803_v56  ;;  %v3804_v55 = vld [vmem:[#allocation11 + $0x3d0] sm:$0xff]  ;;  %v3987_v16 = vld [vmem:[#allocation12 + $0x8] sm:$0xff] }
 0x83f   :  { %v7461_v61 = vpack.c.bf16 %v3808_v24, %v3804_v55 }
 0x841   :  { %7382 = vmatpush1.bf16.msra.mxu0 %v7381_v17  ;;  %7446 = vmatpush1.bf16.msra.mxu1 %v7445_v54  ;;  %v3991_v17 = vld [vmem:[#allocation12 + $0x28] sm:$0xff]  ;;  %v3993_v54 = vld [vmem:[#allocation12 + $0x38] sm:$0xff] }
 0x842   :  { %7384 = vmatprep.subr.bf16.mxu0 %v7383_v11  ;;  %7448 = vmatprep.subr.bf16.mxu1 %v7447_v38  ;;  %v9849_v5 = vpack.c.bf16 %v3991_v17, %v3987_v16  ;;  %v9851_v21 = vpack.c.bf16 %v3993_v54, %v3989_v36  ;;  %v3986_v36 = vld [vmem:[#allocation12] sm:$0xff] }
 0x843   :  { %v3990_v54 = vld [vmem:[#allocation12 + $0x20] sm:$0xff] }
 0x845   :  { %7386 = vmatpush1.bf16.msra.mxu0 %v7385_v42  ;;  %7450 = vmatpush1.bf16.msra.mxu1 %v7449_v47 }
 0x846   :  { %7388 = vmatprep.subr.bf16.mxu0 %v7387_v35  ;;  %7452 = vmatprep.subr.bf16.mxu1 %v7451_v7 }
 0x849   :  { %7390 = vmatpush1.bf16.msra.mxu0 %v7389_v57  ;;  %7454 = vmatpush1.bf16.msra.mxu1 %v7453_v51 }
 0x84a   :  { %7392 = vmatprep.subr.bf16.mxu0 %v7391_v41  ;;  %7456 = vmatprep.subr.bf16.mxu1 %v7455_v31 }
 0x84d   :  { %7394 = vmatpush1.bf16.msra.mxu0 %v7393_v53  ;;  %7458 = vmatpush1.bf16.msra.mxu1 %v7457_v32 }
 0x84e   :  { %7396 = vmatprep.subr.bf16.mxu0 %v7395_v49  ;;  %7460 = vmatprep.subr.bf16.mxu1 %v7459_v37 }
 0x851   :  { %7398 = vmatpush1.bf16.msra.mxu0 %v7397_v6  ;;  %7462 = vmatpush1.bf16.msra.mxu1 %v7461_v61 }
 0x852   :  { %7464 = vmatprep.subr.bf16.mxu0 %v9849_v5  ;;  %7496 = vmatprep.subr.bf16.mxu1 %v9851_v21 }
 0x8c3   :  { %v3381_v22 = vpop.f32.mrb[36].mxu0  ;;  %v3452_v20 = vpop.f32.mrb[36].mxu1 }
 0x8c4   :  { %v3461_v11 = vrot.slane %v3381_v22, 2  ;;  %v3383_v13 = vpop.f32.mrb[37].mxu0  ;;  %v3454_v14 = vpop.f32.mrb[37].mxu1  ;;  %v3463_v0 = vrot.slane %v3452_v20, 2  ;;  %v3988_v22 = vld [vmem:[#allocation12 + $0x10] sm:$0xff] }
 0x8c5   :  { %v3462_v27 = vrot.slane %v3383_v13, 2  ;;  %v3464_v47 = vrot.slane %v3454_v14, 2  ;;  %v3992_v20 = vld [vmem:[#allocation12 + $0x30] sm:$0xff]  ;;  %v3999_v13 = vld [vmem:[#allocation12 + $0x68] sm:$0xff]  ;;  %v3997_v14 = vld [vmem:[#allocation12 + $0x58] sm:$0xff] }
 0x8c6   :  { %v3469_v38 = vadd.f32 %v3461_v11, %v10735_v28  ;;  %v3471_v35 = vadd.f32 %v3463_v0, %v10767_v44  ;;  %v3995_v11 = vld [vmem:[#allocation12 + $0x48] sm:$0xff]  ;;  %v4000_v0 = vld [vmem:[#allocation12 + $0x70] sm:$0xff] }
 0x8c7   :  { %v3470_v42 = vadd.f32 %v3462_v27, %v10736_v63  ;;  %v3472_v25 = vadd.f32 %v3464_v47, %v10737_v33  ;;  %v4001_v27 = vld [vmem:[#allocation12 + $0x78] sm:$0xff]  ;;  %v3996_v47 = vld [vmem:[#allocation12 + $0x50] sm:$0xff] }
 0x8c8   :  { %v6093_v43 = vmul.f32 -1.442695, %v3469_v38  ;;  %v9865_v38 = vpack.c.bf16 %v3990_v54, %v3986_v36  ;;  %v4026_v54 = vld [vmem:[#allocation12 + $0x140] sm:$0xff] }
 0x8c9   :  { %v6094_v52 = vmul.f32 -1.442695, %v3470_v42  ;;  %v6095_v48 = vmul.f32 -1.442695, %v3472_v25  ;;  %v9867_v42 = vpack.c.bf16 %v3992_v20, %v3988_v22  ;;  %v4030_v22 = vld [vmem:[#allocation12 + $0x160] sm:$0xff] }
 0x8ca   :  { %8388 = vpow2.f32 %v6093_v43  ;;  %v3994_v43 = vld [vmem:[#allocation12 + $0x40] sm:$0xff] }
 0x8cb   :  { %8390 = vpow2.f32 %v6094_v52  ;;  %v3998_v52 = vld [vmem:[#allocation12 + $0x60] sm:$0xff] }
 0x8cc   :  { %8392 = vpow2.f32 %v6095_v48  ;;  %v4003_v48 = vld [vmem:[#allocation12 + $0x88] sm:$0xff] }
 0x8cd   :  { %8394 = vtanh.f32 %v3471_v35  ;;  %v9869_v35 = vpack.c.bf16 %v3999_v13, %v3995_v11  ;;  %v4028_v13 = vld [vmem:[#allocation12 + $0x150] sm:$0xff] }
 0x8d4   :  { %v8389_v9 = vpop.eup %8388 }
 0x8d5   :  { %v8391_v15 = vpop.eup %8390  ;;  %v3476_v8 = vadd.f32 1.0, %v8389_v9  ;;  %v9871_v9 = vpack.c.bf16 %v4001_v27, %v3997_v14  ;;  %v4032_v14 = vld [vmem:[#allocation12 + $0x170] sm:$0xff]  ;;  %v4035_v27 = vld [vmem:[#allocation12 + $0x188] sm:$0xff] }
 0x8d6   :  { %v3482_v7 = vadd.f32 1.0, %v8391_v15  ;;  %v8393_v63 = vpop.eup %8392  ;;  %v4007_v15 = vld [vmem:[#allocation12 + $0xa8] sm:$0xff] }
 0x8d7   :  { %8396 = vrcp.f32 %v3476_v8  ;;  %v8395_v28 = vpop.eup %8394  ;;  %v3489_v33 = vadd.f32 1.0, %v8393_v63  ;;  %v4005_v8 = vld [vmem:[#allocation12 + $0x98] sm:$0xff] }
 0x8d8   :  { %8398 = vrcp.f32 %v3482_v7  ;;  %v4009_v7 = vld [vmem:[#allocation12 + $0xb8] sm:$0xff] }
 0x8d9   :  { %8400 = vrcp.f32 %v3489_v33  ;;  %v3681_v63 = vld [vmem:[#allocation2 + $0x18] sm:$0xff]  ;;  %v9879_v33 = vpack.c.bf16 %v4007_v15, %v4003_v48  ;;  %v4038_v48 = vld [vmem:[#allocation12 + $0x1a0] sm:$0xff] }
 0x8e1   :  { %v8397_v57 = vpop.eup %8396 }
 0x8e2   :  { %v8399_v58 = vpop.eup %8398  ;;  %v3496_v51 = vmul.f32 %v8397_v57, %v8395_v28  ;;  %v9875_v28 = vpack.c.bf16 %v3998_v52, %v3994_v43  ;;  %v9877_v57 = vpack.c.bf16 %v4000_v0, %v3996_v47  ;;  %v4037_v43 = vld [vmem:[#allocation12 + $0x198] sm:$0xff]  ;;  %v9925_v47 = vpack.c.bf16 %v4030_v22, %v4026_v54  ;;  %v4034_v0 = vld [vmem:[#allocation12 + $0x180] sm:$0xff]  ;;  %v10771_v54 = vld [vmem:[#allocation62_spill] sm:$0xff] }
 0x8e3   :  { %v3495_v23 = vmul.f32 %v8399_v58, %v3493_v18  ;;  %v8401_v50 = vpop.eup %8400  ;;  %v4002_v18 = vld [vmem:[#allocation12 + $0x80] sm:$0xff]  ;;  %v4041_v52 = vld [vmem:[#allocation12 + $0x1b8] sm:$0xff] }
 0x8e4   :  { %v4006_v58 = vld [vmem:[#allocation12 + $0xa0] sm:$0xff] }
 0x8e5   :  { %v3497_v62 = vadd.f32 %v3496_v51, %v3495_v23  ;;  %v4004_v51 = vld [vmem:[#allocation12 + $0x90] sm:$0xff]  ;;  %v9881_v23 = vpack.c.bf16 %v4009_v7, %v4005_v8  ;;  %v9933_v8 = vpack.c.bf16 %v4041_v52, %v4037_v43 }
 0x8e6   :  { %v4036_v7 = vld [vmem:[#allocation12 + $0x190] sm:$0xff] }
 0x8e7   :  { %8402 = vtanh.f32 %v3497_v62  ;;  %v3570_v44 = vpop.f32.mrb[38].mxu0  ;;  %v3641_v60 = vpop.f32.mrb[38].mxu1  ;;  %v4008_v62 = vld [vmem:[#allocation12 + $0xb0] sm:$0xff] }
 0x8e8   :  { %v3646_v41 = vadd.f32 %v3570_v44, %v10708_v1  ;;  %v3572_v59 = vpop.f32.mrb[39].mxu0  ;;  %v3643_v4 = vpop.f32.mrb[39].mxu1  ;;  %v3648_v46 = vadd.f32 %v3641_v60, %v10711_v40  ;;  %v4011_v44 = vld [vmem:[#allocation12 + $0xc8] sm:$0xff] }
 0x8e9   :  { %v3647_v29 = vadd.f32 %v3572_v59, %v10709_v10  ;;  %v3649_v26 = vadd.f32 %v3643_v4, %v10710_v19  ;;  %v3670_v19 = vrot.slane %v9836_v2, 2  ;;  %v3678_v2 = vld [vmem:[#allocation2] sm:$0xff]  ;;  %v4015_v60 = vld [vmem:[#allocation12 + $0xe8] sm:$0xff]  ;;  %v4013_v59 = vld [vmem:[#allocation12 + $0xd8] sm:$0xff] }
 0x8ea   :  { %v6096_v31 = vmul.f32 -1.442695, %v3646_v41  ;;  %v4017_v4 = vld [vmem:[#allocation12 + $0xf8] sm:$0xff] }
 0x8eb   :  { %v6097_v53 = vmul.f32 -1.442695, %v3647_v29  ;;  %v6098_v32 = vmul.f32 -1.442695, %v3649_v26  ;;  %v9887_v29 = vpack.c.bf16 %v4006_v58, %v4002_v18  ;;  %v4014_v26 = vld [vmem:[#allocation12 + $0xe0] sm:$0xff]  ;;  %v4043_v18 = vld [vmem:[#allocation12 + $0x1c8] sm:$0xff] }
 0x8ec   :  { %8404 = vpow2.f32 %v6096_v31  ;;  %v9889_v31 = vpack.c.bf16 %v4008_v62, %v4004_v51  ;;  %v4047_v58 = vld [vmem:[#allocation12 + $0x1e8] sm:$0xff]  ;;  %v4045_v51 = vld [vmem:[#allocation12 + $0x1d8] sm:$0xff] }
 0x8ed   :  { %8406 = vpow2.f32 %v6097_v53  ;;  %v4010_v53 = vld [vmem:[#allocation12 + $0xc0] sm:$0xff]  ;;  %v4049_v62 = vld [vmem:[#allocation12 + $0x1f8] sm:$0xff] }
 0x8ee   :  { %8408 = vpow2.f32 %v6098_v32  ;;  %v4016_v32 = vld [vmem:[#allocation12 + $0xf0] sm:$0xff] }
 0x8ef   :  { %8410 = vtanh.f32 %v3648_v46  ;;  %v4019_v46 = vld [vmem:[#allocation12 + $0x108] sm:$0xff] }
 0x8f1   :  { %v8403_v39 = vpop.eup %8402 }
 0x8f2   :  { %v3499_v56 = vmul.f32 %v8403_v39, %v8401_v50  ;;  %v9893_v50 = vpack.c.bf16 %v4015_v60, %v4011_v44  ;;  %v9895_v39 = vpack.c.bf16 %v4017_v4, %v4013_v59  ;;  %v9937_v44 = vpack.c.bf16 %v4038_v48, %v4034_v0 }
 0x8f3   :  { %v9943_v59 = vpack.c.bf16 %v4047_v58, %v4043_v18  ;;  %v9945_v4 = vpack.c.bf16 %v4049_v62, %v4045_v51 }
 0x8f4   :  { %3500 = vst [vmem:[#allocation2 + $0x10] sm:$0xc0] %v3499_v56  ;;  %v4012_v56 = vld [vmem:[#allocation12 + $0xd0] sm:$0xff] }
 0x8f6   :  { %v8405_v12 = vpop.eup %8404 }
 0x8f7   :  { %v8407_v30 = vpop.eup %8406  ;;  %v3653_v1 = vadd.f32 1.0, %v8405_v12  ;;  %v4023_v12 = vld [vmem:[#allocation12 + $0x128] sm:$0xff] }
 0x8f8   :  { %v3659_v49 = vadd.f32 1.0, %v8407_v30  ;;  %v8409_v10 = vpop.eup %8408  ;;  %v4021_v30 = vld [vmem:[#allocation12 + $0x118] sm:$0xff] }
 0x8f9   :  { %8412 = vrcp.f32 %v3653_v1  ;;  %v8411_v37 = vpop.eup %8410  ;;  %v3666_v6 = vadd.f32 1.0, %v8409_v10  ;;  %v4025_v1 = vld [vmem:[#allocation12 + $0x138] sm:$0xff]  ;;  %v9903_v10 = vpack.c.bf16 %v4016_v32, %v4012_v56  ;;  %v4048_v56 = vld [vmem:[#allocation12 + $0x1f0] sm:$0xff] }
 0x8fa   :  { %8414 = vrcp.f32 %v3659_v49  ;;  %v9901_v49 = vpack.c.bf16 %v4014_v26, %v4010_v53  ;;  %v4046_v53 = vld [vmem:[#allocation12 + $0x1e0] sm:$0xff]  ;;  %v4044_v26 = vld [vmem:[#allocation12 + $0x1d0] sm:$0xff] }
 0x8fb   :  { %8416 = vrcp.f32 %v3666_v6  ;;  %v3680_v41 = vld [vmem:[#allocation2 + $0x10] sm:$0xff] }
 0x8fc   :  { %v4024_v6 = vld [vmem:[#allocation12 + $0x130] sm:$0xff] }
 0x903   :  { %v8413_v34 = vpop.eup %8412 }
 0x904   :  { %v8415_v45 = vpop.eup %8414  ;;  %v3673_v55 = vmul.f32 %v8413_v34, %v8411_v37  ;;  %v4018_v37 = vld [vmem:[#allocation12 + $0x100] sm:$0xff] }
 0x905   :  { %v3672_v24 = vmul.f32 %v8415_v45, %v3670_v19  ;;  %v8417_v40 = vpop.eup %8416  ;;  %v4022_v34 = vld [vmem:[#allocation12 + $0x120] sm:$0xff]  ;;  %v9907_v19 = vpack.c.bf16 %v4023_v12, %v4019_v46  ;;  %v9909_v45 = vpack.c.bf16 %v4025_v1, %v4021_v30  ;;  %v9951_v46 = vpack.c.bf16 %v4048_v56, %v4044_v26 }
 0x906   :  { %v3810_v12 = vld [vmem:[%s10425_s9] sm:$0xf] }
 0x907   :  { %v3674_v61 = vadd.f32 %v3673_v55, %v3672_v24  ;;  %v4020_v55 = vld [vmem:[#allocation12 + $0x110] sm:$0xff]  ;;  %v4027_v24 = vld [vmem:[#allocation12 + $0x148] sm:$0xff]  ;;  %v3827_v22 = vrot.slane %v3810_v12, %v10771_v54 }
 0x908   :  { %v9915_v36 = vpack.c.bf16 %v4024_v6, %v4020_v55  ;;  %v10768_v55 = vld [vmem:[#allocation59_spill] sm:$0xff] }
 0x909   :  { %8418 = vtanh.f32 %v3674_v61  ;;  %v4031_v61 = vld [vmem:[#allocation12 + $0x168] sm:$0xff]  ;;  %v3815_v6 = vrot.slane %v3810_v12, %v10768_v55 }
 0x90a   :  { %v9919_v20 = vpack.c.bf16 %v4031_v61, %v4027_v24  ;;  %v10769_v24 = vld [vmem:[#allocation61_spill] sm:$0xff] }
 0x90b   :  { %v3823_v61 = vrot.slane %v3810_v12, %v10769_v24 }
 0x913   :  { %v8419_v16 = vpop.eup %8418 }
 0x914   :  { %v3676_v17 = vmul.f32 %v8419_v16, %v8417_v40  ;;  %v4029_v40 = vld [vmem:[#allocation12 + $0x158] sm:$0xff] }
 0x915   :  { %v4033_v16 = vld [vmem:[#allocation12 + $0x178] sm:$0xff] }
 0x916   :  { %3677 = vst [vmem:[#allocation2 + $0x8] sm:$0x3] %v3676_v17  ;;  %v9913_v17 = vpack.c.bf16 %v4022_v34, %v4018_v37  ;;  %v9921_v11 = vpack.c.bf16 %v4033_v16, %v4029_v40  ;;  %v10770_v40 = vld [vmem:[#allocation60_spill] sm:$0xff] }
 0x917   :  { %v3819_v16 = vrot.slane %v3810_v12, %v10770_v40 }
 0x91d   :  { %v3679_v25 = vld [vmem:[#allocation2 + $0x8] sm:$0xff] }
 0x91e   :  { %3896 = vmatprep.mubr.f32.mxu0 %v3679_v25  ;;  %3973 = vmatprep.mubr.f32.mxu1 %v3679_v25  ;;  %v9927_v25 = vpack.c.bf16 %v4032_v14, %v4028_v13 }
 0x91f   :  { %3897 = vmatmul.mubr.f32.vlgmr.msra.gmra.mrb[40].mxu0 %v3678_v2  ;;  %3974 = vmatmul.mubr.f32.vlgmr.msra.gmra.mrb[40].mxu1 %v3678_v2  ;;  %v4039_v2 = vld [vmem:[#allocation12 + $0x1a8] sm:$0xff] }
 0x920   :  { %7466 = vmatpush1.bf16.msra.mxu0 %v9865_v38  ;;  %7498 = vmatpush1.bf16.msra.mxu1 %v9867_v42  ;;  %v9931_v15 = vpack.c.bf16 %v4039_v2, %v4035_v27 }
 0x921   :  { %3902 = vmatprep.mubr.f32.mxu0 %v3681_v63  ;;  %3979 = vmatprep.mubr.f32.mxu1 %v3681_v63  ;;  %v4040_v63 = vld [vmem:[#allocation12 + $0x1b0] sm:$0xff] }
 0x922   :  { %7468 = vmatprep.subr.bf16.mxu0 %v9869_v35  ;;  %7500 = vmatprep.subr.bf16.mxu1 %v9871_v9  ;;  %v9939_v60 = vpack.c.bf16 %v4040_v63, %v4036_v7 }
 0x923   :  { %3903 = vmatmul.mubr.f32.gmra.mrb[42].mxu0 %v3680_v41  ;;  %3980 = vmatmul.mubr.f32.gmra.mrb[42].mxu1 %v3680_v41  ;;  %v4042_v41 = vld [vmem:[#allocation12 + $0x1c0] sm:$0xff] }
 0x924   :  { %7470 = vmatpush1.bf16.msra.mxu0 %v9875_v28  ;;  %7502 = vmatpush1.bf16.msra.mxu1 %v9877_v57  ;;  %v9949_v32 = vpack.c.bf16 %v4046_v53, %v4042_v41 }
 0x925   :  { %7472 = vmatprep.subr.bf16.mxu0 %v9879_v33  ;;  %7504 = vmatprep.subr.bf16.mxu1 %v9881_v23 }
 0x926   :  { %4114 = vmatprep.mubr.f32.mxu0 %v10573_v3  ;;  %4185 = vmatprep.mubr.f32.mxu1 %v10573_v3 }
 0x928   :  { %7474 = vmatpush1.bf16.msra.mxu0 %v9887_v29  ;;  %7506 = vmatpush1.bf16.msra.mxu1 %v9889_v31 }
 0x929   :  { %7476 = vmatprep.subr.bf16.mxu0 %v9893_v50  ;;  %7508 = vmatprep.subr.bf16.mxu1 %v9895_v39 }
 0x92c   :  { %7478 = vmatpush1.bf16.msra.mxu0 %v9901_v49  ;;  %7510 = vmatpush1.bf16.msra.mxu1 %v9903_v10 }
 0x92d   :  { %7480 = vmatprep.subr.bf16.mxu0 %v9907_v19  ;;  %7512 = vmatprep.subr.bf16.mxu1 %v9909_v45 }
 0x930   :  { %7482 = vmatpush1.bf16.msra.mxu0 %v9913_v17  ;;  %7514 = vmatpush1.bf16.msra.mxu1 %v9915_v36 }
 0x931   :  { %7484 = vmatprep.subr.bf16.mxu0 %v9919_v20  ;;  %7516 = vmatprep.subr.bf16.mxu1 %v9921_v11 }
 0x934   :  { %7486 = vmatpush1.bf16.msra.mxu0 %v9925_v47  ;;  %7518 = vmatpush1.bf16.msra.mxu1 %v9927_v25 }
 0x935   :  { %7488 = vmatprep.subr.bf16.mxu0 %v9931_v15  ;;  %7520 = vmatprep.subr.bf16.mxu1 %v9933_v8 }
 0x938   :  { %7490 = vmatpush1.bf16.msra.mxu0 %v9937_v44  ;;  %7522 = vmatpush1.bf16.msra.mxu1 %v9939_v60 }
 0x939   :  { %7492 = vmatprep.subr.bf16.mxu0 %v9943_v59  ;;  %7524 = vmatprep.subr.bf16.mxu1 %v9945_v4 }
 0x93c   :  { %7494 = vmatpush1.bf16.msra.mxu0 %v9949_v32  ;;  %7526 = vmatpush1.bf16.msra.mxu1 %v9951_v46 }
 0x93d   :  { %7528 = vmatprep.subr.bf16.mxu0 %v9849_v5  ;;  %7560 = vmatprep.subr.bf16.mxu1 %v9851_v21 }
 0x93f   :  { %4115 = vmatmul.mubr.f32.vlgmr.msra.gmra.mrb[44].mxu0 %v10573_v3  ;;  %4186 = vmatmul.mubr.f32.vlgmr.msra.gmra.mrb[44].mxu1 %v10573_v3 }
 0x940   :  { %7530 = vmatpush1.bf16.msra.mxu0 %v9865_v38  ;;  %7562 = vmatpush1.bf16.msra.mxu1 %v9867_v42 }
 0x941   :  { %7532 = vmatprep.subr.bf16.mxu0 %v9869_v35  ;;  %7564 = vmatprep.subr.bf16.mxu1 %v9871_v9 }
 0x942   :  { %4284 = vmatprep.mubr.f32.mxu0 %v10573_v3  ;;  %4355 = vmatprep.mubr.f32.mxu1 %v10573_v3 }
 0x944   :  { %7534 = vmatpush1.bf16.msra.mxu0 %v9875_v28  ;;  %7566 = vmatpush1.bf16.msra.mxu1 %v9877_v57 }
 0x945   :  { %7536 = vmatprep.subr.bf16.mxu0 %v9879_v33  ;;  %7568 = vmatprep.subr.bf16.mxu1 %v9881_v23 }
 0x948   :  { %7538 = vmatpush1.bf16.msra.mxu0 %v9887_v29  ;;  %7570 = vmatpush1.bf16.msra.mxu1 %v9889_v31 }
 0x949   :  { %7540 = vmatprep.subr.bf16.mxu0 %v9893_v50  ;;  %7572 = vmatprep.subr.bf16.mxu1 %v9895_v39 }
 0x94c   :  { %7542 = vmatpush1.bf16.msra.mxu0 %v9901_v49  ;;  %7574 = vmatpush1.bf16.msra.mxu1 %v9903_v10 }
 0x94d   :  { %7544 = vmatprep.subr.bf16.mxu0 %v9907_v19  ;;  %7576 = vmatprep.subr.bf16.mxu1 %v9909_v45 }
 0x950   :  { %7546 = vmatpush1.bf16.msra.mxu0 %v9913_v17  ;;  %7578 = vmatpush1.bf16.msra.mxu1 %v9915_v36 }
 0x951   :  { %7548 = vmatprep.subr.bf16.mxu0 %v9919_v20  ;;  %7580 = vmatprep.subr.bf16.mxu1 %v9921_v11 }
 0x954   :  { %7550 = vmatpush1.bf16.msra.mxu0 %v9925_v47  ;;  %7582 = vmatpush1.bf16.msra.mxu1 %v9927_v25 }
 0x955   :  { %7552 = vmatprep.subr.bf16.mxu0 %v9931_v15  ;;  %7584 = vmatprep.subr.bf16.mxu1 %v9933_v8 }
 0x958   :  { %7554 = vmatpush1.bf16.msra.mxu0 %v9937_v44  ;;  %7586 = vmatpush1.bf16.msra.mxu1 %v9939_v60 }
 0x959   :  { %7556 = vmatprep.subr.bf16.mxu0 %v9943_v59  ;;  %7588 = vmatprep.subr.bf16.mxu1 %v9945_v4 }
 0x95c   :  { %7558 = vmatpush1.bf16.msra.mxu0 %v9949_v32  ;;  %7590 = vmatpush1.bf16.msra.mxu1 %v9951_v46 }
 0x95d   :  { %7592 = vmatprep.subr.bf16.mxu0 %v9849_v5  ;;  %7624 = vmatprep.subr.bf16.mxu1 %v9851_v21 }
 0x9f2   :  { %v3898_v30 = vpop.f32.mrb[40].mxu0  ;;  %v3975_v1 = vpop.f32.mrb[40].mxu1 }
 0x9f3   :  { %v3900_v37 = vpop.f32.mrb[41].mxu0  ;;  %v3977_v34 = vpop.f32.mrb[41].mxu1  ;;  %v10010_v7 = vadd.f32 %v3898_v30, %v3815_v6  ;;  %v10019_v30 = vadd.f32 %v3975_v1, %v3823_v61 }
 0x9f4   :  { %v10012_v63 = vadd.f32 %v3900_v37, %v3819_v16  ;;  %v10016_v12 = vadd.f32 %v3977_v34, %v3827_v22 }
 0x9f6   :  { %v3904_v13 = vpop.f32.mrb[42].mxu0  ;;  %v3981_v14 = vpop.f32.mrb[42].mxu1 }
 0x9f7   :  { %v10002_v27 = vadd.f32 %v3904_v13, %v3815_v6  ;;  %v10004_v2 = vadd.f32 %v3981_v14, %v3823_v61  ;;  %v3906_v43 = vpop.f32.mrb[43].mxu0  ;;  %v3983_v52 = vpop.f32.mrb[43].mxu1 }
 0x9f8   :  { %v10006_v0 = vadd.f32 %v3906_v43, %v3819_v16  ;;  %v10008_v48 = vadd.f32 %v3983_v52, %v3827_v22 }
 0xa12   :  { %v4116_v18 = vpop.f32.mrb[44].mxu0  ;;  %v4187_v58 = vpop.f32.mrb[44].mxu1 }
 0xa13   :  { %v4192_v51 = vadd.f32 %v4116_v18, %v10010_v7  ;;  %v4118_v62 = vpop.f32.mrb[45].mxu0  ;;  %v4189_v41 = vpop.f32.mrb[45].mxu1  ;;  %v4194_v6 = vadd.f32 %v4187_v58, %v10019_v30 }
 0xa14   :  { %v4193_v53 = vadd.f32 %v4118_v62, %v10012_v63  ;;  %v4195_v13 = vadd.f32 %v4189_v41, %v10016_v12 }
 0xa15   :  { %v6099_v26 = vmul.f32 -1.442695, %v4192_v51 }
 0xa16   :  { %v6100_v56 = vmul.f32 -1.442695, %v4193_v53  ;;  %v6101_v37 = vmul.f32 -1.442695, %v4195_v13 }
 0xa17   :  { %8420 = vpow2.f32 %v6099_v26 }
 0xa18   :  { %8422 = vpow2.f32 %v6100_v56 }
 0xa19   :  { %8424 = vpow2.f32 %v6101_v37 }
 0xa1a   :  { %8426 = vtanh.f32 %v4194_v6 }
 0xa21   :  { %v8421_v16 = vpop.eup %8420 }
 0xa22   :  { %v8423_v14 = vpop.eup %8422  ;;  %v4199_v43 = vadd.f32 1.0, %v8421_v16 }
 0xa23   :  { %v4205_v52 = vadd.f32 1.0, %v8423_v14  ;;  %v8425_v18 = vpop.eup %8424 }
 0xa24   :  { %8428 = vrcp.f32 %v4199_v43  ;;  %v8427_v51 = vpop.eup %8426  ;;  %v4212_v53 = vadd.f32 1.0, %v8425_v18 }
 0xa25   :  { %8430 = vrcp.f32 %v4205_v52 }
 0xa26   :  { %8432 = vrcp.f32 %v4212_v53 }
 0xa2e   :  { %v8429_v34 = vpop.eup %8428 }
 0xa2f   :  { %v8431_v22 = vpop.eup %8430  ;;  %v4216_v62 = vmul.f32 %v8429_v34, %v8427_v51 }
 0xa30   :  { %v4215_v41 = vmul.f32 0.0, %v8431_v22  ;;  %v8433_v61 = vpop.eup %8432 }
 0xa32   :  { %v10022_v1 = vadd.f32 %v4216_v62, %v4215_v41 }
 0xa34   :  { %8434 = vtanh.f32 %v10022_v1 }
 0xa3e   :  { %v8435_v58 = vpop.eup %8434 }
 0xa3f   :  { %v4219_v26 = vmul.f32 %v8435_v58, %v8433_v61 }
 0xa41   :  { %4285 = vmatmul.mubr.f32.vlgmr.msra.gmra.mrb[46].mxu0 %v4219_v26  ;;  %4356 = vmatmul.mubr.f32.vlgmr.msra.gmra.mrb[46].mxu1 %v4219_v26 }
 0xa42   :  { %7594 = vmatpush1.bf16.msra.mxu0 %v9865_v38  ;;  %7626 = vmatpush1.bf16.msra.mxu1 %v9867_v42 }
 0xa43   :  { %7596 = vmatprep.subr.bf16.mxu0 %v9869_v35  ;;  %7628 = vmatprep.subr.bf16.mxu1 %v9871_v9 }
 0xa44   :  { %4472 = vmatprep.mubr.f32.mxu0 %v10573_v3  ;;  %4543 = vmatprep.mubr.f32.mxu1 %v10573_v3 }
 0xa46   :  { %7598 = vmatpush1.bf16.msra.mxu0 %v9875_v28  ;;  %7630 = vmatpush1.bf16.msra.mxu1 %v9877_v57 }
 0xa47   :  { %7600 = vmatprep.subr.bf16.mxu0 %v9879_v33  ;;  %7632 = vmatprep.subr.bf16.mxu1 %v9881_v23 }
 0xa4a   :  { %7602 = vmatpush1.bf16.msra.mxu0 %v9887_v29  ;;  %7634 = vmatpush1.bf16.msra.mxu1 %v9889_v31 }
 0xa4b   :  { %7604 = vmatprep.subr.bf16.mxu0 %v9893_v50  ;;  %7636 = vmatprep.subr.bf16.mxu1 %v9895_v39 }
 0xa4e   :  { %7606 = vmatpush1.bf16.msra.mxu0 %v9901_v49  ;;  %7638 = vmatpush1.bf16.msra.mxu1 %v9903_v10 }
 0xa4f   :  { %7608 = vmatprep.subr.bf16.mxu0 %v9907_v19  ;;  %7640 = vmatprep.subr.bf16.mxu1 %v9909_v45 }
 0xa52   :  { %7610 = vmatpush1.bf16.msra.mxu0 %v9913_v17  ;;  %7642 = vmatpush1.bf16.msra.mxu1 %v9915_v36 }
 0xa53   :  { %7612 = vmatprep.subr.bf16.mxu0 %v9919_v20  ;;  %7644 = vmatprep.subr.bf16.mxu1 %v9921_v11 }
 0xa56   :  { %7614 = vmatpush1.bf16.msra.mxu0 %v9925_v47  ;;  %7646 = vmatpush1.bf16.msra.mxu1 %v9927_v25 }
 0xa57   :  { %7616 = vmatprep.subr.bf16.mxu0 %v9931_v15  ;;  %7648 = vmatprep.subr.bf16.mxu1 %v9933_v8 }
 0xa5a   :  { %7618 = vmatpush1.bf16.msra.mxu0 %v9937_v44  ;;  %7650 = vmatpush1.bf16.msra.mxu1 %v9939_v60 }
 0xa5b   :  { %7620 = vmatprep.subr.bf16.mxu0 %v9943_v59  ;;  %7652 = vmatprep.subr.bf16.mxu1 %v9945_v4 }
 0xa5e   :  { %7622 = vmatpush1.bf16.msra.mxu0 %v9949_v32  ;;  %7654 = vmatpush1.bf16.msra.mxu1 %v9951_v46 }
 0xa5f   :  { %7656 = vmatprep.subr.bf16.mxu0 %v9849_v5  ;;  %7688 = vmatprep.subr.bf16.mxu1 %v9851_v21 }
 0xb14   :  { %v4286_v56 = vpop.f32.mrb[46].mxu0  ;;  %v4357_v13 = vpop.f32.mrb[46].mxu1 }
 0xb15   :  { %v4366_v37 = vrot.slane %v4286_v56, 6  ;;  %v4288_v6 = vpop.f32.mrb[47].mxu0  ;;  %v4359_v16 = vpop.f32.mrb[47].mxu1  ;;  %v4368_v62 = vrot.slane %v4357_v13, 6 }
 0xb16   :  { %v4367_v14 = vrot.slane %v4288_v6, 6  ;;  %v4369_v34 = vrot.slane %v4359_v16, 6  ;;  %v4398_v16 = vrot.slane %v10022_v1, 6 }
 0xb17   :  { %v4374_v43 = vadd.f32 %v4366_v37, %v10010_v7  ;;  %v4376_v41 = vadd.f32 %v4368_v62, %v10019_v30 }
 0xb18   :  { %v4375_v52 = vadd.f32 %v4367_v14, %v10012_v63  ;;  %v4377_v22 = vadd.f32 %v4369_v34, %v10016_v12 }
 0xb19   :  { %v6102_v18 = vmul.f32 -1.442695, %v4374_v43 }
 0xb1a   :  { %v6103_v51 = vmul.f32 -1.442695, %v4375_v52  ;;  %v6104_v53 = vmul.f32 -1.442695, %v4377_v22 }
 0xb1b   :  { %8436 = vpow2.f32 %v6102_v18 }
 0xb1c   :  { %8438 = vpow2.f32 %v6103_v51 }
 0xb1d   :  { %8440 = vpow2.f32 %v6104_v53 }
 0xb1e   :  { %8442 = vtanh.f32 %v4376_v41 }
 0xb25   :  { %v8437_v61 = vpop.eup %8436 }
 0xb26   :  { %v8439_v58 = vpop.eup %8438  ;;  %v4381_v26 = vadd.f32 1.0, %v8437_v61 }
 0xb27   :  { %v4387_v56 = vadd.f32 1.0, %v8439_v58  ;;  %v8441_v37 = vpop.eup %8440 }
 0xb28   :  { %8444 = vrcp.f32 %v4381_v26  ;;  %v8443_v6 = vpop.eup %8442  ;;  %v4394_v18 = vadd.f32 1.0, %v8441_v37 }
 0xb29   :  { %8446 = vrcp.f32 %v4387_v56 }
 0xb2a   :  { %8448 = vrcp.f32 %v4394_v18 }
 0xb32   :  { %v8445_v14 = vpop.eup %8444 }
 0xb33   :  { %v8447_v43 = vpop.eup %8446  ;;  %v4401_v52 = vmul.f32 %v8445_v14, %v8443_v6 }
 0xb34   :  { %v4400_v13 = vmul.f32 %v8447_v43, %v4398_v16  ;;  %v8449_v34 = vpop.eup %8448 }
 0xb36   :  { %v10064_v51 = vadd.f32 %v4401_v52, %v4400_v13 }
 0xb38   :  { %8450 = vtanh.f32 %v10064_v51 }
 0xb42   :  { %v8451_v22 = vpop.eup %8450 }
 0xb43   :  { %v4404_v62 = vmul.f32 %v8451_v22, %v8449_v34 }
 0xb45   :  { %v4406_v53 = vrot.slane %v4404_v62, 2 }
 0xb47   :  { %4473 = vmatmul.mubr.f32.vlgmr.msra.gmra.mrb[48].mxu0 %v4406_v53  ;;  %4544 = vmatmul.mubr.f32.vlgmr.msra.gmra.mrb[48].mxu1 %v4406_v53 }
 0xb48   :  { %7658 = vmatpush1.bf16.msra.mxu0 %v9865_v38  ;;  %7690 = vmatpush1.bf16.msra.mxu1 %v9867_v42 }
 0xb49   :  { %7660 = vmatprep.subr.bf16.mxu0 %v9869_v35  ;;  %7692 = vmatprep.subr.bf16.mxu1 %v9871_v9 }
 0xb4a   :  { %4660 = vmatprep.mubr.f32.mxu0 %v10573_v3  ;;  %4731 = vmatprep.mubr.f32.mxu1 %v10573_v3 }
 0xb4c   :  { %7662 = vmatpush1.bf16.msra.mxu0 %v9875_v28  ;;  %7694 = vmatpush1.bf16.msra.mxu1 %v9877_v57 }
 0xb4d   :  { %7664 = vmatprep.subr.bf16.mxu0 %v9879_v33  ;;  %7696 = vmatprep.subr.bf16.mxu1 %v9881_v23 }
 0xb50   :  { %7666 = vmatpush1.bf16.msra.mxu0 %v9887_v29  ;;  %7698 = vmatpush1.bf16.msra.mxu1 %v9889_v31 }
 0xb51   :  { %7668 = vmatprep.subr.bf16.mxu0 %v9893_v50  ;;  %7700 = vmatprep.subr.bf16.mxu1 %v9895_v39 }
 0xb54   :  { %7670 = vmatpush1.bf16.msra.mxu0 %v9901_v49  ;;  %7702 = vmatpush1.bf16.msra.mxu1 %v9903_v10 }
 0xb55   :  { %7672 = vmatprep.subr.bf16.mxu0 %v9907_v19  ;;  %7704 = vmatprep.subr.bf16.mxu1 %v9909_v45 }
 0xb58   :  { %7674 = vmatpush1.bf16.msra.mxu0 %v9913_v17  ;;  %7706 = vmatpush1.bf16.msra.mxu1 %v9915_v36 }
 0xb59   :  { %7676 = vmatprep.subr.bf16.mxu0 %v9919_v20  ;;  %7708 = vmatprep.subr.bf16.mxu1 %v9921_v11 }
 0xb5c   :  { %7678 = vmatpush1.bf16.msra.mxu0 %v9925_v47  ;;  %7710 = vmatpush1.bf16.msra.mxu1 %v9927_v25 }
 0xb5d   :  { %7680 = vmatprep.subr.bf16.mxu0 %v9931_v15  ;;  %7712 = vmatprep.subr.bf16.mxu1 %v9933_v8 }
 0xb60   :  { %7682 = vmatpush1.bf16.msra.mxu0 %v9937_v44  ;;  %7714 = vmatpush1.bf16.msra.mxu1 %v9939_v60 }
 0xb61   :  { %7684 = vmatprep.subr.bf16.mxu0 %v9943_v59  ;;  %7716 = vmatprep.subr.bf16.mxu1 %v9945_v4 }
 0xb64   :  { %7686 = vmatpush1.bf16.msra.mxu0 %v9949_v32  ;;  %7718 = vmatpush1.bf16.msra.mxu1 %v9951_v46 }
 0xb65   :  { %7720 = vmatprep.subr.bf16.mxu0 %v9849_v5  ;;  %7752 = vmatprep.subr.bf16.mxu1 %v9851_v21 }
 0xc1a   :  { %v4474_v1 = vpop.f32.mrb[48].mxu0  ;;  %v4545_v41 = vpop.f32.mrb[48].mxu1 }
 0xc1b   :  { %v4554_v61 = vrot.slane %v4474_v1, 4  ;;  %v4476_v58 = vpop.f32.mrb[49].mxu0  ;;  %v4547_v26 = vpop.f32.mrb[49].mxu1  ;;  %v4556_v18 = vrot.slane %v4545_v41, 4 }
 0xc1c   :  { %v4555_v56 = vrot.slane %v4476_v58, 4  ;;  %v4557_v43 = vrot.slane %v4547_v26, 4  ;;  %v4586_v26 = vrot.slane %v10064_v51, 6 }
 0xc1d   :  { %v4562_v37 = vadd.f32 %v4554_v61, %v10010_v7  ;;  %v4564_v34 = vadd.f32 %v4556_v18, %v10019_v30 }
 0xc1e   :  { %v4563_v6 = vadd.f32 %v4555_v56, %v10012_v63  ;;  %v4565_v52 = vadd.f32 %v4557_v43, %v10016_v12 }
 0xc1f   :  { %v6105_v14 = vmul.f32 -1.442695, %v4562_v37 }
 0xc20   :  { %v6106_v16 = vmul.f32 -1.442695, %v4563_v6  ;;  %v6107_v13 = vmul.f32 -1.442695, %v4565_v52 }
 0xc21   :  { %8452 = vpow2.f32 %v6105_v14 }
 0xc22   :  { %8454 = vpow2.f32 %v6106_v16 }
 0xc23   :  { %8456 = vpow2.f32 %v6107_v13 }
 0xc24   :  { %8458 = vtanh.f32 %v4564_v34 }
 0xc2b   :  { %v8453_v22 = vpop.eup %8452 }
 0xc2c   :  { %v8455_v62 = vpop.eup %8454  ;;  %v4569_v53 = vadd.f32 1.0, %v8453_v22 }
 0xc2d   :  { %v4575_v1 = vadd.f32 1.0, %v8455_v62  ;;  %v8457_v61 = vpop.eup %8456 }
 0xc2e   :  { %8460 = vrcp.f32 %v4569_v53  ;;  %v8459_v58 = vpop.eup %8458  ;;  %v4582_v14 = vadd.f32 1.0, %v8457_v61 }
 0xc2f   :  { %8462 = vrcp.f32 %v4575_v1 }
 0xc30   :  { %8464 = vrcp.f32 %v4582_v14 }
 0xc38   :  { %v8461_v56 = vpop.eup %8460 }
 0xc39   :  { %v8463_v37 = vpop.eup %8462  ;;  %v4589_v6 = vmul.f32 %v8461_v56, %v8459_v58 }
 0xc3a   :  { %v4588_v41 = vmul.f32 %v8463_v37, %v4586_v26  ;;  %v8465_v43 = vpop.eup %8464 }
 0xc3c   :  { %v10106_v16 = vadd.f32 %v4589_v6, %v4588_v41 }
 0xc3e   :  { %8466 = vtanh.f32 %v10106_v16 }
 0xc48   :  { %v8467_v52 = vpop.eup %8466 }
 0xc49   :  { %v4592_v18 = vmul.f32 %v8467_v52, %v8465_v43 }
 0xc4b   :  { %v4594_v13 = vrot.slane %v4592_v18, 4 }
 0xc4d   :  { %4661 = vmatmul.mubr.f32.vlgmr.msra.gmra.mrb[50].mxu0 %v4594_v13  ;;  %4732 = vmatmul.mubr.f32.vlgmr.msra.gmra.mrb[50].mxu1 %v4594_v13 }
 0xc4e   :  { %7722 = vmatpush1.bf16.msra.mxu0 %v9865_v38  ;;  %7754 = vmatpush1.bf16.msra.mxu1 %v9867_v42 }
 0xc4f   :  { %7724 = vmatprep.subr.bf16.mxu0 %v9869_v35  ;;  %7756 = vmatprep.subr.bf16.mxu1 %v9871_v9 }
 0xc50   :  { %4848 = vmatprep.mubr.f32.mxu0 %v10573_v3  ;;  %4919 = vmatprep.mubr.f32.mxu1 %v10573_v3 }
 0xc52   :  { %7726 = vmatpush1.bf16.msra.mxu0 %v9875_v28  ;;  %7758 = vmatpush1.bf16.msra.mxu1 %v9877_v57 }
 0xc53   :  { %7728 = vmatprep.subr.bf16.mxu0 %v9879_v33  ;;  %7760 = vmatprep.subr.bf16.mxu1 %v9881_v23 }
 0xc56   :  { %7730 = vmatpush1.bf16.msra.mxu0 %v9887_v29  ;;  %7762 = vmatpush1.bf16.msra.mxu1 %v9889_v31 }
 0xc57   :  { %7732 = vmatprep.subr.bf16.mxu0 %v9893_v50  ;;  %7764 = vmatprep.subr.bf16.mxu1 %v9895_v39 }
 0xc5a   :  { %7734 = vmatpush1.bf16.msra.mxu0 %v9901_v49  ;;  %7766 = vmatpush1.bf16.msra.mxu1 %v9903_v10 }
 0xc5b   :  { %7736 = vmatprep.subr.bf16.mxu0 %v9907_v19  ;;  %7768 = vmatprep.subr.bf16.mxu1 %v9909_v45 }
 0xc5e   :  { %7738 = vmatpush1.bf16.msra.mxu0 %v9913_v17  ;;  %7770 = vmatpush1.bf16.msra.mxu1 %v9915_v36 }
 0xc5f   :  { %7740 = vmatprep.subr.bf16.mxu0 %v9919_v20  ;;  %7772 = vmatprep.subr.bf16.mxu1 %v9921_v11 }
 0xc62   :  { %7742 = vmatpush1.bf16.msra.mxu0 %v9925_v47  ;;  %7774 = vmatpush1.bf16.msra.mxu1 %v9927_v25 }
 0xc63   :  { %7744 = vmatprep.subr.bf16.mxu0 %v9931_v15  ;;  %7776 = vmatprep.subr.bf16.mxu1 %v9933_v8 }
 0xc66   :  { %7746 = vmatpush1.bf16.msra.mxu0 %v9937_v44  ;;  %7778 = vmatpush1.bf16.msra.mxu1 %v9939_v60 }
 0xc67   :  { %7748 = vmatprep.subr.bf16.mxu0 %v9943_v59  ;;  %7780 = vmatprep.subr.bf16.mxu1 %v9945_v4 }
 0xc6a   :  { %7750 = vmatpush1.bf16.msra.mxu0 %v9949_v32  ;;  %7782 = vmatpush1.bf16.msra.mxu1 %v9951_v46 }
 0xc6b   :  { %7784 = vmatprep.subr.bf16.mxu0 %v9849_v5  ;;  %7816 = vmatprep.subr.bf16.mxu1 %v9851_v21 }
 0xd20   :  { %v4662_v51 = vpop.f32.mrb[50].mxu0  ;;  %v4733_v34 = vpop.f32.mrb[50].mxu1 }
 0xd21   :  { %v4742_v22 = vrot.slane %v4662_v51, 2  ;;  %v4664_v62 = vpop.f32.mrb[51].mxu0  ;;  %v4735_v53 = vpop.f32.mrb[51].mxu1  ;;  %v4744_v14 = vrot.slane %v4733_v34, 2 }
 0xd22   :  { %v4743_v1 = vrot.slane %v4664_v62, 2  ;;  %v4745_v37 = vrot.slane %v4735_v53, 2  ;;  %v4774_v62 = vrot.slane %v10106_v16, 6 }
 0xd23   :  { %v4750_v61 = vadd.f32 %v4742_v22, %v10010_v7  ;;  %v4752_v43 = vadd.f32 %v4744_v14, %v10019_v30 }
 0xd24   :  { %v4751_v58 = vadd.f32 %v4743_v1, %v10012_v63  ;;  %v4753_v6 = vadd.f32 %v4745_v37, %v10016_v12 }
 0xd25   :  { %v6108_v56 = vmul.f32 -1.442695, %v4750_v61 }
 0xd26   :  { %v6109_v26 = vmul.f32 -1.442695, %v4751_v58  ;;  %v6110_v41 = vmul.f32 -1.442695, %v4753_v6 }
 0xd27   :  { %8468 = vpow2.f32 %v6108_v56 }
 0xd28   :  { %8470 = vpow2.f32 %v6109_v26 }
 0xd29   :  { %8472 = vpow2.f32 %v6110_v41 }
 0xd2a   :  { %8474 = vtanh.f32 %v4752_v43 }
 0xd31   :  { %v8469_v52 = vpop.eup %8468 }
 0xd32   :  { %v8471_v18 = vpop.eup %8470  ;;  %v4757_v13 = vadd.f32 1.0, %v8469_v52 }
 0xd33   :  { %v4763_v51 = vadd.f32 1.0, %v8471_v18  ;;  %v8473_v7 = vpop.eup %8472 }
 0xd34   :  { %8476 = vrcp.f32 %v4757_v13  ;;  %v8475_v63 = vpop.eup %8474  ;;  %v4770_v12 = vadd.f32 1.0, %v8473_v7 }
 0xd35   :  { %8478 = vrcp.f32 %v4763_v51 }
 0xd36   :  { %8480 = vrcp.f32 %v4770_v12 }
 0xd3e   :  { %v8477_v22 = vpop.eup %8476 }
 0xd3f   :  { %v8479_v53 = vpop.eup %8478  ;;  %v4777_v1 = vmul.f32 %v8477_v22, %v8475_v63 }
 0xd40   :  { %v4776_v34 = vmul.f32 %v8479_v53, %v4774_v62  ;;  %v8481_v30 = vpop.eup %8480 }
 0xd42   :  { %v10148_v61 = vadd.f32 %v4777_v1, %v4776_v34 }
 0xd44   :  { %8482 = vtanh.f32 %v10148_v61 }
 0xd4e   :  { %v8483_v58 = vpop.eup %8482 }
 0xd4f   :  { %v4780_v56 = vmul.f32 %v8483_v58, %v8481_v30  ;;  %v4950_v30 = vrot.slane %v10148_v61, 6 }
 0xd51   :  { %v4782_v26 = vrot.slane %v4780_v56, 6 }
 0xd53   :  { %4849 = vmatmul.mubr.f32.vlgmr.msra.gmra.mrb[52].mxu0 %v4782_v26  ;;  %4920 = vmatmul.mubr.f32.vlgmr.msra.gmra.mrb[52].mxu1 %v4782_v26 }
 0xd54   :  { %7786 = vmatpush1.bf16.msra.mxu0 %v9865_v38  ;;  %7818 = vmatpush1.bf16.msra.mxu1 %v9867_v42 }
 0xd55   :  { %7788 = vmatprep.subr.bf16.mxu0 %v9869_v35  ;;  %7820 = vmatprep.subr.bf16.mxu1 %v9871_v9 }
 0xd56   :  { %5021 = vmatprep.mubr.f32.mxu0 %v10573_v3  ;;  %5092 = vmatprep.mubr.f32.mxu1 %v10573_v3 }
 0xd58   :  { %7790 = vmatpush1.bf16.msra.mxu0 %v9875_v28  ;;  %7822 = vmatpush1.bf16.msra.mxu1 %v9877_v57 }
 0xd59   :  { %7792 = vmatprep.subr.bf16.mxu0 %v9879_v33  ;;  %7824 = vmatprep.subr.bf16.mxu1 %v9881_v23 }
 0xd5c   :  { %7794 = vmatpush1.bf16.msra.mxu0 %v9887_v29  ;;  %7826 = vmatpush1.bf16.msra.mxu1 %v9889_v31 }
 0xd5d   :  { %7796 = vmatprep.subr.bf16.mxu0 %v9893_v50  ;;  %7828 = vmatprep.subr.bf16.mxu1 %v9895_v39 }
 0xd60   :  { %7798 = vmatpush1.bf16.msra.mxu0 %v9901_v49  ;;  %7830 = vmatpush1.bf16.msra.mxu1 %v9903_v10 }
 0xd61   :  { %7800 = vmatprep.subr.bf16.mxu0 %v9907_v19  ;;  %7832 = vmatprep.subr.bf16.mxu1 %v9909_v45 }
 0xd64   :  { %7802 = vmatpush1.bf16.msra.mxu0 %v9913_v17  ;;  %7834 = vmatpush1.bf16.msra.mxu1 %v9915_v36 }
 0xd65   :  { %7804 = vmatprep.subr.bf16.mxu0 %v9919_v20  ;;  %7836 = vmatprep.subr.bf16.mxu1 %v9921_v11 }
 0xd68   :  { %7806 = vmatpush1.bf16.msra.mxu0 %v9925_v47  ;;  %7838 = vmatpush1.bf16.msra.mxu1 %v9927_v25 }
 0xd69   :  { %7808 = vmatprep.subr.bf16.mxu0 %v9931_v15  ;;  %7840 = vmatprep.subr.bf16.mxu1 %v9933_v8 }
 0xd6c   :  { %7810 = vmatpush1.bf16.msra.mxu0 %v9937_v44  ;;  %7842 = vmatpush1.bf16.msra.mxu1 %v9939_v60 }
 0xd6d   :  { %7812 = vmatprep.subr.bf16.mxu0 %v9943_v59  ;;  %7844 = vmatprep.subr.bf16.mxu1 %v9945_v4 }
 0xd70   :  { %7814 = vmatpush1.bf16.msra.mxu0 %v9949_v32  ;;  %7846 = vmatpush1.bf16.msra.mxu1 %v9951_v46 }
 0xd71   :  { %7848 = vmatprep.subr.bf16.mxu0 %v9849_v5  ;;  %7880 = vmatprep.subr.bf16.mxu1 %v9851_v21 }
 0xe26   :  { %v4850_v16 = vpop.f32.mrb[52].mxu0  ;;  %v4921_v37 = vpop.f32.mrb[52].mxu1 }
 0xe27   :  { %v4926_v6 = vadd.f32 %v4850_v16, %v10002_v27  ;;  %v4852_v14 = vpop.f32.mrb[53].mxu0  ;;  %v4923_v41 = vpop.f32.mrb[53].mxu1  ;;  %v4928_v7 = vadd.f32 %v4921_v37, %v10004_v2 }
 0xe28   :  { %v4927_v43 = vadd.f32 %v4852_v14, %v10006_v0  ;;  %v4929_v13 = vadd.f32 %v4923_v41, %v10008_v48 }
 0xe29   :  { %v6111_v52 = vmul.f32 -1.442695, %v4926_v6 }
 0xe2a   :  { %v6112_v18 = vmul.f32 -1.442695, %v4927_v43  ;;  %v6113_v51 = vmul.f32 -1.442695, %v4929_v13 }
 0xe2b   :  { %8484 = vpow2.f32 %v6111_v52 }
 0xe2c   :  { %8486 = vpow2.f32 %v6112_v18 }
 0xe2d   :  { %8488 = vpow2.f32 %v6113_v51 }
 0xe2e   :  { %8490 = vtanh.f32 %v4928_v7 }
 0xe35   :  { %v8485_v63 = vpop.eup %8484 }
 0xe36   :  { %v8487_v22 = vpop.eup %8486  ;;  %v4933_v62 = vadd.f32 1.0, %v8485_v63 }
 0xe37   :  { %v4939_v53 = vadd.f32 1.0, %v8487_v22  ;;  %v8489_v1 = vpop.eup %8488 }
 0xe38   :  { %8492 = vrcp.f32 %v4933_v62  ;;  %v8491_v12 = vpop.eup %8490  ;;  %v4946_v26 = vadd.f32 1.0, %v8489_v1 }
 0xe39   :  { %8494 = vrcp.f32 %v4939_v53 }
 0xe3a   :  { %8496 = vrcp.f32 %v4946_v26 }
 0xe42   :  { %v8493_v34 = vpop.eup %8492 }
 0xe43   :  { %v8495_v58 = vpop.eup %8494  ;;  %v4953_v56 = vmul.f32 %v8493_v34, %v8491_v12 }
 0xe44   :  { %v4952_v16 = vmul.f32 %v8495_v58, %v4950_v30  ;;  %v8497_v37 = vpop.eup %8496 }
 0xe46   :  { %v10190_v6 = vadd.f32 %v4953_v56, %v4952_v16 }
 0xe48   :  { %8498 = vtanh.f32 %v10190_v6 }
 0xe52   :  { %v8499_v14 = vpop.eup %8498 }
 0xe53   :  { %v4956_v41 = vmul.f32 %v8499_v14, %v8497_v37  ;;  %v5135_v14 = vrot.slane %v10190_v6, 6 }
 0xe55   :  { %5022 = vmatmul.mubr.f32.vlgmr.msra.gmra.mrb[54].mxu0 %v4956_v41  ;;  %5093 = vmatmul.mubr.f32.vlgmr.msra.gmra.mrb[54].mxu1 %v4956_v41 }
 0xe56   :  { %7850 = vmatpush1.bf16.msra.mxu0 %v9865_v38  ;;  %7882 = vmatpush1.bf16.msra.mxu1 %v9867_v42 }
 0xe57   :  { %7852 = vmatprep.subr.bf16.mxu0 %v9869_v35  ;;  %7884 = vmatprep.subr.bf16.mxu1 %v9871_v9 }
 0xe58   :  { %5209 = vmatprep.mubr.f32.mxu0 %v10573_v3  ;;  %5280 = vmatprep.mubr.f32.mxu1 %v10573_v3 }
 0xe5a   :  { %7854 = vmatpush1.bf16.msra.mxu0 %v9875_v28  ;;  %7886 = vmatpush1.bf16.msra.mxu1 %v9877_v57 }
 0xe5b   :  { %7856 = vmatprep.subr.bf16.mxu0 %v9879_v33  ;;  %7888 = vmatprep.subr.bf16.mxu1 %v9881_v23 }
 0xe5e   :  { %7858 = vmatpush1.bf16.msra.mxu0 %v9887_v29  ;;  %7890 = vmatpush1.bf16.msra.mxu1 %v9889_v31 }
 0xe5f   :  { %7860 = vmatprep.subr.bf16.mxu0 %v9893_v50  ;;  %7892 = vmatprep.subr.bf16.mxu1 %v9895_v39 }
 0xe62   :  { %7862 = vmatpush1.bf16.msra.mxu0 %v9901_v49  ;;  %7894 = vmatpush1.bf16.msra.mxu1 %v9903_v10 }
 0xe63   :  { %7864 = vmatprep.subr.bf16.mxu0 %v9907_v19  ;;  %7896 = vmatprep.subr.bf16.mxu1 %v9909_v45 }
 0xe66   :  { %7866 = vmatpush1.bf16.msra.mxu0 %v9913_v17  ;;  %7898 = vmatpush1.bf16.msra.mxu1 %v9915_v36 }
 0xe67   :  { %7868 = vmatprep.subr.bf16.mxu0 %v9919_v20  ;;  %7900 = vmatprep.subr.bf16.mxu1 %v9921_v11 }
 0xe6a   :  { %7870 = vmatpush1.bf16.msra.mxu0 %v9925_v47  ;;  %7902 = vmatpush1.bf16.msra.mxu1 %v9927_v25 }
 0xe6b   :  { %7872 = vmatprep.subr.bf16.mxu0 %v9931_v15  ;;  %7904 = vmatprep.subr.bf16.mxu1 %v9933_v8 }
 0xe6e   :  { %7874 = vmatpush1.bf16.msra.mxu0 %v9937_v44  ;;  %7906 = vmatpush1.bf16.msra.mxu1 %v9939_v60 }
 0xe6f   :  { %7876 = vmatprep.subr.bf16.mxu0 %v9943_v59  ;;  %7908 = vmatprep.subr.bf16.mxu1 %v9945_v4 }
 0xe72   :  { %7878 = vmatpush1.bf16.msra.mxu0 %v9949_v32  ;;  %7910 = vmatpush1.bf16.msra.mxu1 %v9951_v46 }
 0xe73   :  { %7912 = vmatprep.subr.bf16.mxu0 %v9849_v5  ;;  %7944 = vmatprep.subr.bf16.mxu1 %v9851_v21 }
 0xf28   :  { %v5023_v61 = vpop.f32.mrb[54].mxu0  ;;  %v5094_v43 = vpop.f32.mrb[54].mxu1 }
 0xf29   :  { %v5103_v52 = vrot.slane %v5023_v61, 6  ;;  %v5025_v18 = vpop.f32.mrb[55].mxu0  ;;  %v5096_v13 = vpop.f32.mrb[55].mxu1  ;;  %v5105_v5 = vrot.slane %v5094_v43, 6 }
 0xf2a   :  { %v5104_v51 = vrot.slane %v5025_v18, 6  ;;  %v5106_v53 = vrot.slane %v5096_v13, 6 }
 0xf2b   :  { %v5111_v7 = vadd.f32 %v5103_v52, %v10002_v27  ;;  %v5113_v21 = vadd.f32 %v5105_v5, %v10004_v2 }
 0xf2c   :  { %v5112_v63 = vadd.f32 %v5104_v51, %v10006_v0  ;;  %v5114_v1 = vadd.f32 %v5106_v53, %v10008_v48 }
 0xf2d   :  { %v6114_v22 = vmul.f32 -1.442695, %v5111_v7 }
 0xf2e   :  { %v6115_v62 = vmul.f32 -1.442695, %v5112_v63  ;;  %v6116_v12 = vmul.f32 -1.442695, %v5114_v1  ;;  %v5518_v1 = vld [vmem:[#allocation14] sm:$0xff] }
 0xf2f   :  { %8500 = vpow2.f32 %v6114_v22 }
 0xf30   :  { %8502 = vpow2.f32 %v6115_v62 }
 0xf31   :  { %8504 = vpow2.f32 %v6116_v12  ;;  %v5522_v12 = vld [vmem:[#allocation14 + $0x20] sm:$0xff] }
 0xf32   :  { %8506 = vtanh.f32 %v5113_v21  ;;  %v5520_v21 = vld [vmem:[#allocation14 + $0x10] sm:$0xff] }
 0xf39   :  { %v8501_v34 = vpop.eup %8500 }
 0xf3a   :  { %v8503_v30 = vpop.eup %8502  ;;  %v5118_v58 = vadd.f32 1.0, %v8501_v34  ;;  %v5524_v34 = vld [vmem:[#allocation14 + $0x30] sm:$0xff] }
 0xf3b   :  { %v5124_v56 = vadd.f32 1.0, %v8503_v30  ;;  %v8505_v26 = vpop.eup %8504 }
 0xf3c   :  { %8508 = vrcp.f32 %v5118_v58  ;;  %v8507_v16 = vpop.eup %8506  ;;  %v5131_v52 = vadd.f32 1.0, %v8505_v26  ;;  %v5527_v58 = vld [vmem:[#allocation14 + $0x48] sm:$0xff] }
 0xf3d   :  { %8510 = vrcp.f32 %v5124_v56  ;;  %v5531_v26 = vld [vmem:[#allocation14 + $0x68] sm:$0xff] }
 0xf3e   :  { %8512 = vrcp.f32 %v5131_v52  ;;  %v5530_v52 = vld [vmem:[#allocation14 + $0x60] sm:$0xff] }
 0xf46   :  { %v8509_v37 = vpop.eup %8508 }
 0xf47   :  { %v8511_v41 = vpop.eup %8510  ;;  %v5138_v61 = vmul.f32 %v8509_v37, %v8507_v16  ;;  %v5529_v16 = vld [vmem:[#allocation14 + $0x58] sm:$0xff] }
 0xf48   :  { %v5137_v43 = vmul.f32 %v8511_v41, %v5135_v14  ;;  %v8513_v13 = vpop.eup %8512  ;;  %v5533_v37 = vld [vmem:[#allocation14 + $0x78] sm:$0xff]  ;;  %v7977_v14 = vpack.c.bf16 %v5522_v12, %v5518_v1  ;;  %v8041_v41 = vpack.c.bf16 %v5524_v34, %v5520_v21  ;;  %v5552_v12 = vld [vmem:[#allocation14 + $0x110] sm:$0xff]  ;;  %v5559_v34 = vld [vmem:[#allocation14 + $0x148] sm:$0xff] }
 0xf49   :  { %v5556_v21 = vld [vmem:[#allocation14 + $0x130] sm:$0xff] }
 0xf4a   :  { %v10232_v18 = vadd.f32 %v5138_v61, %v5137_v43  ;;  %v5526_v61 = vld [vmem:[#allocation14 + $0x40] sm:$0xff] }
 0xf4c   :  { %8514 = vtanh.f32 %v10232_v18 }
 0xf56   :  { %v8515_v51 = vpop.eup %8514 }
 0xf57   :  { %v5141_v7 = vmul.f32 %v8515_v51, %v8513_v13  ;;  %v5532_v13 = vld [vmem:[#allocation14 + $0x70] sm:$0xff]  ;;  %v5535_v51 = vld [vmem:[#allocation14 + $0x88] sm:$0xff] }
 0xf59   :  { %v5143_v63 = vrot.slane %v5141_v7, 2  ;;  %v7979_v7 = vpack.c.bf16 %v5531_v26, %v5527_v58  ;;  %v5561_v58 = vld [vmem:[#allocation14 + $0x158] sm:$0xff] }
 0xf5b   :  { %5210 = vmatmul.mubr.f32.vlgmr.msra.gmra.mrb[56].mxu0 %v5143_v63  ;;  %5281 = vmatmul.mubr.f32.vlgmr.msra.gmra.mrb[56].mxu1 %v5143_v63  ;;  %v8043_v63 = vpack.c.bf16 %v5533_v37, %v5529_v16  ;;  %v8057_v16 = vpack.c.bf16 %v5556_v21, %v5552_v12  ;;  %v5558_v37 = vld [vmem:[#allocation14 + $0x140] sm:$0xff] }
 0xf5c   :  { %7914 = vmatpush1.bf16.msra.mxu0 %v9865_v38  ;;  %7946 = vmatpush1.bf16.msra.mxu1 %v9867_v42  ;;  %v5519_v38 = vld [vmem:[#allocation14 + $0x8] sm:$0xff] }
 0xf5d   :  { %7916 = vmatprep.subr.bf16.mxu0 %v9869_v35  ;;  %7948 = vmatprep.subr.bf16.mxu1 %v9871_v9  ;;  %v5523_v42 = vld [vmem:[#allocation14 + $0x28] sm:$0xff]  ;;  %v5521_v35 = vld [vmem:[#allocation14 + $0x18] sm:$0xff] }
 0xf5e   :  { %5397 = vmatprep.mubr.f32.mxu0 %v10573_v3  ;;  %5468 = vmatprep.mubr.f32.mxu1 %v10573_v3  ;;  %v7975_v9 = vpack.c.bf16 %v5523_v42, %v5519_v38  ;;  %v5539_v38 = vld [vmem:[#allocation14 + $0xa8] sm:$0xff]  ;;  %v5537_v42 = vld [vmem:[#allocation14 + $0x98] sm:$0xff] }
 0xf60   :  { %7918 = vmatpush1.bf16.msra.mxu0 %v9875_v28  ;;  %7950 = vmatpush1.bf16.msra.mxu1 %v9877_v57  ;;  %v5525_v28 = vld [vmem:[#allocation14 + $0x38] sm:$0xff] }
 0xf61   :  { %7920 = vmatprep.subr.bf16.mxu0 %v9879_v33  ;;  %7952 = vmatprep.subr.bf16.mxu1 %v9881_v23  ;;  %v8039_v57 = vpack.c.bf16 %v5525_v28, %v5521_v35  ;;  %v5541_v35 = vld [vmem:[#allocation14 + $0xb8] sm:$0xff] }
 0xf64   :  { %7922 = vmatpush1.bf16.msra.mxu0 %v9887_v29  ;;  %7954 = vmatpush1.bf16.msra.mxu1 %v9889_v31 }
 0xf65   :  { %7924 = vmatprep.subr.bf16.mxu0 %v9893_v50  ;;  %7956 = vmatprep.subr.bf16.mxu1 %v9895_v39 }
 0xf68   :  { %7926 = vmatpush1.bf16.msra.mxu0 %v9901_v49  ;;  %7958 = vmatpush1.bf16.msra.mxu1 %v9903_v10 }
 0xf69   :  { %7928 = vmatprep.subr.bf16.mxu0 %v9907_v19  ;;  %7960 = vmatprep.subr.bf16.mxu1 %v9909_v45 }
 0xf6c   :  { %7930 = vmatpush1.bf16.msra.mxu0 %v9913_v17  ;;  %7962 = vmatpush1.bf16.msra.mxu1 %v9915_v36 }
 0xf6d   :  { %7932 = vmatprep.subr.bf16.mxu0 %v9919_v20  ;;  %7964 = vmatprep.subr.bf16.mxu1 %v9921_v11 }
 0xf70   :  { %7934 = vmatpush1.bf16.msra.mxu0 %v9925_v47  ;;  %7966 = vmatpush1.bf16.msra.mxu1 %v9927_v25 }
 0xf71   :  { %7936 = vmatprep.subr.bf16.mxu0 %v9931_v15  ;;  %7968 = vmatprep.subr.bf16.mxu1 %v9933_v8 }
 0xf74   :  { %7938 = vmatpush1.bf16.msra.mxu0 %v9937_v44  ;;  %7970 = vmatpush1.bf16.msra.mxu1 %v9939_v60 }
 0xf75   :  { %7940 = vmatprep.subr.bf16.mxu0 %v9943_v59  ;;  %7972 = vmatprep.subr.bf16.mxu1 %v9945_v4 }
 0xf78   :  { %7942 = vmatpush1.bf16.msra.mxu0 %v9949_v32  ;;  %7974 = vmatpush1.bf16.msra.mxu1 %v9951_v46  ;;  %v5323_v32 = vrot.slane %v10232_v18, 6  ;;  %v5528_v18 = vld [vmem:[#allocation14 + $0x50] sm:$0xff] }
 0xf79   :  { %7976 = vmatprep.subr.bf16.mxu0 %v7975_v9  ;;  %8040 = vmatprep.subr.bf16.mxu1 %v8039_v57  ;;  %v8564_v9 = vld [vmem:[#allocation2 + $0x18] sm:$0xff]  ;;  %v7981_v57 = vpack.c.bf16 %v5530_v52, %v5526_v61  ;;  %v5560_v52 = vld [vmem:[#allocation14 + $0x150] sm:$0xff] }
 0xf7a   :  { %v5671_v28 = vrot.slane %v8564_v9, 6 }
0x102e   :  { %v5211_v33 = vpop.f32.mrb[56].mxu0  ;;  %v5282_v23 = vpop.f32.mrb[56].mxu1 }
0x102f   :  { %v5291_v29 = vrot.slane %v5211_v33, 4  ;;  %v5213_v31 = vpop.f32.mrb[57].mxu0  ;;  %v5284_v50 = vpop.f32.mrb[57].mxu1  ;;  %v5293_v20 = vrot.slane %v5282_v23, 4  ;;  %v8045_v33 = vpack.c.bf16 %v5532_v13, %v5528_v18  ;;  %v5534_v23 = vld [vmem:[#allocation14 + $0x80] sm:$0xff]  ;;  %v5567_v18 = vld [vmem:[#allocation14 + $0x188] sm:$0xff] }
0x1030   :  { %v5292_v39 = vrot.slane %v5213_v31, 4  ;;  %v5294_v17 = vrot.slane %v5284_v50, 4  ;;  %v7983_v31 = vpack.c.bf16 %v5539_v38, %v5535_v51  ;;  %v8047_v50 = vpack.c.bf16 %v5541_v35, %v5537_v42  ;;  %v5571_v13 = vld [vmem:[#allocation14 + $0x1a8] sm:$0xff]  ;;  %v5569_v51 = vld [vmem:[#allocation14 + $0x198] sm:$0xff]  ;;  %v5566_v42 = vld [vmem:[#allocation14 + $0x180] sm:$0xff] }
0x1031   :  { %v5299_v49 = vadd.f32 %v5291_v29, %v10002_v27  ;;  %v5301_v47 = vadd.f32 %v5293_v20, %v10004_v2  ;;  %v5538_v29 = vld [vmem:[#allocation14 + $0xa0] sm:$0xff]  ;;  %v7999_v9 = vpack.c.bf16 %v5571_v13, %v5567_v18 }
0x1032   :  { %v5300_v10 = vadd.f32 %v5292_v39, %v10006_v0  ;;  %v5302_v36 = vadd.f32 %v5294_v17, %v10008_v48  ;;  %v5536_v39 = vld [vmem:[#allocation14 + $0x90] sm:$0xff]  ;;  %v5549_v17 = vld [vmem:[#allocation14 + $0xf8] sm:$0xff]  ;;  %v5570_v35 = vld [vmem:[#allocation14 + $0x1a0] sm:$0xff] }
0x1033   :  { %v6117_v19 = vmul.f32 -1.442695, %v5299_v49  ;;  %v5540_v49 = vld [vmem:[#allocation14 + $0xb0] sm:$0xff]  ;;  %v5598_v18 = vld [vmem:[#allocation14 + $0x280] sm:$0xff] }
0x1034   :  { %v6118_v45 = vmul.f32 -1.442695, %v5300_v10  ;;  %v6119_v11 = vmul.f32 -1.442695, %v5302_v36  ;;  %v5543_v10 = vld [vmem:[#allocation14 + $0xc8] sm:$0xff]  ;;  %v7985_v36 = vpack.c.bf16 %v5538_v29, %v5534_v23  ;;  %v8049_v20 = vpack.c.bf16 %v5540_v49, %v5536_v39  ;;  %v5602_v13 = vld [vmem:[#allocation14 + $0x2a0] sm:$0xff] }
0x1035   :  { %8516 = vpow2.f32 %v6117_v19  ;;  %v5547_v19 = vld [vmem:[#allocation14 + $0xe8] sm:$0xff]  ;;  %v8001_v39 = vpack.c.bf16 %v5570_v35, %v5566_v42 }
0x1036   :  { %8518 = vpow2.f32 %v6118_v45  ;;  %v5545_v45 = vld [vmem:[#allocation14 + $0xd8] sm:$0xff]  ;;  %v5575_v23 = vld [vmem:[#allocation14 + $0x1c8] sm:$0xff] }
0x1037   :  { %8520 = vpow2.f32 %v6119_v11  ;;  %v5542_v11 = vld [vmem:[#allocation14 + $0xc0] sm:$0xff]  ;;  %v5579_v29 = vld [vmem:[#allocation14 + $0x1e8] sm:$0xff] }
0x1038   :  { %8522 = vtanh.f32 %v5301_v47  ;;  %v5546_v47 = vld [vmem:[#allocation14 + $0xe0] sm:$0xff]  ;;  %v5607_v42 = vld [vmem:[#allocation14 + $0x2c8] sm:$0xff] }
0x1039   :  { %v5611_v35 = vld [vmem:[#allocation14 + $0x2e8] sm:$0xff] }
0x103f   :  { %v8517_v25 = vpop.eup %8516 }
0x1040   :  { %v8519_v15 = vpop.eup %8518  ;;  %v5306_v8 = vadd.f32 1.0, %v8517_v25  ;;  %v7987_v25 = vpack.c.bf16 %v5547_v19, %v5543_v10  ;;  %v5574_v10 = vld [vmem:[#allocation14 + $0x1c0] sm:$0xff] }
0x1041   :  { %v5312_v44 = vadd.f32 1.0, %v8519_v15  ;;  %v8521_v60 = vpop.eup %8520  ;;  %v8051_v15 = vpack.c.bf16 %v5549_v17, %v5545_v45  ;;  %v5578_v19 = vld [vmem:[#allocation14 + $0x1e0] sm:$0xff]  ;;  %v8003_v45 = vpack.c.bf16 %v5579_v29, %v5575_v23 }
0x1042   :  { %8524 = vrcp.f32 %v5306_v8  ;;  %v8523_v59 = vpop.eup %8522  ;;  %v5319_v22 = vadd.f32 1.0, %v8521_v60  ;;  %v5544_v8 = vld [vmem:[#allocation14 + $0xd0] sm:$0xff]  ;;  %v5551_v60 = vld [vmem:[#allocation14 + $0x108] sm:$0xff]  ;;  %v5606_v23 = vld [vmem:[#allocation14 + $0x2c0] sm:$0xff] }
0x1043   :  { %8526 = vrcp.f32 %v5312_v44  ;;  %v5548_v44 = vld [vmem:[#allocation14 + $0xf0] sm:$0xff]  ;;  %v5610_v29 = vld [vmem:[#allocation14 + $0x2e0] sm:$0xff] }
0x1044   :  { %8528 = vrcp.f32 %v5319_v22  ;;  %v5550_v22 = vld [vmem:[#allocation14 + $0x100] sm:$0xff] }
0x104c   :  { %v8525_v4 = vpop.eup %8524 }
0x104d   :  { %v8527_v46 = vpop.eup %8526  ;;  %v5326_v6 = vmul.f32 %v8525_v4, %v8523_v59  ;;  %v5555_v59 = vld [vmem:[#allocation14 + $0x128] sm:$0xff]  ;;  %v5553_v4 = vld [vmem:[#allocation14 + $0x118] sm:$0xff] }
0x104e   :  { %v5325_v62 = vmul.f32 %v8527_v46, %v5323_v32  ;;  %v8529_v5 = vpop.eup %8528  ;;  %v5557_v32 = vld [vmem:[#allocation14 + $0x138] sm:$0xff]  ;;  %v7989_v46 = vpack.c.bf16 %v5546_v47, %v5542_v11  ;;  %v7991_v1 = vpack.c.bf16 %v5555_v59, %v5551_v60  ;;  %v5583_v11 = vld [vmem:[#allocation14 + $0x208] sm:$0xff]  ;;  %v5582_v60 = vld [vmem:[#allocation14 + $0x200] sm:$0xff] }
0x104f   :  { %v5587_v47 = vld [vmem:[#allocation14 + $0x228] sm:$0xff]  ;;  %v5586_v59 = vld [vmem:[#allocation14 + $0x220] sm:$0xff] }
0x1050   :  { %v10272_v53 = vadd.f32 %v5326_v6, %v5325_v62  ;;  %v8053_v6 = vpack.c.bf16 %v5548_v44, %v5544_v8  ;;  %v5554_v62 = vld [vmem:[#allocation14 + $0x120] sm:$0xff]  ;;  %v8005_v8 = vpack.c.bf16 %v5578_v19, %v5574_v10  ;;  %v8009_v12 = vpack.c.bf16 %v5586_v59, %v5582_v60  ;;  %v5615_v10 = vld [vmem:[#allocation14 + $0x308] sm:$0xff] }
0x1051   :  { %v7993_v26 = vpack.c.bf16 %v5554_v62, %v5550_v22  ;;  %v5591_v22 = vld [vmem:[#allocation14 + $0x248] sm:$0xff] }
0x1052   :  { %8530 = vtanh.f32 %v10272_v53  ;;  %v5595_v62 = vld [vmem:[#allocation14 + $0x268] sm:$0xff] }
0x1053   :  { %v5619_v19 = vld [vmem:[#allocation14 + $0x328] sm:$0xff] }
0x1054   :  { %v5623_v60 = vld [vmem:[#allocation14 + $0x348] sm:$0xff] }
0x1055   :  { %v5627_v59 = vld [vmem:[#allocation14 + $0x368] sm:$0xff] }
0x105c   :  { %v8531_v30 = vpop.eup %8530 }
0x105d   :  { %v5329_v56 = vmul.f32 %v8531_v30, %v8529_v5  ;;  %v8055_v5 = vpack.c.bf16 %v5557_v32, %v5553_v4  ;;  %v5563_v30 = vld [vmem:[#allocation14 + $0x168] sm:$0xff]  ;;  %v8007_v4 = vpack.c.bf16 %v5587_v47, %v5583_v11  ;;  %v5614_v11 = vld [vmem:[#allocation14 + $0x300] sm:$0xff] }
0x105e   :  { %v5618_v47 = vld [vmem:[#allocation14 + $0x320] sm:$0xff] }
0x105f   :  { %v5331_v43 = vrot.slane %v5329_v56, 4  ;;  %v5565_v56 = vld [vmem:[#allocation14 + $0x178] sm:$0xff] }
0x1060   :  { %v8059_v61 = vpack.c.bf16 %v5565_v56, %v5561_v58  ;;  %v8011_v58 = vpack.c.bf16 %v5595_v62, %v5591_v22  ;;  %v5622_v22 = vld [vmem:[#allocation14 + $0x340] sm:$0xff] }
0x1061   :  { %5398 = vmatmul.mubr.f32.vlgmr.msra.gmra.mrb[58].mxu0 %v5331_v43  ;;  %5469 = vmatmul.mubr.f32.vlgmr.msra.gmra.mrb[58].mxu1 %v5331_v43  ;;  %v5564_v43 = vld [vmem:[#allocation14 + $0x170] sm:$0xff]  ;;  %v5626_v62 = vld [vmem:[#allocation14 + $0x360] sm:$0xff] }
0x1062   :  { %7978 = vmatpush1.bf16.msra.mxu0 %v7977_v14  ;;  %8042 = vmatpush1.bf16.msra.mxu1 %v8041_v41  ;;  %v5562_v14 = vld [vmem:[#allocation14 + $0x160] sm:$0xff]  ;;  %v7995_v41 = vpack.c.bf16 %v5563_v30, %v5559_v34  ;;  %v8061_v38 = vpack.c.bf16 %v5564_v43, %v5560_v52 }
0x1063   :  { %5738 = vmatprep.mubr.f32.mxu0 %v5671_v28  ;;  %5809 = vmatprep.mubr.f32.mxu1 %v5671_v28  ;;  %v5590_v34 = vld [vmem:[#allocation14 + $0x240] sm:$0xff] }
0x1064   :  { %7980 = vmatprep.subr.bf16.mxu0 %v7979_v7  ;;  %8044 = vmatprep.subr.bf16.mxu1 %v8043_v63  ;;  %v5573_v7 = vld [vmem:[#allocation14 + $0x1b8] sm:$0xff]  ;;  %v7997_v63 = vpack.c.bf16 %v5562_v14, %v5558_v37  ;;  %v5594_v30 = vld [vmem:[#allocation14 + $0x260] sm:$0xff]  ;;  %v5599_v37 = vld [vmem:[#allocation14 + $0x288] sm:$0xff] }
0x1065   :  { %v8063_v28 = vpack.c.bf16 %v5573_v7, %v5569_v51  ;;  %v5603_v14 = vld [vmem:[#allocation14 + $0x2a8] sm:$0xff]  ;;  %v8013_v52 = vpack.c.bf16 %v5594_v30, %v5590_v34 }
0x1066   :  { %7982 = vmatpush1.bf16.msra.mxu0 %v7981_v57  ;;  %8046 = vmatpush1.bf16.msra.mxu1 %v8045_v33  ;;  %v5568_v57 = vld [vmem:[#allocation14 + $0x190] sm:$0xff]  ;;  %v8015_v51 = vpack.c.bf16 %v5603_v14, %v5599_v37  ;;  %v5631_v34 = vld [vmem:[#allocation14 + $0x388] sm:$0xff]  ;;  %v5630_v37 = vld [vmem:[#allocation14 + $0x380] sm:$0xff] }
0x1067   :  { %7984 = vmatprep.subr.bf16.mxu0 %v7983_v31  ;;  %8048 = vmatprep.subr.bf16.mxu1 %v8047_v50  ;;  %v5572_v33 = vld [vmem:[#allocation14 + $0x1b0] sm:$0xff]  ;;  %v5577_v31 = vld [vmem:[#allocation14 + $0x1d8] sm:$0xff]  ;;  %v5635_v30 = vld [vmem:[#allocation14 + $0x3a8] sm:$0xff] }
0x1068   :  { %v5581_v50 = vld [vmem:[#allocation14 + $0x1f8] sm:$0xff]  ;;  %v8065_v49 = vpack.c.bf16 %v5572_v33, %v5568_v57  ;;  %v8017_v57 = vpack.c.bf16 %v5602_v13, %v5598_v18  ;;  %v5634_v14 = vld [vmem:[#allocation14 + $0x3a0] sm:$0xff]  ;;  %v5639_v18 = vld [vmem:[#allocation14 + $0x3c8] sm:$0xff] }
0x1069   :  { %v8067_v17 = vpack.c.bf16 %v5581_v50, %v5577_v31  ;;  %v8019_v31 = vpack.c.bf16 %v5611_v35, %v5607_v42  ;;  %v5643_v13 = vld [vmem:[#allocation14 + $0x3e8] sm:$0xff]  ;;  %v5638_v42 = vld [vmem:[#allocation14 + $0x3c0] sm:$0xff] }
0x106a   :  { %7986 = vmatpush1.bf16.msra.mxu0 %v7985_v36  ;;  %8050 = vmatpush1.bf16.msra.mxu1 %v8049_v20  ;;  %v5576_v36 = vld [vmem:[#allocation14 + $0x1d0] sm:$0xff]  ;;  %v8035_v35 = vpack.c.bf16 %v5643_v13, %v5639_v18 }
0x106b   :  { %7988 = vmatprep.subr.bf16.mxu0 %v7987_v25  ;;  %8052 = vmatprep.subr.bf16.mxu1 %v8051_v15  ;;  %v5580_v20 = vld [vmem:[#allocation14 + $0x1f0] sm:$0xff]  ;;  %v5585_v25 = vld [vmem:[#allocation14 + $0x218] sm:$0xff] }
0x106c   :  { %v5589_v15 = vld [vmem:[#allocation14 + $0x238] sm:$0xff]  ;;  %v8069_v44 = vpack.c.bf16 %v5580_v20, %v5576_v36  ;;  %v8021_v36 = vpack.c.bf16 %v5610_v29, %v5606_v23  ;;  %v5866_v13 = vld [vmem:[%s10429_s13 + $0x50] sm:$0xff] }
0x106d   :  { %v8071_v32 = vpack.c.bf16 %v5589_v15, %v5585_v25  ;;  %v8023_v25 = vpack.c.bf16 %v5619_v19, %v5615_v10  ;;  %v8762_v19 = vmov 0.0|0.0  }
0x106e   :  { %7990 = vmatpush1.bf16.msra.mxu0 %v7989_v46  ;;  %8054 = vmatpush1.bf16.msra.mxu1 %v8053_v6  ;;  %v5584_v46 = vld [vmem:[#allocation14 + $0x210] sm:$0xff] }
0x106f   :  { %7992 = vmatprep.subr.bf16.mxu0 %v7991_v1  ;;  %8056 = vmatprep.subr.bf16.mxu1 %v8055_v5  ;;  %v5588_v6 = vld [vmem:[#allocation14 + $0x230] sm:$0xff]  ;;  %v5593_v1 = vld [vmem:[#allocation14 + $0x258] sm:$0xff] }
0x1070   :  { %v5597_v5 = vld [vmem:[#allocation14 + $0x278] sm:$0xff]  ;;  %v8073_v21 = vpack.c.bf16 %v5588_v6, %v5584_v46  ;;  %v8025_v46 = vpack.c.bf16 %v5618_v47, %v5614_v11  ;;  %v5845_v11 = vld [vmem:[%s10428_s12 + $0x28] sm:$0xff] }
0x1071   :  { %v8075_v56 = vpack.c.bf16 %v5597_v5, %v5593_v1  ;;  %v8027_v1 = vpack.c.bf16 %v5627_v59, %v5623_v60  ;;  %v5849_v60 = vld [vmem:[%s10428_s12 + $0x48] sm:$0xff] }
0x1072   :  { %7994 = vmatpush1.bf16.msra.mxu0 %v7993_v26  ;;  %8058 = vmatpush1.bf16.msra.mxu1 %v8057_v16  ;;  %v5592_v26 = vld [vmem:[#allocation14 + $0x250] sm:$0xff] }
0x1073   :  { %7996 = vmatprep.subr.bf16.mxu0 %v7995_v41  ;;  %8060 = vmatprep.subr.bf16.mxu1 %v8059_v61  ;;  %v5596_v16 = vld [vmem:[#allocation14 + $0x270] sm:$0xff]  ;;  %v5601_v41 = vld [vmem:[#allocation14 + $0x298] sm:$0xff] }
0x1074   :  { %v5605_v61 = vld [vmem:[#allocation14 + $0x2b8] sm:$0xff]  ;;  %v8077_v43 = vpack.c.bf16 %v5596_v16, %v5592_v26  ;;  %v8029_v26 = vpack.c.bf16 %v5626_v62, %v5622_v22  ;;  %v5853_v22 = vld [vmem:[%s10428_s12 + $0x68] sm:$0xff] }
0x1075   :  { %v8079_v7 = vpack.c.bf16 %v5605_v61, %v5601_v41  ;;  %v8031_v41 = vpack.c.bf16 %v5635_v30, %v5631_v34  ;;  %v5858_v30 = vld [vmem:[%s10429_s13 + $0x10] sm:$0xff] }
0x1076   :  { %7998 = vmatpush1.bf16.msra.mxu0 %v7997_v63  ;;  %8062 = vmatpush1.bf16.msra.mxu1 %v8061_v38  ;;  %v5600_v63 = vld [vmem:[#allocation14 + $0x290] sm:$0xff] }
0x1077   :  { %8000 = vmatprep.subr.bf16.mxu0 %v7999_v9  ;;  %8064 = vmatprep.subr.bf16.mxu1 %v8063_v28  ;;  %v5604_v38 = vld [vmem:[#allocation14 + $0x2b0] sm:$0xff]  ;;  %v5609_v9 = vld [vmem:[#allocation14 + $0x2d8] sm:$0xff] }
0x1078   :  { %v5613_v28 = vld [vmem:[#allocation14 + $0x2f8] sm:$0xff]  ;;  %v8081_v33 = vpack.c.bf16 %v5604_v38, %v5600_v63  ;;  %v8033_v63 = vpack.c.bf16 %v5634_v14, %v5630_v37  ;;  %v5862_v14 = vld [vmem:[%s10429_s13 + $0x30] sm:$0xff] }
0x1079   :  { %v8083_v50 = vpack.c.bf16 %v5613_v28, %v5609_v9  ;;  %v5642_v28 = vld [vmem:[#allocation14 + $0x3e0] sm:$0xff] }
0x107a   :  { %8002 = vmatpush1.bf16.msra.mxu0 %v8001_v39  ;;  %8066 = vmatpush1.bf16.msra.mxu1 %v8065_v49  ;;  %v5608_v39 = vld [vmem:[#allocation14 + $0x2d0] sm:$0xff]  ;;  %v8037_v23 = vpack.c.bf16 %v5642_v28, %v5638_v42 }
0x107b   :  { %8004 = vmatprep.subr.bf16.mxu0 %v8003_v45  ;;  %8068 = vmatprep.subr.bf16.mxu1 %v8067_v17  ;;  %v5612_v49 = vld [vmem:[#allocation14 + $0x2f0] sm:$0xff]  ;;  %v5617_v45 = vld [vmem:[#allocation14 + $0x318] sm:$0xff] }
0x107c   :  { %v5621_v17 = vld [vmem:[#allocation14 + $0x338] sm:$0xff]  ;;  %v8085_v20 = vpack.c.bf16 %v5612_v49, %v5608_v39  ;;  %v5840_v39 = vld [vmem:[%s10428_s12] sm:$0xff]  ;;  %v5841_v49 = vld [vmem:[%s10428_s12 + $0x8] sm:$0xff] }
0x107d   :  { %v8087_v15 = vpack.c.bf16 %v5621_v17, %v5617_v45  ;;  %v8128_v10 = vpack.c.bf16 %v5841_v49, %v5840_v39  ;;  %v5842_v45 = vld [vmem:[%s10428_s12 + $0x10] sm:$0xff]  ;;  %v5843_v17 = vld [vmem:[%s10428_s12 + $0x18] sm:$0xff] }
0x107e   :  { %8006 = vmatpush1.bf16.msra.mxu0 %v8005_v8  ;;  %8070 = vmatpush1.bf16.msra.mxu1 %v8069_v44  ;;  %v5616_v8 = vld [vmem:[#allocation14 + $0x310] sm:$0xff] }
0x107f   :  { %8008 = vmatprep.subr.bf16.mxu0 %v8007_v4  ;;  %8072 = vmatprep.subr.bf16.mxu1 %v8071_v32  ;;  %v5620_v44 = vld [vmem:[#allocation14 + $0x330] sm:$0xff]  ;;  %v5625_v4 = vld [vmem:[#allocation14 + $0x358] sm:$0xff] }
0x1080   :  { %v5629_v32 = vld [vmem:[#allocation14 + $0x378] sm:$0xff]  ;;  %v8089_v6 = vpack.c.bf16 %v5620_v44, %v5616_v8  ;;  %v5848_v44 = vld [vmem:[%s10428_s12 + $0x40] sm:$0xff] }
0x1081   :  { %v8091_v5 = vpack.c.bf16 %v5629_v32, %v5625_v4  ;;  %v8140_v59 = vpack.c.bf16 %v5849_v60, %v5848_v44  ;;  %v5850_v4 = vld [vmem:[%s10428_s12 + $0x50] sm:$0xff]  ;;  %v5851_v32 = vld [vmem:[%s10428_s12 + $0x58] sm:$0xff]  ;;  %v5511_v60 = vrot.slane %v10272_v53, 6 }
0x1082   :  { %8010 = vmatpush1.bf16.msra.mxu0 %v8009_v12  ;;  %8074 = vmatpush1.bf16.msra.mxu1 %v8073_v21  ;;  %v5624_v12 = vld [vmem:[#allocation14 + $0x350] sm:$0xff] }
0x1083   :  { %8012 = vmatprep.subr.bf16.mxu0 %v8011_v58  ;;  %8076 = vmatprep.subr.bf16.mxu1 %v8075_v56  ;;  %v5628_v21 = vld [vmem:[#allocation14 + $0x370] sm:$0xff]  ;;  %v5633_v58 = vld [vmem:[#allocation14 + $0x398] sm:$0xff] }
0x1084   :  { %v5637_v56 = vld [vmem:[#allocation14 + $0x3b8] sm:$0xff]  ;;  %v8093_v16 = vpack.c.bf16 %v5628_v21, %v5624_v12  ;;  %v5856_v12 = vld [vmem:[%s10429_s13] sm:$0xff]  ;;  %v5857_v21 = vld [vmem:[%s10429_s13 + $0x8] sm:$0xff] }
0x1085   :  { %v8095_v61 = vpack.c.bf16 %v5637_v56, %v5633_v58  ;;  %v8104_v34 = vpack.c.bf16 %v5857_v21, %v5856_v12  ;;  %v5859_v58 = vld [vmem:[%s10429_s13 + $0x18] sm:$0xff] }
0x1086   :  { %8014 = vmatpush1.bf16.msra.mxu0 %v8013_v52  ;;  %8078 = vmatpush1.bf16.msra.mxu1 %v8077_v43  ;;  %v5632_v52 = vld [vmem:[#allocation14 + $0x390] sm:$0xff]  ;;  %v8107_v56 = vpack.c.bf16 %v5859_v58, %v5858_v30 }
0x1087   :  { %8016 = vmatprep.subr.bf16.mxu0 %v8015_v51  ;;  %8080 = vmatprep.subr.bf16.mxu1 %v8079_v7  ;;  %v5636_v43 = vld [vmem:[#allocation14 + $0x3b0] sm:$0xff]  ;;  %v5641_v51 = vld [vmem:[#allocation14 + $0x3d8] sm:$0xff] }
0x1088   :  { %v5645_v7 = vld [vmem:[#allocation14 + $0x3f8] sm:$0xff]  ;;  %v8097_v38 = vpack.c.bf16 %v5636_v43, %v5632_v52  ;;  %v5864_v52 = vld [vmem:[%s10429_s13 + $0x40] sm:$0xff]  ;;  %v5865_v43 = vld [vmem:[%s10429_s13 + $0x48] sm:$0xff] }
0x1089   :  { %v8099_v9 = vpack.c.bf16 %v5645_v7, %v5641_v51  ;;  %v8116_v18 = vpack.c.bf16 %v5865_v43, %v5864_v52  ;;  %v5867_v51 = vld [vmem:[%s10429_s13 + $0x58] sm:$0xff]  ;;  %v5868_v7 = vld [vmem:[%s10429_s13 + $0x60] sm:$0xff] }
0x108a   :  { %8018 = vmatpush1.bf16.msra.mxu0 %v8017_v57  ;;  %8082 = vmatpush1.bf16.msra.mxu1 %v8081_v33  ;;  %v5640_v57 = vld [vmem:[#allocation14 + $0x3d0] sm:$0xff] }
0x108b   :  { %8020 = vmatprep.subr.bf16.mxu0 %v8019_v31  ;;  %8084 = vmatprep.subr.bf16.mxu1 %v8083_v50  ;;  %v5644_v33 = vld [vmem:[#allocation14 + $0x3f0] sm:$0xff] }
0x108c   :  { %v8101_v29 = vpack.c.bf16 %v5644_v33, %v5640_v57  ;;  %v8565_v31 = vld [vmem:[#allocation2 + $0x10] sm:$0xff] }
0x108d   :  { %v5670_v50 = vrot.slane %v8565_v31, 6 }
0x108e   :  { %8022 = vmatpush1.bf16.msra.mxu0 %v8021_v36  ;;  %8086 = vmatpush1.bf16.msra.mxu1 %v8085_v20  ;;  %v8131_v36 = vpack.c.bf16 %v5843_v17, %v5842_v45  ;;  %v5844_v20 = vld [vmem:[%s10428_s12 + $0x20] sm:$0xff] }
0x108f   :  { %8024 = vmatprep.subr.bf16.mxu0 %v8023_v25  ;;  %8088 = vmatprep.subr.bf16.mxu1 %v8087_v15  ;;  %v8134_v47 = vpack.c.bf16 %v5845_v11, %v5844_v20  ;;  %v5846_v25 = vld [vmem:[%s10428_s12 + $0x30] sm:$0xff]  ;;  %v5847_v15 = vld [vmem:[%s10428_s12 + $0x38] sm:$0xff] }
0x1090   :  { %v8137_v8 = vpack.c.bf16 %v5847_v15, %v5846_v25 }
0x1092   :  { %8026 = vmatpush1.bf16.msra.mxu0 %v8025_v46  ;;  %8090 = vmatpush1.bf16.msra.mxu1 %v8089_v6  ;;  %v8143_v46 = vpack.c.bf16 %v5851_v32, %v5850_v4  ;;  %v5852_v6 = vld [vmem:[%s10428_s12 + $0x60] sm:$0xff] }
0x1093   :  { %8028 = vmatprep.subr.bf16.mxu0 %v8027_v1  ;;  %8092 = vmatprep.subr.bf16.mxu1 %v8091_v5  ;;  %v8146_v62 = vpack.c.bf16 %v5853_v22, %v5852_v6  ;;  %v5855_v1 = vld [vmem:[%s10428_s12 + $0x78] sm:$0xff] }
0x1096   :  { %8030 = vmatpush1.bf16.msra.mxu0 %v8029_v26  ;;  %8094 = vmatpush1.bf16.msra.mxu1 %v8093_v16  ;;  %v5860_v26 = vld [vmem:[%s10429_s13 + $0x20] sm:$0xff]  ;;  %v5861_v16 = vld [vmem:[%s10429_s13 + $0x28] sm:$0xff] }
0x1097   :  { %8032 = vmatprep.subr.bf16.mxu0 %v8031_v41  ;;  %8096 = vmatprep.subr.bf16.mxu1 %v8095_v61  ;;  %v8110_v37 = vpack.c.bf16 %v5861_v16, %v5860_v26  ;;  %v5863_v41 = vld [vmem:[%s10429_s13 + $0x38] sm:$0xff] }
0x1098   :  { %v8113_v61 = vpack.c.bf16 %v5863_v41, %v5862_v14 }
0x109a   :  { %8034 = vmatpush1.bf16.msra.mxu0 %v8033_v63  ;;  %8098 = vmatpush1.bf16.msra.mxu1 %v8097_v38  ;;  %v8119_v63 = vpack.c.bf16 %v5867_v51, %v5866_v13  ;;  %v5869_v38 = vld [vmem:[%s10429_s13 + $0x68] sm:$0xff] }
0x109b   :  { %8036 = vmatprep.subr.bf16.mxu0 %v8035_v35  ;;  %8100 = vmatprep.subr.bf16.mxu1 %v8099_v9  ;;  %v8122_v42 = vpack.c.bf16 %v5869_v38, %v5868_v7  ;;  %v5870_v35 = vld [vmem:[%s10429_s13 + $0x70] sm:$0xff]  ;;  %v5871_v9 = vld [vmem:[%s10429_s13 + $0x78] sm:$0xff] }
0x109c   :  { %v8125_v28 = vpack.c.bf16 %v5871_v9, %v5870_v35 }
0x109e   :  { %8038 = vmatpush1.bf16.msra.mxu0 %v8037_v23  ;;  %8102 = vmatpush1.bf16.msra.mxu1 %v8101_v29 }
0x109f   :  { %8127 = vmatprep.subr.bf16.mxu1 %v8762_v19  ;;  %8103 = vmatprep.subr.bf16.mxu0 %v8762_v19 }
0x10a1   :  { %5739 = vmatmul.mubr.f32.vlgmr.msra.gmra.mrb[60].mxu0 %v5670_v50  ;;  %5810 = vmatmul.mubr.f32.vlgmr.msra.gmra.mrb[60].mxu1 %v5670_v50 }
0x10a2   :  { %8129 = vmatpush3.bf16.msra.mxu1 %v8128_v10  ;;  %6228 = vmatprep.mubr.msk.f32.mxu1 %vm8763_vm1, %v10573_v3 }
0x10a3   :  { %8130 = vmatprep.subr.bf16.mxu1 %v8762_v19  ;;  %6193 = vmatprep.mubr.msk.f32.mxu0 %vm8763_vm1, %v10573_v3  ;;  %v5854_v3 = vld [vmem:[%s10428_s12 + $0x70] sm:$0xff] }
0x10a4   :  { %v8149_v5 = vpack.c.bf16 %v5855_v1, %v5854_v3  ;;  %8105 = vmatpush3.bf16.msra.mxu0 %v8104_v34  ;;  %v5646_v3 = vld [vmem:[%s10427_s11] sm:$0xf] }
0x10a5   :  { %8106 = vmatprep.subr.bf16.mxu0 %v8762_v19  ;;  %v5651_v1 = vrot.slane %v5646_v3, %v10768_v55  ;;  %v5655_v53 = vrot.slane %v5646_v3, %v10770_v40  ;;  %v5663_v16 = vrot.slane %v5646_v3, %v10771_v54  ;;  %v5659_v14 = vrot.slane %v5646_v3, %v10769_v24 }
0x10a6   :  { %8132 = vmatpush3.bf16.msra.mxu1 %v8131_v36 }
0x10a7   :  { %8133 = vmatprep.subr.bf16.mxu1 %v8762_v19 }
0x10a8   :  { %8108 = vmatpush3.bf16.msra.mxu0 %v8107_v56 }
0x10a9   :  { %8109 = vmatprep.subr.bf16.mxu0 %v8762_v19 }
0x10aa   :  { %8135 = vmatpush3.bf16.msra.mxu1 %v8134_v47 }
0x10ab   :  { %8136 = vmatprep.subr.bf16.mxu1 %v8762_v19 }
0x10ac   :  { %8111 = vmatpush3.bf16.msra.mxu0 %v8110_v37 }
0x10ad   :  { %8112 = vmatprep.subr.bf16.mxu0 %v8762_v19 }
0x10ae   :  { %8138 = vmatpush3.bf16.msra.mxu1 %v8137_v8 }
0x10af   :  { %8139 = vmatprep.subr.bf16.mxu1 %v8762_v19 }
0x10b0   :  { %8114 = vmatpush3.bf16.msra.mxu0 %v8113_v61 }
0x10b1   :  { %8115 = vmatprep.subr.bf16.mxu0 %v8762_v19 }
0x10b2   :  { %8141 = vmatpush3.bf16.msra.mxu1 %v8140_v59 }
0x10b3   :  { %8142 = vmatprep.subr.bf16.mxu1 %v8762_v19 }
0x10b4   :  { %8117 = vmatpush3.bf16.msra.mxu0 %v8116_v18 }
0x10b5   :  { %8118 = vmatprep.subr.bf16.mxu0 %v8762_v19 }
0x10b6   :  { %8144 = vmatpush3.bf16.msra.mxu1 %v8143_v46 }
0x10b7   :  { %8145 = vmatprep.subr.bf16.mxu1 %v8762_v19 }
0x10b8   :  { %8120 = vmatpush3.bf16.msra.mxu0 %v8119_v63 }
0x10b9   :  { %8121 = vmatprep.subr.bf16.mxu0 %v8762_v19 }
0x10ba   :  { %8147 = vmatpush3.bf16.msra.mxu1 %v8146_v62 }
0x10bb   :  { %8148 = vmatprep.subr.bf16.mxu1 %v8762_v19 }
0x10bc   :  { %8123 = vmatpush3.bf16.msra.mxu0 %v8122_v42 }
0x10bd   :  { %8124 = vmatprep.subr.bf16.mxu0 %v8762_v19 }
0x10be   :  { %8150 = vmatpush3.bf16.msra.mxu1 %v8149_v5 }
0x10c0   :  { %8126 = vmatpush3.bf16.msra.mxu0 %v8125_v28 }
0x1134   :  { %v5399_v57 = vpop.f32.mrb[58].mxu0  ;;  %v5470_v33 = vpop.f32.mrb[58].mxu1 }
0x1135   :  { %v5479_v23 = vrot.slane %v5399_v57, 2  ;;  %v5401_v29 = vpop.f32.mrb[59].mxu0  ;;  %v5472_v31 = vpop.f32.mrb[59].mxu1  ;;  %v5481_v20 = vrot.slane %v5470_v33, 2 }
0x1136   :  { %v5480_v50 = vrot.slane %v5401_v29, 2  ;;  %v5482_v17 = vrot.slane %v5472_v31, 2 }
0x1137   :  { %v5487_v39 = vadd.f32 %v5479_v23, %v10002_v27  ;;  %v5489_v11 = vadd.f32 %v5481_v20, %v10004_v2  ;;  %v6126_v23 = vld [vmem:[%s10430_s14] ss:$0 sm:$0xff] }
0x1138   :  { %v5488_v49 = vadd.f32 %v5480_v50, %v10006_v0  ;;  %v5490_v36 = vadd.f32 %v5482_v17, %v10008_v48 }
0x1139   :  { %v6120_v10 = vmul.f32 -1.442695, %v5487_v39 }
0x113a   :  { %v6121_v45 = vmul.f32 -1.442695, %v5488_v49  ;;  %v6122_v19 = vmul.f32 -1.442695, %v5490_v36 }
0x113b   :  { %8532 = vpow2.f32 %v6120_v10 }
0x113c   :  { %8534 = vpow2.f32 %v6121_v45 }
0x113d   :  { %8536 = vpow2.f32 %v6122_v19 }
0x113e   :  { %8538 = vtanh.f32 %v5489_v11 }
0x1145   :  { %v8533_v47 = vpop.eup %8532 }
0x1146   :  { %v8535_v25 = vpop.eup %8534  ;;  %v5494_v15 = vadd.f32 1.0, %v8533_v47 }
0x1147   :  { %v5500_v8 = vadd.f32 1.0, %v8535_v25  ;;  %v8537_v27 = vpop.eup %8536 }
0x1148   :  { %8540 = vrcp.f32 %v5494_v15  ;;  %v8539_v0 = vpop.eup %8538  ;;  %v5507_v48 = vadd.f32 1.0, %v8537_v27 }
0x1149   :  { %8542 = vrcp.f32 %v5500_v8 }
0x114a   :  { %8544 = vrcp.f32 %v5507_v48 }
0x1152   :  { %v8541_v44 = vpop.eup %8540 }
0x1153   :  { %v8543_v59 = vpop.eup %8542  ;;  %v5514_v4 = vmul.f32 %v8541_v44, %v8539_v0 }
0x1154   :  { %v5513_v32 = vmul.f32 %v8543_v59, %v5511_v60  ;;  %v8545_v2 = vpop.eup %8544 }
0x1156   :  { %v5515_v46 = vadd.f32 %v5514_v4, %v5513_v32 }
0x1158   :  { %8546 = vtanh.f32 %v5515_v46 }
0x1162   :  { %v8547_v6 = vpop.eup %8546 }
0x1163   :  { %v5517_v22 = vmul.f32 %v8547_v6, %v8545_v2 }
0x1165   :  { %v5943_v62 = vrot.slane %v5517_v22, 6 }
0x1167   :  { %6229 = vmatmul.mubr.f32.vlgmr.msra.gmra.mrb[62].mxu1 %v5943_v62 }
0x1174   :  { %v5740_v5 = vpop.f32.mrb[60].mxu0  ;;  %v5811_v12 = vpop.f32.mrb[60].mxu1 }
0x1175   :  { %v5741_v21 = vadd.f32 %v5740_v5, %v5651_v1  ;;  %v5742_v34 = vpop.f32.mrb[61].mxu0  ;;  %v5813_v30 = vpop.f32.mrb[61].mxu1  ;;  %v5812_v61 = vadd.f32 %v5811_v12, %v5659_v14 }
0x1176   :  { %v5743_v58 = vadd.f32 %v5742_v34, %v5655_v53  ;;  %v5814_v37 = vadd.f32 %v5813_v30, %v5663_v16 }
0x1177   :  { %v6123_v56 = vmul.f32 -1.442695, %v5741_v21 }
0x1178   :  { %v6124_v26 = vmul.f32 -1.442695, %v5743_v58  ;;  %v6125_v41 = vmul.f32 -1.442695, %v5814_v37 }
0x1179   :  { %8548 = vpow2.f32 %v6123_v56 }
0x117a   :  { %8550 = vpow2.f32 %v6124_v26 }
0x117b   :  { %8552 = vpow2.f32 %v6125_v41 }
0x117c   :  { %8554 = vtanh.f32 %v5812_v61 }
0x1183   :  { %v8549_v55 = vpop.eup %8548 }
0x1184   :  { %v8551_v52 = vpop.eup %8550  ;;  %v5819_v40 = vadd.f32 1.0, %v8549_v55 }
0x1185   :  { %v5825_v43 = vadd.f32 1.0, %v8551_v52  ;;  %v8553_v18 = vpop.eup %8552 }
0x1186   :  { %8556 = vrcp.f32 %v5819_v40  ;;  %v8555_v13 = vpop.eup %8554  ;;  %v5832_v63 = vadd.f32 1.0, %v8553_v18 }
0x1187   :  { %8558 = vrcp.f32 %v5825_v43 }
0x1188   :  { %8560 = vrcp.f32 %v5832_v63 }
0x1190   :  { %v8557_v51 = vpop.eup %8556 }
0x1191   :  { %v8559_v7 = vpop.eup %8558  ;;  %v5836_v54 = vmul.f32 %v8557_v51, %v8555_v13 }
0x1192   :  { %v5835_v38 = vmul.f32 0.0, %v8559_v7  ;;  %v8561_v24 = vpop.eup %8560 }
0x1194   :  { %v5837_v42 = vadd.f32 %v5836_v54, %v5835_v38 }
0x1196   :  { %8562 = vtanh.f32 %v5837_v42 }
0x11a0   :  { %v8563_v35 = vpop.eup %8562 }
0x11a1   :  { %v5839_v9 = vmul.f32 %v8563_v35, %v8561_v24 }
0x11a3   :  { %6194 = vmatmul.mubr.f32.vlgmr.msra.gmra.mrb[62].mxu0 %v5839_v9 }
0x123a   :  { %v6011_v28 = vpop.f32.mrb[62].mxu1 }
0x123b   :  { %v6230_v57 = vpop.f32.mrb[63].mxu1 }
0x1276   :  { %v5938_v33 = vpop.f32.mrb[62].mxu0 }
0x1277   :  { %v6012_v29 = vadd.f32 %v6011_v28, %v5938_v33  ;;  %v6195_v31 = vpop.f32.mrb[63].mxu0 }
0x1279   :  { %v6022_v50 = vadd.f32 %v6126_v23, %v6012_v29 }
0x127b   :  { %6024 = vst.msk [vmem:[#allocation15] sm:$0x3] %vm6023_vm2, %v6022_v50 }
0x127c   :  { %8731 = shalt.err (!%p8728_p4)
}
0x127d   :  { %s8732_s30 = scalar_lea.hbm %s10431_s15, 32 }
0x127e   :  { %p8733_p5 = scmp.ne.s32.totalorder %s10431_s15, %s8732_s30  ;;  %p8736_p6 = scmp.lt.u32.totalorder %s8732_s30, %s10431_s15 }
0x1280   :  { %p8738_p7 = pnand %p8736_p6, %p8733_p5 }
0x1282   :  { %8741 = shalt.err (!%p8738_p7)
}
0x1283   :  { %6034 = dma.vmem_to_hbm [thread:$0]  %s6032_s17, 32, %s10431_s15, [#allocation5]  }
0x1284   :  { %8750 = dma.done.wait [#allocation5], 32  }
0x1285   :  { %8751 = vsyncadd [#allocation5], 4294967264 }
0x1286   :  { %6038 = vsyncpa [#allocation4], 1 }
0x1287   :  { %6039 = vsyncpa [#allocation7], 1 }
0x1288   :  { %6040 = vsyncpa [#allocation10], 1 }
0x1289   :  { %6041 = vsyncpa [#allocation13], 1 }
0x128a   :  { %6042 = vsyncpa [#allocation5], 1 }

</bundles_post_ra>
